<compile_context>
chip_gen: v6e
topology: v6e:2x2x1
jax: 0.10.0
libtpu: 0.0.40
codegen_flags: <defaults>
</compile_context>

<pallas_src>
import math
import functools

import jax
import jax.numpy as jnp
from jax.experimental import pallas as pl
from jax.experimental.pallas import tpu as pltpu

EPS = 1e-5
NEG_INF = -1e30        # finite "minus infinity": safe with bf16/f32 online softmax
VMEM_LIMIT_BYTES = 56 * 1024 * 1024   # > v5e/v6e scoped default, < v7x physical cap


def _cparams(dims):
    return pltpu.CompilerParams(dimension_semantics=dims,
                                vmem_limit_bytes=VMEM_LIMIT_BYTES)


# ---------------------------------------------------------------------------
# In-kernel math helpers (traced inside the Pallas kernel bodies)
# ---------------------------------------------------------------------------
def _layernorm_f32(x, gamma, beta):
    x = x.astype(jnp.float32)
    mean = jnp.mean(x, axis=-1, keepdims=True)
    var = jnp.mean(jnp.square(x - mean), axis=-1, keepdims=True)
    return (x - mean) * jax.lax.rsqrt(var + EPS) * gamma + beta


def _gelu_tanh(x):
    # tanh-approximate GELU: jnp.tanh lowers to the EUP slot (nearly free) instead of
    # a large erf polynomial on the VALU over the (rows, Fm) MLP activation.
    # TODO(synk): switch to exact erf GELU if bit-accuracy vs nn.GELU() is required.
    c = math.sqrt(2.0 / math.pi)
    return 0.5 * x * (1.0 + jnp.tanh(c * (x + 0.044715 * x * x * x)))


# ---------------------------------------------------------------------------
# Pallas kernels
# ---------------------------------------------------------------------------
def ln_qkv_kernel(x_ref, g_ref, b_ref, w_ref, bias_ref, o_ref, h_s):
    # o = LayerNorm(x) @ W + b, column tiles innermost; LN is computed once per row
    # tile into a bf16 scratch (c axis is "arbitrary").
    @pl.when(pl.program_id(2) == 0)
    def _():
        h_s[...] = _layernorm_f32(x_ref[...], g_ref[...], b_ref[...]).astype(jnp.bfloat16)

    y = jnp.dot(h_s[...], w_ref[...], preferred_element_type=jnp.float32) + bias_ref[...]
    o_ref[...] = y.astype(o_ref.dtype)


def ln_linear_kernel(x_ref, g_ref, b_ref, w_ref, bias_ref, o_ref):
    # o = LayerNorm(x) @ W + b.  Used for the vocab projection with a weight-major
    # grid (row tiles innermost), so LN is recomputed per step but the big weight
    # streams from HBM only once per (batch, column-tile).
    h = _layernorm_f32(x_ref[...], g_ref[...], b_ref[...]).astype(jnp.bfloat16)
    y = jnp.dot(h, w_ref[...], preferred_element_type=jnp.float32) + bias_ref[...]
    o_ref[...] = y.astype(o_ref.dtype)


def flash_attn_kernel(q_ref, k_ref, v_ref, o_ref, m_s, l_s, acc_s,
                      *, causal, tq, tk):
    # One (batch, head, q-tile) output block, reduced over the kv-tile grid axis with
    # online softmax.  Q already carries the 1/sqrt(head_dim) scale (folded into the
    # QKV weight columns host-side).
    qi = pl.program_id(2)
    ki = pl.program_id(3)

    @pl.when(ki == 0)
    def _():
        m_s[...] = jnp.full_like(m_s, NEG_INF)
        l_s[...] = jnp.zeros_like(l_s)
        acc_s[...] = jnp.zeros_like(acc_s)

    def update():
        s = jax.lax.dot_general(                              # (tq, tk) f32 scores
            q_ref[...], k_ref[...], (((1,), (1,)), ((), ())),
            preferred_element_type=jnp.float32)
        if causal:
            row = qi * tq + jax.lax.broadcasted_iota(jnp.int32, (tq, tk), 0)
            col = ki * tk + jax.lax.broadcasted_iota(jnp.int32, (tq, tk), 1)
            s = jnp.where(col > row, NEG_INF, s)
        m_prev = m_s[...]
        m_new = jnp.maximum(m_prev, jnp.max(s, axis=-1, keepdims=True))
        alpha = jnp.exp(m_prev - m_new)
        p = jnp.exp(s - m_new)
        l_s[...] = alpha * l_s[...] + jnp.sum(p, axis=-1, keepdims=True)
        acc_s[...] = alpha * acc_s[...] + jnp.dot(
            p.astype(jnp.bfloat16), v_ref[...], preferred_element_type=jnp.float32)
        m_s[...] = m_new

    if causal:
        # Skip kv tiles entirely above the diagonal (compute-only skip).
        # TODO(synk): remap the kv grid per q-tile via scalar prefetch so the skipped
        # tiles are not DMA'd at all when causal=True.
        @pl.when(ki * tk <= (qi + 1) * tq - 1)
        def _():
            update()
    else:
        update()

    @pl.when(ki == pl.num_programs(3) - 1)
    def _():
        inv_l = pl.reciprocal(l_s[...], approx=True)   # EUP, not a VALU divide
        o_ref[...] = (acc_s[...] * inv_l).astype(o_ref.dtype)


def residual_out_kernel(res_ref, attn_ref, w_ref, bias_ref, o_ref, acc_s):
    # o = res + sum_h attn[:, h] @ Wout[h] + b   (out-projection + residual add),
    # reduced over the head grid axis so the (D, D) weight is never one block.
    h = pl.program_id(2)

    @pl.when(h == 0)
    def _():
        acc_s[...] = jnp.zeros_like(acc_s)

    acc_s[...] += jnp.dot(attn_ref[...], w_ref[...], preferred_element_type=jnp.float32)

    @pl.when(h == pl.num_programs(2) - 1)
    def _():
        o_ref[...] = (res_ref[...].astype(jnp.float32) + acc_s[...]
                      + bias_ref[...]).astype(o_ref.dtype)


def mlp_kernel(x_ref, g_ref, b_ref, w1_ref, b1_ref, w2_ref, b2_ref, o_ref,
               h_s, acc_s):
    # o = x + GELU(LayerNorm(x) @ W1 + b1) @ W2 + b2, reduced over Fm tiles.
    f = pl.program_id(2)

    @pl.when(f == 0)
    def _():
        h_s[...] = _layernorm_f32(x_ref[...], g_ref[...], b_ref[...]).astype(jnp.bfloat16)
        acc_s[...] = jnp.zeros_like(acc_s)

    m = jnp.dot(h_s[...], w1_ref[...], preferred_element_type=jnp.float32) + b1_ref[...]
    m = _gelu_tanh(m)
    acc_s[...] += jnp.dot(m.astype(jnp.bfloat16), w2_ref[...],
                          preferred_element_type=jnp.float32)

    @pl.when(f == pl.num_programs(2) - 1)
    def _():
        o_ref[...] = (x_ref[...].astype(jnp.float32) + acc_s[...]
                      + b2_ref[...]).astype(o_ref.dtype)


# ---------------------------------------------------------------------------
# Wrappers (pallas_call plumbing)
# ---------------------------------------------------------------------------
def _divisor_tile(n, target, align):
    """Largest multiple of `align` that divides n and is <= target (n if none)."""
    if n <= target:
        return n
    t = (target // align) * align
    while t >= align:
        if n % t == 0:
            return t
        t -= align
    return n


def run_ln_qkv(x, gamma, beta, w, bias):
    """LN1 + fused QKV projection. x: (B, T, D) bf16 -> (B, T, 3D) bf16."""
    B, T, D = x.shape
    N = w.shape[1]
    tr = _divisor_tile(T, 512, 8)
    tc = _divisor_tile(N, 512, 128)
    return pl.pallas_call(
        ln_qkv_kernel,
        out_shape=jax.ShapeDtypeStruct((B, T, N), jnp.bfloat16),
        grid=(B, T // tr, N // tc),
        in_specs=[
            pl.BlockSpec((None, tr, D), lambda b, r, c: (b, r, 0),
                         pipeline_mode=pl.Buffered(1)),     # constant along c
            pl.BlockSpec((1, D), lambda b, r, c: (0, 0), pipeline_mode=pl.Buffered(1)),
            pl.BlockSpec((1, D), lambda b, r, c: (0, 0), pipeline_mode=pl.Buffered(1)),
            pl.BlockSpec((D, tc), lambda b, r, c: (0, c)),
            pl.BlockSpec((1, tc), lambda b, r, c: (0, c)),
        ],
        out_specs=pl.BlockSpec((None, tr, tc), lambda b, r, c: (b, r, c)),
        scratch_shapes=[pltpu.VMEM((tr, D), jnp.bfloat16)],  # cached LN(x) in bf16
        compiler_params=_cparams(("parallel", "parallel", "arbitrary")),
    )(x, gamma, beta, w, bias)


def run_flash_attention(qkv, num_heads, head_dim, causal):
    """Flash attention reading Q/K/V head slices straight out of (B, T, 3D) qkv.

    Returns attention output in (B, H, T, hd) layout (no transposes)."""
    B, T, _ = qkv.shape
    H, hd = num_heads, head_dim
    tq = _divisor_tile(T, 256, 8)
    tk = _divisor_tile(T, 256, 8)
    return pl.pallas_call(
        functools.partial(flash_attn_kernel, causal=causal, tq=tq, tk=tk),
        out_shape=jax.ShapeDtypeStruct((B, H, T, hd), jnp.bfloat16),
        grid=(B, H, T // tq, T // tk),
        in_specs=[
            # Column block index selects the head slice: Q_h at h, K_h at H+h, V_h at 2H+h.
            pl.BlockSpec((None, tq, hd), lambda b, h, qi, ki: (b, qi, h)),
            pl.BlockSpec((None, tk, hd), lambda b, h, qi, ki: (b, ki, H + h)),
            pl.BlockSpec((None, tk, hd), lambda b, h, qi, ki: (b, ki, 2 * H + h)),
        ],
        out_specs=pl.BlockSpec((None, None, tq, hd), lambda b, h, qi, ki: (b, h, qi, 0)),
        scratch_shapes=[
            pltpu.VMEM((tq, 1), jnp.float32),    # running max m
            pltpu.VMEM((tq, 1), jnp.float32),    # running denominator l
            pltpu.VMEM((tq, hd), jnp.float32),   # output accumulator
        ],
        compiler_params=_cparams(("parallel", "parallel", "parallel", "arbitrary")),
    )(qkv, qkv, qkv)


def run_residual_out(res, attn, wout_h, bias):
    """res + out_proj(attn) with attn in (B, H, T, hd) layout; reduce over heads."""
    B, T, D = res.shape
    H, hd, _ = wout_h.shape
    tr = _divisor_tile(T, 512, 8)
    return pl.pallas_call(
        residual_out_kernel,
        out_shape=jax.ShapeDtypeStruct((B, T, D), res.dtype),
        grid=(B, T // tr, H),
        in_specs=[
            pl.BlockSpec((None, tr, D), lambda b, r, h: (b, r, 0),
                         pipeline_mode=pl.Buffered(1)),     # constant along h
            pl.BlockSpec((None, None, tr, hd), lambda b, r, h: (b, h, r, 0)),
            pl.BlockSpec((None, hd, D), lambda b, r, h: (h, 0, 0)),
            pl.BlockSpec((1, D), lambda b, r, h: (0, 0), pipeline_mode=pl.Buffered(1)),
        ],
        out_specs=pl.BlockSpec((None, tr, D), lambda b, r, h: (b, r, 0)),
        scratch_shapes=[pltpu.VMEM((tr, D), jnp.float32)],   # f32 accumulator over heads
        compiler_params=_cparams(("parallel", "parallel", "arbitrary")),
    )(res, attn, wout_h, bias)


def run_mlp(x, gamma, beta, w1, b1, w2, b2):
    B, T, D = x.shape
    Fm = w1.shape[1]
    tr = _divisor_tile(T, 256, 8)       # kept modest so the tf-tiled working set fits v7x
    tf = _divisor_tile(Fm, 512, 128)
    return pl.pallas_call(
        mlp_kernel,
        out_shape=jax.ShapeDtypeStruct((B, T, D), x.dtype),
        grid=(B, T // tr, Fm // tf),
        in_specs=[
            pl.BlockSpec((None, tr, D), lambda b, r, f: (b, r, 0),
                         pipeline_mode=pl.Buffered(1)),     # constant along f
            pl.BlockSpec((1, D), lambda b, r, f: (0, 0), pipeline_mode=pl.Buffered(1)),
            pl.BlockSpec((1, D), lambda b, r, f: (0, 0), pipeline_mode=pl.Buffered(1)),
            pl.BlockSpec((D, tf), lambda b, r, f: (0, f)),
            pl.BlockSpec((1, tf), lambda b, r, f: (0, f)),
            pl.BlockSpec((tf, D), lambda b, r, f: (f, 0)),
            pl.BlockSpec((1, D), lambda b, r, f: (0, 0), pipeline_mode=pl.Buffered(1)),
        ],
        out_specs=pl.BlockSpec((None, tr, D), lambda b, r, f: (b, r, 0)),
        scratch_shapes=[
            pltpu.VMEM((tr, D), jnp.bfloat16),   # cached LayerNorm(x) in bf16
            pltpu.VMEM((tr, D), jnp.float32),    # f32 accumulator over Fm tiles
        ],
        compiler_params=_cparams(("parallel", "parallel", "arbitrary")),
    )(x, gamma, beta, w1, b1, w2, b2)


def run_vocab_proj(x, gamma, beta, w, bias):
    """Final LN + vocab projection, weight-major grid (weight streams once per batch)."""
    B, T, D = x.shape
    N = w.shape[1]
    tr = _divisor_tile(T, 512, 8)
    tc = _divisor_tile(N, 512, 128)
    return pl.pallas_call(
        ln_linear_kernel,
        out_shape=jax.ShapeDtypeStruct((B, T, N), jnp.float32),
        grid=(B, N // tc, T // tr),          # row tiles innermost: weight index varies slowest
        in_specs=[
            pl.BlockSpec((None, tr, D), lambda b, c, r: (b, r, 0)),
            pl.BlockSpec((1, D), lambda b, c, r: (0, 0), pipeline_mode=pl.Buffered(1)),
            pl.BlockSpec((1, D), lambda b, c, r: (0, 0), pipeline_mode=pl.Buffered(1)),
            pl.BlockSpec((D, tc), lambda b, c, r: (0, c)),
            pl.BlockSpec((1, tc), lambda b, c, r: (0, c), pipeline_mode=pl.Buffered(1)),
        ],
        out_specs=pl.BlockSpec((None, tr, tc), lambda b, c, r: (b, r, c)),
        compiler_params=_cparams(("parallel", "parallel", "parallel")),
    )(x, gamma, beta, w, bias)


# ---------------------------------------------------------------------------
# Model forward
# ---------------------------------------------------------------------------
def run_transformer_block(x, p, num_heads, causal):
    B, T, D = x.shape
    hd = D // num_heads
    qkv = run_ln_qkv(x, p["ln1_g"], p["ln1_b"], p["wqkv"], p["bqkv"])       # (B, T, 3D)
    attn = run_flash_attention(qkv, num_heads, hd, causal)                  # (B, H, T, hd)
    x = run_residual_out(x, attn, p["wout_h"], p["bout"])                   # x + out_proj(attn)
    x = run_mlp(x, p["ln2_g"], p["ln2_b"], p["w1"], p["b1"], p["w2"], p["b2"])
    return x


def vanilla_transformer_forward(tokens, params, num_heads, causal=False, vocab_size=None):
    B, T = tokens.shape
    # Embedding-table gather + learned positional embedding: plain-JAX glue.
    # Residual stream is carried in bf16 between kernels (f32 math inside kernels).
    x = (params["embed"][tokens] + params["pos_embed"][:, :T, :]).astype(jnp.bfloat16)
    for blk in params["blocks"]:
        x = run_transformer_block(x, blk, num_heads, causal)
    logits = run_vocab_proj(x, params["norm_g"], params["norm_b"],
                            params["w_vocab"], params["b_vocab"])
    if vocab_size is not None and logits.shape[-1] != vocab_size:
        logits = logits[..., :vocab_size]          # strip lane-alignment padding
    return logits


# ---------------------------------------------------------------------------
# Parameters: PyTorch-equivalent init, then conversion to kernel layout
# ---------------------------------------------------------------------------
def init_torch_style_params(key, vocab_size, D, num_heads, num_layers, max_len,
                            mlp_ratio=4.0):
    """f32 parameters in a PyTorch-equivalent layout.

    Linear weights are stored pre-transposed as (in_features, out_features); the
    fused QKV weight uses PyTorch's per-head interleaved column order
    ([q_h | k_h | v_h] for h = 0..H-1), matching qkv_proj(x).view(B, T, H, 3*hd)."""
    Fm = int(D * mlp_ratio)
    keys = jax.random.split(key, 3 + num_layers)
    params = {
        "embed": 0.02 * jax.random.normal(keys[0], (vocab_size, D), jnp.float32),
        "pos_embed": 0.02 * jax.random.normal(keys[1], (1, max_len, D), jnp.float32),
        "norm_g": jnp.ones((1, D), jnp.float32),
        "norm_b": jnp.zeros((1, D), jnp.float32),
    }
    kv = jax.random.split(keys[2], 2)
    params["w_vocab"] = 0.02 * jax.random.normal(kv[0], (D, vocab_size), jnp.float32)
    params["b_vocab"] = jnp.zeros((1, vocab_size), jnp.float32)

    blocks = []
    for layer in range(num_layers):
        k = jax.random.split(keys[3 + layer], 4)
        blocks.append(dict(
            ln1_g=jnp.ones((1, D), jnp.float32), ln1_b=jnp.zeros((1, D), jnp.float32),
            wqkv=0.02 * jax.random.normal(k[0], (D, 3 * D), jnp.float32),
            bqkv=jnp.zeros((1, 3 * D), jnp.float32),
            wout=0.02 * jax.random.normal(k[1], (D, D), jnp.float32),
            bout=jnp.zeros((1, D), jnp.float32),
            ln2_g=jnp.ones((1, D), jnp.float32), ln2_b=jnp.zeros((1, D), jnp.float32),
            w1=0.02 * jax.random.normal(k[2], (D, Fm), jnp.float32),
            b1=jnp.zeros((1, Fm), jnp.float32),
            w2=0.02 * jax.random.normal(k[3], (Fm, D), jnp.float32),
            b2=jnp.zeros((1, D), jnp.float32),
        ))
    params["blocks"] = blocks
    return params


def _pad_last(a, mult):
    pad = (-a.shape[-1]) % mult
    if pad:
        a = jnp.pad(a, [(0, 0)] * (a.ndim - 1) + [(0, pad)])
    return a


def _pad_first(a, mult):
    pad = (-a.shape[0]) % mult
    if pad:
        a = jnp.pad(a, [(0, pad)] + [(0, 0)] * (a.ndim - 1))
    return a


def prepare_params(raw, num_heads):
    """Convert PyTorch-layout f32 params into the kernel layout:
       * QKV columns permuted from per-head interleaved [q_h|k_h|v_h] to contiguous
         [Q | K | V] (head-major inside each third) -> head slices are D-aligned
         column blocks readable directly by the flash-attention BlockSpecs.
       * 1/sqrt(head_dim) attention scale folded into the Q columns.
       * out-proj weight reshaped to (H, hd, D) for the head-reduction kernel.
       * vocab and MLP hidden dims zero-padded to multiples of 128 (exact, pads are
         stripped / contribute zero).
       * Matmul weights cast to bf16 (kernels accumulate in f32)."""
    D = raw["embed"].shape[1]
    hd = D // num_heads
    assert D % 128 == 0 and hd % 128 == 0, (
        "embed_dim and head_dim must be multiples of 128 for head-sliced BlockSpecs")
    # TODO(synk): pack >=2 heads per attention grid step to support head_dim < 128.
    scale = 1.0 / math.sqrt(hd)
    idx = jnp.arange(3 * D).reshape(num_heads, 3, hd)
    perm = jnp.concatenate([idx[:, 0, :].reshape(-1),
                            idx[:, 1, :].reshape(-1),
                            idx[:, 2, :].reshape(-1)])

    def prep_block(b):
        wqkv = b["wqkv"][:, perm]
        bqkv = b["bqkv"][:, perm]
        wqkv = wqkv.at[:, :D].multiply(scale)
        bqkv = bqkv.at[:, :D].multiply(scale)
        w1 = _pad_last(b["w1"], 128)
        b1 = _pad_last(b["b1"], 128)
        w2 = _pad_first(b["w2"], 128)
        return dict(
            ln1_g=b["ln1_g"], ln1_b=b["ln1_b"],
            wqkv=wqkv.astype(jnp.bfloat16), bqkv=bqkv,
            wout_h=b["wout"].reshape(num_heads, hd, D).astype(jnp.bfloat16),
            bout=b["bout"],
            ln2_g=b["ln2_g"], ln2_b=b["ln2_b"],
            w1=w1.astype(jnp.bfloat16), b1=b1,
            w2=w2.astype(jnp.bfloat16), b2=b["b2"],
        )

    return dict(
        embed=raw["embed"], pos_embed=raw["pos_embed"],
        norm_g=raw["norm_g"], norm_b=raw["norm_b"],
        w_vocab=_pad_last(raw["w_vocab"], 128).astype(jnp.bfloat16),
        b_vocab=_pad_last(raw["b_vocab"], 128),
        blocks=[prep_block(b) for b in raw["blocks"]],
    )


if __name__ == "__main__":
    vocab_size = 300      # deliberately unaligned; padded to 384 inside prepare_params
    embed_dim = 256
    num_heads = 2         # head_dim = 128 (lane-aligned, required by head-sliced specs)
    num_layers = 2
    max_len = 128
    B, T = 2, 128
    causal = False        # module default

    root = jax.random.PRNGKey(0)
    k_param, k_tok = jax.random.split(root)
    raw_params = init_torch_style_params(k_param, vocab_size, embed_dim,
                                         num_heads, num_layers, max_len)
    params = prepare_params(raw_params, num_heads)
    tokens = jax.random.randint(k_tok, (B, T), 0, vocab_size, dtype=jnp.int32)

    fwd = jax.jit(functools.partial(vanilla_transformer_forward,
                                    num_heads=num_heads, causal=causal,
                                    vocab_size=vocab_size))
    logits = fwd(tokens, params)
    jax.block_until_ready(logits)
    assert logits.shape == (B, T, vocab_size) and logits.dtype == jnp.float32
    print("KERNEL_OK")
</pallas_src>

<mosaic_0001>
module attributes {stable_mosaic.version = 11 : i64} {
  func.func @ln_qkv_kernel(%arg0: i32, %arg1: i32, %arg2: i32, %arg3: memref<1x128x256xbf16, #tpu.memory_space<vmem>>, %arg4: memref<1x256xf32, #tpu.memory_space<vmem>>, %arg5: memref<1x256xf32, #tpu.memory_space<vmem>>, %arg6: memref<256x384xbf16, #tpu.memory_space<vmem>>, %arg7: memref<1x384xf32, #tpu.memory_space<vmem>>, %arg8: memref<1x128x384xbf16, #tpu.memory_space<vmem>>, %arg9: memref<128x256xbf16, #tpu.memory_space<vmem>>) attributes {dimension_semantics = [#tpu.dimension_semantics<parallel>, #tpu.dimension_semantics<parallel>, #tpu.dimension_semantics<arbitrary>], iteration_bounds = array<i64: 2, 1, 2>, scalar_prefetch = 0 : i64, scratch_operands = 1 : i64, tpu.core_type = #tpu.core_type<tc>, window_params = [{pipeline_mode = #tpu.pipeline_mode<synchronous>, transform_indices = @transform_0, window_bounds = array<i64: 1, 128, 256>}, {pipeline_mode = #tpu.pipeline_mode<synchronous>, transform_indices = @transform_1, window_bounds = array<i64: 1, 256>}, {pipeline_mode = #tpu.pipeline_mode<synchronous>, transform_indices = @transform_2, window_bounds = array<i64: 1, 256>}, {transform_indices = @transform_3, window_bounds = array<i64: 256, 384>}, {transform_indices = @transform_4, window_bounds = array<i64: 1, 384>}, {transform_indices = @transform_5, window_bounds = array<i64: 1, 128, 384>}]} {
    %c0_i32 = arith.constant 0 : i32
    %0 = arith.cmpi eq, %arg2, %c0_i32 : i32
    %1 = arith.extui %0 : i1 to i32
    %c0_i32_0 = arith.constant 0 : i32
    %2 = arith.cmpi ne, %1, %c0_i32_0 : i32
    scf.if %2 {
      %c0_9 = arith.constant 0 : index
      %c0_10 = arith.constant 0 : index
      %c0_11 = arith.constant 0 : index
      %13 = vector.load %arg3[%c0_9, %c0_10, %c0_11] : memref<1x128x256xbf16, #tpu.memory_space<vmem>>, vector<1x128x256xbf16>
      %14 = vector.shape_cast %13 : vector<1x128x256xbf16> to vector<128x256xbf16>
      %c0_12 = arith.constant 0 : index
      %c0_13 = arith.constant 0 : index
      %15 = vector.load %arg4[%c0_12, %c0_13] : memref<1x256xf32, #tpu.memory_space<vmem>>, vector<1x256xf32>
      %c0_14 = arith.constant 0 : index
      %c0_15 = arith.constant 0 : index
      %16 = vector.load %arg5[%c0_14, %c0_15] : memref<1x256xf32, #tpu.memory_space<vmem>>, vector<1x256xf32>
      %17 = arith.extf %14 : vector<128x256xbf16> to vector<128x256xf32>
      %cst_16 = arith.constant dense<0.000000e+00> : vector<128xf32>
      %18 = vector.multi_reduction <add>, %17, %cst_16 [1] : vector<128x256xf32> to vector<128xf32>
      %19 = vector.shape_cast %18 : vector<128xf32> to vector<128x1xf32>
      %cst_17 = arith.constant 2.560000e+02 : f32
      %20 = vector.broadcast %cst_17 : f32 to vector<128x1xf32>
      %21 = arith.divf %19, %20 : vector<128x1xf32>
      %22 = vector.broadcast %21 : vector<128x1xf32> to vector<128x256xf32>
      %23 = arith.subf %17, %22 : vector<128x256xf32>
      %24 = arith.mulf %23, %23 : vector<128x256xf32>
      %cst_18 = arith.constant dense<0.000000e+00> : vector<128xf32>
      %25 = vector.multi_reduction <add>, %24, %cst_18 [1] : vector<128x256xf32> to vector<128xf32>
      %26 = vector.shape_cast %25 : vector<128xf32> to vector<128x1xf32>
      %cst_19 = arith.constant 2.560000e+02 : f32
      %27 = vector.broadcast %cst_19 : f32 to vector<128x1xf32>
      %28 = arith.divf %26, %27 : vector<128x1xf32>
      %29 = vector.broadcast %21 : vector<128x1xf32> to vector<128x256xf32>
      %30 = arith.subf %17, %29 : vector<128x256xf32>
      %cst_20 = arith.constant 9.99999974E-6 : f32
      %31 = vector.broadcast %cst_20 : f32 to vector<128x1xf32>
      %32 = arith.addf %28, %31 : vector<128x1xf32>
      %33 = math.rsqrt %32 : vector<128x1xf32>
      %34 = vector.broadcast %33 : vector<128x1xf32> to vector<128x256xf32>
      %35 = arith.mulf %30, %34 : vector<128x256xf32>
      %36 = vector.broadcast %15 : vector<1x256xf32> to vector<128x256xf32>
      %37 = arith.mulf %35, %36 : vector<128x256xf32>
      %38 = vector.broadcast %16 : vector<1x256xf32> to vector<128x256xf32>
      %39 = arith.addf %37, %38 : vector<128x256xf32>
      %40 = arith.truncf %39 : vector<128x256xf32> to vector<128x256xbf16>
      %c0_21 = arith.constant 0 : index
      %c0_22 = arith.constant 0 : index
      %41 = vector.load %arg9[%c0_21, %c0_22] : memref<128x256xbf16, #tpu.memory_space<vmem>>, vector<128x256xbf16>
      tpu.vector_store %arg9[%c0_21, %c0_22], %40 {strides = array<i32>} : memref<128x256xbf16, #tpu.memory_space<vmem>>, vector<128x256xbf16>,
    } else {
    }
    %c0 = arith.constant 0 : index
    %c0_1 = arith.constant 0 : index
    %3 = vector.load %arg9[%c0, %c0_1] : memref<128x256xbf16, #tpu.memory_space<vmem>>, vector<128x256xbf16>
    %c0_2 = arith.constant 0 : index
    %c0_3 = arith.constant 0 : index
    %4 = vector.load %arg6[%c0_2, %c0_3] : memref<256x384xbf16, #tpu.memory_space<vmem>>, vector<256x384xbf16>
    %cst = arith.constant dense<0.000000e+00> : vector<128x384xf32>
    %5 = tpu.matmul %3, %4, %cst {dimension_numbers = #tpu.dot_dimension_numbers<[1], [0], [0], [1], [0, 0, 1, 1], [], []>} : vector<128x256xbf16>, vector<256x384xbf16>, vector<128x384xf32> -> vector<128x384xf32>
    %c0_4 = arith.constant 0 : index
    %c0_5 = arith.constant 0 : index
    %6 = vector.load %arg7[%c0_4, %c0_5] : memref<1x384xf32, #tpu.memory_space<vmem>>, vector<1x384xf32>
    %7 = vector.broadcast %6 : vector<1x384xf32> to vector<128x384xf32>
    %8 = arith.addf %5, %7 : vector<128x384xf32>
    %9 = arith.truncf %8 : vector<128x384xf32> to vector<128x384xbf16>
    %c0_6 = arith.constant 0 : index
    %c0_7 = arith.constant 0 : index
    %c0_8 = arith.constant 0 : index
    %10 = vector.load %arg8[%c0_6, %c0_7, %c0_8] : memref<1x128x384xbf16, #tpu.memory_space<vmem>>, vector<1x128x384xbf16>
    %11 = vector.shape_cast %10 : vector<1x128x384xbf16> to vector<128x384xbf16>
    %12 = vector.shape_cast %9 : vector<128x384xbf16> to vector<1x128x384xbf16>
    tpu.vector_store %arg8[%c0_6, %c0_7, %c0_8], %12 {strides = array<i32>} : memref<1x128x384xbf16, #tpu.memory_space<vmem>>, vector<1x128x384xbf16>,
    return
  }
  func.func @transform_0(%arg0: i32, %arg1: i32, %arg2: i32) -> (i32, i32, i32) {
    %c0_i32 = arith.constant 0 : i32
    %c0_i32_0 = arith.constant 0 : i32
    return %arg0, %arg1, %c0_i32 : i32, i32, i32
  }
  func.func @transform_1(%arg0: i32, %arg1: i32, %arg2: i32) -> (i32, i32) {
    %c0_i32 = arith.constant 0 : i32
    %c0_i32_0 = arith.constant 0 : i32
    %c0_i32_1 = arith.constant 0 : i32
    return %c0_i32, %c0_i32_0 : i32, i32
  }
  func.func @transform_2(%arg0: i32, %arg1: i32, %arg2: i32) -> (i32, i32) {
    %c0_i32 = arith.constant 0 : i32
    %c0_i32_0 = arith.constant 0 : i32
    %c0_i32_1 = arith.constant 0 : i32
    return %c0_i32, %c0_i32_0 : i32, i32
  }
  func.func @transform_3(%arg0: i32, %arg1: i32, %arg2: i32) -> (i32, i32) {
    %c0_i32 = arith.constant 0 : i32
    %c0_i32_0 = arith.constant 0 : i32
    return %c0_i32, %arg2 : i32, i32
  }
  func.func @transform_4(%arg0: i32, %arg1: i32, %arg2: i32) -> (i32, i32) {
    %c0_i32 = arith.constant 0 : i32
    %c0_i32_0 = arith.constant 0 : i32
    return %c0_i32, %arg2 : i32, i32
  }
  func.func @transform_5(%arg0: i32, %arg1: i32, %arg2: i32) -> (i32, i32, i32) {
    %c0_i32 = arith.constant 0 : i32
    return %arg0, %arg1, %arg2 : i32, i32, i32
  }
}

module attributes {stable_mosaic.version = 11 : i64} {
  func.func @flash_attn_kernel(%arg0: i32, %arg1: i32, %arg2: i32, %arg3: i32, %arg4: memref<1x128x128xbf16, #tpu.memory_space<vmem>>, %arg5: memref<1x128x128xbf16, #tpu.memory_space<vmem>>, %arg6: memref<1x128x128xbf16, #tpu.memory_space<vmem>>, %arg7: memref<1x1x128x128xbf16, #tpu.memory_space<vmem>>, %arg8: memref<128x1xf32, #tpu.memory_space<vmem>>, %arg9: memref<128x1xf32, #tpu.memory_space<vmem>>, %arg10: memref<128x128xf32, #tpu.memory_space<vmem>>) attributes {dimension_semantics = [#tpu.dimension_semantics<parallel>, #tpu.dimension_semantics<parallel>, #tpu.dimension_semantics<parallel>, #tpu.dimension_semantics<arbitrary>], iteration_bounds = array<i64: 2, 2, 1, 1>, scalar_prefetch = 0 : i64, scratch_operands = 3 : i64, tpu.core_type = #tpu.core_type<tc>, window_params = [{transform_indices = @transform_0, window_bounds = array<i64: 1, 128, 128>}, {transform_indices = @transform_1, window_bounds = array<i64: 1, 128, 128>}, {transform_indices = @transform_2, window_bounds = array<i64: 1, 128, 128>}, {transform_indices = @transform_3, window_bounds = array<i64: 1, 1, 128, 128>}]} {
    %c0_i32 = arith.constant 0 : i32
    %0 = arith.cmpi eq, %arg3, %c0_i32 : i32
    %1 = arith.extui %0 : i1 to i32
    %c0_i32_0 = arith.constant 0 : i32
    %2 = arith.cmpi ne, %1, %c0_i32_0 : i32
    scf.if %2 {
      %cst_26 = arith.constant -1.000000e+30 : f32
      %36 = vector.broadcast %cst_26 : f32 to vector<128x1xf32>
      %c0_27 = arith.constant 0 : index
      %c0_28 = arith.constant 0 : index
      %37 = vector.load %arg8[%c0_27, %c0_28] : memref<128x1xf32, #tpu.memory_space<vmem>>, vector<128x1xf32>
      tpu.vector_store %arg8[%c0_27, %c0_28], %36 {strides = array<i32>} : memref<128x1xf32, #tpu.memory_space<vmem>>, vector<128x1xf32>,
      %cst_29 = arith.constant 0.000000e+00 : f32
      %38 = vector.broadcast %cst_29 : f32 to vector<128x1xf32>
      %c0_30 = arith.constant 0 : index
      %c0_31 = arith.constant 0 : index
      %39 = vector.load %arg9[%c0_30, %c0_31] : memref<128x1xf32, #tpu.memory_space<vmem>>, vector<128x1xf32>
      tpu.vector_store %arg9[%c0_30, %c0_31], %38 {strides = array<i32>} : memref<128x1xf32, #tpu.memory_space<vmem>>, vector<128x1xf32>,
      %cst_32 = arith.constant 0.000000e+00 : f32
      %40 = vector.broadcast %cst_32 : f32 to vector<128x128xf32>
      %c0_33 = arith.constant 0 : index
      %c0_34 = arith.constant 0 : index
      %41 = vector.load %arg10[%c0_33, %c0_34] : memref<128x128xf32, #tpu.memory_space<vmem>>, vector<128x128xf32>
      tpu.vector_store %arg10[%c0_33, %c0_34], %40 {strides = array<i32>} : memref<128x128xf32, #tpu.memory_space<vmem>>, vector<128x128xf32>,
    } else {
    }
    %c0 = arith.constant 0 : index
    %c0_1 = arith.constant 0 : index
    %c0_2 = arith.constant 0 : index
    %3 = vector.load %arg4[%c0, %c0_1, %c0_2] : memref<1x128x128xbf16, #tpu.memory_space<vmem>>, vector<1x128x128xbf16>
    %4 = vector.shape_cast %3 : vector<1x128x128xbf16> to vector<128x128xbf16>
    %c0_3 = arith.constant 0 : index
    %c0_4 = arith.constant 0 : index
    %c0_5 = arith.constant 0 : index
    %5 = vector.load %arg5[%c0_3, %c0_4, %c0_5] : memref<1x128x128xbf16, #tpu.memory_space<vmem>>, vector<1x128x128xbf16>
    %6 = vector.shape_cast %5 : vector<1x128x128xbf16> to vector<128x128xbf16>
    %cst = arith.constant dense<0.000000e+00> : vector<128x128xf32>
    %7 = tpu.matmul %4, %6, %cst {dimension_numbers = #tpu.dot_dimension_numbers<[1], [1], [0], [0], [0, 0, 1, 0], [], []>} : vector<128x128xbf16>, vector<128x128xbf16>, vector<128x128xf32> -> vector<128x128xf32>
    %c0_6 = arith.constant 0 : index
    %c0_7 = arith.constant 0 : index
    %8 = vector.load %arg8[%c0_6, %c0_7] : memref<128x1xf32, #tpu.memory_space<vmem>>, vector<128x1xf32>
    %cst_8 = arith.constant dense<0xFF800000> : vector<128xf32>
    %9 = vector.multi_reduction <maximumf>, %7, %cst_8 [1] : vector<128x128xf32> to vector<128xf32>
    %10 = vector.shape_cast %9 : vector<128xf32> to vector<128x1xf32>
    %11 = arith.maximumf %8, %10 : vector<128x1xf32>
    %12 = arith.subf %8, %11 : vector<128x1xf32>
    %13 = math.exp %12 : vector<128x1xf32>
    %14 = vector.broadcast %11 : vector<128x1xf32> to vector<128x128xf32>
    %15 = arith.subf %7, %14 : vector<128x128xf32>
    %16 = math.exp %15 : vector<128x128xf32>
    %c0_9 = arith.constant 0 : index
    %c0_10 = arith.constant 0 : index
    %17 = vector.load %arg9[%c0_9, %c0_10] : memref<128x1xf32, #tpu.memory_space<vmem>>, vector<128x1xf32>
    %18 = arith.mulf %13, %17 : vector<128x1xf32>
    %cst_11 = arith.constant dense<0.000000e+00> : vector<128xf32>
    %19 = vector.multi_reduction <add>, %16, %cst_11 [1] : vector<128x128xf32> to vector<128xf32>
    %20 = vector.shape_cast %19 : vector<128xf32> to vector<128x1xf32>
    %21 = arith.addf %18, %20 : vector<128x1xf32>
    %c0_12 = arith.constant 0 : index
    %c0_13 = arith.constant 0 : index
    %22 = vector.load %arg9[%c0_12, %c0_13] : memref<128x1xf32, #tpu.memory_space<vmem>>, vector<128x1xf32>
    tpu.vector_store %arg9[%c0_12, %c0_13], %21 {strides = array<i32>} : memref<128x1xf32, #tpu.memory_space<vmem>>, vector<128x1xf32>,
    %c0_14 = arith.constant 0 : index
    %c0_15 = arith.constant 0 : index
    %23 = vector.load %arg10[%c0_14, %c0_15] : memref<128x128xf32, #tpu.memory_space<vmem>>, vector<128x128xf32>
    %24 = vector.broadcast %13 : vector<128x1xf32> to vector<128x128xf32>
    %25 = arith.mulf %24, %23 : vector<128x128xf32>
    %26 = arith.truncf %16 : vector<128x128xf32> to vector<128x128xbf16>
    %c0_16 = arith.constant 0 : index
    %c0_17 = arith.constant 0 : index
    %c0_18 = arith.constant 0 : index
    %27 = vector.load %arg6[%c0_16, %c0_17, %c0_18] : memref<1x128x128xbf16, #tpu.memory_space<vmem>>, vector<1x128x128xbf16>
    %28 = vector.shape_cast %27 : vector<1x128x128xbf16> to vector<128x128xbf16>
    %cst_19 = arith.constant dense<0.000000e+00> : vector<128x128xf32>
    %29 = tpu.matmul %26, %28, %cst_19 {dimension_numbers = #tpu.dot_dimension_numbers<[1], [0], [0], [1], [0, 0, 1, 1], [], []>} : vector<128x128xbf16>, vector<128x128xbf16>, vector<128x128xf32> -> vector<128x128xf32>
    %30 = arith.addf %25, %29 : vector<128x128xf32>
    %c0_20 = arith.constant 0 : index
    %c0_21 = arith.constant 0 : index
    %31 = vector.load %arg10[%c0_20, %c0_21] : memref<128x128xf32, #tpu.memory_space<vmem>>, vector<128x128xf32>
    tpu.vector_store %arg10[%c0_20, %c0_21], %30 {strides = array<i32>} : memref<128x128xf32, #tpu.memory_space<vmem>>, vector<128x128xf32>,
    %c0_22 = arith.constant 0 : index
    %c0_23 = arith.constant 0 : index
    %32 = vector.load %arg8[%c0_22, %c0_23] : memref<128x1xf32, #tpu.memory_space<vmem>>, vector<128x1xf32>
    tpu.vector_store %arg8[%c0_22, %c0_23], %11 {strides = array<i32>} : memref<128x1xf32, #tpu.memory_space<vmem>>, vector<128x1xf32>,
    %c0_i32_24 = arith.constant 0 : i32
    %33 = arith.cmpi eq, %arg3, %c0_i32_24 : i32
    %34 = arith.extui %33 : i1 to i32
    %c0_i32_25 = arith.constant 0 : i32
    %35 = arith.cmpi ne, %34, %c0_i32_25 : i32
    scf.if %35 {
      %c0_26 = arith.constant 0 : index
      %c0_27 = arith.constant 0 : index
      %36 = vector.load %arg9[%c0_26, %c0_27] : memref<128x1xf32, #tpu.memory_space<vmem>>, vector<128x1xf32>
      %37 = tpu.reciprocal %36 {approx = true} : vector<128x1xf32> -> vector<128x1xf32>
      %c0_28 = arith.constant 0 : index
      %c0_29 = arith.constant 0 : index
      %38 = vector.load %arg10[%c0_28, %c0_29] : memref<128x128xf32, #tpu.memory_space<vmem>>, vector<128x128xf32>
      %39 = vector.broadcast %37 : vector<128x1xf32> to vector<128x128xf32>
      %40 = arith.mulf %38, %39 : vector<128x128xf32>
      %41 = arith.truncf %40 : vector<128x128xf32> to vector<128x128xbf16>
      %c0_30 = arith.constant 0 : index
      %c0_31 = arith.constant 0 : index
      %c0_32 = arith.constant 0 : index
      %c0_33 = arith.constant 0 : index
      %42 = vector.load %arg7[%c0_30, %c0_31, %c0_32, %c0_33] : memref<1x1x128x128xbf16, #tpu.memory_space<vmem>>, vector<1x1x128x128xbf16>
      %43 = vector.shape_cast %42 : vector<1x1x128x128xbf16> to vector<128x128xbf16>
      %44 = vector.shape_cast %41 : vector<128x128xbf16> to vector<1x1x128x128xbf16>
      tpu.vector_store %arg7[%c0_30, %c0_31, %c0_32, %c0_33], %44 {strides = array<i32>} : memref<1x1x128x128xbf16, #tpu.memory_space<vmem>>, vector<1x1x128x128xbf16>,
    } else {
    }
    return
  }
  func.func @transform_0(%arg0: i32, %arg1: i32, %arg2: i32, %arg3: i32) -> (i32, i32, i32) {
    %c0_i32 = arith.constant 0 : i32
    return %arg0, %arg2, %arg1 : i32, i32, i32
  }
  func.func @transform_1(%arg0: i32, %arg1: i32, %arg2: i32, %arg3: i32) -> (i32, i32, i32) {
    %c2_i32 = arith.constant 2 : i32
    %0 = arith.addi %c2_i32, %arg1 : i32
    %c0_i32 = arith.constant 0 : i32
    return %arg0, %arg3, %0 : i32, i32, i32
  }
  func.func @transform_2(%arg0: i32, %arg1: i32, %arg2: i32, %arg3: i32) -> (i32, i32, i32) {
    %c4_i32 = arith.constant 4 : i32
    %0 = arith.addi %c4_i32, %arg1 : i32
    %c0_i32 = arith.constant 0 : i32
    return %arg0, %arg3, %0 : i32, i32, i32
  }
  func.func @transform_3(%arg0: i32, %arg1: i32, %arg2: i32, %arg3: i32) -> (i32, i32, i32, i32) {
    %c0_i32 = arith.constant 0 : i32
    %c0_i32_0 = arith.constant 0 : i32
    return %arg0, %arg1, %arg2, %c0_i32 : i32, i32, i32, i32
  }
}

module attributes {stable_mosaic.version = 11 : i64} {
  func.func @residual_out_kernel(%arg0: i32, %arg1: i32, %arg2: i32, %arg3: memref<1x128x256xbf16, #tpu.memory_space<vmem>>, %arg4: memref<1x1x128x128xbf16, #tpu.memory_space<vmem>>, %arg5: memref<1x128x256xbf16, #tpu.memory_space<vmem>>, %arg6: memref<1x256xf32, #tpu.memory_space<vmem>>, %arg7: memref<1x128x256xbf16, #tpu.memory_space<vmem>>, %arg8: memref<128x256xf32, #tpu.memory_space<vmem>>) attributes {dimension_semantics = [#tpu.dimension_semantics<parallel>, #tpu.dimension_semantics<parallel>, #tpu.dimension_semantics<arbitrary>], iteration_bounds = array<i64: 2, 1, 2>, scalar_prefetch = 0 : i64, scratch_operands = 1 : i64, tpu.core_type = #tpu.core_type<tc>, window_params = [{pipeline_mode = #tpu.pipeline_mode<synchronous>, transform_indices = @transform_0, window_bounds = array<i64: 1, 128, 256>}, {transform_indices = @transform_1, window_bounds = array<i64: 1, 1, 128, 128>}, {transform_indices = @transform_2, window_bounds = array<i64: 1, 128, 256>}, {pipeline_mode = #tpu.pipeline_mode<synchronous>, transform_indices = @transform_3, window_bounds = array<i64: 1, 256>}, {transform_indices = @transform_4, window_bounds = array<i64: 1, 128, 256>}]} {
    %c0_i32 = arith.constant 0 : i32
    %0 = arith.cmpi eq, %arg2, %c0_i32 : i32
    %1 = arith.extui %0 : i1 to i32
    %c0_i32_0 = arith.constant 0 : i32
    %2 = arith.cmpi ne, %1, %c0_i32_0 : i32
    scf.if %2 {
      %cst_12 = arith.constant 0.000000e+00 : f32
      %14 = vector.broadcast %cst_12 : f32 to vector<128x256xf32>
      %c0_13 = arith.constant 0 : index
      %c0_14 = arith.constant 0 : index
      %15 = vector.load %arg8[%c0_13, %c0_14] : memref<128x256xf32, #tpu.memory_space<vmem>>, vector<128x256xf32>
      tpu.vector_store %arg8[%c0_13, %c0_14], %14 {strides = array<i32>} : memref<128x256xf32, #tpu.memory_space<vmem>>, vector<128x256xf32>,
    } else {
    }
    %c0 = arith.constant 0 : index
    %c0_1 = arith.constant 0 : index
    %3 = vector.load %arg8[%c0, %c0_1] : memref<128x256xf32, #tpu.memory_space<vmem>>, vector<128x256xf32>
    %c0_2 = arith.constant 0 : index
    %c0_3 = arith.constant 0 : index
    %c0_4 = arith.constant 0 : index
    %c0_5 = arith.constant 0 : index
    %4 = vector.load %arg4[%c0_2, %c0_3, %c0_4, %c0_5] : memref<1x1x128x128xbf16, #tpu.memory_space<vmem>>, vector<1x1x128x128xbf16>
    %5 = vector.shape_cast %4 : vector<1x1x128x128xbf16> to vector<128x128xbf16>
    %c0_6 = arith.constant 0 : index
    %c0_7 = arith.constant 0 : index
    %c0_8 = arith.constant 0 : index
    %6 = vector.load %arg5[%c0_6, %c0_7, %c0_8] : memref<1x128x256xbf16, #tpu.memory_space<vmem>>, vector<1x128x256xbf16>
    %7 = vector.shape_cast %6 : vector<1x128x256xbf16> to vector<128x256xbf16>
    %cst = arith.constant dense<0.000000e+00> : vector<128x256xf32>
    %8 = tpu.matmul %5, %7, %cst {dimension_numbers = #tpu.dot_dimension_numbers<[1], [0], [0], [1], [0, 0, 1, 1], [], []>} : vector<128x128xbf16>, vector<128x256xbf16>, vector<128x256xf32> -> vector<128x256xf32>
    %9 = arith.addf %3, %8 : vector<128x256xf32>
    %c0_9 = arith.constant 0 : index
    %c0_10 = arith.constant 0 : index
    %10 = vector.load %arg8[%c0_9, %c0_10] : memref<128x256xf32, #tpu.memory_space<vmem>>, vector<128x256xf32>
    tpu.vector_store %arg8[%c0_9, %c0_10], %9 {strides = array<i32>} : memref<128x256xf32, #tpu.memory_space<vmem>>, vector<128x256xf32>,
    %c1_i32 = arith.constant 1 : i32
    %11 = arith.cmpi eq, %arg2, %c1_i32 : i32
    %12 = arith.extui %11 : i1 to i32
    %c0_i32_11 = arith.constant 0 : i32
    %13 = arith.cmpi ne, %12, %c0_i32_11 : i32
    scf.if %13 {
      %c0_12 = arith.constant 0 : index
      %c0_13 = arith.constant 0 : index
      %c0_14 = arith.constant 0 : index
      %14 = vector.load %arg3[%c0_12, %c0_13, %c0_14] : memref<1x128x256xbf16, #tpu.memory_space<vmem>>, vector<1x128x256xbf16>
      %15 = vector.shape_cast %14 : vector<1x128x256xbf16> to vector<128x256xbf16>
      %16 = arith.extf %15 : vector<128x256xbf16> to vector<128x256xf32>
      %c0_15 = arith.constant 0 : index
      %c0_16 = arith.constant 0 : index
      %17 = vector.load %arg8[%c0_15, %c0_16] : memref<128x256xf32, #tpu.memory_space<vmem>>, vector<128x256xf32>
      %18 = arith.addf %16, %17 : vector<128x256xf32>
      %c0_17 = arith.constant 0 : index
      %c0_18 = arith.constant 0 : index
      %19 = vector.load %arg6[%c0_17, %c0_18] : memref<1x256xf32, #tpu.memory_space<vmem>>, vector<1x256xf32>
      %20 = vector.broadcast %19 : vector<1x256xf32> to vector<128x256xf32>
      %21 = arith.addf %18, %20 : vector<128x256xf32>
      %22 = arith.truncf %21 : vector<128x256xf32> to vector<128x256xbf16>
      %c0_19 = arith.constant 0 : index
      %c0_20 = arith.constant 0 : index
      %c0_21 = arith.constant 0 : index
      %23 = vector.load %arg7[%c0_19, %c0_20, %c0_21] : memref<1x128x256xbf16, #tpu.memory_space<vmem>>, vector<1x128x256xbf16>
      %24 = vector.shape_cast %23 : vector<1x128x256xbf16> to vector<128x256xbf16>
      %25 = vector.shape_cast %22 : vector<128x256xbf16> to vector<1x128x256xbf16>
      tpu.vector_store %arg7[%c0_19, %c0_20, %c0_21], %25 {strides = array<i32>} : memref<1x128x256xbf16, #tpu.memory_space<vmem>>, vector<1x128x256xbf16>,
    } else {
    }
    return
  }
  func.func @transform_0(%arg0: i32, %arg1: i32, %arg2: i32) -> (i32, i32, i32) {
    %c0_i32 = arith.constant 0 : i32
    %c0_i32_0 = arith.constant 0 : i32
    return %arg0, %arg1, %c0_i32 : i32, i32, i32
  }
  func.func @transform_1(%arg0: i32, %arg1: i32, %arg2: i32) -> (i32, i32, i32, i32) {
    %c0_i32 = arith.constant 0 : i32
    %c0_i32_0 = arith.constant 0 : i32
    return %arg0, %arg2, %arg1, %c0_i32 : i32, i32, i32, i32
  }
  func.func @transform_2(%arg0: i32, %arg1: i32, %arg2: i32) -> (i32, i32, i32) {
    %c0_i32 = arith.constant 0 : i32
    %c0_i32_0 = arith.constant 0 : i32
    %c0_i32_1 = arith.constant 0 : i32
    return %arg2, %c0_i32, %c0_i32_0 : i32, i32, i32
  }
  func.func @transform_3(%arg0: i32, %arg1: i32, %arg2: i32) -> (i32, i32) {
    %c0_i32 = arith.constant 0 : i32
    %c0_i32_0 = arith.constant 0 : i32
    %c0_i32_1 = arith.constant 0 : i32
    return %c0_i32, %c0_i32_0 : i32, i32
  }
  func.func @transform_4(%arg0: i32, %arg1: i32, %arg2: i32) -> (i32, i32, i32) {
    %c0_i32 = arith.constant 0 : i32
    %c0_i32_0 = arith.constant 0 : i32
    return %arg0, %arg1, %c0_i32 : i32, i32, i32
  }
}

module attributes {stable_mosaic.version = 11 : i64} {
  func.func @mlp_kernel(%arg0: i32, %arg1: i32, %arg2: i32, %arg3: memref<1x128x256xbf16, #tpu.memory_space<vmem>>, %arg4: memref<1x256xf32, #tpu.memory_space<vmem>>, %arg5: memref<1x256xf32, #tpu.memory_space<vmem>>, %arg6: memref<256x512xbf16, #tpu.memory_space<vmem>>, %arg7: memref<1x512xf32, #tpu.memory_space<vmem>>, %arg8: memref<512x256xbf16, #tpu.memory_space<vmem>>, %arg9: memref<1x256xf32, #tpu.memory_space<vmem>>, %arg10: memref<1x128x256xbf16, #tpu.memory_space<vmem>>, %arg11: memref<128x256xbf16, #tpu.memory_space<vmem>>, %arg12: memref<128x256xf32, #tpu.memory_space<vmem>>) attributes {dimension_semantics = [#tpu.dimension_semantics<parallel>, #tpu.dimension_semantics<parallel>, #tpu.dimension_semantics<arbitrary>], iteration_bounds = array<i64: 2, 1, 2>, scalar_prefetch = 0 : i64, scratch_operands = 2 : i64, tpu.core_type = #tpu.core_type<tc>, window_params = [{pipeline_mode = #tpu.pipeline_mode<synchronous>, transform_indices = @transform_0, window_bounds = array<i64: 1, 128, 256>}, {pipeline_mode = #tpu.pipeline_mode<synchronous>, transform_indices = @transform_1, window_bounds = array<i64: 1, 256>}, {pipeline_mode = #tpu.pipeline_mode<synchronous>, transform_indices = @transform_2, window_bounds = array<i64: 1, 256>}, {transform_indices = @transform_3, window_bounds = array<i64: 256, 512>}, {transform_indices = @transform_4, window_bounds = array<i64: 1, 512>}, {transform_indices = @transform_5, window_bounds = array<i64: 512, 256>}, {pipeline_mode = #tpu.pipeline_mode<synchronous>, transform_indices = @transform_6, window_bounds = array<i64: 1, 256>}, {transform_indices = @transform_7, window_bounds = array<i64: 1, 128, 256>}]} {
    %c0_i32 = arith.constant 0 : i32
    %0 = arith.cmpi eq, %arg2, %c0_i32 : i32
    %1 = arith.extui %0 : i1 to i32
    %c0_i32_0 = arith.constant 0 : i32
    %2 = arith.cmpi ne, %1, %c0_i32_0 : i32
    scf.if %2 {
      %c0_18 = arith.constant 0 : index
      %c0_19 = arith.constant 0 : index
      %c0_20 = arith.constant 0 : index
      %31 = vector.load %arg3[%c0_18, %c0_19, %c0_20] : memref<1x128x256xbf16, #tpu.memory_space<vmem>>, vector<1x128x256xbf16>
      %32 = vector.shape_cast %31 : vector<1x128x256xbf16> to vector<128x256xbf16>
      %c0_21 = arith.constant 0 : index
      %c0_22 = arith.constant 0 : index
      %33 = vector.load %arg4[%c0_21, %c0_22] : memref<1x256xf32, #tpu.memory_space<vmem>>, vector<1x256xf32>
      %c0_23 = arith.constant 0 : index
      %c0_24 = arith.constant 0 : index
      %34 = vector.load %arg5[%c0_23, %c0_24] : memref<1x256xf32, #tpu.memory_space<vmem>>, vector<1x256xf32>
      %35 = arith.extf %32 : vector<128x256xbf16> to vector<128x256xf32>
      %cst_25 = arith.constant dense<0.000000e+00> : vector<128xf32>
      %36 = vector.multi_reduction <add>, %35, %cst_25 [1] : vector<128x256xf32> to vector<128xf32>
      %37 = vector.shape_cast %36 : vector<128xf32> to vector<128x1xf32>
      %cst_26 = arith.constant 2.560000e+02 : f32
      %38 = vector.broadcast %cst_26 : f32 to vector<128x1xf32>
      %39 = arith.divf %37, %38 : vector<128x1xf32>
      %40 = vector.broadcast %39 : vector<128x1xf32> to vector<128x256xf32>
      %41 = arith.subf %35, %40 : vector<128x256xf32>
      %42 = arith.mulf %41, %41 : vector<128x256xf32>
      %cst_27 = arith.constant dense<0.000000e+00> : vector<128xf32>
      %43 = vector.multi_reduction <add>, %42, %cst_27 [1] : vector<128x256xf32> to vector<128xf32>
      %44 = vector.shape_cast %43 : vector<128xf32> to vector<128x1xf32>
      %cst_28 = arith.constant 2.560000e+02 : f32
      %45 = vector.broadcast %cst_28 : f32 to vector<128x1xf32>
      %46 = arith.divf %44, %45 : vector<128x1xf32>
      %47 = vector.broadcast %39 : vector<128x1xf32> to vector<128x256xf32>
      %48 = arith.subf %35, %47 : vector<128x256xf32>
      %cst_29 = arith.constant 9.99999974E-6 : f32
      %49 = vector.broadcast %cst_29 : f32 to vector<128x1xf32>
      %50 = arith.addf %46, %49 : vector<128x1xf32>
      %51 = math.rsqrt %50 : vector<128x1xf32>
      %52 = vector.broadcast %51 : vector<128x1xf32> to vector<128x256xf32>
      %53 = arith.mulf %48, %52 : vector<128x256xf32>
      %54 = vector.broadcast %33 : vector<1x256xf32> to vector<128x256xf32>
      %55 = arith.mulf %53, %54 : vector<128x256xf32>
      %56 = vector.broadcast %34 : vector<1x256xf32> to vector<128x256xf32>
      %57 = arith.addf %55, %56 : vector<128x256xf32>
      %58 = arith.truncf %57 : vector<128x256xf32> to vector<128x256xbf16>
      %c0_30 = arith.constant 0 : index
      %c0_31 = arith.constant 0 : index
      %59 = vector.load %arg11[%c0_30, %c0_31] : memref<128x256xbf16, #tpu.memory_space<vmem>>, vector<128x256xbf16>
      tpu.vector_store %arg11[%c0_30, %c0_31], %58 {strides = array<i32>} : memref<128x256xbf16, #tpu.memory_space<vmem>>, vector<128x256xbf16>,
      %cst_32 = arith.constant 0.000000e+00 : f32
      %60 = vector.broadcast %cst_32 : f32 to vector<128x256xf32>
      %c0_33 = arith.constant 0 : index
      %c0_34 = arith.constant 0 : index
      %61 = vector.load %arg12[%c0_33, %c0_34] : memref<128x256xf32, #tpu.memory_space<vmem>>, vector<128x256xf32>
      tpu.vector_store %arg12[%c0_33, %c0_34], %60 {strides = array<i32>} : memref<128x256xf32, #tpu.memory_space<vmem>>, vector<128x256xf32>,
    } else {
    }
    %c0 = arith.constant 0 : index
    %c0_1 = arith.constant 0 : index
    %3 = vector.load %arg11[%c0, %c0_1] : memref<128x256xbf16, #tpu.memory_space<vmem>>, vector<128x256xbf16>
    %c0_2 = arith.constant 0 : index
    %c0_3 = arith.constant 0 : index
    %4 = vector.load %arg6[%c0_2, %c0_3] : memref<256x512xbf16, #tpu.memory_space<vmem>>, vector<256x512xbf16>
    %cst = arith.constant dense<0.000000e+00> : vector<128x512xf32>
    %5 = tpu.matmul %3, %4, %cst {dimension_numbers = #tpu.dot_dimension_numbers<[1], [0], [0], [1], [0, 0, 1, 1], [], []>} : vector<128x256xbf16>, vector<256x512xbf16>, vector<128x512xf32> -> vector<128x512xf32>
    %c0_4 = arith.constant 0 : index
    %c0_5 = arith.constant 0 : index
    %6 = vector.load %arg7[%c0_4, %c0_5] : memref<1x512xf32, #tpu.memory_space<vmem>>, vector<1x512xf32>
    %7 = vector.broadcast %6 : vector<1x512xf32> to vector<128x512xf32>
    %8 = arith.addf %5, %7 : vector<128x512xf32>
    %cst_6 = arith.constant 5.000000e-01 : f32
    %9 = vector.broadcast %cst_6 : f32 to vector<128x512xf32>
    %10 = arith.mulf %9, %8 : vector<128x512xf32>
    %cst_7 = arith.constant 4.471500e-02 : f32
    %11 = vector.broadcast %cst_7 : f32 to vector<128x512xf32>
    %12 = arith.mulf %11, %8 : vector<128x512xf32>
    %13 = arith.mulf %12, %8 : vector<128x512xf32>
    %14 = arith.mulf %13, %8 : vector<128x512xf32>
    %15 = arith.addf %8, %14 : vector<128x512xf32>
    %cst_8 = arith.constant 0.797884583 : f32
    %16 = vector.broadcast %cst_8 : f32 to vector<128x512xf32>
    %17 = arith.mulf %16, %15 : vector<128x512xf32>
    %18 = math.tanh %17 : vector<128x512xf32>
    %cst_9 = arith.constant 1.000000e+00 : f32
    %19 = vector.broadcast %cst_9 : f32 to vector<128x512xf32>
    %20 = arith.addf %19, %18 : vector<128x512xf32>
    %21 = arith.mulf %10, %20 : vector<128x512xf32>
    %c0_10 = arith.constant 0 : index
    %c0_11 = arith.constant 0 : index
    %22 = vector.load %arg12[%c0_10, %c0_11] : memref<128x256xf32, #tpu.memory_space<vmem>>, vector<128x256xf32>
    %23 = arith.truncf %21 : vector<128x512xf32> to vector<128x512xbf16>
    %c0_12 = arith.constant 0 : index
    %c0_13 = arith.constant 0 : index
    %24 = vector.load %arg8[%c0_12, %c0_13] : memref<512x256xbf16, #tpu.memory_space<vmem>>, vector<512x256xbf16>
    %cst_14 = arith.constant dense<0.000000e+00> : vector<128x256xf32>
    %25 = tpu.matmul %23, %24, %cst_14 {dimension_numbers = #tpu.dot_dimension_numbers<[1], [0], [0], [1], [0, 0, 1, 1], [], []>} : vector<128x512xbf16>, vector<512x256xbf16>, vector<128x256xf32> -> vector<128x256xf32>
    %26 = arith.addf %22, %25 : vector<128x256xf32>
    %c0_15 = arith.constant 0 : index
    %c0_16 = arith.constant 0 : index
    %27 = vector.load %arg12[%c0_15, %c0_16] : memref<128x256xf32, #tpu.memory_space<vmem>>, vector<128x256xf32>
    tpu.vector_store %arg12[%c0_15, %c0_16], %26 {strides = array<i32>} : memref<128x256xf32, #tpu.memory_space<vmem>>, vector<128x256xf32>,
    %c1_i32 = arith.constant 1 : i32
    %28 = arith.cmpi eq, %arg2, %c1_i32 : i32
    %29 = arith.extui %28 : i1 to i32
    %c0_i32_17 = arith.constant 0 : i32
    %30 = arith.cmpi ne, %29, %c0_i32_17 : i32
    scf.if %30 {
      %c0_18 = arith.constant 0 : index
      %c0_19 = arith.constant 0 : index
      %c0_20 = arith.constant 0 : index
      %31 = vector.load %arg3[%c0_18, %c0_19, %c0_20] : memref<1x128x256xbf16, #tpu.memory_space<vmem>>, vector<1x128x256xbf16>
      %32 = vector.shape_cast %31 : vector<1x128x256xbf16> to vector<128x256xbf16>
      %33 = arith.extf %32 : vector<128x256xbf16> to vector<128x256xf32>
      %c0_21 = arith.constant 0 : index
      %c0_22 = arith.constant 0 : index
      %34 = vector.load %arg12[%c0_21, %c0_22] : memref<128x256xf32, #tpu.memory_space<vmem>>, vector<128x256xf32>
      %35 = arith.addf %33, %34 : vector<128x256xf32>
      %c0_23 = arith.constant 0 : index
      %c0_24 = arith.constant 0 : index
      %36 = vector.load %arg9[%c0_23, %c0_24] : memref<1x256xf32, #tpu.memory_space<vmem>>, vector<1x256xf32>
      %37 = vector.broadcast %36 : vector<1x256xf32> to vector<128x256xf32>
      %38 = arith.addf %35, %37 : vector<128x256xf32>
      %39 = arith.truncf %38 : vector<128x256xf32> to vector<128x256xbf16>
      %c0_25 = arith.constant 0 : index
      %c0_26 = arith.constant 0 : index
      %c0_27 = arith.constant 0 : index
      %40 = vector.load %arg10[%c0_25, %c0_26, %c0_27] : memref<1x128x256xbf16, #tpu.memory_space<vmem>>, vector<1x128x256xbf16>
      %41 = vector.shape_cast %40 : vector<1x128x256xbf16> to vector<128x256xbf16>
      %42 = vector.shape_cast %39 : vector<128x256xbf16> to vector<1x128x256xbf16>
      tpu.vector_store %arg10[%c0_25, %c0_26, %c0_27], %42 {strides = array<i32>} : memref<1x128x256xbf16, #tpu.memory_space<vmem>>, vector<1x128x256xbf16>,
    } else {
    }
    return
  }
  func.func @transform_0(%arg0: i32, %arg1: i32, %arg2: i32) -> (i32, i32, i32) {
    %c0_i32 = arith.constant 0 : i32
    %c0_i32_0 = arith.constant 0 : i32
    return %arg0, %arg1, %c0_i32 : i32, i32, i32
  }
  func.func @transform_1(%arg0: i32, %arg1: i32, %arg2: i32) -> (i32, i32) {
    %c0_i32 = arith.constant 0 : i32
    %c0_i32_0 = arith.constant 0 : i32
    %c0_i32_1 = arith.constant 0 : i32
    return %c0_i32, %c0_i32_0 : i32, i32
  }
  func.func @transform_2(%arg0: i32, %arg1: i32, %arg2: i32) -> (i32, i32) {
    %c0_i32 = arith.constant 0 : i32
    %c0_i32_0 = arith.constant 0 : i32
    %c0_i32_1 = arith.constant 0 : i32
    return %c0_i32, %c0_i32_0 : i32, i32
  }
  func.func @transform_3(%arg0: i32, %arg1: i32, %arg2: i32) -> (i32, i32) {
    %c0_i32 = arith.constant 0 : i32
    %c0_i32_0 = arith.constant 0 : i32
    return %c0_i32, %arg2 : i32, i32
  }
  func.func @transform_4(%arg0: i32, %arg1: i32, %arg2: i32) -> (i32, i32) {
    %c0_i32 = arith.constant 0 : i32
    %c0_i32_0 = arith.constant 0 : i32
    return %c0_i32, %arg2 : i32, i32
  }
  func.func @transform_5(%arg0: i32, %arg1: i32, %arg2: i32) -> (i32, i32) {
    %c0_i32 = arith.constant 0 : i32
    %c0_i32_0 = arith.constant 0 : i32
    return %arg2, %c0_i32 : i32, i32
  }
  func.func @transform_6(%arg0: i32, %arg1: i32, %arg2: i32) -> (i32, i32) {
    %c0_i32 = arith.constant 0 : i32
    %c0_i32_0 = arith.constant 0 : i32
    %c0_i32_1 = arith.constant 0 : i32
    return %c0_i32, %c0_i32_0 : i32, i32
  }
  func.func @transform_7(%arg0: i32, %arg1: i32, %arg2: i32) -> (i32, i32, i32) {
    %c0_i32 = arith.constant 0 : i32
    %c0_i32_0 = arith.constant 0 : i32
    return %arg0, %arg1, %c0_i32 : i32, i32, i32
  }
}

module attributes {stable_mosaic.version = 11 : i64} {
  func.func @ln_linear_kernel(%arg0: i32, %arg1: i32, %arg2: i32, %arg3: memref<1x128x256xbf16, #tpu.memory_space<vmem>>, %arg4: memref<1x256xf32, #tpu.memory_space<vmem>>, %arg5: memref<1x256xf32, #tpu.memory_space<vmem>>, %arg6: memref<256x384xbf16, #tpu.memory_space<vmem>>, %arg7: memref<1x384xf32, #tpu.memory_space<vmem>>, %arg8: memref<1x128x384xf32, #tpu.memory_space<vmem>>) attributes {dimension_semantics = [#tpu.dimension_semantics<parallel>, #tpu.dimension_semantics<parallel>, #tpu.dimension_semantics<parallel>], iteration_bounds = array<i64: 2, 1, 1>, scalar_prefetch = 0 : i64, scratch_operands = 0 : i64, tpu.core_type = #tpu.core_type<tc>, window_params = [{transform_indices = @transform_0, window_bounds = array<i64: 1, 128, 256>}, {pipeline_mode = #tpu.pipeline_mode<synchronous>, transform_indices = @transform_1, window_bounds = array<i64: 1, 256>}, {pipeline_mode = #tpu.pipeline_mode<synchronous>, transform_indices = @transform_2, window_bounds = array<i64: 1, 256>}, {transform_indices = @transform_3, window_bounds = array<i64: 256, 384>}, {pipeline_mode = #tpu.pipeline_mode<synchronous>, transform_indices = @transform_4, window_bounds = array<i64: 1, 384>}, {transform_indices = @transform_5, window_bounds = array<i64: 1, 128, 384>}]} {
    %c0 = arith.constant 0 : index
    %c0_0 = arith.constant 0 : index
    %c0_1 = arith.constant 0 : index
    %0 = vector.load %arg3[%c0, %c0_0, %c0_1] : memref<1x128x256xbf16, #tpu.memory_space<vmem>>, vector<1x128x256xbf16>
    %1 = vector.shape_cast %0 : vector<1x128x256xbf16> to vector<128x256xbf16>
    %c0_2 = arith.constant 0 : index
    %c0_3 = arith.constant 0 : index
    %2 = vector.load %arg4[%c0_2, %c0_3] : memref<1x256xf32, #tpu.memory_space<vmem>>, vector<1x256xf32>
    %c0_4 = arith.constant 0 : index
    %c0_5 = arith.constant 0 : index
    %3 = vector.load %arg5[%c0_4, %c0_5] : memref<1x256xf32, #tpu.memory_space<vmem>>, vector<1x256xf32>
    %4 = arith.extf %1 : vector<128x256xbf16> to vector<128x256xf32>
    %cst = arith.constant dense<0.000000e+00> : vector<128xf32>
    %5 = vector.multi_reduction <add>, %4, %cst [1] : vector<128x256xf32> to vector<128xf32>
    %6 = vector.shape_cast %5 : vector<128xf32> to vector<128x1xf32>
    %cst_6 = arith.constant 2.560000e+02 : f32
    %7 = vector.broadcast %cst_6 : f32 to vector<128x1xf32>
    %8 = arith.divf %6, %7 : vector<128x1xf32>
    %9 = vector.broadcast %8 : vector<128x1xf32> to vector<128x256xf32>
    %10 = arith.subf %4, %9 : vector<128x256xf32>
    %11 = arith.mulf %10, %10 : vector<128x256xf32>
    %cst_7 = arith.constant dense<0.000000e+00> : vector<128xf32>
    %12 = vector.multi_reduction <add>, %11, %cst_7 [1] : vector<128x256xf32> to vector<128xf32>
    %13 = vector.shape_cast %12 : vector<128xf32> to vector<128x1xf32>
    %cst_8 = arith.constant 2.560000e+02 : f32
    %14 = vector.broadcast %cst_8 : f32 to vector<128x1xf32>
    %15 = arith.divf %13, %14 : vector<128x1xf32>
    %16 = vector.broadcast %8 : vector<128x1xf32> to vector<128x256xf32>
    %17 = arith.subf %4, %16 : vector<128x256xf32>
    %cst_9 = arith.constant 9.99999974E-6 : f32
    %18 = vector.broadcast %cst_9 : f32 to vector<128x1xf32>
    %19 = arith.addf %15, %18 : vector<128x1xf32>
    %20 = math.rsqrt %19 : vector<128x1xf32>
    %21 = vector.broadcast %20 : vector<128x1xf32> to vector<128x256xf32>
    %22 = arith.mulf %17, %21 : vector<128x256xf32>
    %23 = vector.broadcast %2 : vector<1x256xf32> to vector<128x256xf32>
    %24 = arith.mulf %22, %23 : vector<128x256xf32>
    %25 = vector.broadcast %3 : vector<1x256xf32> to vector<128x256xf32>
    %26 = arith.addf %24, %25 : vector<128x256xf32>
    %27 = arith.truncf %26 : vector<128x256xf32> to vector<128x256xbf16>
    %c0_10 = arith.constant 0 : index
    %c0_11 = arith.constant 0 : index
    %28 = vector.load %arg6[%c0_10, %c0_11] : memref<256x384xbf16, #tpu.memory_space<vmem>>, vector<256x384xbf16>
    %cst_12 = arith.constant dense<0.000000e+00> : vector<128x384xf32>
    %29 = tpu.matmul %27, %28, %cst_12 {dimension_numbers = #tpu.dot_dimension_numbers<[1], [0], [0], [1], [0, 0, 1, 1], [], []>} : vector<128x256xbf16>, vector<256x384xbf16>, vector<128x384xf32> -> vector<128x384xf32>
    %c0_13 = arith.constant 0 : index
    %c0_14 = arith.constant 0 : index
    %30 = vector.load %arg7[%c0_13, %c0_14] : memref<1x384xf32, #tpu.memory_space<vmem>>, vector<1x384xf32>
    %31 = vector.broadcast %30 : vector<1x384xf32> to vector<128x384xf32>
    %32 = arith.addf %29, %31 : vector<128x384xf32>
    %c0_15 = arith.constant 0 : index
    %c0_16 = arith.constant 0 : index
    %c0_17 = arith.constant 0 : index
    %33 = vector.load %arg8[%c0_15, %c0_16, %c0_17] : memref<1x128x384xf32, #tpu.memory_space<vmem>>, vector<1x128x384xf32>
    %34 = vector.shape_cast %33 : vector<1x128x384xf32> to vector<128x384xf32>
    %35 = vector.shape_cast %32 : vector<128x384xf32> to vector<1x128x384xf32>
    tpu.vector_store %arg8[%c0_15, %c0_16, %c0_17], %35 {strides = array<i32>} : memref<1x128x384xf32, #tpu.memory_space<vmem>>, vector<1x128x384xf32>,
    return
  }
  func.func @transform_0(%arg0: i32, %arg1: i32, %arg2: i32) -> (i32, i32, i32) {
    %c0_i32 = arith.constant 0 : i32
    %c0_i32_0 = arith.constant 0 : i32
    return %arg0, %arg2, %c0_i32 : i32, i32, i32
  }
  func.func @transform_1(%arg0: i32, %arg1: i32, %arg2: i32) -> (i32, i32) {
    %c0_i32 = arith.constant 0 : i32
    %c0_i32_0 = arith.constant 0 : i32
    %c0_i32_1 = arith.constant 0 : i32
    return %c0_i32, %c0_i32_0 : i32, i32
  }
  func.func @transform_2(%arg0: i32, %arg1: i32, %arg2: i32) -> (i32, i32) {
    %c0_i32 = arith.constant 0 : i32
    %c0_i32_0 = arith.constant 0 : i32
    %c0_i32_1 = arith.constant 0 : i32
    return %c0_i32, %c0_i32_0 : i32, i32
  }
  func.func @transform_3(%arg0: i32, %arg1: i32, %arg2: i32) -> (i32, i32) {
    %c0_i32 = arith.constant 0 : i32
    %c0_i32_0 = arith.constant 0 : i32
    return %c0_i32, %arg1 : i32, i32
  }
  func.func @transform_4(%arg0: i32, %arg1: i32, %arg2: i32) -> (i32, i32) {
    %c0_i32 = arith.constant 0 : i32
    %c0_i32_0 = arith.constant 0 : i32
    return %c0_i32, %arg1 : i32, i32
  }
  func.func @transform_5(%arg0: i32, %arg1: i32, %arg2: i32) -> (i32, i32, i32) {
    %c0_i32 = arith.constant 0 : i32
    return %arg0, %arg2, %arg1 : i32, i32, i32
  }
}

</mosaic_0001>

<bundles_post_ra>
// kernel: vanilla_transformer_forward.9
= control target key start
LH: loop header
LB: loop body
LE: loop exit
PB: predicated region body
PF: predicated region fallthrough
CT: control target
= control target key end

     0   :  { %s3572_s0 = inlined_call_operand.vmem [shape: bf16[2,128,256], index: 0, kind: input, shape index: {}]   ;;  %s3573_s1 = inlined_call_operand.vmem [shape: f32[1,256], index: 1, kind: input, shape index: {}]   ;;  %s3574_s2 = inlined_call_operand.vmem [shape: f32[1,256], index: 2, kind: input, shape index: {}]   ;;  %s3575_s3 = inlined_call_operand.vmem [shape: bf16[256,768], index: 3, kind: input, shape index: {}]   ;;  %s3576_s4 = inlined_call_operand.vmem [shape: f32[1,768], index: 4, kind: input, shape index: {}]   ;;  %s3577_s5 = inlined_call_operand.vmem [shape: bf16[2,128,768], index: 5, kind: output, shape index: {}]  }
   0x1   :  { %3578 = sst [smem:[#allocation5_spill]] %s3575_s3 }
   0x2   :  { %s2648_s18 = smov 0   ;;  %s2650_s19 = smov 0  }
   0x3   :  { %s2652_s20 = smov 0   ;;  %s2654_s21 = smov 0  }
   0x4   :  { %s2656_s22 = smov 0   ;;  %s2658_s23 = smov 0  }
   0x5   :  { %s2660_s24 = smov 0   ;;  %s2662_s25 = smov 0  }
   0x6   :  { %s2664_s26 = smov 0  }
   0x7 LB: > { %s2025_s27 = sadd.s32 4294967295, %s2616_s26   ;;  %s27_s28 = sadd.s32 1, %s2608_s24  ;;  %s2616_s26 = sphi %s2664_s26, %s15_s26   ;;  %s2612_s25 = sphi %s2662_s25, %s3588_s25   ;;  %s2608_s24 = sphi %s2660_s24, %s3587_s24   ;;  %s2604_s23 = sphi %s2658_s23, %s3586_s23   ;;  %s2600_s22 = sphi %s2656_s22, %s3585_s22   ;;  %s2596_s21 = sphi %s2654_s21, %s3584_s21   ;;  %s2592_s20 = sphi %s2652_s20, %s3583_s20   ;;  %s2588_s19 = sphi %s2650_s19, %s3582_s19   ;;  %s2584_s18 = sphi %s2648_s18, %s3581_s18  }
   0x8   : > { %p28_p0 = scmp.ge.s32.totalorder %s27_s28, 2  ;;  %s34_s29 = sadd.s32 1, %s2612_s25 }
   0x9   : > { %s111_s30 = sadd.s32 1, %s2596_s21  ;;  %p118_p1 = scmp.ne.s32.totalorder %s2596_s21, %s2592_s20 }
   0xa   : > { %s3590_s28 = smov (%p28_p0, %s27_s28), 0  ;;  %s3592_s29 = smov (!%p28_p0, %s34_s29), %s2612_s25 }
   0xb   : > { %s108_s6 = ssub.s32 %s2608_s24, %s3590_s28  ;;  %p119_p2 = scmp.eq.s32.totalorder %s2616_s26, 0 }
   0xc   : > { %p36_p3 = scmp.ge.s32.totalorder %s3592_s29, 2  ;;  %p109_p4 = scmp.eq.s32.totalorder %s108_s6, 0 }
   0xd   : > { %p120_p5 = por %p119_p2, %p118_p1  ;;  %s167_s7 = sadd.s32 1, %s2588_s19 }
   0xe   : > { %s3594_s29 = smov (%p36_p3, %s3592_s29), 0  ;;  %p177_p6 = scmp.ne.s32.totalorder %s2588_s19, %s2584_s18 }
   0xf   : > { %s2709_s8 = scalar_select %p109_p4, %s2596_s21, %s111_s30  }
  0x10   : > { %s160_s9 = ssub.s32 %s2612_s25, %s3594_s29  ;;  %p178_p7 = scmp.eq.s32.totalorder %s2025_s27, 3 }
  0x11   : > { %s164_s10 = sor.u32 %s160_s9, %s108_s6  ;;  %p2028_p10 = scmp.ge.s32.totalorder %s2616_s26, 4 }
  0x12   : > { %p165_p8 = scmp.eq.s32.totalorder %s164_s10, 0  ;;  %p2715_p9 = por %p178_p7, %p177_p6 }
  0x13   : > { %220 = sbr.rel (%p2028_p10) target bundleno = 70 (0x46), region = 28 }
  0x14   : > { %s2720_s12 = scalar_select %p165_p8, %s2588_s19, %s167_s7  }
  0x18   : > { %223 = sbr.rel (!%p120_p5) target bundleno = 70 (0x46), region = 32  ;;  %s225_s13 = sand.u32 (%p120_p5), 1, %s2596_s21  }
  0x19   : > { %s2245_s14 = smul.u32 (%p120_p5), 12, %s2608_s24  ;;  %s3580_s3 = sld [smem:[#allocation5_spill]] (%p120_p5) }
  0x1a   : > { %s2359_s15 = smul.u32 (%p120_p5), 384, %s225_s13 }
  0x1c   : > { %s2733_s30 = scalar_lea.vmem (%p120_p5), [#allocation3], %s2359_s15 }
  0x1f   : > { %s2728_s27 = scalar_lea.vmem %s3580_s3, %s2245_s14 }
  0x20   : > { %v245_v0 = vld [vmem:[%s2728_s27] sm:$0xff]  ;;  %v247_v1 = vld [vmem:[%s2728_s27 + $0x18] sm:$0xff]  ;;  %v249_v2 = vld [vmem:[%s2728_s27 + $0x30] sm:$0xff] }
  0x21   : > { %246 = vst [vmem:[%s2733_s30] sm:$0xff] %v245_v0  ;;  %248 = vst [vmem:[%s2733_s30 + $0xc] sm:$0xff] %v247_v1  ;;  %v251_v3 = vld [vmem:[%s2728_s27 + $0x48] sm:$0xff]  ;;  %v253_v4 = vld [vmem:[%s2728_s27 + $0x60] sm:$0xff] }
  0x22   : > { %250 = vst [vmem:[%s2733_s30 + $0x18] sm:$0xff] %v249_v2  ;;  %v255_v5 = vld [vmem:[%s2728_s27 + $0x78] sm:$0xff]  ;;  %252 = vst [vmem:[%s2733_s30 + $0x24] sm:$0xff] %v251_v3  ;;  %v257_v6 = vld [vmem:[%s2728_s27 + $0x90] sm:$0xff] }
  0x23   : > { %254 = vst [vmem:[%s2733_s30 + $0x30] sm:$0xff] %v253_v4  ;;  %256 = vst [vmem:[%s2733_s30 + $0x3c] sm:$0xff] %v255_v5  ;;  %v259_v7 = vld [vmem:[%s2728_s27 + $0xa8] sm:$0xff]  ;;  %v261_v8 = vld [vmem:[%s2728_s27 + $0xc0] sm:$0xff] }
  0x24   : > { %258 = vst [vmem:[%s2733_s30 + $0x48] sm:$0xff] %v257_v6  ;;  %260 = vst [vmem:[%s2733_s30 + $0x54] sm:$0xff] %v259_v7  ;;  %v263_v9 = vld [vmem:[%s2728_s27 + $0xd8] sm:$0xff]  ;;  %v265_v10 = vld [vmem:[%s2728_s27 + $0xf0] sm:$0xff] }
  0x25   : > { %262 = vst [vmem:[%s2733_s30 + $0x60] sm:$0xff] %v261_v8  ;;  %v267_v11 = vld [vmem:[%s2728_s27 + $0x108] sm:$0xff]  ;;  %264 = vst [vmem:[%s2733_s30 + $0x6c] sm:$0xff] %v263_v9  ;;  %v269_v12 = vld [vmem:[%s2728_s27 + $0x120] sm:$0xff] }
  0x26   : > { %266 = vst [vmem:[%s2733_s30 + $0x78] sm:$0xff] %v265_v10  ;;  %268 = vst [vmem:[%s2733_s30 + $0x84] sm:$0xff] %v267_v11  ;;  %v271_v13 = vld [vmem:[%s2728_s27 + $0x138] sm:$0xff]  ;;  %v273_v14 = vld [vmem:[%s2728_s27 + $0x150] sm:$0xff] }
  0x27   : > { %270 = vst [vmem:[%s2733_s30 + $0x90] sm:$0xff] %v269_v12  ;;  %272 = vst [vmem:[%s2733_s30 + $0x9c] sm:$0xff] %v271_v13  ;;  %v275_v15 = vld [vmem:[%s2728_s27 + $0x168] sm:$0xff]  ;;  %v277_v16 = vld [vmem:[%s2728_s27 + $0x180] sm:$0xff] }
  0x28   : > { %274 = vst [vmem:[%s2733_s30 + $0xa8] sm:$0xff] %v273_v14  ;;  %v279_v17 = vld [vmem:[%s2728_s27 + $0x198] sm:$0xff]  ;;  %276 = vst [vmem:[%s2733_s30 + $0xb4] sm:$0xff] %v275_v15  ;;  %v281_v18 = vld [vmem:[%s2728_s27 + $0x1b0] sm:$0xff] }
  0x29   : > { %278 = vst [vmem:[%s2733_s30 + $0xc0] sm:$0xff] %v277_v16  ;;  %280 = vst [vmem:[%s2733_s30 + $0xcc] sm:$0xff] %v279_v17  ;;  %v283_v19 = vld [vmem:[%s2728_s27 + $0x1c8] sm:$0xff]  ;;  %v285_v20 = vld [vmem:[%s2728_s27 + $0x1e0] sm:$0xff] }
  0x2a   : > { %282 = vst [vmem:[%s2733_s30 + $0xd8] sm:$0xff] %v281_v18  ;;  %284 = vst [vmem:[%s2733_s30 + $0xe4] sm:$0xff] %v283_v19  ;;  %v287_v21 = vld [vmem:[%s2728_s27 + $0x1f8] sm:$0xff]  ;;  %v289_v22 = vld [vmem:[%s2728_s27 + $0x210] sm:$0xff] }
  0x2b   : > { %286 = vst [vmem:[%s2733_s30 + $0xf0] sm:$0xff] %v285_v20  ;;  %v291_v23 = vld [vmem:[%s2728_s27 + $0x228] sm:$0xff]  ;;  %288 = vst [vmem:[%s2733_s30 + $0xfc] sm:$0xff] %v287_v21  ;;  %v293_v24 = vld [vmem:[%s2728_s27 + $0x240] sm:$0xff] }
  0x2c   : > { %290 = vst [vmem:[%s2733_s30 + $0x108] sm:$0xff] %v289_v22  ;;  %292 = vst [vmem:[%s2733_s30 + $0x114] sm:$0xff] %v291_v23  ;;  %v295_v25 = vld [vmem:[%s2728_s27 + $0x258] sm:$0xff]  ;;  %v297_v26 = vld [vmem:[%s2728_s27 + $0x270] sm:$0xff] }
  0x2d   : > { %294 = vst [vmem:[%s2733_s30 + $0x120] sm:$0xff] %v293_v24  ;;  %296 = vst [vmem:[%s2733_s30 + $0x12c] sm:$0xff] %v295_v25  ;;  %v299_v27 = vld [vmem:[%s2728_s27 + $0x288] sm:$0xff]  ;;  %v301_v28 = vld [vmem:[%s2728_s27 + $0x2a0] sm:$0xff] }
  0x2e   : > { %298 = vst [vmem:[%s2733_s30 + $0x138] sm:$0xff] %v297_v26  ;;  %v303_v29 = vld [vmem:[%s2728_s27 + $0x2b8] sm:$0xff]  ;;  %300 = vst [vmem:[%s2733_s30 + $0x144] sm:$0xff] %v299_v27  ;;  %v305_v30 = vld [vmem:[%s2728_s27 + $0x2d0] sm:$0xff] }
  0x2f   : > { %302 = vst [vmem:[%s2733_s30 + $0x150] sm:$0xff] %v301_v28  ;;  %304 = vst [vmem:[%s2733_s30 + $0x15c] sm:$0xff] %v303_v29  ;;  %v307_v31 = vld [vmem:[%s2728_s27 + $0x2e8] sm:$0xff]  ;;  %v2032_v33 = vld [vmem:[%s2728_s27 + $0x20] sm:$0xf] }
  0x30   : > { %v2030_v32 = vld [vmem:[%s2728_s27 + $0x8] sm:$0xf]  ;;  %306 = vst [vmem:[%s2733_s30 + $0x168] sm:$0xff] %v305_v30  ;;  %308 = vst [vmem:[%s2733_s30 + $0x174] sm:$0xff] %v307_v31  ;;  %v2034_v34 = vld [vmem:[%s2728_s27 + $0x38] sm:$0xf] }
  0x31   : > { %2031 = vst [vmem:[%s2733_s30 + $0x8] sm:$0xf] %v2030_v32  ;;  %v2036_v35 = vld [vmem:[%s2728_s27 + $0x50] sm:$0xf]  ;;  %2033 = vst [vmem:[%s2733_s30 + $0x14] sm:$0xf] %v2032_v33 }
  0x32   : > { %2035 = vst [vmem:[%s2733_s30 + $0x20] sm:$0xf] %v2034_v34  ;;  %2037 = vst [vmem:[%s2733_s30 + $0x2c] sm:$0xf] %v2036_v35  ;;  %v2038_v36 = vld [vmem:[%s2728_s27 + $0x68] sm:$0xf] }
  0x33   : > { %v2040_v37 = vld [vmem:[%s2728_s27 + $0x80] sm:$0xf]  ;;  %v2042_v38 = vld [vmem:[%s2728_s27 + $0x98] sm:$0xf]  ;;  %2039 = vst [vmem:[%s2733_s30 + $0x38] sm:$0xf] %v2038_v36 }
  0x34   : > { %2041 = vst [vmem:[%s2733_s30 + $0x44] sm:$0xf] %v2040_v37  ;;  %2043 = vst [vmem:[%s2733_s30 + $0x50] sm:$0xf] %v2042_v38  ;;  %v2044_v39 = vld [vmem:[%s2728_s27 + $0xb0] sm:$0xf] }
  0x35   : > { %v2046_v40 = vld [vmem:[%s2728_s27 + $0xc8] sm:$0xf]  ;;  %v2048_v41 = vld [vmem:[%s2728_s27 + $0xe0] sm:$0xf]  ;;  %2045 = vst [vmem:[%s2733_s30 + $0x5c] sm:$0xf] %v2044_v39 }
  0x36   : > { %2047 = vst [vmem:[%s2733_s30 + $0x68] sm:$0xf] %v2046_v40  ;;  %2049 = vst [vmem:[%s2733_s30 + $0x74] sm:$0xf] %v2048_v41  ;;  %v2050_v42 = vld [vmem:[%s2728_s27 + $0xf8] sm:$0xf] }
  0x37   : > { %v2052_v43 = vld [vmem:[%s2728_s27 + $0x110] sm:$0xf]  ;;  %v2054_v44 = vld [vmem:[%s2728_s27 + $0x128] sm:$0xf]  ;;  %2051 = vst [vmem:[%s2733_s30 + $0x80] sm:$0xf] %v2050_v42 }
  0x38   : > { %2053 = vst [vmem:[%s2733_s30 + $0x8c] sm:$0xf] %v2052_v43  ;;  %2055 = vst [vmem:[%s2733_s30 + $0x98] sm:$0xf] %v2054_v44  ;;  %v2056_v45 = vld [vmem:[%s2728_s27 + $0x140] sm:$0xf] }
  0x39   : > { %v2058_v46 = vld [vmem:[%s2728_s27 + $0x158] sm:$0xf]  ;;  %v2060_v47 = vld [vmem:[%s2728_s27 + $0x170] sm:$0xf]  ;;  %2057 = vst [vmem:[%s2733_s30 + $0xa4] sm:$0xf] %v2056_v45 }
  0x3a   : > { %2059 = vst [vmem:[%s2733_s30 + $0xb0] sm:$0xf] %v2058_v46  ;;  %2061 = vst [vmem:[%s2733_s30 + $0xbc] sm:$0xf] %v2060_v47  ;;  %v2062_v48 = vld [vmem:[%s2728_s27 + $0x188] sm:$0xf] }
  0x3b   : > { %v2064_v49 = vld [vmem:[%s2728_s27 + $0x1a0] sm:$0xf]  ;;  %v2066_v50 = vld [vmem:[%s2728_s27 + $0x1b8] sm:$0xf]  ;;  %2063 = vst [vmem:[%s2733_s30 + $0xc8] sm:$0xf] %v2062_v48 }
  0x3c   : > { %2065 = vst [vmem:[%s2733_s30 + $0xd4] sm:$0xf] %v2064_v49  ;;  %2067 = vst [vmem:[%s2733_s30 + $0xe0] sm:$0xf] %v2066_v50  ;;  %v2068_v51 = vld [vmem:[%s2728_s27 + $0x1d0] sm:$0xf] }
  0x3d   : > { %v2070_v52 = vld [vmem:[%s2728_s27 + $0x1e8] sm:$0xf]  ;;  %v2072_v53 = vld [vmem:[%s2728_s27 + $0x200] sm:$0xf]  ;;  %2069 = vst [vmem:[%s2733_s30 + $0xec] sm:$0xf] %v2068_v51 }
  0x3e   : > { %2071 = vst [vmem:[%s2733_s30 + $0xf8] sm:$0xf] %v2070_v52  ;;  %2073 = vst [vmem:[%s2733_s30 + $0x104] sm:$0xf] %v2072_v53  ;;  %v2074_v54 = vld [vmem:[%s2728_s27 + $0x218] sm:$0xf] }
  0x3f   : > { %v2076_v55 = vld [vmem:[%s2728_s27 + $0x230] sm:$0xf]  ;;  %v2078_v56 = vld [vmem:[%s2728_s27 + $0x248] sm:$0xf]  ;;  %2075 = vst [vmem:[%s2733_s30 + $0x110] sm:$0xf] %v2074_v54 }
  0x40   : > { %2077 = vst [vmem:[%s2733_s30 + $0x11c] sm:$0xf] %v2076_v55  ;;  %2079 = vst [vmem:[%s2733_s30 + $0x128] sm:$0xf] %v2078_v56  ;;  %v2080_v57 = vld [vmem:[%s2728_s27 + $0x260] sm:$0xf] }
  0x41   : > { %v2082_v58 = vld [vmem:[%s2728_s27 + $0x278] sm:$0xf]  ;;  %v2084_v59 = vld [vmem:[%s2728_s27 + $0x290] sm:$0xf]  ;;  %2081 = vst [vmem:[%s2733_s30 + $0x134] sm:$0xf] %v2080_v57 }
  0x42   : > { %2083 = vst [vmem:[%s2733_s30 + $0x140] sm:$0xf] %v2082_v58  ;;  %2085 = vst [vmem:[%s2733_s30 + $0x14c] sm:$0xf] %v2084_v59  ;;  %v2086_v60 = vld [vmem:[%s2728_s27 + $0x2a8] sm:$0xf] }
  0x43   : > { %v2088_v61 = vld [vmem:[%s2728_s27 + $0x2c0] sm:$0xf]  ;;  %v2090_v62 = vld [vmem:[%s2728_s27 + $0x2d8] sm:$0xf]  ;;  %2087 = vst [vmem:[%s2733_s30 + $0x158] sm:$0xf] %v2086_v60 }
  0x44   : > { %2089 = vst [vmem:[%s2733_s30 + $0x164] sm:$0xf] %v2088_v61  ;;  %2091 = vst [vmem:[%s2733_s30 + $0x170] sm:$0xf] %v2090_v62  ;;  %v2092_v63 = vld [vmem:[%s2728_s27 + $0x2f0] sm:$0xf] }
  0x45   : > { %2093 = vst [vmem:[%s2733_s30 + $0x17c] sm:$0xf] %v2092_v63 }
  0x46 PF: > { %p2094_p11 = scmp.ge.s32.totalorder %s2616_s26, 1  ;;  %p393_p12 = scmp.lt.s32.totalorder %s2616_s26, 5 }
  0x48   : > { %p394_p13 = pnand %p2094_p11, %p393_p12 }
  0x49   : > { %s400_s6 = sand.u32 (!%p394_p13), 1, %s2592_s20   ;;  %s437_s7 = sand.u32 (!%p394_p13), 1, %s2584_s18  }
  0x4a   : > { %397 = sbr.rel (%p394_p13) target bundleno = 776 (0x308), region = 62  ;;  %p441_p0 = scmp.lt.s32.totalorder (!%p394_p13), %s2604_s23, 1 }
  0x4b   : > { %s2360_s9 = smul.u32 (!%p394_p13), 384, %s400_s6  ;;  %p2097_p2 = scmp.ne.s32.totalorder (!%p394_p13), %s2600_s22, 0 }
  0x4c   : > { %s2361_s10 = smul.u32 (!%p394_p13), 192, %s437_s7 }
  0x4d   : > { %s2866_s13 = smul.u32 (!%p394_p13), 3, %s2600_s22  ;;  %s2882_s7 = scalar_lea.vmem (!%p394_p13), [#allocation3], %s2360_s9 }
  0x4e   : > { %s2884_s3 = scalar_lea.vmem (!%p394_p13), [#allocation4], %s2361_s10 }
  0x4f   : > { %s442_s14 = scalar_select %p441_p0, %s2604_s23, 1 }
  0x50   : > { %p453_p1 = scmp.lt.s32.totalorder %s2866_s13, 5 }
  0x51   : > { %s2246_s15 = sshll.u32 %s442_s14, 7  ;;  %463 = sbr.rel (%p2097_p2) target bundleno = 443 (0x1bb), region = 70 }
  0x52   : > { %s2873_s27 = scalar_lea.vmem %s3572_s0, %s2246_s15 }
  0x53   : > { %s2876_s30 = scalar_select %p453_p1, %s2866_s13, 5 }
  0x55   : > { %s455_s6 = scalar_lea.vmem %s3576_s4, %s2876_s30 }
  0x56   : > { %v2888_v0 = vld [vmem:[%s2873_s27] sm:$0xff]  ;;  %v2891_v1 = vld [vmem:[%s2873_s27 + $0x10] sm:$0xff]  ;;  %v2894_v2 = vld [vmem:[%s2873_s27 + $0x8] sm:$0xff] }
  0x57   : > { %v482_v3 = vunpack.c.l.bf16 %v2888_v0  ;;  %v483_v4 = vunpack.c.h.bf16 %v2888_v0  ;;  %v486_v5 = vunpack.c.l.bf16 %v2891_v1  ;;  %v487_v6 = vunpack.c.h.bf16 %v2891_v1  ;;  %v2901_v7 = vld [vmem:[%s2873_s27 + $0x18] sm:$0xff]  ;;  %v2904_v8 = vld [vmem:[%s2873_s27 + $0x20] sm:$0xff]  ;;  %v2911_v13 = vld [vmem:[%s2873_s27 + $0x28] sm:$0xff] }
  0x58   : > { %v484_v9 = vunpack.c.l.bf16 %v2894_v2  ;;  %v485_v10 = vunpack.c.h.bf16 %v2894_v2  ;;  %v488_v11 = vunpack.c.l.bf16 %v2901_v7  ;;  %v489_v12 = vunpack.c.h.bf16 %v2901_v7  ;;  %v2934_v22 = vld [vmem:[%s2873_s27 + $0x30] sm:$0xff]  ;;  %v2937_v23 = vld [vmem:[%s2873_s27 + $0x38] sm:$0xff]  ;;  %v2952_v30 = vld [vmem:[%s2873_s27 + $0x40] sm:$0xff] }
  0x59   : > { %v514_v14 = vadd.f32 %v483_v4, %v482_v3  ;;  %v520_v15 = vadd.f32 %v487_v6, %v486_v5  ;;  %v490_v16 = vunpack.c.l.bf16 %v2904_v8  ;;  %v491_v17 = vunpack.c.h.bf16 %v2904_v8  ;;  %v2955_v31 = vld [vmem:[%s2873_s27 + $0x48] sm:$0xff]  ;;  %v2970_v38 = vld [vmem:[%s2873_s27 + $0x50] sm:$0xff]  ;;  %v2973_v39 = vld [vmem:[%s2873_s27 + $0x58] sm:$0xff] }
  0x5a   : > { %v517_v18 = vadd.f32 %v485_v10, %v484_v9  ;;  %v523_v19 = vadd.f32 %v489_v12, %v488_v11  ;;  %v492_v20 = vunpack.c.l.bf16 %v2911_v13  ;;  %v493_v21 = vunpack.c.h.bf16 %v2911_v13  ;;  %v2988_v46 = vld [vmem:[%s2873_s27 + $0x60] sm:$0xff]  ;;  %v2991_v47 = vld [vmem:[%s2873_s27 + $0x68] sm:$0xff]  ;;  %v3006_v54 = vld [vmem:[%s2873_s27 + $0x70] sm:$0xff] }
  0x5b   : > { %515 = vadd.xlane.f32.xlu0 %v514_v14  ;;  %521 = vadd.xlane.f32.xlu1 %v520_v15  ;;  %v526_v24 = vadd.f32 %v491_v17, %v490_v16  ;;  %v494_v25 = vunpack.c.l.bf16 %v2934_v22  ;;  %v495_v27 = vunpack.c.h.bf16 %v2934_v22  ;;  %v496_v28 = vunpack.c.l.bf16 %v2937_v23  ;;  %v3009_v55 = vld [vmem:[%s2873_s27 + $0x78] sm:$0xff] }
  0x5c   : > { %v529_v26 = vadd.f32 %v493_v21, %v492_v20  ;;  %v497_v29 = vunpack.c.h.bf16 %v2937_v23  ;;  %v498_v32 = vunpack.c.l.bf16 %v2952_v30  ;;  %v499_v33 = vunpack.c.h.bf16 %v2952_v30 }
  0x5d   : > { %v532_v34 = vadd.f32 %v495_v27, %v494_v25  ;;  %v500_v36 = vunpack.c.l.bf16 %v2955_v31  ;;  %v501_v37 = vunpack.c.h.bf16 %v2955_v31  ;;  %v502_v41 = vunpack.c.l.bf16 %v2970_v38 }
  0x5e   : > { %v535_v35 = vadd.f32 %v497_v29, %v496_v28  ;;  %v538_v40 = vadd.f32 %v499_v33, %v498_v32  ;;  %v503_v43 = vunpack.c.h.bf16 %v2970_v38  ;;  %v504_v44 = vunpack.c.l.bf16 %v2973_v39 }
  0x5f   : > { %518 = vadd.xlane.f32.xlu0 %v517_v18  ;;  %524 = vadd.xlane.f32.xlu1 %v523_v19  ;;  %v541_v42 = vadd.f32 %v501_v37, %v500_v36  ;;  %v505_v45 = vunpack.c.h.bf16 %v2973_v39  ;;  %v506_v48 = vunpack.c.l.bf16 %v2988_v46  ;;  %v507_v49 = vunpack.c.h.bf16 %v2988_v46 }
  0x60   : > { %v544_v50 = vadd.f32 %v503_v43, %v502_v41  ;;  %v508_v52 = vunpack.c.l.bf16 %v2991_v47  ;;  %v509_v53 = vunpack.c.h.bf16 %v2991_v47  ;;  %v510_v57 = vunpack.c.l.bf16 %v3006_v54 }
  0x61   : > { %v547_v51 = vadd.f32 %v505_v45, %v504_v44  ;;  %v550_v56 = vadd.f32 %v507_v49, %v506_v48  ;;  %v511_v59 = vunpack.c.h.bf16 %v3006_v54  ;;  %v512_v60 = vunpack.c.l.bf16 %v3009_v55 }
  0x62   : > { %v553_v58 = vadd.f32 %v509_v53, %v508_v52  ;;  %v513_v61 = vunpack.c.h.bf16 %v3009_v55 }
  0x63   : > { %527 = vadd.xlane.f32.xlu0 %v526_v24  ;;  %530 = vadd.xlane.f32.xlu1 %v529_v26  ;;  %v556_v62 = vadd.f32 %v511_v59, %v510_v57 }
  0x64   : > { %v559_v63 = vadd.f32 %v513_v61, %v512_v60 }
  0x67   : > { %533 = vadd.xlane.f32.xlu0 %v532_v34  ;;  %536 = vadd.xlane.f32.xlu1 %v535_v35 }
  0x6b   : > { %539 = vadd.xlane.f32.xlu0 %v538_v40  ;;  %542 = vadd.xlane.f32.xlu1 %v541_v42 }
  0x6f   : > { %545 = vadd.xlane.f32.xlu0 %v544_v50  ;;  %548 = vadd.xlane.f32.xlu1 %v547_v51 }
  0x73   : > { %551 = vadd.xlane.f32.xlu0 %v550_v56  ;;  %554 = vadd.xlane.f32.xlu1 %v553_v58 }
  0x77   : > { %557 = vadd.xlane.f32.xlu0 %v556_v62  ;;  %560 = vadd.xlane.f32.xlu1 %v559_v63 }
  0xe4   : > { %v516_v14 = vpop.xlane.xlu0 %515  ;;  %v522_v15 = vpop.xlane.xlu1 %521 }
  0xe5   : > { %v563_v18 = vmul.f32 0.00390625, %v516_v14  ;;  %v565_v19 = vmul.f32 0.00390625, %v522_v15 }
  0xe7   : > { %v3033_v24 = vsub.f32 %v482_v3, %v563_v18  ;;  %v3037_v26 = vsub.f32 %v483_v4, %v563_v18  ;;  %v3041_v34 = vsub.f32 %v486_v5, %v565_v19  ;;  %v3045_v35 = vsub.f32 %v487_v6, %v565_v19 }
  0xe8   : > { %v519_v40 = vpop.xlane.xlu0 %518  ;;  %v525_v42 = vpop.xlane.xlu1 %524 }
  0xe9   : > { %v564_v50 = vmul.f32 0.00390625, %v519_v40  ;;  %v566_v51 = vmul.f32 0.00390625, %v525_v42  ;;  %v611_v3 = vmul.f32 %v3033_v24, %v3033_v24  ;;  %v612_v0 = vmul.f32 %v3037_v26, %v3037_v26 }
  0xea   : > { %v615_v4 = vmul.f32 %v3041_v34, %v3041_v34  ;;  %v616_v5 = vmul.f32 %v3045_v35, %v3045_v35 }
  0xeb   : > { %v3057_v1 = vsub.f32 %v484_v9, %v564_v50  ;;  %v3061_v6 = vsub.f32 %v485_v10, %v564_v50  ;;  %v3065_v56 = vsub.f32 %v488_v11, %v566_v51  ;;  %v3069_v58 = vsub.f32 %v489_v12, %v566_v51 }
  0xec   : > { %v528_v62 = vpop.xlane.xlu0 %527  ;;  %v643_v63 = vadd.f32 %v612_v0, %v611_v3  ;;  %v531_v14 = vpop.xlane.xlu1 %530  ;;  %v649_v10 = vadd.f32 %v616_v5, %v615_v4 }
  0xed   : > { %v567_v15 = vmul.f32 0.00390625, %v528_v62  ;;  %v568_v18 = vmul.f32 0.00390625, %v531_v14  ;;  %v613_v9 = vmul.f32 %v3057_v1, %v3057_v1  ;;  %v614_v2 = vmul.f32 %v3061_v6, %v3061_v6 }
  0xee   : > { %644 = vadd.xlane.f32.xlu0 %v643_v63  ;;  %v617_v11 = vmul.f32 %v3065_v56, %v3065_v56  ;;  %v618_v7 = vmul.f32 %v3069_v58, %v3069_v58 }
  0xef   : > { %v3081_v12 = vsub.f32 %v490_v16, %v567_v15  ;;  %v3085_v19 = vsub.f32 %v491_v17, %v567_v15  ;;  %v3089_v40 = vsub.f32 %v492_v20, %v568_v18  ;;  %v3093_v42 = vsub.f32 %v493_v21, %v568_v18 }
  0xf0   : > { %v534_v50 = vpop.xlane.xlu0 %533  ;;  %v646_v51 = vadd.f32 %v614_v2, %v613_v9  ;;  %v537_v3 = vpop.xlane.xlu1 %536  ;;  %v652_v17 = vadd.f32 %v618_v7, %v617_v11 }
  0xf1   : > { %v569_v0 = vmul.f32 0.00390625, %v534_v50  ;;  %v570_v4 = vmul.f32 0.00390625, %v537_v3  ;;  %v619_v16 = vmul.f32 %v3081_v12, %v3081_v12  ;;  %v620_v8 = vmul.f32 %v3085_v19, %v3085_v19 }
  0xf2   : > { %650 = vadd.xlane.f32.xlu0 %v649_v10  ;;  %647 = vadd.xlane.f32.xlu1 %v646_v51  ;;  %v621_v20 = vmul.f32 %v3089_v40, %v3089_v40  ;;  %v622_v13 = vmul.f32 %v3093_v42, %v3093_v42 }
  0xf3   : > { %v3105_v21 = vsub.f32 %v494_v25, %v569_v0  ;;  %v3109_v5 = vsub.f32 %v495_v27, %v569_v0  ;;  %v3113_v62 = vsub.f32 %v496_v28, %v570_v4  ;;  %v3117_v63 = vsub.f32 %v497_v29, %v570_v4 }
  0xf4   : > { %v540_v14 = vpop.xlane.xlu0 %539  ;;  %v655_v15 = vadd.f32 %v620_v8, %v619_v16  ;;  %v543_v18 = vpop.xlane.xlu1 %542  ;;  %v658_v27 = vadd.f32 %v622_v13, %v621_v20 }
  0xf5   : > { %v571_v9 = vmul.f32 0.00390625, %v540_v14  ;;  %v572_v2 = vmul.f32 0.00390625, %v543_v18  ;;  %v623_v25 = vmul.f32 %v3105_v21, %v3105_v21  ;;  %v624_v22 = vmul.f32 %v3109_v5, %v3109_v5 }
  0xf6   : > { %653 = vadd.xlane.f32.xlu1 %v652_v17  ;;  %656 = vadd.xlane.f32.xlu0 %v655_v15  ;;  %v625_v28 = vmul.f32 %v3113_v62, %v3113_v62  ;;  %v626_v23 = vmul.f32 %v3117_v63, %v3117_v63 }
  0xf7   : > { %v3129_v29 = vsub.f32 %v498_v32, %v571_v9  ;;  %v3133_v10 = vsub.f32 %v499_v33, %v571_v9  ;;  %v3137_v11 = vsub.f32 %v500_v36, %v572_v2  ;;  %v3141_v7 = vsub.f32 %v501_v37, %v572_v2 }
  0xf8   : > { %v546_v50 = vpop.xlane.xlu0 %545  ;;  %v661_v51 = vadd.f32 %v624_v22, %v623_v25  ;;  %v549_v3 = vpop.xlane.xlu1 %548  ;;  %v664_v33 = vadd.f32 %v626_v23, %v625_v28 }
  0xf9   : > { %v573_v0 = vmul.f32 0.00390625, %v546_v50  ;;  %v574_v4 = vmul.f32 0.00390625, %v549_v3  ;;  %v627_v32 = vmul.f32 %v3129_v29, %v3129_v29  ;;  %v628_v30 = vmul.f32 %v3133_v10, %v3133_v10 }
  0xfa   : > { %659 = vadd.xlane.f32.xlu1 %v658_v27  ;;  %662 = vadd.xlane.f32.xlu0 %v661_v51  ;;  %v629_v36 = vmul.f32 %v3137_v11, %v3137_v11  ;;  %v630_v31 = vmul.f32 %v3141_v7, %v3141_v7 }
  0xfb   : > { %v3153_v37 = vsub.f32 %v502_v41, %v573_v0  ;;  %v3157_v16 = vsub.f32 %v503_v43, %v573_v0  ;;  %v3161_v8 = vsub.f32 %v504_v44, %v574_v4  ;;  %v3165_v17 = vsub.f32 %v505_v45, %v574_v4 }
  0xfc   : > { %v552_v20 = vpop.xlane.xlu0 %551  ;;  %v667_v13 = vadd.f32 %v628_v30, %v627_v32  ;;  %v555_v14 = vpop.xlane.xlu1 %554  ;;  %v670_v43 = vadd.f32 %v630_v31, %v629_v36  ;;  %v772_v31 = vlaneseq }
  0xfd   : > { %v575_v15 = vmul.f32 0.00390625, %v552_v20  ;;  %v576_v18 = vmul.f32 0.00390625, %v555_v14  ;;  %v631_v41 = vmul.f32 %v3153_v37, %v3153_v37  ;;  %v632_v38 = vmul.f32 %v3157_v16, %v3157_v16 }
  0xfe   : > { %665 = vadd.xlane.f32.xlu1 %v664_v33  ;;  %668 = vadd.xlane.f32.xlu0 %v667_v13  ;;  %v633_v44 = vmul.f32 %v3161_v8, %v3161_v8  ;;  %v634_v39 = vmul.f32 %v3165_v17, %v3165_v17 }
  0xff   : > { %v3177_v45 = vsub.f32 %v506_v48, %v575_v15  ;;  %v3181_v9 = vsub.f32 %v507_v49, %v575_v15  ;;  %v3185_v2 = vsub.f32 %v508_v52, %v576_v18  ;;  %v3189_v25 = vsub.f32 %v509_v53, %v576_v18 }
 0x100   : > { %v558_v22 = vpop.xlane.xlu0 %557  ;;  %v673_v27 = vadd.f32 %v632_v38, %v631_v41  ;;  %v561_v28 = vpop.xlane.xlu1 %560  ;;  %v676_v49 = vadd.f32 %v634_v39, %v633_v44  ;;  %v773_v38 = vshrl.u32 %v772_v31, 7 }
 0x101   : > { %v577_v23 = vmul.f32 0.00390625, %v558_v22  ;;  %v578_v50 = vmul.f32 0.00390625, %v561_v28  ;;  %v635_v48 = vmul.f32 %v3177_v45, %v3177_v45  ;;  %v636_v46 = vmul.f32 %v3181_v9, %v3181_v9 }
 0x102   : > { %671 = vadd.xlane.f32.xlu1 %v670_v43  ;;  %674 = vadd.xlane.f32.xlu0 %v673_v27  ;;  %v637_v52 = vmul.f32 %v3185_v2, %v3185_v2  ;;  %v638_v47 = vmul.f32 %v3189_v25, %v3189_v25 }
 0x103   : > { %v3201_v53 = vsub.f32 %v510_v57, %v577_v23  ;;  %v3205_v51 = vsub.f32 %v511_v59, %v577_v23  ;;  %v3209_v3 = vsub.f32 %v512_v60, %v578_v50  ;;  %v3213_v0 = vsub.f32 %v513_v61, %v578_v50 }
 0x104   : > { %v679_v4 = vadd.f32 %v636_v46, %v635_v48  ;;  %v682_v54 = vadd.f32 %v638_v47, %v637_v52  ;;  %v774_v23 = vsub.s32 0, %v773_v38  ;;  %v480_v46 = vld [vmem:[%s3573_s1] sm:$0x3] }
 0x105   : > { %v639_v32 = vmul.f32 %v3201_v53, %v3201_v53  ;;  %v640_v57 = vmul.f32 %v3205_v51, %v3205_v51  ;;  %v641_v59 = vmul.f32 %v3209_v3, %v3209_v3  ;;  %v642_v60 = vmul.f32 %v3213_v0, %v3213_v0 }
 0x106   : > { %677 = vadd.xlane.f32.xlu1 %v676_v49  ;;  %680 = vadd.xlane.f32.xlu0 %v679_v4  ;;  %v778_v49 = vsub.s32 1, %v773_v38  ;;  %v481_v4 = vld [vmem:[%s3574_s2] sm:$0x3] }
 0x107   : > { %v685_v30 = vadd.f32 %v640_v57, %v639_v32  ;;  %v688_v55 = vadd.f32 %v642_v60, %v641_v59 }
 0x108   : > { %v3235_v31 = vrot.slane %v481_v4, %v778_v49 }
 0x10a   : > { %683 = vadd.xlane.f32.xlu1 %v682_v54  ;;  %686 = vadd.xlane.f32.xlu0 %v685_v30  ;;  %v3229_v54 = vrot.slane %v480_v46, %v774_v23  ;;  %v3231_v30 = vrot.slane %v480_v46, %v778_v49 }
 0x10e   : > { %689 = vadd.xlane.f32.xlu1 %v688_v55 }
 0x177   : > { %v645_v61 = vpop.xlane.xlu0 %644 }
 0x178   : > { %v691_v33 = vmul.f32 0.00390625, %v645_v61 }
 0x17a   : > { %v707_v36 = vadd.f32 1e-05, %v691_v33 }
 0x17b   : > { %v648_v20 = vpop.xlane.xlu1 %647  ;;  %v651_v13 = vpop.xlane.xlu0 %650 }
 0x17c   : > { %2435 = vrsqrt.f32 %v707_v36  ;;  %v692_v14 = vmul.f32 0.00390625, %v648_v20  ;;  %v693_v15 = vmul.f32 0.00390625, %v651_v13  ;;  %v3233_v36 = vrot.slane %v481_v4, %v774_v23 }
 0x17e   : > { %v708_v18 = vadd.f32 1e-05, %v692_v14  ;;  %v709_v41 = vadd.f32 1e-05, %v693_v15 }
 0x17f   : > { %v654_v43 = vpop.xlane.xlu1 %653  ;;  %v657_v44 = vpop.xlane.xlu0 %656 }
 0x180   : > { %2437 = vrsqrt.f32 %v708_v18  ;;  %v694_v39 = vmul.f32 0.00390625, %v654_v43  ;;  %v695_v22 = vmul.f32 0.00390625, %v657_v44 }
 0x181   : > { %2439 = vrsqrt.f32 %v709_v41 }
 0x182   : > { %v710_v27 = vadd.f32 1e-05, %v694_v39  ;;  %v711_v28 = vadd.f32 1e-05, %v695_v22 }
 0x183   : > { %v660_v50 = vpop.xlane.xlu1 %659  ;;  %v663_v48 = vpop.xlane.xlu0 %662 }
 0x184   : > { %2441 = vrsqrt.f32 %v710_v27  ;;  %v696_v52 = vmul.f32 0.00390625, %v660_v50  ;;  %v697_v47 = vmul.f32 0.00390625, %v663_v48 }
 0x185   : > { %2443 = vrsqrt.f32 %v711_v28 }
 0x186   : > { %v712_v32 = vadd.f32 1e-05, %v696_v52  ;;  %v713_v57 = vadd.f32 1e-05, %v697_v47 }
 0x187   : > { %v666_v59 = vpop.xlane.xlu1 %665  ;;  %v669_v60 = vpop.xlane.xlu0 %668 }
 0x188   : > { %2445 = vrsqrt.f32 %v712_v32  ;;  %v698_v55 = vmul.f32 0.00390625, %v666_v59  ;;  %v699_v61 = vmul.f32 0.00390625, %v669_v60 }
 0x189   : > { %v2436_v33 = vpop.eup %2435  ;;  %2447 = vrsqrt.f32 %v713_v57 }
 0x18a   : > { %v739_v20 = vmul.f32 %v2436_v33, %v3033_v24  ;;  %v740_v13 = vmul.f32 %v2436_v33, %v3037_v26  ;;  %v714_v14 = vadd.f32 1e-05, %v698_v55  ;;  %v715_v15 = vadd.f32 1e-05, %v699_v61 }
 0x18b   : > { %v672_v18 = vpop.xlane.xlu1 %671  ;;  %v675_v41 = vpop.xlane.xlu0 %674 }
 0x18c   : > { %v782_v38 = vmul.f32 %v3229_v54, %v739_v20  ;;  %v783_v43 = vmul.f32 %v3231_v30, %v740_v13  ;;  %2449 = vrsqrt.f32 %v714_v14  ;;  %v700_v44 = vmul.f32 0.00390625, %v672_v18 }
 0x18d   : > { %v2438_v39 = vpop.eup %2437  ;;  %2451 = vrsqrt.f32 %v715_v15  ;;  %v701_v22 = vmul.f32 0.00390625, %v675_v41 }
 0x18e   : > { %v2440_v27 = vpop.eup %2439  ;;  %v825_v28 = vadd.f32 %v3233_v36, %v782_v38  ;;  %v826_v24 = vadd.f32 %v3235_v31, %v783_v43  ;;  %v741_v26 = vmul.f32 %v2438_v39, %v3057_v1  ;;  %v742_v23 = vmul.f32 %v2438_v39, %v3061_v6 }
 0x18f   : > { %v743_v50 = vmul.f32 %v2440_v27, %v3041_v34  ;;  %v744_v48 = vmul.f32 %v2440_v27, %v3045_v35  ;;  %v716_v46 = vadd.f32 1e-05, %v700_v44  ;;  %v717_v49 = vadd.f32 1e-05, %v701_v22  ;;  %v678_v52 = vpop.xlane.xlu1 %677  ;;  %v681_v47 = vpop.xlane.xlu0 %680 }
 0x190   : > { %v2247_v4 = vpack.c.bf16 %v826_v24, %v825_v28  ;;  %v784_v32 = vmul.f32 %v3229_v54, %v741_v26  ;;  %v785_v57 = vmul.f32 %v3231_v30, %v742_v23  ;;  %v702_v59 = vmul.f32 0.00390625, %v678_v52 }
 0x191   : > { %v2442_v60 = vpop.eup %2441  ;;  %v786_v55 = vmul.f32 %v3229_v54, %v743_v50  ;;  %v787_v1 = vmul.f32 %v3231_v30, %v744_v48  ;;  %2453 = vrsqrt.f32 %v716_v46  ;;  %v703_v6 = vmul.f32 0.00390625, %v681_v47 }
 0x192   : > { %v2444_v34 = vpop.eup %2443  ;;  %953 = vst [vmem:[#allocation2 + $0x30] sm:$0xff] %v2247_v4  ;;  %v827_v35 = vadd.f32 %v3233_v36, %v784_v32  ;;  %v828_v61 = vadd.f32 %v3235_v31, %v785_v57  ;;  %v745_v33 = vmul.f32 %v2442_v60, %v3065_v56  ;;  %v746_v20 = vmul.f32 %v2442_v60, %v3069_v58 }
 0x193   : > { %v829_v13 = vadd.f32 %v3233_v36, %v786_v55  ;;  %v830_v14 = vadd.f32 %v3235_v31, %v787_v1  ;;  %v747_v15 = vmul.f32 %v2444_v34, %v3081_v12  ;;  %v748_v18 = vmul.f32 %v2444_v34, %v3085_v19  ;;  %v684_v27 = vpop.xlane.xlu1 %683 }
 0x194   : > { %v2248_v41 = vpack.c.bf16 %v828_v61, %v827_v35  ;;  %v788_v38 = vmul.f32 %v3229_v54, %v745_v33  ;;  %v789_v43 = vmul.f32 %v3231_v30, %v746_v20  ;;  %2455 = vrsqrt.f32 %v717_v49 }
 0x195   : > { %v2446_v44 = vpop.eup %2445  ;;  %v2249_v39 = vpack.c.bf16 %v830_v14, %v829_v13  ;;  %v790_v56 = vmul.f32 %v3229_v54, %v747_v15  ;;  %v791_v58 = vmul.f32 %v3231_v30, %v748_v18  ;;  %v718_v22 = vadd.f32 1e-05, %v702_v59 }
 0x196   : > { %v2448_v28 = vpop.eup %2447  ;;  %954 = vst [vmem:[#allocation2] sm:$0xff] %v2248_v41  ;;  %v831_v12 = vadd.f32 %v3233_v36, %v788_v38  ;;  %v832_v19 = vadd.f32 %v3235_v31, %v789_v43  ;;  %v749_v24 = vmul.f32 %v2446_v44, %v3089_v40  ;;  %v750_v26 = vmul.f32 %v2446_v44, %v3093_v42 }
 0x197   : > { %955 = vst [vmem:[#allocation2 + $0x58] sm:$0xff] %v2249_v39  ;;  %v833_v23 = vadd.f32 %v3233_v36, %v790_v56  ;;  %v834_v50 = vadd.f32 %v3235_v31, %v791_v58  ;;  %v751_v48 = vmul.f32 %v2448_v28, %v3105_v21  ;;  %v752_v46 = vmul.f32 %v2448_v28, %v3109_v5  ;;  %v690_v33 = vpop.xlane.xlu1 %689 }
 0x198   : > { %v2250_v49 = vpack.c.bf16 %v832_v19, %v831_v12  ;;  %v792_v52 = vmul.f32 %v3229_v54, %v749_v24  ;;  %v793_v47 = vmul.f32 %v3231_v30, %v750_v26  ;;  %2457 = vrsqrt.f32 %v718_v22 }
 0x199   : > { %v2450_v4 = vpop.eup %2449  ;;  %v2251_v32 = vpack.c.bf16 %v834_v50, %v833_v23  ;;  %v794_v40 = vmul.f32 %v3229_v54, %v751_v48  ;;  %v795_v42 = vmul.f32 %v3231_v30, %v752_v46  ;;  %v719_v57 = vadd.f32 1e-05, %v703_v6  ;;  %v687_v6 = vpop.xlane.xlu0 %686 }
 0x19a   : > { %v2452_v59 = vpop.eup %2451  ;;  %956 = vst [vmem:[#allocation2 + $0x18] sm:$0xff] %v2250_v49  ;;  %v835_v60 = vadd.f32 %v3233_v36, %v792_v52  ;;  %v836_v21 = vadd.f32 %v3235_v31, %v793_v47  ;;  %v753_v5 = vmul.f32 %v2450_v4, %v3113_v62  ;;  %v754_v55 = vmul.f32 %v2450_v4, %v3117_v63 }
 0x19b   : > { %957 = vst [vmem:[#allocation2 + $0x50] sm:$0xff] %v2251_v32  ;;  %v837_v1 = vadd.f32 %v3233_v36, %v794_v40  ;;  %v838_v34 = vadd.f32 %v3235_v31, %v795_v42  ;;  %v755_v35 = vmul.f32 %v2452_v59, %v3129_v29  ;;  %v756_v61 = vmul.f32 %v2452_v59, %v3133_v10 }
 0x19c   : > { %v2252_v20 = vpack.c.bf16 %v836_v21, %v835_v60  ;;  %v796_v13 = vmul.f32 %v3229_v54, %v753_v5  ;;  %v797_v14 = vmul.f32 %v3231_v30, %v754_v55  ;;  %2459 = vrsqrt.f32 %v719_v57 }
 0x19d   : > { %v2253_v62 = vpack.c.bf16 %v838_v34, %v837_v1  ;;  %v798_v63 = vmul.f32 %v3229_v54, %v755_v35  ;;  %v799_v15 = vmul.f32 %v3231_v30, %v756_v61  ;;  %v704_v18 = vmul.f32 0.00390625, %v684_v27 }
 0x19e   : > { %v2454_v41 = vpop.eup %2453  ;;  %958 = vst [vmem:[#allocation2 + $0x68] sm:$0xff] %v2252_v20  ;;  %v839_v29 = vadd.f32 %v3233_v36, %v796_v13  ;;  %v840_v10 = vadd.f32 %v3235_v31, %v797_v14  ;;  %v705_v38 = vmul.f32 0.00390625, %v687_v6  ;;  %v706_v43 = vmul.f32 0.00390625, %v690_v33 }
 0x19f   : > { %959 = vst [vmem:[#allocation2 + $0x8] sm:$0xff] %v2253_v62  ;;  %v841_v44 = vadd.f32 %v3233_v36, %v798_v63  ;;  %v842_v39 = vadd.f32 %v3235_v31, %v799_v15  ;;  %v757_v56 = vmul.f32 %v2454_v41, %v3137_v11  ;;  %v758_v58 = vmul.f32 %v2454_v41, %v3141_v7 }
 0x1a0   : > { %v2254_v22 = vpack.c.bf16 %v840_v10, %v839_v29  ;;  %v720_v28 = vadd.f32 1e-05, %v704_v18  ;;  %v721_v27 = vadd.f32 1e-05, %v705_v38  ;;  %v722_v12 = vadd.f32 1e-05, %v706_v43 }
 0x1a1   : > { %v2456_v19 = vpop.eup %2455  ;;  %v2255_v24 = vpack.c.bf16 %v842_v39, %v841_v44  ;;  %v800_v26 = vmul.f32 %v3229_v54, %v757_v56  ;;  %v801_v23 = vmul.f32 %v3231_v30, %v758_v58 }
 0x1a2   : > { %960 = vst [vmem:[#allocation2 + $0x48] sm:$0xff] %v2254_v22  ;;  %v759_v50 = vmul.f32 %v2456_v19, %v3153_v37  ;;  %v760_v48 = vmul.f32 %v2456_v19, %v3157_v16  ;;  %2461 = vrsqrt.f32 %v720_v28 }
 0x1a3   : > { %961 = vst [vmem:[#allocation2 + $0x40] sm:$0xff] %v2255_v24  ;;  %v843_v11 = vadd.f32 %v3233_v36, %v800_v26  ;;  %v844_v7 = vadd.f32 %v3235_v31, %v801_v23  ;;  %2463 = vrsqrt.f32 %v721_v27 }
 0x1a4   : > { %v802_v46 = vmul.f32 %v3229_v54, %v759_v50  ;;  %v803_v49 = vmul.f32 %v3231_v30, %v760_v48  ;;  %2465 = vrsqrt.f32 %v722_v12 }
 0x1a5   : > { %v2458_v52 = vpop.eup %2457  ;;  %v2256_v47 = vpack.c.bf16 %v844_v7, %v843_v11 }
 0x1a6   : > { %v845_v4 = vadd.f32 %v3233_v36, %v802_v46  ;;  %v846_v37 = vadd.f32 %v3235_v31, %v803_v49  ;;  %v761_v16 = vmul.f32 %v2458_v52, %v3161_v8  ;;  %v762_v32 = vmul.f32 %v2458_v52, %v3165_v17 }
 0x1a7   : > { %962 = vst [vmem:[#allocation2 + $0x20] sm:$0xff] %v2256_v47 }
 0x1a8   : > { %v2257_v40 = vpack.c.bf16 %v846_v37, %v845_v4  ;;  %v804_v42 = vmul.f32 %v3229_v54, %v761_v16  ;;  %v805_v57 = vmul.f32 %v3231_v30, %v762_v32 }
 0x1a9   : > { %v2460_v59 = vpop.eup %2459 }
 0x1aa   : > { %963 = vst [vmem:[#allocation2 + $0x10] sm:$0xff] %v2257_v40  ;;  %v847_v60 = vadd.f32 %v3233_v36, %v804_v42  ;;  %v848_v21 = vadd.f32 %v3235_v31, %v805_v57  ;;  %v763_v5 = vmul.f32 %v2460_v59, %v3177_v45  ;;  %v764_v55 = vmul.f32 %v2460_v59, %v3181_v9 }
 0x1ac   : > { %v2258_v1 = vpack.c.bf16 %v848_v21, %v847_v60  ;;  %v806_v8 = vmul.f32 %v3229_v54, %v763_v5  ;;  %v807_v17 = vmul.f32 %v3231_v30, %v764_v55 }
 0x1ae   : > { %964 = vst [vmem:[#allocation2 + $0x38] sm:$0xff] %v2258_v1  ;;  %v849_v34 = vadd.f32 %v3233_v36, %v806_v8  ;;  %v850_v35 = vadd.f32 %v3235_v31, %v807_v17 }
 0x1af   : > { %v2462_v61 = vpop.eup %2461 }
 0x1b0   : > { %v2464_v6 = vpop.eup %2463  ;;  %v2259_v33 = vpack.c.bf16 %v850_v35, %v849_v34  ;;  %v765_v20 = vmul.f32 %v2462_v61, %v3185_v2  ;;  %v766_v13 = vmul.f32 %v2462_v61, %v3189_v25 }
 0x1b1   : > { %v2466_v45 = vpop.eup %2465  ;;  %v767_v9 = vmul.f32 %v2464_v6, %v3201_v53  ;;  %v768_v14 = vmul.f32 %v2464_v6, %v3205_v51 }
 0x1b2   : > { %965 = vst [vmem:[#allocation2 + $0x60] sm:$0xff] %v2259_v33  ;;  %v808_v62 = vmul.f32 %v3229_v54, %v765_v20  ;;  %v809_v63 = vmul.f32 %v3231_v30, %v766_v13  ;;  %v769_v15 = vmul.f32 %v2466_v45, %v3209_v3  ;;  %v770_v18 = vmul.f32 %v2466_v45, %v3213_v0 }
 0x1b3   : > { %v810_v41 = vmul.f32 %v3229_v54, %v767_v9  ;;  %v811_v2 = vmul.f32 %v3231_v30, %v768_v14 }
 0x1b4   : > { %v851_v25 = vadd.f32 %v3233_v36, %v808_v62  ;;  %v852_v29 = vadd.f32 %v3235_v31, %v809_v63  ;;  %v812_v53 = vmul.f32 %v3229_v54, %v769_v15  ;;  %v813_v51 = vmul.f32 %v3231_v30, %v770_v18 }
 0x1b5   : > { %v853_v10 = vadd.f32 %v3233_v36, %v810_v41  ;;  %v854_v38 = vadd.f32 %v3235_v31, %v811_v2 }
 0x1b6   : > { %v2260_v43 = vpack.c.bf16 %v852_v29, %v851_v25  ;;  %v855_v3 = vadd.f32 %v3233_v36, %v812_v53  ;;  %v856_v0 = vadd.f32 %v3235_v31, %v813_v51 }
 0x1b7   : > { %v2261_v44 = vpack.c.bf16 %v854_v38, %v853_v10 }
 0x1b8   : > { %966 = vst [vmem:[#allocation2 + $0x70] sm:$0xff] %v2260_v43  ;;  %v2262_v39 = vpack.c.bf16 %v856_v0, %v855_v3 }
 0x1b9   : > { %967 = vst [vmem:[#allocation2 + $0x78] sm:$0xff] %v2261_v44 }
 0x1ba   : > { %968 = vst [vmem:[#allocation2 + $0x28] sm:$0xff] %v2262_v39 }
 0x1bb PF: > { %v2467_v54 = vld [vmem:[%s2882_s7 + $0xac] ss:$12 sps:$4 sm:$0xff]   ;;  %v2469_v30 = vld [vmem:[%s2882_s7 + $0xa8] ss:$12 sps:$4 sm:$0xff]   ;;  %v2472_v31 = vld [vmem:[%s2882_s7 + $0x90] ss:$12 sps:$4 sm:$0xff]  }
 0x1bc   : > { %1402 = vmatprep.subr.bf16.mxu0 %v2467_v54  ;;  %v2470_v36 = vld [vmem:[%s2882_s7 + $0x94] ss:$12 sps:$4 sm:$0xff]   ;;  %v2473_v56 = vld [vmem:[%s2882_s7 + $0x7c] ss:$12 sps:$4 sm:$0xff]   ;;  %v2475_v58 = vld [vmem:[%s2882_s7 + $0x78] ss:$12 sps:$4 sm:$0xff]  }
 0x1bd   : > { %1403 = vmatpush1.bf16.msra.mxu0 %v2469_v30  ;;  %v2476_v22 = vld [vmem:[%s2882_s7 + $0x64] ss:$12 sps:$4 sm:$0xff]   ;;  %v2478_v27 = vld [vmem:[%s2882_s7 + $0x60] ss:$12 sps:$4 sm:$0xff]   ;;  %v2481_v23 = vld [vmem:[%s2882_s7 + $0x48] ss:$12 sps:$4 sm:$0xff]  }
 0x1be   : > { %1404 = vmatprep.subr.bf16.mxu0 %v2470_v36  ;;  %v2487_v28 = vld [vmem:[%s2882_s7 + $0x170] ss:$12 sps:$4 sm:$0xff]   ;;  %v2479_v19 = vld [vmem:[%s2882_s7 + $0x4c] ss:$12 sps:$4 sm:$0xff]   ;;  %v2482_v50 = vld [vmem:[%s2882_s7 + $0x34] ss:$12 sps:$4 sm:$0xff]  }
 0x1bf   : > { %2295 = vmatprep.subr.bf16.mxu1 %v2487_v28  ;;  %v2489_v12 = vld [vmem:[%s2882_s7 + $0xb0] ss:$12 sps:$4 sm:$0xff]   ;;  %v2492_v24 = vld [vmem:[%s2882_s7 + $0x158] ss:$12 sps:$4 sm:$0xff]   ;;  %v2497_v48 = vld [vmem:[%s2882_s7 + $0x140] ss:$12 sps:$4 sm:$0xff]  }
 0x1c0   : > { %2296 = vmatpush3.bf16.msra.mxu1 %v2489_v12  ;;  %v2494_v26 = vld [vmem:[%s2882_s7 + $0x98] ss:$12 sps:$4 sm:$0xff]   ;;  %v2499_v11 = vld [vmem:[%s2882_s7 + $0x80] ss:$12 sps:$4 sm:$0xff]   ;;  %v2484_v7 = vld [vmem:[%s2882_s7 + $0x30] ss:$12 sps:$4 sm:$0xff]  }
 0x1c1   : > { %1405 = vmatpush1.bf16.msra.mxu0 %v2472_v31  ;;  %2297 = vmatprep.subr.bf16.mxu1 %v2492_v24  ;;  %v2502_v46 = vld [vmem:[%s2882_s7 + $0x128] ss:$12 sps:$4 sm:$0xff]   ;;  %v2488_v47 = vld [vmem:[%s2882_s7 + $0x18] ss:$12 sps:$4 sm:$0xff]   ;;  %v2507_v4 = vld [vmem:[%s2882_s7 + $0x110] ss:$12 sps:$4 sm:$0xff]  }
 0x1c2   : > { %1406 = vmatprep.subr.bf16.mxu0 %v2473_v56  ;;  %v2485_v49 = vld [vmem:[%s2882_s7 + $0x1c] ss:$12 sps:$4 sm:$0xff]   ;;  %v2490_v37 = vld [vmem:[%s2882_s7 + $0x4] ss:$12 sps:$4 sm:$0xff]   ;;  %v2493_v40 = vld [vmem:[%s2882_s7] ss:$12 sps:$4 sm:$0xff]  }
 0x1c3   : > { %v2504_v52 = vld [vmem:[%s2882_s7 + $0x68] ss:$12 sps:$4 sm:$0xff]   ;;  %v2509_v16 = vld [vmem:[%s2882_s7 + $0x50] ss:$12 sps:$4 sm:$0xff]   ;;  %v2512_v32 = vld [vmem:[%s2882_s7 + $0xf8] ss:$12 sps:$4 sm:$0xff]  }
 0x1c4   : > { %2298 = vmatpush3.bf16.msra.mxu1 %v2494_v26  ;;  %v2495_v42 = vld [vmem:[%s2882_s7 + $0x16c] ss:$12 sps:$4 sm:$0xff]   ;;  %v2498_v60 = vld [vmem:[%s2882_s7 + $0x168] ss:$12 sps:$4 sm:$0xff]   ;;  %v2503_v1 = vld [vmem:[%s2882_s7 + $0x150] ss:$12 sps:$4 sm:$0xff]  }
 0x1c5   : > { %1407 = vmatpush1.bf16.msra.mxu0 %v2475_v58  ;;  %2299 = vmatprep.subr.bf16.mxu1 %v2497_v48  ;;  %v2514_v57 = vld [vmem:[%s2882_s7 + $0x38] ss:$12 sps:$4 sm:$0xff]   ;;  %v2517_v59 = vld [vmem:[%s2882_s7 + $0xe0] ss:$12 sps:$4 sm:$0xff]   ;;  %v2522_v55 = vld [vmem:[%s2882_s7 + $0xc8] ss:$12 sps:$4 sm:$0xff]  }
 0x1c6   : > { %1408 = vmatprep.subr.bf16.mxu0 %v2476_v22  ;;  %v2500_v21 = vld [vmem:[%s2882_s7 + $0x154] ss:$12 sps:$4 sm:$0xff]   ;;  %v2505_v17 = vld [vmem:[%s2882_s7 + $0x13c] ss:$12 sps:$4 sm:$0xff]   ;;  %v2508_v35 = vld [vmem:[%s2882_s7 + $0x138] ss:$12 sps:$4 sm:$0xff]   ;;  %v1051_v22 = vlaneseq }
 0x1c7   : > { %v2519_v5 = vld [vmem:[%s2882_s7 + $0x20] ss:$12 sps:$4 sm:$0xff]   ;;  %v2527_v8 = vld [vmem:[#allocation2 + $0x34] ss:$-48 sps:$4 sm:$0xff]   ;;  %v971_v61 = vld [vmem:[#allocation2 + $0x58] sm:$0xff]  ;;  %s2362_s17 = smul.u32 (%p2715_p9), 96, %s2604_s23 }
 0x1c8   : > { %2300 = vmatpush3.bf16.msra.mxu1 %v2499_v11  ;;  %v2524_v34 = vld [vmem:[%s2882_s7 + $0x8] ss:$12 sps:$4 sm:$0xff]   ;;  %1547 = vmatprep.mubr.bf16.mxu1 %v2527_v8  ;;  %v972_v6 = vld [vmem:[#allocation2 + $0x18] sm:$0xff]  ;;  %v2510_v33 = vld [vmem:[%s2882_s7 + $0x124] ss:$12 sps:$4 sm:$0xff]   ;;  %v1052_v28 = vshrl.u32 %v1051_v22, 7 }
 0x1c9   : > { %1409 = vmatpush1.bf16.msra.mxu0 %v2478_v27  ;;  %2301 = vmatprep.subr.bf16.mxu1 %v2502_v46  ;;  %v2525_v20 = vld [vmem:[#allocation2 + $0x30] ss:$-48 sps:$4 sm:$0xff]   ;;  %v2117_v13 = vcombine.high %v971_v61, %v972_v6  ;;  %v2515_v9 = vld [vmem:[%s2882_s7 + $0x10c] ss:$12 sps:$4 sm:$0xff]   ;;  %v2518_v14 = vld [vmem:[%s2882_s7 + $0x108] ss:$12 sps:$4 sm:$0xff]   ;;  %v2116_v63 = vcombine.low %v971_v61, %v972_v6  ;;  %s1816_s11 = sadd.s32 (%p2715_p9), %s2362_s17, %s2866_s13 }
 0x1ca   : > { %1410 = vmatprep.subr.bf16.mxu0 %v2479_v19  ;;  %1434 = vmatprep.mubr.bf16.mxu0 %v2527_v8  ;;  %v2513_v45 = vld [vmem:[%s2882_s7 + $0x120] ss:$12 sps:$4 sm:$0xff]   ;;  %v2523_v18 = vld [vmem:[%s2882_s7 + $0xf0] ss:$12 sps:$4 sm:$0xff]   ;;  %v2530_v29 = vld [vmem:[%s2882_s7 + $0xd8] ss:$12 sps:$4 sm:$0xff]  }
 0x1cb   : > { %v2520_v62 = vld [vmem:[%s2882_s7 + $0xf4] ss:$12 sps:$4 sm:$0xff]   ;;  %v2528_v41 = vld [vmem:[%s2882_s7 + $0xdc] ss:$12 sps:$4 sm:$0xff]   ;;  %v2531_v53 = vld [vmem:[%s2882_s7 + $0xc4] ss:$12 sps:$4 sm:$0xff]  }
 0x1cc   : > { %2302 = vmatpush3.bf16.msra.mxu1 %v2504_v52  ;;  %v2534_v15 = vld [vmem:[#allocation2 + $0x54] ss:$24 sps:$4 sm:$0xff]   ;;  %v2536_v51 = vld [vmem:[#allocation2 + $0x50] ss:$24 sps:$4 sm:$0xff]   ;;  %v977_v43 = vld [vmem:[#allocation2 + $0x40] sm:$0xff]  ;;  %v1061_v27 = vsub.s32 2, %v1052_v28 }
 0x1cd   : > { %1411 = vmatpush1.bf16.msra.mxu0 %v2481_v23  ;;  %2303 = vmatprep.subr.bf16.mxu1 %v2507_v4  ;;  %v975_v2 = vld [vmem:[#allocation2 + $0x8] sm:$0xff]  ;;  %v978_v3 = vld [vmem:[#allocation2 + $0x20] sm:$0xff]  ;;  %v2537_v54 = vld [vmem:[#allocation2 + $0x14] ss:$40 sps:$4 sm:$0xff]   ;;  %s2210_s27 = sshll.u32 (%p2715_p9), %s1816_s11, 2 }
 0x1ce   : > { %1412 = vmatprep.subr.bf16.mxu0 %v2482_v50  ;;  %v976_v25 = vld [vmem:[#allocation2 + $0x48] sm:$0xff]  ;;  %v2123_v44 = vcombine.high %v977_v43, %v978_v3  ;;  %v2122_v39 = vcombine.low %v977_v43, %v978_v3  ;;  %v2539_v30 = vld [vmem:[#allocation2 + $0x10] ss:$40 sps:$4 sm:$0xff]   ;;  %v2540_v36 = vld [vmem:[#allocation2 + $0x64] ss:$16 sps:$4 sm:$0xff]   ;;  %s3491_s23 = scalar_lea.vmem (%p2715_p9), %s3577_s5, %s2210_s27 }
 0x1cf   : > { %v2121_v10 = vcombine.high %v975_v2, %v976_v25  ;;  %v2533_v38 = vld [vmem:[%s2882_s7 + $0xc0] ss:$12 sps:$4 sm:$0xff]   ;;  %v2120_v0 = vcombine.low %v975_v2, %v976_v25  ;;  %v2545_v58 = vld [vmem:[#allocation2 + $0x78] ss:$-80 sps:$4 sm:$0xff]  }
 0x1d0   : > { %2304 = vmatpush3.bf16.msra.mxu1 %v2509_v16  ;;  %v2542_v31 = vld [vmem:[#allocation2 + $0x60] ss:$16 sps:$4 sm:$0xff]   ;;  %v2543_v56 = vld [vmem:[#allocation2 + $0x7c] ss:$-80 sps:$4 sm:$0xff]  }
 0x1d1   : > { %1413 = vmatpush1.bf16.msra.mxu0 %v2484_v7  ;;  %2305 = vmatprep.subr.bf16.mxu1 %v2512_v32  ;;  %v1049_v12 = vld [vmem:[%s455_s6] sm:$0x7] }
 0x1d2   : > { %1414 = vmatprep.subr.bf16.mxu0 %v2485_v49  ;;  %v3386_v24 = vrot.slane %v1049_v12, %v1061_v27 }
 0x1d4   : > { %2306 = vmatpush3.bf16.msra.mxu1 %v2514_v57 }
 0x1d5   : > { %1415 = vmatpush1.bf16.msra.mxu0 %v2488_v47  ;;  %2307 = vmatprep.subr.bf16.mxu1 %v2517_v59 }
 0x1d6   : > { %1416 = vmatprep.subr.bf16.mxu0 %v2490_v37 }
 0x1d8   : > { %2308 = vmatpush3.bf16.msra.mxu1 %v2519_v5 }
 0x1d9   : > { %1417 = vmatpush1.bf16.msra.mxu0 %v2493_v40  ;;  %2309 = vmatprep.subr.bf16.mxu1 %v2522_v55 }
 0x1da   : > { %1418 = vmatprep.subr.bf16.mxu0 %v2495_v42 }
 0x1dc   : > { %2310 = vmatpush3.bf16.msra.mxu1 %v2524_v34 }
 0x1dd   : > { %1419 = vmatpush2.bf16.msra.mxu0 %v2498_v60  ;;  %v1053_v60 = vsub.s32 0, %v1052_v28 }
 0x1de   : > { %1420 = vmatprep.subr.bf16.mxu0 %v2500_v21  ;;  %v1057_v21 = vsub.s32 1, %v1052_v28 }
 0x1df   : > { %1548 = vmatmul.mubr.bf16.vlgmr.msra.gmra.mxu1 %v2525_v20  ;;  %v3395_v34 = vrot.slane %v1049_v12, %v1053_v60 }
 0x1e0   : > { %1555 = vmatprep.mubr.bf16.mxu1 %v2117_v13 }
 0x1e1   : > { %1421 = vmatpush2.bf16.msra.mxu0 %v2503_v1 }
 0x1e2   : > { %1422 = vmatprep.subr.bf16.mxu0 %v2505_v17 }
 0x1e5   : > { %1423 = vmatpush2.bf16.msra.mxu0 %v2508_v35  ;;  %v3397_v35 = vrot.slane %v1049_v12, %v1057_v21 }
 0x1e6   : > { %1424 = vmatprep.subr.bf16.mxu0 %v2510_v33 }
 0x1e7   : > { %1556 = vmatmul.mubr.bf16.gmra.mxu1 %v2116_v63 }
 0x1e8   : > { %1563 = vmatprep.mubr.bf16.mxu1 %v2534_v15 }
 0x1e9   : > { %1425 = vmatpush2.bf16.msra.mxu0 %v2513_v45 }
 0x1ea   : > { %1426 = vmatprep.subr.bf16.mxu0 %v2515_v9 }
 0x1ed   : > { %1427 = vmatpush2.bf16.msra.mxu0 %v2518_v14 }
 0x1ee   : > { %1428 = vmatprep.subr.bf16.mxu0 %v2520_v62 }
 0x1ef   : > { %1564 = vmatmul.mubr.bf16.gmra.mxu1 %v2536_v51 }
 0x1f0   : > { %1571 = vmatprep.mubr.bf16.mxu1 %v2121_v10 }
 0x1f1   : > { %1429 = vmatpush2.bf16.msra.mxu0 %v2523_v18 }
 0x1f2   : > { %1430 = vmatprep.subr.bf16.mxu0 %v2528_v41 }
 0x1f5   : > { %1431 = vmatpush2.bf16.msra.mxu0 %v2530_v29 }
 0x1f6   : > { %1432 = vmatprep.subr.bf16.mxu0 %v2531_v53 }
 0x1f7   : > { %1572 = vmatmul.mubr.bf16.gmra.mxu1 %v2120_v0 }
 0x1f8   : > { %1579 = vmatprep.mubr.bf16.mxu1 %v2123_v44 }
 0x1f9   : > { %1433 = vmatpush2.bf16.msra.mxu0 %v2533_v38 }
 0x1fc   : > { %1435 = vmatmul.mubr.bf16.vlgmr.msra.gmra.mxu0 %v2525_v20 }
 0x1fd   : > { %1444 = vmatprep.mubr.bf16.mxu0 %v2117_v13 }
 0x1ff   : > { %1580 = vmatmul.mubr.bf16.gmra.mxu1 %v2122_v39 }
 0x200   : > { %1587 = vmatprep.mubr.bf16.mxu1 %v2537_v54 }
 0x204   : > { %1445 = vmatmul.mubr.bf16.gmra.mxu0 %v2116_v63 }
 0x205   : > { %1454 = vmatprep.mubr.bf16.mxu0 %v2534_v15 }
 0x207   : > { %1588 = vmatmul.mubr.bf16.gmra.mxu1 %v2539_v30 }
 0x208   : > { %1595 = vmatprep.mubr.bf16.mxu1 %v2540_v36 }
 0x20c   : > { %1455 = vmatmul.mubr.bf16.gmra.mxu0 %v2536_v51 }
 0x20d   : > { %1464 = vmatprep.mubr.bf16.mxu0 %v2121_v10 }
 0x20f   : > { %1596 = vmatmul.mubr.bf16.gmra.mxu1 %v2542_v31 }
 0x210   : > { %1603 = vmatprep.mubr.bf16.mxu1 %v2543_v56 }
 0x214   : > { %1465 = vmatmul.mubr.bf16.gmra.mxu0 %v2120_v0 }
 0x215   : > { %1474 = vmatprep.mubr.bf16.mxu0 %v2123_v44 }
 0x217   : > { %1604 = vmatmul.mubr.bf16.gmra.mxu1 %v2545_v58 }
 0x21c   : > { %1475 = vmatmul.mubr.bf16.gmra.mxu0 %v2122_v39 }
 0x21d   : > { %1484 = vmatprep.mubr.bf16.mxu0 %v2537_v54 }
 0x224   : > { %1485 = vmatmul.mubr.bf16.gmra.mxu0 %v2539_v30 }
 0x225   : > { %1494 = vmatprep.mubr.bf16.mxu0 %v2540_v36 }
 0x22c   : > { %1495 = vmatmul.mubr.bf16.gmra.mxu0 %v2542_v31 }
 0x22d   : > { %1504 = vmatprep.mubr.bf16.mxu0 %v2543_v56 }
 0x234   : > { %1505 = vmatmul.mubr.bf16.gmra.mxu0 %v2545_v58 }
 0x29f   : > { %v2311_v19 = vpop.f32.mrf.mxu1 }
 0x2a1   : > { %v2312_v26 = vpop.f32.mrf.mxu1 }
 0x2a2   : > { %v2313_v23 = vadd.f32 %v2312_v26, %v2311_v19 }
 0x2a3   : > { %v2314_v50 = vpop.f32.mrf.mxu1 }
 0x2a4   : > { %v1550_v48 = vadd.f32 %v2313_v23, %v3386_v24 }
 0x2a5   : > { %v2315_v11 = vpop.f32.mrf.mxu1 }
 0x2a6   : > { %v2264_v7 = vpack.c.bf16 %v1550_v48, %v1550_v48  ;;  %v2316_v46 = vadd.f32 %v2315_v11, %v2314_v50 }
 0x2a7   : > { %v2317_v49 = vpop.f32.mrf.mxu1 }
 0x2a8   : > { %1773 = vst [vmem:[%s2884_s3 + $0x8] sm:$0xf] %v2264_v7  ;;  %v1553_v52 = vadd.f32 %v2316_v46, %v3386_v24 }
 0x2a9   : > { %v2318_v47 = vpop.f32.mrf.mxu1 }
 0x2aa   : > { %v2266_v4 = vpack.c.bf16 %v1553_v52, %v1553_v52  ;;  %v2319_v37 = vadd.f32 %v2318_v47, %v2317_v49 }
 0x2ab   : > { %v2320_v16 = vpop.f32.mrf.mxu1 }
 0x2ac   : > { %1775 = vst [vmem:[%s2884_s3 + $0x14] sm:$0xf] %v2266_v4  ;;  %v1558_v32 = vadd.f32 %v2319_v37, %v3386_v24 }
 0x2ad   : > { %v2321_v40 = vpop.f32.mrf.mxu1 }
 0x2ae   : > { %v2268_v42 = vpack.c.bf16 %v1558_v32, %v1558_v32  ;;  %v2322_v57 = vadd.f32 %v2321_v40, %v2320_v16 }
 0x2af   : > { %v2323_v59 = vpop.f32.mrf.mxu1 }
 0x2b0   : > { %1777 = vst [vmem:[%s2884_s3 + $0x20] sm:$0xf] %v2268_v42  ;;  %v1561_v5 = vadd.f32 %v2322_v57, %v3386_v24 }
 0x2b1   : > { %v2324_v55 = vpop.f32.mrf.mxu1 }
 0x2b2   : > { %v2270_v1 = vpack.c.bf16 %v1561_v5, %v1561_v5  ;;  %v2325_v8 = vadd.f32 %v2324_v55, %v2323_v59 }
 0x2b3   : > { %v2326_v17 = vpop.f32.mrf.mxu1 }
 0x2b4   : > { %1779 = vst [vmem:[%s2884_s3 + $0x2c] sm:$0xf] %v2270_v1  ;;  %v1566_v61 = vadd.f32 %v2325_v8, %v3386_v24 }
 0x2b5   : > { %v2327_v33 = vpop.f32.mrf.mxu1 }
 0x2b6   : > { %v2272_v20 = vpack.c.bf16 %v1566_v61, %v1566_v61  ;;  %v2328_v13 = vadd.f32 %v2327_v33, %v2326_v17 }
 0x2b7   : > { %v2329_v9 = vpop.f32.mrf.mxu1 }
 0x2b8   : > { %1781 = vst [vmem:[%s2884_s3 + $0x38] sm:$0xf] %v2272_v20  ;;  %v1569_v63 = vadd.f32 %v2328_v13, %v3386_v24 }
 0x2b9   : > { %v2330_v18 = vpop.f32.mrf.mxu1 }
 0x2ba   : > { %v2274_v2 = vpack.c.bf16 %v1569_v63, %v1569_v63  ;;  %v2331_v25 = vadd.f32 %v2330_v18, %v2329_v9 }
 0x2bb   : > { %v2332_v53 = vpop.f32.mrf.mxu1 }
 0x2bc   : > { %v1436_v6 = vpop.f32.mrf.mxu0  ;;  %1783 = vst [vmem:[%s2884_s3 + $0x44] sm:$0xf] %v2274_v2  ;;  %v1574_v38 = vadd.f32 %v2331_v25, %v3386_v24 }
 0x2bd   : > { %v1437_v14 = vadd.f32 %v1436_v6, %v3395_v34  ;;  %v2333_v3 = vpop.f32.mrf.mxu1 }
 0x2be   : > { %v1438_v45 = vpop.f32.mrf.mxu0  ;;  %v2276_v44 = vpack.c.bf16 %v1574_v38, %v1574_v38  ;;  %v2334_v39 = vadd.f32 %v2333_v3, %v2332_v53 }
 0x2bf   : > { %v1439_v62 = vadd.f32 %v1438_v45, %v3397_v35  ;;  %v2335_v30 = vpop.f32.mrf.mxu1 }
 0x2c0   : > { %v1440_v15 = vpop.f32.mrf.mxu0  ;;  %1785 = vst [vmem:[%s2884_s3 + $0x50] sm:$0xf] %v2276_v44  ;;  %v1577_v56 = vadd.f32 %v2334_v39, %v3386_v24 }
 0x2c1   : > { %v2263_v41 = vpack.c.bf16 %v1439_v62, %v1437_v14  ;;  %v1441_v51 = vadd.f32 %v1440_v15, %v3395_v34  ;;  %v2336_v22 = vpop.f32.mrf.mxu1 }
 0x2c2   : > { %v1442_v29 = vpop.f32.mrf.mxu0  ;;  %v2278_v27 = vpack.c.bf16 %v1577_v56, %v1577_v56  ;;  %v2337_v12 = vadd.f32 %v2336_v22, %v2335_v30 }
 0x2c3   : > { %1772 = vst [vmem:[%s2884_s3] sm:$0xff] %v2263_v41  ;;  %v1443_v10 = vadd.f32 %v1442_v29, %v3397_v35  ;;  %v2338_v26 = vpop.f32.mrf.mxu1 }
 0x2c4   : > { %v1446_v43 = vpop.f32.mrf.mxu0  ;;  %1787 = vst [vmem:[%s2884_s3 + $0x5c] sm:$0xf] %v2278_v27  ;;  %v1582_v48 = vadd.f32 %v2337_v12, %v3386_v24 }
 0x2c5   : > { %v2265_v0 = vpack.c.bf16 %v1443_v10, %v1441_v51  ;;  %v1447_v36 = vadd.f32 %v1446_v43, %v3395_v34  ;;  %v2339_v7 = vpop.f32.mrf.mxu1 }
 0x2c6   : > { %v1448_v54 = vpop.f32.mrf.mxu0  ;;  %v2280_v49 = vpack.c.bf16 %v1582_v48, %v1582_v48  ;;  %v2340_v52 = vadd.f32 %v2339_v7, %v2338_v26 }
 0x2c7   : > { %1774 = vst [vmem:[%s2884_s3 + $0xc] sm:$0xff] %v2265_v0  ;;  %v1449_v31 = vadd.f32 %v1448_v54, %v3397_v35  ;;  %v2341_v4 = vpop.f32.mrf.mxu1 }
 0x2c8   : > { %v1450_v58 = vpop.f32.mrf.mxu0  ;;  %1789 = vst [vmem:[%s2884_s3 + $0x68] sm:$0xf] %v2280_v49  ;;  %v1585_v32 = vadd.f32 %v2340_v52, %v3386_v24 }
 0x2c9   : > { %v2267_v28 = vpack.c.bf16 %v1449_v31, %v1447_v36  ;;  %v1451_v23 = vadd.f32 %v1450_v58, %v3395_v34  ;;  %v2342_v42 = vpop.f32.mrf.mxu1 }
 0x2ca   : > { %v1452_v19 = vpop.f32.mrf.mxu0  ;;  %v2282_v59 = vpack.c.bf16 %v1585_v32, %v1585_v32  ;;  %v2343_v60 = vadd.f32 %v2342_v42, %v2341_v4 }
 0x2cb   : > { %1776 = vst [vmem:[%s2884_s3 + $0x18] sm:$0xff] %v2267_v28  ;;  %v1453_v50 = vadd.f32 %v1452_v19, %v3397_v35  ;;  %v2344_v5 = vpop.f32.mrf.mxu1 }
 0x2cc   : > { %v1456_v11 = vpop.f32.mrf.mxu0  ;;  %1791 = vst [vmem:[%s2884_s3 + $0x74] sm:$0xf] %v2282_v59  ;;  %v1590_v8 = vadd.f32 %v2343_v60, %v3386_v24 }
 0x2cd   : > { %v2269_v46 = vpack.c.bf16 %v1453_v50, %v1451_v23  ;;  %v1457_v37 = vadd.f32 %v1456_v11, %v3395_v34  ;;  %v2345_v61 = vpop.f32.mrf.mxu1 }
 0x2ce   : > { %v1458_v47 = vpop.f32.mrf.mxu0  ;;  %v2284_v33 = vpack.c.bf16 %v1590_v8, %v1590_v8  ;;  %v2346_v20 = vadd.f32 %v2345_v61, %v2344_v5 }
 0x2cf   : > { %1778 = vst [vmem:[%s2884_s3 + $0x24] sm:$0xff] %v2269_v46  ;;  %v1459_v16 = vadd.f32 %v1458_v47, %v3397_v35  ;;  %v2347_v45 = vpop.f32.mrf.mxu1 }
 0x2d0   : > { %v1460_v40 = vpop.f32.mrf.mxu0  ;;  %1793 = vst [vmem:[%s2884_s3 + $0x80] sm:$0xf] %v2284_v33  ;;  %v1593_v62 = vadd.f32 %v2346_v20, %v3386_v24 }
 0x2d1   : > { %v2271_v57 = vpack.c.bf16 %v1459_v16, %v1457_v37  ;;  %v1461_v55 = vadd.f32 %v1460_v40, %v3395_v34  ;;  %v2348_v15 = vpop.f32.mrf.mxu1 }
 0x2d2   : > { %v1462_v21 = vpop.f32.mrf.mxu0  ;;  %v2286_v41 = vpack.c.bf16 %v1593_v62, %v1593_v62  ;;  %v2349_v2 = vadd.f32 %v2348_v15, %v2347_v45 }
 0x2d3   : > { %1780 = vst [vmem:[%s2884_s3 + $0x30] sm:$0xff] %v2271_v57  ;;  %v1463_v1 = vadd.f32 %v1462_v21, %v3397_v35  ;;  %v2350_v29 = vpop.f32.mrf.mxu1 }
 0x2d4   : > { %v1466_v17 = vpop.f32.mrf.mxu0  ;;  %1795 = vst [vmem:[%s2884_s3 + $0x8c] sm:$0xf] %v2286_v41  ;;  %v1598_v10 = vadd.f32 %v2349_v2, %v3386_v24  ;;  %v1837_v2 = vld [vmem:[%s2884_s3 + $0x18] sm:$0xff] (%p2715_p9) }
 0x2d5   : > { %v2273_v6 = vpack.c.bf16 %v1463_v1, %v1461_v55  ;;  %v1467_v9 = vadd.f32 %v1466_v17, %v3395_v34  ;;  %v2351_v43 = vpop.f32.mrf.mxu1  ;;  %1838 = vst [vmem:[%s3491_s23 + $0x30] sm:$0xff] (%p2715_p9), %v1837_v2 }
 0x2d6   : > { %v1468_v13 = vpop.f32.mrf.mxu0  ;;  %v2288_v0 = vpack.c.bf16 %v1598_v10, %v1598_v10  ;;  %v2352_v44 = vadd.f32 %v2351_v43, %v2350_v29 }
 0x2d7   : > { %1782 = vst [vmem:[%s2884_s3 + $0x3c] sm:$0xff] %v2273_v6  ;;  %v1469_v14 = vadd.f32 %v1468_v13, %v3397_v35  ;;  %v2353_v54 = vpop.f32.mrf.mxu1 }
 0x2d8   : > { %v1470_v63 = vpop.f32.mrf.mxu0  ;;  %1797 = vst [vmem:[%s2884_s3 + $0x98] sm:$0xf] %v2288_v0  ;;  %v1601_v31 = vadd.f32 %v2352_v44, %v3386_v24 }
 0x2d9   : > { %v2275_v18 = vpack.c.bf16 %v1469_v14, %v1467_v9  ;;  %v1471_v53 = vadd.f32 %v1470_v63, %v3395_v34  ;;  %v2354_v58 = vpop.f32.mrf.mxu1 }
 0x2da   : > { %v1472_v25 = vpop.f32.mrf.mxu0  ;;  %v2290_v28 = vpack.c.bf16 %v1601_v31, %v1601_v31  ;;  %v2355_v27 = vadd.f32 %v2354_v58, %v2353_v54  ;;  %v1841_v29 = vld [vmem:[%s2884_s3 + $0x30] sm:$0xff] (%p2715_p9)  ;;  %v2217_v58 = vld [vmem:[%s2884_s3 + $0x2c] sm:$0xf] (%p2715_p9) }
 0x2db   : > { %1784 = vst [vmem:[%s2884_s3 + $0x48] sm:$0xff] %v2275_v18  ;;  %v1473_v51 = vadd.f32 %v1472_v25, %v3397_v35  ;;  %v2356_v19 = vpop.f32.mrf.mxu1  ;;  %v1839_v25 = vld [vmem:[%s2884_s3 + $0x24] sm:$0xff] (%p2715_p9)  ;;  %1842 = vst [vmem:[%s3491_s23 + $0x60] sm:$0xff] (%p2715_p9), %v1841_v29  ;;  %v2213_v31 = vld [vmem:[%s2884_s3 + $0x14] sm:$0xf] (%p2715_p9) }
 0x2dc   : > { %v1476_v38 = vpop.f32.mrf.mxu0  ;;  %1799 = vst [vmem:[%s2884_s3 + $0xa4] sm:$0xf] %v2290_v28  ;;  %v1606_v50 = vadd.f32 %v2355_v27, %v3386_v24  ;;  %1840 = vst [vmem:[%s3491_s23 + $0x48] sm:$0xff] (%p2715_p9), %v1839_v25  ;;  %v2221_v28 = vld [vmem:[%s2884_s3 + $0x44] sm:$0xf] (%p2715_p9) }
 0x2dd   : > { %v2277_v3 = vpack.c.bf16 %v1473_v51, %v1471_v53  ;;  %v1477_v30 = vadd.f32 %v1476_v38, %v3395_v34  ;;  %v2357_v11 = vpop.f32.mrf.mxu1  ;;  %2214 = vst [vmem:[%s3491_s23 + $0x20] sm:$0xf] (%p2715_p9), %v2213_v31  ;;  %2218 = vst [vmem:[%s3491_s23 + $0x50] sm:$0xf] (%p2715_p9), %v2217_v58  ;;  %v2223_v27 = vld [vmem:[%s2884_s3 + $0x50] sm:$0xf] (%p2715_p9) }
 0x2de   : > { %v1478_v39 = vpop.f32.mrf.mxu0  ;;  %v2292_v46 = vpack.c.bf16 %v1606_v50, %v1606_v50  ;;  %v2358_v49 = vadd.f32 %v2357_v11, %v2356_v19  ;;  %v1843_v53 = vld [vmem:[%s2884_s3 + $0x3c] sm:$0xff] (%p2715_p9)  ;;  %2222 = vst [vmem:[%s3491_s23 + $0x80] sm:$0xf] (%p2715_p9), %v2221_v28  ;;  %2224 = vst [vmem:[%s3491_s23 + $0x98] sm:$0xf] (%p2715_p9), %v2223_v27 }
 0x2df   : > { %1786 = vst [vmem:[%s2884_s3 + $0x54] sm:$0xff] %v2277_v3  ;;  %v1479_v36 = vadd.f32 %v1478_v39, %v3397_v35  ;;  %1844 = vst [vmem:[%s3491_s23 + $0x78] sm:$0xff] (%p2715_p9), %v1843_v53  ;;  %v2227_v19 = vld [vmem:[%s2884_s3 + $0x68] sm:$0xf] (%p2715_p9)  ;;  %v2233_v50 = vld [vmem:[%s2884_s3 + $0x8c] sm:$0xf] (%p2715_p9) }
 0x2e0   : > { %v1480_v56 = vpop.f32.mrf.mxu0  ;;  %1801 = vst [vmem:[%s2884_s3 + $0xb0] sm:$0xf] %v2292_v46  ;;  %v1609_v37 = vadd.f32 %v2358_v49, %v3386_v24  ;;  %2228 = vst [vmem:[%s3491_s23 + $0xc8] sm:$0xf] (%p2715_p9), %v2227_v19 }
 0x2e1   : > { %v2279_v22 = vpack.c.bf16 %v1479_v36, %v1477_v30  ;;  %v1481_v26 = vadd.f32 %v1480_v56, %v3395_v34  ;;  %v2211_v36 = vld [vmem:[%s2884_s3 + $0x8] sm:$0xf] (%p2715_p9)  ;;  %v2215_v56 = vld [vmem:[%s2884_s3 + $0x20] sm:$0xf] (%p2715_p9)  ;;  %2234 = vst [vmem:[%s3491_s23 + $0x110] sm:$0xf] (%p2715_p9), %v2233_v50 }
 0x2e2   : > { %v1482_v12 = vpop.f32.mrf.mxu0  ;;  %v2294_v40 = vpack.c.bf16 %v1609_v37, %v1609_v37  ;;  %v1845_v51 = vld [vmem:[%s2884_s3 + $0x48] sm:$0xff] (%p2715_p9)  ;;  %2212 = vst [vmem:[%s3491_s23 + $0x8] sm:$0xf] (%p2715_p9), %v2211_v36  ;;  %2216 = vst [vmem:[%s3491_s23 + $0x38] sm:$0xf] (%p2715_p9), %v2215_v56 }
 0x2e3   : > { %1788 = vst [vmem:[%s2884_s3 + $0x60] sm:$0xff] %v2279_v22  ;;  %v1483_v23 = vadd.f32 %v1482_v12, %v3397_v35  ;;  %1846 = vst [vmem:[%s3491_s23 + $0x90] sm:$0xff] (%p2715_p9), %v1845_v51  ;;  %v2219_v22 = vld [vmem:[%s2884_s3 + $0x38] sm:$0xf] (%p2715_p9)  ;;  %v2225_v12 = vld [vmem:[%s2884_s3 + $0x5c] sm:$0xf] (%p2715_p9) }
 0x2e4   : > { %v1486_v48 = vpop.f32.mrf.mxu0  ;;  %1803 = vst [vmem:[%s2884_s3 + $0xbc] sm:$0xf] %v2294_v40  ;;  %2220 = vst [vmem:[%s3491_s23 + $0x68] sm:$0xf] (%p2715_p9), %v2219_v22  ;;  %v2237_v11 = vld [vmem:[%s2884_s3 + $0xa4] sm:$0xf] (%p2715_p9) }
 0x2e5   : > { %v2281_v7 = vpack.c.bf16 %v1483_v23, %v1481_v26  ;;  %v1487_v47 = vadd.f32 %v1486_v48, %v3395_v34  ;;  %2226 = vst [vmem:[%s3491_s23 + $0xb0] sm:$0xf] (%p2715_p9), %v2225_v12  ;;  %v2229_v26 = vld [vmem:[%s2884_s3 + $0x74] sm:$0xf] (%p2715_p9)  ;;  %v2231_v23 = vld [vmem:[%s2884_s3 + $0x80] sm:$0xf] (%p2715_p9) }
 0x2e6   : > { %v1488_v52 = vpop.f32.mrf.mxu0  ;;  %v1847_v10 = vld [vmem:[%s2884_s3 + $0x54] sm:$0xff] (%p2715_p9)  ;;  %2230 = vst [vmem:[%s3491_s23 + $0xe0] sm:$0xf] (%p2715_p9), %v2229_v26  ;;  %2232 = vst [vmem:[%s3491_s23 + $0xf8] sm:$0xf] (%p2715_p9), %v2231_v23 }
 0x2e7   : > { %1790 = vst [vmem:[%s2884_s3 + $0x6c] sm:$0xff] %v2281_v7  ;;  %v1489_v4 = vadd.f32 %v1488_v52, %v3397_v35  ;;  %1848 = vst [vmem:[%s3491_s23 + $0xa8] sm:$0xff] (%p2715_p9), %v1847_v10  ;;  %v2235_v48 = vld [vmem:[%s2884_s3 + $0x98] sm:$0xf] (%p2715_p9)  ;;  %v2239_v7 = vld [vmem:[%s2884_s3 + $0xb0] sm:$0xf] (%p2715_p9) }
 0x2e8   : > { %v1490_v16 = vpop.f32.mrf.mxu0  ;;  %2236 = vst [vmem:[%s3491_s23 + $0x128] sm:$0xf] (%p2715_p9), %v2235_v48  ;;  %2238 = vst [vmem:[%s3491_s23 + $0x140] sm:$0xf] (%p2715_p9), %v2237_v11 }
 0x2e9   : > { %v2283_v32 = vpack.c.bf16 %v1489_v4, %v1487_v47  ;;  %v1491_v57 = vadd.f32 %v1490_v16, %v3395_v34  ;;  %2240 = vst [vmem:[%s3491_s23 + $0x158] sm:$0xf] (%p2715_p9), %v2239_v7 }
 0x2ea   : > { %v1492_v42 = vpop.f32.mrf.mxu0  ;;  %v1849_v38 = vld [vmem:[%s2884_s3 + $0x60] sm:$0xff] (%p2715_p9) }
 0x2eb   : > { %1792 = vst [vmem:[%s2884_s3 + $0x78] sm:$0xff] %v2283_v32  ;;  %v1493_v59 = vadd.f32 %v1492_v42, %v3397_v35  ;;  %1850 = vst [vmem:[%s3491_s23 + $0xc0] sm:$0xff] (%p2715_p9), %v1849_v38  ;;  %v2241_v46 = vld [vmem:[%s2884_s3 + $0xbc] sm:$0xf] (%p2715_p9) }
 0x2ec   : > { %v1496_v60 = vpop.f32.mrf.mxu0  ;;  %2242 = vst [vmem:[%s3491_s23 + $0x170] sm:$0xf] (%p2715_p9), %v2241_v46 }
 0x2ed   : > { %v2285_v21 = vpack.c.bf16 %v1493_v59, %v1491_v57  ;;  %v1497_v55 = vadd.f32 %v1496_v60, %v3395_v34 }
 0x2ee   : > { %v1498_v5 = vpop.f32.mrf.mxu0  ;;  %v1851_v43 = vld [vmem:[%s2884_s3 + $0x6c] sm:$0xff] (%p2715_p9) }
 0x2ef   : > { %1794 = vst [vmem:[%s2884_s3 + $0x84] sm:$0xff] %v2285_v21  ;;  %v1499_v24 = vadd.f32 %v1498_v5, %v3397_v35  ;;  %1852 = vst [vmem:[%s3491_s23 + $0xd8] sm:$0xff] (%p2715_p9), %v1851_v43 }
 0x2f0   : > { %v1500_v1 = vpop.f32.mrf.mxu0 }
 0x2f1   : > { %v2287_v8 = vpack.c.bf16 %v1499_v24, %v1497_v55  ;;  %v1501_v61 = vadd.f32 %v1500_v1, %v3395_v34 }
 0x2f2   : > { %v1502_v17 = vpop.f32.mrf.mxu0  ;;  %v1853_v3 = vld [vmem:[%s2884_s3 + $0x78] sm:$0xff] (%p2715_p9) }
 0x2f3   : > { %1796 = vst [vmem:[%s2884_s3 + $0x90] sm:$0xff] %v2287_v8  ;;  %v1503_v6 = vadd.f32 %v1502_v17, %v3397_v35  ;;  %1854 = vst [vmem:[%s3491_s23 + $0xf0] sm:$0xff] (%p2715_p9), %v1853_v3 }
 0x2f4   : > { %v1506_v33 = vpop.f32.mrf.mxu0 }
 0x2f5   : > { %v2289_v20 = vpack.c.bf16 %v1503_v6, %v1501_v61  ;;  %v1507_v45 = vadd.f32 %v1506_v33, %v3395_v34 }
 0x2f6   : > { %v1508_v13 = vpop.f32.mrf.mxu0  ;;  %v1855_v0 = vld [vmem:[%s2884_s3 + $0x84] sm:$0xff] (%p2715_p9) }
 0x2f7   : > { %1798 = vst [vmem:[%s2884_s3 + $0x9c] sm:$0xff] %v2289_v20  ;;  %v1509_v9 = vadd.f32 %v1508_v13, %v3397_v35  ;;  %1856 = vst [vmem:[%s3491_s23 + $0x108] sm:$0xff] (%p2715_p9), %v1855_v0 }
 0x2f8   : > { %v1510_v14 = vpop.f32.mrf.mxu0 }
 0x2f9   : > { %v2291_v62 = vpack.c.bf16 %v1509_v9, %v1507_v45  ;;  %v1511_v15 = vadd.f32 %v1510_v14, %v3395_v34  ;;  %v1833_v34 = vld [vmem:[%s2884_s3] sm:$0xff] (%p2715_p9) }
 0x2fa   : > { %v1512_v63 = vpop.f32.mrf.mxu0  ;;  %v1857_v44 = vld [vmem:[%s2884_s3 + $0x90] sm:$0xff] (%p2715_p9)  ;;  %1834 = vst [vmem:[%s3491_s23] sm:$0xff] (%p2715_p9), %v1833_v34 }
 0x2fb   : > { %1800 = vst [vmem:[%s2884_s3 + $0xa8] sm:$0xff] %v2291_v62  ;;  %v1513_v18 = vadd.f32 %v1512_v63, %v3397_v35  ;;  %1810 = sbr.rel (!%p2715_p9) target bundleno = 776 (0x308), region = 74  ;;  %v1835_v35 = vld [vmem:[%s2884_s3 + $0xc] sm:$0xff] (%p2715_p9)  ;;  %1858 = vst [vmem:[%s3491_s23 + $0x120] sm:$0xff] (%p2715_p9), %v1857_v44 }
 0x2fc   : > { %1836 = vst [vmem:[%s3491_s23 + $0x18] sm:$0xff] (%p2715_p9), %v1835_v35 }
 0x2fd   : > { %v2293_v41 = vpack.c.bf16 %v1513_v18, %v1511_v15 }
 0x2fe   : > { %v1859_v39 = vld [vmem:[%s2884_s3 + $0x9c] sm:$0xff] (%p2715_p9) }
 0x2ff   : > { %1802 = vst [vmem:[%s2884_s3 + $0xb4] sm:$0xff] %v2293_v41  ;;  %1860 = vst [vmem:[%s3491_s23 + $0x138] sm:$0xff] (%p2715_p9), %v1859_v39 }
 0x302   : > { %v1861_v54 = vld [vmem:[%s2884_s3 + $0xa8] sm:$0xff] }
 0x303   : > { %1862 = vst [vmem:[%s3491_s23 + $0x150] sm:$0xff] %v1861_v54 }
 0x306   : > { %v1863_v30 = vld [vmem:[%s2884_s3 + $0xb4] sm:$0xff] }
 0x307   : > { %1864 = vst [vmem:[%s3491_s23 + $0x168] sm:$0xff] %v1863_v30 }
 0x308 PF: > { %s15_s26 = sadd.s32 1, %s2616_s26   ;;  %s3581_s18 = smov %s2588_s19 }
 0x309   : > { %p12_p3 = scmp.ge.s32.totalorder %s15_s26, 6   ;;  %s3582_s19 = smov %s2720_s12 }
 0x30a   : > { %s3583_s20 = smov %s2596_s21  ;;  %s3584_s21 = smov %s2709_s8 }
 0x30b   : > { %s3585_s22 = smov %s2608_s24  ;;  %s3586_s23 = smov %s2612_s25 }
 0x30c   : > { %s3587_s24 = smov %s3590_s28  ;;  %s3588_s25 = smov %s3594_s29 }
 0x30d   :  { %14 = sbr.rel (!%p12_p3) target bundleno = 7 (0x7), region = 149 }

// kernel: vanilla_transformer_forward.10
= control target key start
LH: loop header
LB: loop body
LE: loop exit
PB: predicated region body
PF: predicated region fallthrough
CT: control target
= control target key end

     0   :  { %s3160_s0 = inlined_call_operand.vmem [shape: bf16[2,128,768], index: 0, kind: input, shape index: {}, may-alias: {0,1,2}]   ;;  %s3161_s1 = inlined_call_operand.vmem [shape: bf16[2,128,768], index: 1, kind: input, shape index: {}, may-alias: {0,1,2}]   ;;  %s3162_s2 = inlined_call_operand.vmem [shape: bf16[2,128,768], index: 2, kind: input, shape index: {}, may-alias: {0,1,2}]   ;;  %s3163_s3 = inlined_call_operand.vmem [shape: bf16[2,2,128,128], index: 3, kind: output, shape index: {}]  }
   0x1   :  { %3165 = sst [smem:[#allocation9_spill]] %s3163_s3 }
   0x2   :  { %s2514_s12 = smov 0   ;;  %s2516_s13 = smov 0  }
   0x3   :  { %s2518_s14 = smov 0   ;;  %s2520_s15 = smov 0  }
   0x4   :  { %s2522_s16 = smov 0   ;;  %s2524_s17 = smov 0  }
   0x5   :  { %s2526_s18 = smov 0   ;;  %s2528_s19 = smov 0  }
   0x6   :  { %s2530_s20 = smov 0   ;;  %s2532_s21 = smov 0  }
   0x7   :  { %s2534_s22 = smov 0  }
   0x8 LB: > { %3166 = sst [smem:[#allocation8_spill]] %s2473_s18  ;;  %s35_s23 = sadd.s32 1, %s2481_s20  ;;  %s2489_s22 = sphi %s2534_s22, %s13_s22   ;;  %s2485_s21 = sphi %s2532_s21, %s3195_s21   ;;  %s2481_s20 = sphi %s2530_s20, %s3194_s20   ;;  %s2477_s19 = sphi %s2528_s19, %s3193_s19   ;;  %s2473_s18 = sphi %s2526_s18, %s3192_s18   ;;  %s2469_s17 = sphi %s2524_s17, %s3191_s17   ;;  %s2465_s16 = sphi %s2522_s16, %s3190_s16   ;;  %s2461_s15 = sphi %s2520_s15, %s3189_s15   ;;  %s2457_s14 = sphi %s2518_s14, %s3188_s14   ;;  %s2453_s13 = sphi %s2516_s13, %s3187_s13   ;;  %s2449_s12 = sphi %s2514_s12, %s3186_s12  }
   0x9   : > { %s39_s24 = sadd.s32 1, %s2485_s21  ;;  %p37_p0 = scmp.ge.s32.totalorder %s35_s23, 2 }
   0xa   : > { %s50_s25 = sadd.s32 1, %s2469_s17  ;;  %p57_p1 = scmp.ne.s32.totalorder %s2469_s17, %s2465_s16 }
   0xb   : > { %p58_p2 = scmp.eq.s32.totalorder %s2489_s22, 0  ;;  %s3197_s23 = smov (%p37_p0, %s35_s23), 0 }
   0xc   : > { %s3199_s24 = smov (!%p37_p0, %s39_s24), %s2485_s21  ;;  %s46_s26 = ssub.s32 %s2481_s20, %s3197_s23 }
   0xd   : > { %p2582_p3 = por %p58_p2, %p57_p1  ;;  %p41_p4 = scmp.ge.s32.totalorder %s3199_s24, 2 }
   0xe   : > { %s73_s28 = sadd.s32 2, %s2481_s20  ;;  %s74_s29 = sadd.s32 2, %s3197_s23 }
   0xf   : > { %s82_s30 = sadd.s32 1, %s2461_s15  ;;  %s3201_s24 = smov (%p41_p4, %s3199_s24), 0 }
  0x10   : > { %s78_s4 = ssub.s32 %s73_s28, %s74_s29  ;;  %p89_p5 = scmp.ne.s32.totalorder %s2461_s15, %s2457_s14 }
  0x11   : > { %s43_s5 = ssub.s32 %s2485_s21, %s3201_s24  ;;  %s105_s6 = sadd.s32 4, %s2481_s20 }
  0x12   : > { %s47_s7 = sor.u32 %s46_s26, %s43_s5  ;;  %s79_s8 = sor.u32 %s78_s4, %s43_s5 }
  0x13   : > { %p48_p6 = scmp.eq.s32.totalorder %s47_s7, 0  ;;  %p80_p7 = scmp.eq.s32.totalorder %s79_s8, 0 }
  0x14   : > { %p2598_p8 = por %p89_p5, %p58_p2  ;;  %s106_s10 = sadd.s32 4, %s3197_s23 }
  0x15   : > { %s2604_s11 = scalar_select %p48_p6, %s2469_s17, %s50_s25  }
  0x16   : > { %s2607_s3 = scalar_select %p80_p7, %s2461_s15, %s82_s30  }
  0x17   : > { %s110_s28 = ssub.s32 %s105_s6, %s106_s10  ;;  %s114_s29 = sadd.s32 1, %s2453_s13 }
  0x18   : > { %s111_s18 = sor.u32 %s110_s28, %s43_s5  ;;  %p121_p9 = scmp.ne.s32.totalorder %s2453_s13, %s2449_s12 }
  0x19   : > { %p112_p10 = scmp.eq.s32.totalorder %s111_s18, 0  ;;  %p1942_p12 = scmp.ge.s32.totalorder %s2489_s22, 4 }
  0x1a   : > { %p2614_p11 = por %p121_p9, %p58_p2 }
  0x1b   : > { %s2619_s4 = scalar_select %p112_p10, %s2453_s13, %s114_s29  }
  0x1c   : > { %177 = sbr.rel (%p1942_p12) target bundleno = 84 (0x54), region = 16 }
  0x21   : > { %180 = sbr.rel (!%p2582_p3) target bundleno = 50 (0x32), region = 20  ;;  %s182_s25 = sand.u32 (%p2582_p3), 1, %s2469_s17  }
  0x22   : > { %s2189_s30 = smul.u32 (%p2582_p3), 96, %s2485_s21  ;;  %s1943_s5 = sshll.u32 (%p2582_p3), %s182_s25, 6 }
  0x23   : > { %s184_s27 = scalar_lea.vmem (%p2582_p3), [#allocation5], %s1943_s5 }
  0x24   : > { %s189_s18 = sadd.s32 (%p2582_p3), %s2481_s20, %s2189_s30 }
  0x25   : > { %s1944_s6 = sshll.u32 (%p2582_p3), %s189_s18, 2 }
  0x26   : > { %s2630_s10 = scalar_lea.vmem %s3160_s0, %s1944_s6 }
  0x27   : > { %v208_v0 = vld [vmem:[%s2630_s10] sm:$0xf]  ;;  %v210_v1 = vld [vmem:[%s2630_s10 + $0x18] sm:$0xf]  ;;  %v212_v2 = vld [vmem:[%s2630_s10 + $0x30] sm:$0xf] }
  0x28   : > { %209 = vst [vmem:[%s184_s27] sm:$0xf] %v208_v0  ;;  %211 = vst [vmem:[%s184_s27 + $0x4] sm:$0xf] %v210_v1  ;;  %v214_v3 = vld [vmem:[%s2630_s10 + $0x48] sm:$0xf] }
  0x29   : > { %213 = vst [vmem:[%s184_s27 + $0x8] sm:$0xf] %v212_v2  ;;  %v216_v4 = vld [vmem:[%s2630_s10 + $0x60] sm:$0xf]  ;;  %v218_v5 = vld [vmem:[%s2630_s10 + $0x78] sm:$0xf] }
  0x2a   : > { %215 = vst [vmem:[%s184_s27 + $0xc] sm:$0xf] %v214_v3  ;;  %217 = vst [vmem:[%s184_s27 + $0x10] sm:$0xf] %v216_v4  ;;  %v220_v6 = vld [vmem:[%s2630_s10 + $0x90] sm:$0xf] }
  0x2b   : > { %219 = vst [vmem:[%s184_s27 + $0x14] sm:$0xf] %v218_v5  ;;  %v222_v7 = vld [vmem:[%s2630_s10 + $0xa8] sm:$0xf]  ;;  %v224_v8 = vld [vmem:[%s2630_s10 + $0xc0] sm:$0xf] }
  0x2c   : > { %221 = vst [vmem:[%s184_s27 + $0x18] sm:$0xf] %v220_v6  ;;  %223 = vst [vmem:[%s184_s27 + $0x1c] sm:$0xf] %v222_v7  ;;  %v226_v9 = vld [vmem:[%s2630_s10 + $0xd8] sm:$0xf] }
  0x2d   : > { %225 = vst [vmem:[%s184_s27 + $0x20] sm:$0xf] %v224_v8  ;;  %v228_v10 = vld [vmem:[%s2630_s10 + $0xf0] sm:$0xf]  ;;  %v230_v11 = vld [vmem:[%s2630_s10 + $0x108] sm:$0xf] }
  0x2e   : > { %227 = vst [vmem:[%s184_s27 + $0x24] sm:$0xf] %v226_v9  ;;  %229 = vst [vmem:[%s184_s27 + $0x28] sm:$0xf] %v228_v10  ;;  %v232_v12 = vld [vmem:[%s2630_s10 + $0x120] sm:$0xf] }
  0x2f   : > { %231 = vst [vmem:[%s184_s27 + $0x2c] sm:$0xf] %v230_v11  ;;  %v234_v13 = vld [vmem:[%s2630_s10 + $0x138] sm:$0xf]  ;;  %v236_v14 = vld [vmem:[%s2630_s10 + $0x150] sm:$0xf] }
  0x30   : > { %233 = vst [vmem:[%s184_s27 + $0x30] sm:$0xf] %v232_v12  ;;  %235 = vst [vmem:[%s184_s27 + $0x34] sm:$0xf] %v234_v13  ;;  %v238_v15 = vld [vmem:[%s2630_s10 + $0x168] sm:$0xf] }
  0x31   : > { %237 = vst [vmem:[%s184_s27 + $0x38] sm:$0xf] %v236_v14  ;;  %239 = vst [vmem:[%s184_s27 + $0x3c] sm:$0xf] %v238_v15 }
  0x32 PF: > { %295 = sbr.rel (!%p2598_p8) target bundleno = 67 (0x43), region = 61  ;;  %s297_s28 = sand.u32 (%p2598_p8), 1, %s2461_s15  }
  0x33   : > { %s1827_s29 = smul.u32 (%p2598_p8), 96, %s2485_s21  ;;  %s1945_s25 = sshll.u32 (%p2598_p8), %s297_s28, 6 }
  0x34   : > { %s299_s9 = scalar_lea.vmem (%p2598_p8), [#allocation6], %s1945_s25 }
  0x35   : > { %s1828_s30 = sadd.s32 (%p2598_p8), %s2481_s20, %s1827_s29 }
  0x36   : > { %s1946_s5 = sshll.u32 (%p2598_p8), %s1828_s30, 2 }
  0x37   : > { %s2656_s7 = scalar_lea.vmem %s3161_s1, %s1946_s5 }
  0x38   : > { %v1947_v16 = vld [vmem:[%s2656_s7 + $0x8] sm:$0xf]  ;;  %v1948_v17 = vld [vmem:[%s2656_s7 + $0x20] sm:$0xf]  ;;  %v1949_v18 = vld [vmem:[%s2656_s7 + $0x38] sm:$0xf] }
  0x39   : > { %325 = vst [vmem:[%s299_s9] sm:$0xf] %v1947_v16  ;;  %327 = vst [vmem:[%s299_s9 + $0x4] sm:$0xf] %v1948_v17  ;;  %v1950_v19 = vld [vmem:[%s2656_s7 + $0x50] sm:$0xf] }
  0x3a   : > { %329 = vst [vmem:[%s299_s9 + $0x8] sm:$0xf] %v1949_v18  ;;  %v1951_v20 = vld [vmem:[%s2656_s7 + $0x68] sm:$0xf]  ;;  %v1952_v21 = vld [vmem:[%s2656_s7 + $0x80] sm:$0xf] }
  0x3b   : > { %331 = vst [vmem:[%s299_s9 + $0xc] sm:$0xf] %v1950_v19  ;;  %333 = vst [vmem:[%s299_s9 + $0x10] sm:$0xf] %v1951_v20  ;;  %v1953_v22 = vld [vmem:[%s2656_s7 + $0x98] sm:$0xf] }
  0x3c   : > { %335 = vst [vmem:[%s299_s9 + $0x14] sm:$0xf] %v1952_v21  ;;  %v1954_v23 = vld [vmem:[%s2656_s7 + $0xb0] sm:$0xf]  ;;  %v1955_v24 = vld [vmem:[%s2656_s7 + $0xc8] sm:$0xf] }
  0x3d   : > { %337 = vst [vmem:[%s299_s9 + $0x18] sm:$0xf] %v1953_v22  ;;  %339 = vst [vmem:[%s299_s9 + $0x1c] sm:$0xf] %v1954_v23  ;;  %v1956_v25 = vld [vmem:[%s2656_s7 + $0xe0] sm:$0xf] }
  0x3e   : > { %341 = vst [vmem:[%s299_s9 + $0x20] sm:$0xf] %v1955_v24  ;;  %v1957_v26 = vld [vmem:[%s2656_s7 + $0xf8] sm:$0xf]  ;;  %v1958_v27 = vld [vmem:[%s2656_s7 + $0x110] sm:$0xf] }
  0x3f   : > { %343 = vst [vmem:[%s299_s9 + $0x24] sm:$0xf] %v1956_v25  ;;  %345 = vst [vmem:[%s299_s9 + $0x28] sm:$0xf] %v1957_v26  ;;  %v1959_v28 = vld [vmem:[%s2656_s7 + $0x128] sm:$0xf] }
  0x40   : > { %347 = vst [vmem:[%s299_s9 + $0x2c] sm:$0xf] %v1958_v27  ;;  %v1960_v29 = vld [vmem:[%s2656_s7 + $0x140] sm:$0xf]  ;;  %v1961_v30 = vld [vmem:[%s2656_s7 + $0x158] sm:$0xf] }
  0x41   : > { %349 = vst [vmem:[%s299_s9 + $0x30] sm:$0xf] %v1959_v28  ;;  %351 = vst [vmem:[%s299_s9 + $0x34] sm:$0xf] %v1960_v29  ;;  %v1962_v31 = vld [vmem:[%s2656_s7 + $0x170] sm:$0xf] }
  0x42   : > { %353 = vst [vmem:[%s299_s9 + $0x38] sm:$0xf] %v1961_v30  ;;  %355 = vst [vmem:[%s299_s9 + $0x3c] sm:$0xf] %v1962_v31 }
  0x43 PF: > { %411 = sbr.rel (!%p2614_p11) target bundleno = 84 (0x54), region = 102  ;;  %s413_s8 = sand.u32 (%p2614_p11), 1, %s2453_s13  }
  0x44   : > { %s1836_s10 = smul.u32 (%p2614_p11), 96, %s2485_s21  ;;  %s1963_s27 = sshll.u32 (%p2614_p11), %s413_s8, 6 }
  0x45   : > { %s415_s26 = scalar_lea.vmem (%p2614_p11), [#allocation7], %s1963_s27 }
  0x46   : > { %s1837_s28 = sadd.s32 (%p2614_p11), %s2481_s20, %s1836_s10 }
  0x47   : > { %s1964_s29 = sshll.u32 (%p2614_p11), %s1837_s28, 2 }
  0x48   : > { %s2682_s5 = scalar_lea.vmem %s3162_s2, %s1964_s29 }
  0x49   : > { %v1965_v32 = vld [vmem:[%s2682_s5 + $0x10] sm:$0xf]  ;;  %v1966_v33 = vld [vmem:[%s2682_s5 + $0x28] sm:$0xf]  ;;  %v1967_v34 = vld [vmem:[%s2682_s5 + $0x40] sm:$0xf] }
  0x4a   : > { %441 = vst [vmem:[%s415_s26] sm:$0xf] %v1965_v32  ;;  %443 = vst [vmem:[%s415_s26 + $0x4] sm:$0xf] %v1966_v33  ;;  %v1968_v35 = vld [vmem:[%s2682_s5 + $0x58] sm:$0xf] }
  0x4b   : > { %445 = vst [vmem:[%s415_s26 + $0x8] sm:$0xf] %v1967_v34  ;;  %v1969_v36 = vld [vmem:[%s2682_s5 + $0x70] sm:$0xf]  ;;  %v1970_v37 = vld [vmem:[%s2682_s5 + $0x88] sm:$0xf] }
  0x4c   : > { %447 = vst [vmem:[%s415_s26 + $0xc] sm:$0xf] %v1968_v35  ;;  %449 = vst [vmem:[%s415_s26 + $0x10] sm:$0xf] %v1969_v36  ;;  %v1971_v38 = vld [vmem:[%s2682_s5 + $0xa0] sm:$0xf] }
  0x4d   : > { %451 = vst [vmem:[%s415_s26 + $0x14] sm:$0xf] %v1970_v37  ;;  %v1972_v39 = vld [vmem:[%s2682_s5 + $0xb8] sm:$0xf]  ;;  %v1973_v40 = vld [vmem:[%s2682_s5 + $0xd0] sm:$0xf] }
  0x4e   : > { %453 = vst [vmem:[%s415_s26 + $0x18] sm:$0xf] %v1971_v38  ;;  %455 = vst [vmem:[%s415_s26 + $0x1c] sm:$0xf] %v1972_v39  ;;  %v1974_v41 = vld [vmem:[%s2682_s5 + $0xe8] sm:$0xf] }
  0x4f   : > { %457 = vst [vmem:[%s415_s26 + $0x20] sm:$0xf] %v1973_v40  ;;  %v1975_v42 = vld [vmem:[%s2682_s5 + $0x100] sm:$0xf]  ;;  %v1976_v43 = vld [vmem:[%s2682_s5 + $0x118] sm:$0xf] }
  0x50   : > { %459 = vst [vmem:[%s415_s26 + $0x24] sm:$0xf] %v1974_v41  ;;  %461 = vst [vmem:[%s415_s26 + $0x28] sm:$0xf] %v1975_v42  ;;  %v1977_v44 = vld [vmem:[%s2682_s5 + $0x130] sm:$0xf] }
  0x51   : > { %463 = vst [vmem:[%s415_s26 + $0x2c] sm:$0xf] %v1976_v43  ;;  %v1978_v45 = vld [vmem:[%s2682_s5 + $0x148] sm:$0xf]  ;;  %v1979_v46 = vld [vmem:[%s2682_s5 + $0x160] sm:$0xf] }
  0x52   : > { %465 = vst [vmem:[%s415_s26 + $0x30] sm:$0xf] %v1977_v44  ;;  %467 = vst [vmem:[%s415_s26 + $0x34] sm:$0xf] %v1978_v45  ;;  %v1980_v47 = vld [vmem:[%s2682_s5 + $0x178] sm:$0xf] }
  0x53   : > { %469 = vst [vmem:[%s415_s26 + $0x38] sm:$0xf] %v1979_v46  ;;  %471 = vst [vmem:[%s415_s26 + $0x3c] sm:$0xf] %v1980_v47 }
  0x54 PF: > { %p1981_p13 = scmp.ge.s32.totalorder %s2489_s22, 1  ;;  %p526_p0 = scmp.lt.s32.totalorder %s2489_s22, 5 }
  0x56   : > { %p527_p1 = pnand %p1981_p13, %p526_p0 }
  0x57   : > { %s540_s18 = sand.u32 (!%p527_p1), 1, %s2457_s14   ;;  %s533_s7 = sand.u32 (!%p527_p1), 1, %s2465_s16  }
  0x58   : > { %530 = sbr.rel (%p527_p1) target bundleno = 975 (0x3cf), region = 143  ;;  %s1983_s6 = sshll.u32 (!%p527_p1), %s540_s18, 6 }
  0x59   : > { %s542_s9 = scalar_lea.vmem (!%p527_p1), [#allocation6], %s1983_s6  ;;  %s1982_s8 = sshll.u32 (!%p527_p1), %s533_s7, 6 }
  0x5a   : > { %s2704_s10 = scalar_lea.vmem (!%p527_p1), [#allocation5], %s1982_s8  ;;  %s547_s14 = sand.u32 (!%p527_p1), 1, %s2449_s12  }
  0x5b   : > { %s1984_s16 = sshll.u32 (!%p527_p1), %s547_s14, 6  ;;  %s3184_s12 = sld [smem:[#allocation8_spill]] (!%p527_p1) }
  0x5c   : > { %s2795_s27 = scalar_lea.vmem (!%p527_p1), [#allocation7], %s1984_s16  ;;  %p592_p2 = scmp.lt.s32.totalorder (!%p527_p1), %s2477_s19, 1 }
  0x5d   : > { %v2283_v48 = vld [vmem:[%s542_s9 + $0x38] sm:$0xff]   ;;  %v2284_v49 = vld [vmem:[%s542_s9 + $0x30] sm:$0xff]   ;;  %v2285_v50 = vld [vmem:[%s542_s9 + $0x28] sm:$0xff]   ;;  %vm610_vm0 = vcmask 7168   ;;  %v2491_v0 = vmov -1e+30  }
  0x5e   : > { %2125 = vmatprep.subr.bf16.mxu0 %v2283_v48  ;;  %v2291_v51 = vld [vmem:[%s2704_s10] sm:$0xff]   ;;  %v2287_v53 = vld [vmem:[%s542_s9 + $0x18] sm:$0xff]   ;;  %v2288_v54 = vld [vmem:[%s542_s9 + $0x10] sm:$0xff]   ;;  %613 = vst.msk [vmem:[#allocation2 + $0x10] sm:$0xff] %vm610_vm0, %v2491_v0  ;;  %v2492_v8 = vmov 0   ;;  %v2493_v14 = vmov 0.0  }
  0x5f   : > { %2126 = vmatpush3.bf16.xpose.msra.mxu0 %v2283_v48  ;;  %2141 = vmatprep.mubr.bf16.mxu0 %v2291_v51  ;;  %v2286_v52 = vld [vmem:[%s542_s9 + $0x20] sm:$0xff]   ;;  %v2289_v55 = vld [vmem:[%s542_s9 + $0x8] sm:$0xff]   ;;  %v2293_v58 = vld [vmem:[%s2704_s10 + $0x10] sm:$0xff]   ;;  %611 = vst.msk [vmem:[#allocation2] sm:$0xff] %vm610_vm0, %v2491_v0  ;;  %s3203_s19 = smov (!%p592_p2, %s2477_s19), 1 }
  0x60   : > { %2127 = vmatprep.subr.bf16.mxu0 %v2284_v49  ;;  %v2290_v56 = vld [vmem:[%s542_s9] sm:$0xff]   ;;  %v2292_v57 = vld [vmem:[%s2704_s10 + $0x8] sm:$0xff]   ;;  %v2294_v59 = vld [vmem:[%s2704_s10 + $0x18] sm:$0xff]   ;;  %612 = vst.msk [vmem:[#allocation2 + $0x8] sm:$0xff] %vm610_vm0, %v2491_v0  ;;  %2282 = vset.pattern.permute.xlu1 %v2492_v8  ;;  %s1986_s29 = sshll.u32 %s3203_s19, 5  ;;  %s3185_s19 = sld [smem:[#allocation9_spill]] }
  0x61   : > { %v2295_v60 = vld [vmem:[%s2704_s10 + $0x20] sm:$0xff]   ;;  %v2296_v61 = vld [vmem:[%s2704_s10 + $0x28] sm:$0xff]   ;;  %v2297_v62 = vld [vmem:[%s2704_s10 + $0x30] sm:$0xff]   ;;  %614 = vst.msk [vmem:[#allocation2 + $0x18] sm:$0xff] %vm610_vm0, %v2491_v0  ;;  %2281 = vset.pattern.permute.xlu0 %v2492_v8  ;;  %p594_p3 = scmp.lt.s32.totalorder %s3184_s12, 1 }
  0x62   : > { %v2298_v63 = vld [vmem:[%s2704_s10 + $0x38] sm:$0xff]   ;;  %615 = vst.msk [vmem:[#allocation2 + $0x20] sm:$0xff] %vm610_vm0, %v2491_v0  ;;  %616 = vst.msk [vmem:[#allocation2 + $0x28] sm:$0xff] %vm610_vm0, %v2491_v0  ;;  %v2300_v21 = vld [vmem:[%s2795_s27 + $0x30] sm:$0xff]  }
  0x63   : > { %617 = vst.msk [vmem:[#allocation2 + $0x30] sm:$0xff] %vm610_vm0, %v2491_v0  ;;  %618 = vst.msk [vmem:[#allocation2 + $0x38] sm:$0xff] %vm610_vm0, %v2491_v0  ;;  %v2299_v19 = vld [vmem:[%s2795_s27 + $0x38] sm:$0xff]   ;;  %v2301_v27 = vld [vmem:[%s2795_s27 + $0x28] sm:$0xff]   ;;  %s3205_s12 = smov (!%p594_p3, %s3184_s12), 1 }
  0x64   : > { %619 = vst.msk [vmem:[#allocation2 + $0x40] sm:$0xff] %vm610_vm0, %v2491_v0  ;;  %620 = vst.msk [vmem:[#allocation2 + $0x48] sm:$0xff] %vm610_vm0, %v2491_v0  ;;  %2157 = vmatprep.subr.bf16.mxu1 %v2299_v19  ;;  %v2302_v35 = vld [vmem:[%s2795_s27 + $0x20] sm:$0xff]   ;;  %v2303_v42 = vld [vmem:[%s2795_s27 + $0x18] sm:$0xff]   ;;  %s1985_s28 = sshll.u32 %s3205_s12, 4 }
  0x65   : > { %621 = vst.msk [vmem:[#allocation2 + $0x50] sm:$0xff] %vm610_vm0, %v2491_v0  ;;  %622 = vst.msk [vmem:[#allocation2 + $0x58] sm:$0xff] %vm610_vm0, %v2491_v0  ;;  %2158 = vmatpush3.bf16.msra.mxu1 %v2299_v19  ;;  %v2798_v20 = vld [vmem:[#allocation2 + $0x10] sm:$0xff]  ;;  %s601_s25 = sadd.s32 %s1986_s29, %s1985_s28 }
  0x66   : > { %623 = vst.msk [vmem:[#allocation2 + $0x60] sm:$0xff] %vm610_vm0, %v2491_v0  ;;  %624 = vst.msk [vmem:[#allocation2 + $0x68] sm:$0xff] %vm610_vm0, %v2491_v0  ;;  %v2801_v23 = vld [vmem:[#allocation2] sm:$0xff]  ;;  %2159 = vmatprep.subr.bf16.mxu1 %v2300_v21  ;;  %s1987_s30 = sshll.u32 %s601_s25, 2 }
  0x67   : > { %2128 = vmatpush3.bf16.xpose.msra.mxu0 %v2284_v49  ;;  %625 = vst.msk [vmem:[#allocation2 + $0x70] sm:$0xff] %vm610_vm0, %v2491_v0  ;;  %626 = vst.msk [vmem:[#allocation2 + $0x78] sm:$0xff] %vm610_vm0, %v2491_v0  ;;  %v2817_v31 = vld [vmem:[#allocation2 + $0x8] sm:$0xff]  ;;  %s3110_s18 = scalar_lea.vmem %s3185_s19, %s1987_s30 }
  0x68   : > { %2129 = vmatprep.subr.bf16.mxu0 %v2285_v50  ;;  %629 = vst.msk [vmem:[#allocation3 + $0x10] sm:$0xff] %vm610_vm0, %v2493_v14  ;;  %627 = vst.msk [vmem:[#allocation3] sm:$0xff] %vm610_vm0, %v2493_v14  ;;  %v2806_v26 = vld [vmem:[#allocation2 + $0x18] sm:$0xff] }
  0x69   : > { %628 = vst.msk [vmem:[#allocation3 + $0x8] sm:$0xff] %vm610_vm0, %v2493_v14  ;;  %630 = vst.msk [vmem:[#allocation3 + $0x18] sm:$0xff] %vm610_vm0, %v2493_v14  ;;  %2160 = vmatpush3.bf16.msra.mxu1 %v2300_v21  ;;  %v2836_v38 = vld [vmem:[#allocation2 + $0x20] sm:$0xff]  ;;  %v2858_v49 = vld [vmem:[#allocation2 + $0x28] sm:$0xff] }
  0x6a   : > { %631 = vst.msk [vmem:[#allocation3 + $0x20] sm:$0xff] %vm610_vm0, %v2493_v14  ;;  %632 = vst.msk [vmem:[#allocation3 + $0x28] sm:$0xff] %vm610_vm0, %v2493_v14  ;;  %2161 = vmatprep.subr.bf16.mxu1 %v2301_v27  ;;  %v2842_v41 = vld [vmem:[#allocation2 + $0x38] sm:$0xff]  ;;  %v2849_v45 = vld [vmem:[#allocation2 + $0x30] sm:$0xff] }
  0x6b   : > { %633 = vst.msk [vmem:[#allocation3 + $0x30] sm:$0xff] %vm610_vm0, %v2493_v14  ;;  %634 = vst.msk [vmem:[#allocation3 + $0x38] sm:$0xff] %vm610_vm0, %v2493_v14  ;;  %v2898_v19 = vld [vmem:[#allocation2 + $0x48] sm:$0xff]  ;;  %v2306_v21 = vld [vmem:[%s2795_s27] sm:$0xff]  }
  0x6c   : > { %635 = vst.msk [vmem:[#allocation3 + $0x40] sm:$0xff] %vm610_vm0, %v2493_v14  ;;  %636 = vst.msk [vmem:[#allocation3 + $0x48] sm:$0xff] %vm610_vm0, %v2493_v14 }
  0x6d   : > { %637 = vst.msk [vmem:[#allocation3 + $0x50] sm:$0xff] %vm610_vm0, %v2493_v14  ;;  %638 = vst.msk [vmem:[#allocation3 + $0x58] sm:$0xff] %vm610_vm0, %v2493_v14  ;;  %2162 = vmatpush3.bf16.msra.mxu1 %v2301_v27 }
  0x6e   : > { %639 = vst.msk [vmem:[#allocation3 + $0x60] sm:$0xff] %vm610_vm0, %v2493_v14  ;;  %640 = vst.msk [vmem:[#allocation3 + $0x68] sm:$0xff] %vm610_vm0, %v2493_v14  ;;  %2163 = vmatprep.subr.bf16.mxu1 %v2302_v35 }
  0x6f   : > { %2130 = vmatpush3.bf16.xpose.msra.mxu0 %v2285_v50  ;;  %641 = vst.msk [vmem:[#allocation3 + $0x70] sm:$0xff] %vm610_vm0, %v2493_v14  ;;  %642 = vst.msk [vmem:[#allocation3 + $0x78] sm:$0xff] %vm610_vm0, %v2493_v14  ;;  %v2304_v50 = vld [vmem:[%s2795_s27 + $0x10] sm:$0xff]  }
  0x70   : > { %2131 = vmatprep.subr.bf16.mxu0 %v2286_v52 }
  0x71   : > { %2164 = vmatpush3.bf16.msra.mxu1 %v2302_v35 }
  0x72   : > { %2165 = vmatprep.subr.bf16.mxu1 %v2303_v42 }
  0x75   : > { %2166 = vmatpush3.bf16.msra.mxu1 %v2303_v42  ;;  %v2918_v42 = vld [vmem:[#allocation2 + $0x78] sm:$0xff] }
  0x76   : > { %2167 = vmatprep.subr.bf16.mxu1 %v2304_v50 }
  0x77   : > { %2132 = vmatpush3.bf16.xpose.msra.mxu0 %v2286_v52 }
  0x78   : > { %2133 = vmatprep.subr.bf16.mxu0 %v2287_v53 }
  0x79   : > { %2168 = vmatpush3.bf16.msra.mxu1 %v2304_v50 }
  0x7f   : > { %2134 = vmatpush3.bf16.xpose.msra.mxu0 %v2287_v53 }
  0x80   : > { %2135 = vmatprep.subr.bf16.mxu0 %v2288_v54 }
  0x87   : > { %2136 = vmatpush3.bf16.xpose.msra.mxu0 %v2288_v54  ;;  %v2868_v54 = vld [vmem:[#allocation2 + $0x40] sm:$0xff] }
  0x88   : > { %2137 = vmatprep.subr.bf16.mxu0 %v2289_v55 }
  0x8f   : > { %2138 = vmatpush3.bf16.xpose.msra.mxu0 %v2289_v55 }
  0x90   : > { %2139 = vmatprep.subr.bf16.mxu0 %v2290_v56 }
  0x97   : > { %2140 = vmatpush3.bf16.xpose.msra.mxu0 %v2290_v56 }
  0x9e   : > { %2142 = vmatmul.mubr.bf16.vlgmr.msra.gmra.mxu0 %v2292_v57 }
  0x9f   : > { %2145 = vmatprep.mubr.bf16.mxu0 %v2293_v58  ;;  %v2878_v58 = vld [vmem:[#allocation2 + $0x58] sm:$0xff] }
  0xa6   : > { %2146 = vmatmul.mubr.bf16.gmra.mxu0 %v2294_v59  ;;  %v2305_v59 = vld [vmem:[%s2795_s27 + $0x8] sm:$0xff]  }
  0xa7   : > { %2149 = vmatprep.mubr.bf16.mxu0 %v2295_v60  ;;  %2169 = vmatprep.subr.bf16.mxu1 %v2305_v59 }
  0xa8   : > { %2170 = vmatpush3.bf16.msra.mxu1 %v2305_v59 }
  0xa9   : > { %2171 = vmatprep.subr.bf16.mxu1 %v2306_v21 }
  0xac   : > { %2172 = vmatpush3.bf16.msra.mxu1 %v2306_v21 }
  0xae   : > { %2150 = vmatmul.mubr.bf16.gmra.mxu0 %v2296_v61 }
  0xaf   : > { %2153 = vmatprep.mubr.bf16.mxu0 %v2297_v62 }
  0xb6   : > { %2154 = vmatmul.mubr.bf16.gmra.mxu0 %v2298_v63  ;;  %v2888_v63 = vld [vmem:[#allocation2 + $0x50] sm:$0xff] }
 0x15e   : > { %v2730_v1 = vpop.f32.mrf.mxu0 }
 0x15f   : > { %904 = vmax.xlane.f32.xlu1 %v2730_v1 }
 0x160   : > { %v2733_v2 = vpop.f32.mrf.mxu0 }
 0x161   : > { %900 = vmax.xlane.f32.xlu0 %v2733_v2 }
 0x162   : > { %v2736_v3 = vpop.f32.mrf.mxu0 }
 0x163   : > { %906 = vmax.xlane.f32.xlu1 %v2736_v3 }
 0x164   : > { %v2739_v4 = vpop.f32.mrf.mxu0 }
 0x165   : > { %902 = vmax.xlane.f32.xlu0 %v2739_v4 }
 0x166   : > { %v2742_v5 = vpop.f32.mrf.mxu0 }
 0x168   : > { %v2744_v6 = vpop.f32.mrf.mxu0 }
 0x169   : > { %908 = vmax.xlane.f32.xlu0 %v2744_v6 }
 0x16a   : > { %v2747_v7 = vpop.f32.mrf.mxu0 }
 0x16b   : > { %914 = vmax.xlane.f32.xlu1 %v2747_v7 }
 0x16c   : > { %v2750_v9 = vpop.f32.mrf.mxu0 }
 0x16d   : > { %912 = vmax.xlane.f32.xlu0 %v2742_v5 }
 0x16e   : > { %v2753_v10 = vpop.f32.mrf.mxu0 }
 0x16f   : > { %910 = vmax.xlane.f32.xlu1 %v2750_v9 }
 0x170   : > { %v2756_v11 = vpop.f32.mrf.mxu0 }
 0x171   : > { %916 = vmax.xlane.f32.xlu0 %v2756_v11 }
 0x172   : > { %v2759_v12 = vpop.f32.mrf.mxu0 }
 0x173   : > { %922 = vmax.xlane.f32.xlu1 %v2759_v12 }
 0x174   : > { %v2762_v13 = vpop.f32.mrf.mxu0 }
 0x175   : > { %920 = vmax.xlane.f32.xlu0 %v2753_v10 }
 0x176   : > { %v2781_v15 = vpop.f32.mrf.mxu0 }
 0x177   : > { %918 = vmax.xlane.f32.xlu1 %v2762_v13 }
 0x178   : > { %v2784_v16 = vpop.f32.mrf.mxu0 }
 0x179   : > { %924 = vmax.xlane.f32.xlu0 %v2784_v16 }
 0x17a   : > { %v2787_v17 = vpop.f32.mrf.mxu0 }
 0x17b   : > { %930 = vmax.xlane.f32.xlu1 %v2787_v17 }
 0x17c   : > { %v2791_v18 = vpop.f32.mrf.mxu0 }
 0x17d   : > { %928 = vmax.xlane.f32.xlu0 %v2781_v15 }
 0x17f   : > { %926 = vmax.xlane.f32.xlu1 %v2791_v18 }
 0x1e8   : > { %v905_v22 = vpop.xlane.xlu1 %904 }
 0x1e9   : > { %v2804_v24 = vmax.f32 %v2798_v20, %v905_v22 }
 0x1ea   : > { %v901_v25 = vpop.xlane.xlu0 %900 }
 0x1eb   : > { %v950_v28 = vsub.f32 %v2798_v20, %v2804_v24  ;;  %1536 = vst.msk [vmem:[#allocation2 + $0x10] sm:$0xff] %vm610_vm0, %v2804_v24  ;;  %v2814_v29 = vmax.f32 %v2801_v23, %v901_v25  ;;  %1008 = vperm.xlu1 %2282, %v2804_v24  }
 0x1ec   : > { %v907_v30 = vpop.xlane.xlu1 %906 }
 0x1ed   : > { %1534 = vst.msk [vmem:[#allocation2] sm:$0xff] %vm610_vm0, %v2814_v29  ;;  %v2824_v33 = vmax.f32 %v2806_v26, %v907_v30  ;;  %998 = vperm.xlu0 %2281, %v2814_v29   ;;  %v2908_v30 = vld [vmem:[#allocation2 + $0x60] sm:$0xff] }
 0x1ee   : > { %v903_v34 = vpop.xlane.xlu0 %902 }
 0x1ef   : > { %1537 = vst.msk [vmem:[#allocation2 + $0x18] sm:$0xff] %vm610_vm0, %v2824_v33  ;;  %v2833_v37 = vmax.f32 %v2817_v31, %v903_v34  ;;  %1013 = vperm.xlu1 %2282, %v2824_v33  }
 0x1f1   : > { %v949_v39 = vsub.f32 %v2817_v31, %v2833_v37  ;;  %1535 = vst.msk [vmem:[#allocation2 + $0x8] sm:$0xff] %vm610_vm0, %v2833_v37  ;;  %v3172_v31 = vsub.f32 %v2806_v26, %v2824_v33 }
 0x1f2   : > { %v909_v40 = vpop.xlane.xlu0 %908 }
 0x1f3   : > { %v2846_v43 = vmax.f32 %v2836_v38, %v909_v40  ;;  %1003 = vperm.xlu1 %2282, %v2833_v37   ;;  %v970_v37 = vmul.f32 1.442695, %v3172_v31 }
 0x1f4   : > { %v915_v44 = vpop.xlane.xlu1 %914 }
 0x1f5   : > { %1538 = vst.msk [vmem:[#allocation2 + $0x20] sm:$0xff] %vm610_vm0, %v2846_v43  ;;  %v2856_v47 = vmax.f32 %v2842_v41, %v915_v44 }
 0x1f6   : > { %v913_v48 = vpop.xlane.xlu0 %912 }
 0x1f7   : > { %1541 = vst.msk [vmem:[#allocation2 + $0x38] sm:$0xff] %vm610_vm0, %v2856_v47  ;;  %v2866_v52 = vmax.f32 %v2849_v45, %v913_v48  ;;  %v3176_v26 = vsub.f32 %v2842_v41, %v2856_v47 }
 0x1f8   : > { %v911_v53 = vpop.xlane.xlu1 %910 }
 0x1f9   : > { %1540 = vst.msk [vmem:[#allocation2 + $0x30] sm:$0xff] %vm610_vm0, %v2866_v52  ;;  %v2875_v56 = vmax.f32 %v2858_v49, %v911_v53  ;;  %1028 = vperm.xlu1 %2282, %v2866_v52   ;;  %v2928_v53 = vld [vmem:[#allocation2 + $0x70] sm:$0xff]  ;;  %v3173_v20 = vsub.f32 %v2849_v45, %v2866_v52  ;;  %v978_v33 = vmul.f32 1.442695, %v3176_v26  ;;  %v1129_v26 = vld [vmem:[#allocation3 + $0x28] sm:$0xff] }
 0x1fa   : > { %v917_v57 = vpop.xlane.xlu0 %916 }
 0x1fb   : > { %1539 = vst.msk [vmem:[#allocation2 + $0x28] sm:$0xff] %vm610_vm0, %v2875_v56  ;;  %v2886_v61 = vmax.f32 %v2868_v54, %v917_v57  ;;  %v976_v24 = vmul.f32 1.442695, %v3173_v20 }
 0x1fc   : > { %v923_v62 = vpop.xlane.xlu1 %922 }
 0x1fd   : > { %1542 = vst.msk [vmem:[#allocation2 + $0x40] sm:$0xff] %vm610_vm0, %v2886_v61  ;;  %v2895_v8 = vmax.f32 %v2878_v58, %v923_v62  ;;  %1018 = vperm.xlu1 %2282, %v2846_v43  }
 0x1fe   : > { %v921_v14 = vpop.xlane.xlu0 %920 }
 0x1ff   : > { %1545 = vst.msk [vmem:[#allocation2 + $0x58] sm:$0xff] %vm610_vm0, %v2895_v8  ;;  %v2906_v25 = vmax.f32 %v2888_v63, %v921_v14  ;;  %v2938_v14 = vld [vmem:[#allocation2 + $0x68] sm:$0xff] }
 0x200   : > { %v919_v27 = vpop.xlane.xlu1 %918 }
 0x201   : > { %1544 = vst.msk [vmem:[#allocation2 + $0x50] sm:$0xff] %vm610_vm0, %v2906_v25  ;;  %v2915_v35 = vmax.f32 %v2898_v19, %v919_v27  ;;  %1023 = vperm.xlu1 %2282, %v2875_v56  }
 0x202   : > { %v925_v40 = vpop.xlane.xlu0 %924 }
 0x203   : > { %1543 = vst.msk [vmem:[#allocation2 + $0x48] sm:$0xff] %vm610_vm0, %v2915_v35  ;;  %v2925_v48 = vmax.f32 %v2908_v30, %v925_v40  ;;  %1043 = vperm.xlu0 %2281, %v2915_v35   ;;  %v3178_v52 = vsub.f32 %v2898_v19, %v2915_v35 }
 0x204   : > { %v931_v50 = vpop.xlane.xlu1 %930 }
 0x205   : > { %1546 = vst.msk [vmem:[#allocation2 + $0x60] sm:$0xff] %vm610_vm0, %v2925_v48  ;;  %v2935_v59 = vmax.f32 %v2918_v42, %v931_v50  ;;  %1033 = vperm.xlu1 %2282, %v2856_v47   ;;  %v3179_v41 = vsub.f32 %v2908_v30, %v2925_v48 }
 0x206   : > { %v929_v62 = vpop.xlane.xlu0 %928 }
 0x207   : > { %1549 = vst.msk [vmem:[#allocation2 + $0x78] sm:$0xff] %vm610_vm0, %v2935_v59  ;;  %v2945_v27 = vmax.f32 %v2928_v53, %v929_v62  ;;  %1053 = vperm.xlu0 %2281, %v2895_v8   ;;  %v988_v47 = vmul.f32 1.442695, %v3179_v41  ;;  %v1135_v41 = vld [vmem:[#allocation3 + $0x58] sm:$0xff] }
 0x208   : > { %v927_v40 = vpop.xlane.xlu1 %926 }
 0x209   : > { %1548 = vst.msk [vmem:[#allocation2 + $0x70] sm:$0xff] %vm610_vm0, %v2945_v27  ;;  %v2953_v22 = vmax.f32 %v2938_v14, %v927_v40  ;;  %1038 = vperm.xlu1 %2282, %v2886_v61   ;;  %v3181_v19 = vsub.f32 %v2928_v53, %v2945_v27 }
 0x20b   : > { %1547 = vst.msk [vmem:[#allocation2 + $0x68] sm:$0xff] %vm610_vm0, %v2953_v22  ;;  %1063 = vperm.xlu0 %2281, %v2953_v22   ;;  %v992_v35 = vmul.f32 1.442695, %v3181_v19  ;;  %v3182_v30 = vsub.f32 %v2938_v14, %v2953_v22 }
 0x20d   : > { %1048 = vperm.xlu1 %2282, %v2906_v25  }
 0x20f   : > { %1073 = vperm.xlu0 %2281, %v2935_v59  }
 0x211   : > { %1058 = vperm.xlu1 %2282, %v2925_v48   ;;  %v990_v48 = vmul.f32 1.442695, %v3182_v30 }
 0x215   : > { %1068 = vperm.xlu1 %2282, %v2945_v27  }
 0x266   : > { %v1009_v62 = vpop.permute.xlu1 %1008 }
 0x267   : > { %v1078_v40 = vsub.f32 %v2730_v1, %v1009_v62 }
 0x268   : > { %v999_v50 = vpop.permute.xlu0 %998 }
 0x269   : > { %v1096_v57 = vmul.f32 1.442695, %v1078_v40  ;;  %v1076_v21 = vsub.f32 %v2733_v2, %v999_v50 }
 0x26a   : > { %v1014_v44 = vpop.permute.xlu1 %1013 }
 0x26b   : > { %2307 = vpow2.f32 %v1096_v57  ;;  %v1092_v34 = vmul.f32 1.442695, %v1076_v21  ;;  %v1079_v51 = vsub.f32 %v2736_v3, %v1014_v44 }
 0x26d   : > { %2309 = vpow2.f32 %v1092_v34  ;;  %v1098_v0 = vmul.f32 1.442695, %v1079_v51 }
 0x26e   : > { %v1004_v60 = vpop.permute.xlu1 %1003 }
 0x26f   : > { %v1077_v55 = vsub.f32 %v2739_v4, %v1004_v60  ;;  %2311 = vpow2.f32 %v1098_v0 }
 0x271   : > { %v1094_v36 = vmul.f32 1.442695, %v1077_v55 }
 0x273   : > { %2313 = vpow2.f32 %v1094_v36 }
 0x274   : > { %v1029_v46 = vpop.permute.xlu1 %1028 }
 0x275   : > { %v1082_v1 = vsub.f32 %v2742_v5, %v1029_v46 }
 0x277   : > { %v1104_v62 = vmul.f32 1.442695, %v1082_v1 }
 0x278   : > { %v2308_v40 = vpop.eup %2307  ;;  %v1019_v32 = vpop.permute.xlu1 %1018 }
 0x279   : > { %2315 = vpow2.f32 %v1104_v62  ;;  %v1080_v2 = vsub.f32 %v2744_v6, %v1019_v32  ;;  %1160 = vadd.xlane.f32.xlu0 %v2308_v40 }
 0x27a   : > { %v2310_v57 = vpop.eup %2309 }
 0x27b   : > { %v1100_v3 = vmul.f32 1.442695, %v1080_v2  ;;  %1156 = vadd.xlane.f32.xlu1 %v2310_v57 }
 0x27c   : > { %v1024_v51 = vpop.permute.xlu1 %1023  ;;  %v2312_v60 = vpop.eup %2311 }
 0x27d   : > { %2317 = vpow2.f32 %v1100_v3  ;;  %v1081_v4 = vsub.f32 %v2750_v9, %v1024_v51  ;;  %v1334_v44 = vpack.c.bf16 %v2312_v60, %v2308_v40 }
 0x27e   : > { %v1044_v55 = vpop.permute.xlu0 %1043 }
 0x27f   : > { %v1102_v36 = vmul.f32 1.442695, %v1081_v4  ;;  %1162 = vadd.xlane.f32.xlu1 %v2312_v60  ;;  %v1085_v5 = vsub.f32 %v2762_v13, %v1044_v55 }
 0x280   : > { %v2314_v0 = vpop.eup %2313  ;;  %v1034_v46 = vpop.permute.xlu1 %1033 }
 0x281   : > { %2319 = vpow2.f32 %v1102_v36  ;;  %v1083_v34 = vsub.f32 %v2747_v7, %v1034_v46  ;;  %1158 = vadd.xlane.f32.xlu0 %v2314_v0  ;;  %v1333_v6 = vpack.c.bf16 %v2314_v0, %v2310_v57  ;;  %v1110_v50 = vmul.f32 1.442695, %v1085_v5 }
 0x282   : > { %v1054_v32 = vpop.permute.xlu0 %1053 }
 0x283   : > { %v1106_v21 = vmul.f32 1.442695, %v1083_v34  ;;  %2173 = vmatprep.mubr.bf16.mxu1 %v1333_v6  ;;  %v1087_v9 = vsub.f32 %v2759_v12, %v1054_v32 }
 0x284   : > { %2174 = vmatmul.mubr.bf16.vlgmr.msra.gmra.mxu1 %v1334_v44  ;;  %v1039_v1 = vpop.permute.xlu1 %1038 }
 0x285   : > { %2321 = vpow2.f32 %v1106_v21  ;;  %v1084_v62 = vsub.f32 %v2756_v11, %v1039_v1  ;;  %v1114_v7 = vmul.f32 1.442695, %v1087_v9 }
 0x286   : > { %v2316_v2 = vpop.eup %2315  ;;  %v1064_v13 = vpop.permute.xlu0 %1063  ;;  %2323 = vpow2.f32 %v1110_v50 }
 0x287   : > { %v1108_v3 = vmul.f32 1.442695, %v1084_v62  ;;  %1168 = vadd.xlane.f32.xlu0 %v2316_v2  ;;  %v1089_v57 = vsub.f32 %v2791_v18, %v1064_v13 }
 0x288   : > { %v1049_v51 = vpop.permute.xlu1 %1048 }
 0x289   : > { %2325 = vpow2.f32 %v1108_v3  ;;  %v1086_v40 = vsub.f32 %v2753_v10, %v1049_v51  ;;  %v1118_v55 = vmul.f32 1.442695, %v1089_v57  ;;  %v966_v51 = vmul.f32 1.442695, %v949_v39 }
 0x28a   : > { %v2318_v4 = vpop.eup %2317  ;;  %v1074_v60 = vpop.permute.xlu0 %1073  ;;  %2327 = vpow2.f32 %v1114_v7 }
 0x28b   : > { %v1112_v12 = vmul.f32 1.442695, %v1086_v40  ;;  %1164 = vadd.xlane.f32.xlu0 %v2318_v4  ;;  %v1091_v11 = vsub.f32 %v2787_v17, %v1074_v60  ;;  %v968_v40 = vmul.f32 1.442695, %v950_v28 }
 0x28c   : > { %v1059_v36 = vpop.permute.xlu1 %1058 }
 0x28d   : > { %2329 = vpow2.f32 %v1112_v12  ;;  %v1088_v0 = vsub.f32 %v2784_v16, %v1059_v36  ;;  %v1122_v18 = vmul.f32 1.442695, %v1091_v11  ;;  %v3171_v12 = vsub.f32 %v2836_v38, %v2846_v43 }
 0x28e   : > { %v2320_v5 = vpop.eup %2319  ;;  %2331 = vpow2.f32 %v1118_v55  ;;  %v3177_v43 = vsub.f32 %v2888_v63, %v2906_v25  ;;  %v3180_v63 = vsub.f32 %v2878_v58, %v2895_v8  ;;  %v3183_v8 = vsub.f32 %v2918_v42, %v2935_v59 }
 0x28f   : > { %v1116_v46 = vmul.f32 1.442695, %v1088_v0  ;;  %v1335_v34 = vpack.c.bf16 %v2320_v5, %v2318_v4  ;;  %v3170_v4 = vsub.f32 %v2801_v23, %v2814_v29  ;;  %v972_v55 = vmul.f32 1.442695, %v3171_v12 }
 0x290   : > { %v1069_v6 = vpop.permute.xlu1 %1068  ;;  %v3174_v23 = vsub.f32 %v2858_v49, %v2875_v56  ;;  %v3175_v29 = vsub.f32 %v2868_v54, %v2886_v61  ;;  %v984_v45 = vmul.f32 1.442695, %v3177_v43  ;;  %v982_v54 = vmul.f32 1.442695, %v3178_v52 }
 0x291   : > { %2333 = vpow2.f32 %v1116_v46  ;;  %v1090_v10 = vsub.f32 %v2781_v15, %v1069_v6  ;;  %2177 = vmatprep.mubr.bf16.mxu1 %v1335_v34  ;;  %v964_v60 = vmul.f32 1.442695, %v3170_v4  ;;  %v986_v25 = vmul.f32 1.442695, %v3180_v63  ;;  %v1124_v6 = vld [vmem:[#allocation3] sm:$0xff] }
 0x292   : > { %v2322_v32 = vpop.eup %2321  ;;  %2335 = vpow2.f32 %v1122_v18  ;;  %v974_v28 = vmul.f32 1.442695, %v3174_v23  ;;  %v980_v38 = vmul.f32 1.442695, %v3175_v29  ;;  %v1126_v18 = vld [vmem:[#allocation3 + $0x10] sm:$0xff]  ;;  %v1131_v23 = vld [vmem:[#allocation3 + $0x38] sm:$0xff] }
 0x293   : > { %v1120_v44 = vmul.f32 1.442695, %v1090_v10  ;;  %1170 = vadd.xlane.f32.xlu1 %v2322_v32  ;;  %v1336_v21 = vpack.c.bf16 %v2322_v32, %v2316_v2  ;;  %v2324_v17 = vpop.eup %2323 }
 0x295   : > { %2337 = vpow2.f32 %v1120_v44  ;;  %2178 = vmatmul.mubr.bf16.gmra.mxu1 %v1336_v21 }
 0x296   : > { %v2326_v50 = vpop.eup %2325  ;;  %2339 = vpow2.f32 %v966_v51 }
 0x297   : > { %1166 = vadd.xlane.f32.xlu1 %v2320_v5  ;;  %v1337_v16 = vpack.c.bf16 %v2324_v17, %v2326_v50  ;;  %v2328_v9 = vpop.eup %2327  ;;  %2341 = vpow2.f32 %v968_v40  ;;  %v994_v5 = vmul.f32 1.442695, %v3183_v8 }
 0x298   : > { %2343 = vpow2.f32 %v964_v60  ;;  %v1128_v60 = vld [vmem:[#allocation3 + $0x20] sm:$0xff] }
 0x299   : > { %2181 = vmatprep.mubr.bf16.mxu1 %v1337_v16  ;;  %2345 = vpow2.f32 %v972_v55 }
 0x29a   : > { %v2330_v1 = vpop.eup %2329  ;;  %2347 = vpow2.f32 %v970_v37 }
 0x29b   : > { %1178 = vadd.xlane.f32.xlu1 %v2328_v9  ;;  %1176 = vadd.xlane.f32.xlu0 %v2330_v1  ;;  %v1338_v62 = vpack.c.bf16 %v2328_v9, %v2330_v1  ;;  %v2332_v13 = vpop.eup %2331  ;;  %2349 = vpow2.f32 %v976_v24  ;;  %v1125_v9 = vld [vmem:[#allocation3 + $0x8] sm:$0xff] }
 0x29c   : > { %2351 = vpow2.f32 %v974_v28 }
 0x29d   : > { %2182 = vmatmul.mubr.bf16.gmra.mxu1 %v1338_v62  ;;  %2353 = vpow2.f32 %v980_v38 }
 0x29e   : > { %v2334_v15 = vpop.eup %2333  ;;  %2355 = vpow2.f32 %v978_v33 }
 0x29f   : > { %1174 = vadd.xlane.f32.xlu1 %v2324_v17  ;;  %1172 = vadd.xlane.f32.xlu0 %v2326_v50  ;;  %v1339_v3 = vpack.c.bf16 %v2332_v13, %v2334_v15  ;;  %v2336_v2 = vpop.eup %2335  ;;  %2357 = vpow2.f32 %v984_v45  ;;  %v1127_v50 = vld [vmem:[#allocation3 + $0x18] sm:$0xff] }
 0x2a0   : > { %2359 = vpow2.f32 %v982_v54 }
 0x2a1   : > { %2185 = vmatprep.mubr.bf16.mxu1 %v1339_v3  ;;  %2361 = vpow2.f32 %v988_v47 }
 0x2a2   : > { %v2338_v7 = vpop.eup %2337  ;;  %2363 = vpow2.f32 %v986_v25 }
 0x2a3   : > { %1186 = vadd.xlane.f32.xlu1 %v2336_v2  ;;  %1180 = vadd.xlane.f32.xlu0 %v2334_v15  ;;  %v1340_v57 = vpack.c.bf16 %v2336_v2, %v2338_v7  ;;  %v3005_v39 = vpop.eup %2339  ;;  %2365 = vpow2.f32 %v992_v35  ;;  %v1132_v35 = vld [vmem:[#allocation3 + $0x40] sm:$0xff] }
 0x2a4   : > { %v2342_v49 = vpop.eup %2341  ;;  %2367 = vpow2.f32 %v990_v48  ;;  %v1141_v15 = vmul.f32 %v3005_v39, %v1125_v9  ;;  %v1137_v9 = vld [vmem:[#allocation3 + $0x68] sm:$0xff] }
 0x2a5   : > { %2186 = vmatmul.mubr.bf16.gmra.mxu1 %v1340_v57  ;;  %v2344_v56 = vpop.eup %2343  ;;  %2369 = vpow2.f32 %v994_v5  ;;  %v1142_v10 = vmul.f32 %v2342_v49, %v1126_v18  ;;  %v1136_v18 = vld [vmem:[#allocation3 + $0x60] sm:$0xff] }
 0x2a6   : > { %v3020_v61 = vpop.eup %2345  ;;  %v1140_v21 = vmul.f32 %v2344_v56, %v1124_v6  ;;  %v1139_v6 = vld [vmem:[#allocation3 + $0x78] sm:$0xff] }
 0x2a7   : > { %1182 = vadd.xlane.f32.xlu1 %v2332_v13  ;;  %1184 = vadd.xlane.f32.xlu0 %v2338_v7  ;;  %v2348_v11 = vpop.eup %2347  ;;  %v1130_v7 = vld [vmem:[#allocation3 + $0x30] sm:$0xff]  ;;  %v1144_v31 = vmul.f32 %v3020_v61, %v1128_v60 }
 0x2a8   : > { %v2350_v36 = vpop.eup %2349  ;;  %v1143_v1 = vmul.f32 %v2348_v11, %v1127_v50 }
 0x2a9   : > { %v3032_v0 = vpop.eup %2351  ;;  %v1146_v40 = vmul.f32 %v2350_v36, %v1130_v7 }
 0x2aa   : > { %v3035_v58 = vpop.eup %2353 }
 0x2ab   : > { %v2356_v53 = vpop.eup %2355  ;;  %v1148_v8 = vmul.f32 %v3035_v58, %v1132_v35 }
 0x2ac   : > { %v3041_v27 = vpop.eup %2357  ;;  %v1147_v38 = vmul.f32 %v2356_v53, %v1131_v23 }
 0x2ad   : > { %v3043_v22 = vpop.eup %2359 }
 0x2ae   : > { %v3047_v14 = vpop.eup %2361 }
 0x2af   : > { %v3049_v46 = vpop.eup %2363 }
 0x2b0   : > { %v3053_v42 = vpop.eup %2365  ;;  %v1151_v63 = vmul.f32 %v3049_v46, %v1135_v41 }
 0x2b1   : > { %v3055_v59 = vpop.eup %2367 }
 0x2b2   : > { %v3059_v34 = vpop.eup %2369 }
 0x2b8   : > { %1244 = vperm.xlu1 %2282, %v3005_v39  }
 0x2bc   : > { %1249 = vperm.xlu1 %2282, %v2342_v49   ;;  %v1145_v49 = vmul.f32 %v3032_v0, %v1129_v26 }
 0x2bd   : > { %1239 = vperm.xlu0 %2281, %v2344_v56   ;;  %v1134_v56 = vld [vmem:[#allocation3 + $0x50] sm:$0xff] }
 0x2c0   : > { %1259 = vperm.xlu1 %2282, %v3020_v61   ;;  %v1150_v61 = vmul.f32 %v3041_v27, %v1134_v56 }
 0x2c1   : > { %1254 = vperm.xlu0 %2281, %v2348_v11  }
 0x2c4   : > { %1269 = vperm.xlu1 %2282, %v2350_v36   ;;  %v1133_v36 = vld [vmem:[#allocation3 + $0x48] sm:$0xff] }
 0x2c5   : > { %1264 = vperm.xlu0 %2281, %v3032_v0   ;;  %v1149_v5 = vmul.f32 %v3043_v22, %v1133_v36 }
 0x2c8   : > { %1279 = vperm.xlu1 %2282, %v3035_v58   ;;  %v1155_v58 = vmul.f32 %v3059_v34, %v1139_v6 }
 0x2c9   : > { %1274 = vperm.xlu0 %2281, %v2356_v53  }
 0x2cc   : > { %1289 = vperm.xlu1 %2282, %v3041_v27  }
 0x2cd   : > { %1284 = vperm.xlu0 %2281, %v3043_v22  }
 0x2d0   : > { %1299 = vperm.xlu1 %2282, %v3047_v14  }
 0x2d1   : > { %1294 = vperm.xlu0 %2281, %v3049_v46  }
 0x2d4   : > { %1309 = vperm.xlu1 %2282, %v3053_v42  }
 0x2d5   : > { %1304 = vperm.xlu0 %2281, %v3055_v59  }
 0x2d9   : > { %1314 = vperm.xlu0 %2281, %v3059_v34  }
 0x302   : > { %v1161_v32 = vpop.xlane.xlu0 %1160 }
 0x303   : > { %v1190_v44 = vadd.f32 %v1161_v32, %v1142_v10 }
 0x304   : > { %v1157_v17 = vpop.xlane.xlu1 %1156 }
 0x305   : > { %1207 = vst.msk [vmem:[#allocation3 + $0x10] sm:$0xff] %vm610_vm0, %v1190_v44  ;;  %v1188_v16 = vadd.f32 %v1157_v17, %v1140_v21  ;;  %v1152_v21 = vmul.f32 %v3047_v14, %v1136_v18  ;;  %v1153_v14 = vmul.f32 %v3055_v59, %v1137_v9 }
 0x307   : > { %1205 = vst.msk [vmem:[#allocation3] sm:$0xff] %vm610_vm0, %v1188_v16  ;;  %v1138_v16 = vld [vmem:[#allocation3 + $0x70] sm:$0xff] }
 0x308   : > { %v1163_v62 = vpop.xlane.xlu1 %1162 }
 0x309   : > { %v1191_v13 = vadd.f32 %v1163_v62, %v1143_v1 }
 0x30a   : > { %v1159_v3 = vpop.xlane.xlu0 %1158 }
 0x30b   : > { %1208 = vst.msk [vmem:[#allocation3 + $0x18] sm:$0xff] %vm610_vm0, %v1191_v13  ;;  %v1189_v2 = vadd.f32 %v1159_v3, %v1141_v15  ;;  %v1154_v3 = vmul.f32 %v3053_v42, %v1138_v16 }
 0x30c   : > { %v1555_v57 = vld [vmem:[#allocation3 + $0x10] sm:$0xff] }
 0x30d   : > { %1206 = vst.msk [vmem:[#allocation3 + $0x8] sm:$0xff] %vm610_vm0, %v1189_v2  ;;  %2371 = vrcp.f32 %v1555_v57 }
 0x30e   : > { %v1553_v51 = vld [vmem:[#allocation3] sm:$0xff] }
 0x30f   : > { %2373 = vrcp.f32 %v1553_v51 }
 0x310   : > { %v1169_v4 = vpop.xlane.xlu0 %1168 }
 0x311   : > { %v1194_v12 = vadd.f32 %v1169_v4, %v1146_v40 }
 0x312   : > { %v1556_v55 = vld [vmem:[#allocation3 + $0x18] sm:$0xff] }
 0x313   : > { %1211 = vst.msk [vmem:[#allocation3 + $0x30] sm:$0xff] %vm610_vm0, %v1194_v12  ;;  %2375 = vrcp.f32 %v1556_v55 }
 0x314   : > { %v1165_v37 = vpop.xlane.xlu0 %1164  ;;  %v1554_v20 = vld [vmem:[#allocation3 + $0x8] sm:$0xff] }
 0x315   : > { %v1192_v24 = vadd.f32 %v1165_v37, %v1144_v31  ;;  %2377 = vrcp.f32 %v1554_v20 }
 0x317   : > { %1209 = vst.msk [vmem:[#allocation3 + $0x20] sm:$0xff] %vm610_vm0, %v1192_v24 }
 0x31a   : > { %v2372_v28 = vpop.eup %2371  ;;  %v1559_v29 = vld [vmem:[#allocation3 + $0x30] sm:$0xff] }
 0x31b   : > { %1613 = vperm.xlu1 %2282, %v2372_v28   ;;  %2379 = vrcp.f32 %v1559_v29 }
 0x31c   : > { %v1171_v39 = vpop.xlane.xlu1 %1170  ;;  %v2374_v43 = vpop.eup %2373 }
 0x31d   : > { %v1195_v33 = vadd.f32 %v1171_v39, %v1147_v38 }
 0x31e   : > { %v1557_v45 = vld [vmem:[#allocation3 + $0x20] sm:$0xff] }
 0x31f   : > { %1212 = vst.msk [vmem:[#allocation3 + $0x38] sm:$0xff] %vm610_vm0, %v1195_v33  ;;  %1603 = vperm.xlu1 %2282, %v2374_v43   ;;  %2381 = vrcp.f32 %v1557_v45 }
 0x320   : > { %v2376_v52 = vpop.eup %2375  ;;  %v1167_v54 = vpop.xlane.xlu1 %1166 }
 0x321   : > { %v1193_v47 = vadd.f32 %v1167_v54, %v1145_v49  ;;  %1618 = vperm.xlu0 %2281, %v2376_v52  }
 0x322   : > { %v2378_v25 = vpop.eup %2377 }
 0x323   : > { %1210 = vst.msk [vmem:[#allocation3 + $0x28] sm:$0xff] %vm610_vm0, %v1193_v47 }
 0x324   : > { %v1177_v11 = vpop.xlane.xlu0 %1176  ;;  %v1179_v19 = vpop.xlane.xlu1 %1178 }
 0x325   : > { %v1198_v30 = vadd.f32 %v1177_v11, %v1150_v61  ;;  %v1199_v48 = vadd.f32 %v1179_v19, %v1151_v63  ;;  %1608 = vperm.xlu0 %2281, %v2378_v25  }
 0x326   : > { %v1560_v0 = vld [vmem:[#allocation3 + $0x38] sm:$0xff] }
 0x327   : > { %1215 = vst.msk [vmem:[#allocation3 + $0x50] sm:$0xff] %vm610_vm0, %v1198_v30  ;;  %1216 = vst.msk [vmem:[#allocation3 + $0x58] sm:$0xff] %vm610_vm0, %v1199_v48  ;;  %2383 = vrcp.f32 %v1560_v0 }
 0x328   : > { %v2380_v53 = vpop.eup %2379  ;;  %v1173_v27 = vpop.xlane.xlu0 %1172 }
 0x329   : > { %v1175_v46 = vpop.xlane.xlu1 %1174  ;;  %v1196_v10 = vadd.f32 %v1173_v27, %v1148_v8  ;;  %1633 = vperm.xlu1 %2282, %v2380_v53  }
 0x32a   : > { %v1197_v32 = vadd.f32 %v1175_v46, %v1149_v5  ;;  %v1558_v44 = vld [vmem:[#allocation3 + $0x28] sm:$0xff] }
 0x32b   : > { %1213 = vst.msk [vmem:[#allocation3 + $0x40] sm:$0xff] %vm610_vm0, %v1196_v10  ;;  %2385 = vrcp.f32 %v1558_v44 }
 0x32c   : > { %1214 = vst.msk [vmem:[#allocation3 + $0x48] sm:$0xff] %vm610_vm0, %v1197_v32  ;;  %v2382_v22 = vpop.eup %2381  ;;  %v1181_v17 = vpop.xlane.xlu0 %1180 }
 0x32d   : > { %v1187_v50 = vpop.xlane.xlu1 %1186  ;;  %v1200_v1 = vadd.f32 %v1181_v17, %v1152_v21  ;;  %1623 = vperm.xlu1 %2282, %v2382_v22  }
 0x32e   : > { %v1203_v62 = vadd.f32 %v1187_v50, %v1155_v58  ;;  %v1563_v13 = vld [vmem:[#allocation3 + $0x50] sm:$0xff]  ;;  %v1564_v15 = vld [vmem:[#allocation3 + $0x58] sm:$0xff] }
 0x32f   : > { %1217 = vst.msk [vmem:[#allocation3 + $0x60] sm:$0xff] %vm610_vm0, %v1200_v1  ;;  %2387 = vrcp.f32 %v1563_v13 }
 0x330   : > { %1220 = vst.msk [vmem:[#allocation3 + $0x78] sm:$0xff] %vm610_vm0, %v1203_v62  ;;  %v1185_v34 = vpop.xlane.xlu0 %1184  ;;  %2389 = vrcp.f32 %v1564_v15 }
 0x331   : > { %v1183_v2 = vpop.xlane.xlu1 %1182  ;;  %v1202_v7 = vadd.f32 %v1185_v34, %v1154_v3 }
 0x332   : > { %v1201_v57 = vadd.f32 %v1183_v2, %v1153_v14  ;;  %v1561_v51 = vld [vmem:[#allocation3 + $0x40] sm:$0xff] }
 0x333   : > { %v1562_v40 = vld [vmem:[#allocation3 + $0x48] sm:$0xff]  ;;  %1219 = vst.msk [vmem:[#allocation3 + $0x70] sm:$0xff] %vm610_vm0, %v1202_v7  ;;  %2391 = vrcp.f32 %v1561_v51 }
 0x334   : > { %1218 = vst.msk [vmem:[#allocation3 + $0x68] sm:$0xff] %vm610_vm0, %v1201_v57  ;;  %v2384_v4 = vpop.eup %2383  ;;  %2393 = vrcp.f32 %v1562_v40 }
 0x335   : > { %1638 = vperm.xlu0 %2281, %v2384_v4   ;;  %v1245_v39 = vpop.permute.xlu1 %1244 }
 0x336   : > { %v1565_v60 = vld [vmem:[#allocation3 + $0x60] sm:$0xff]  ;;  %v1318_v10 = vmul.f32 0.0, %v1245_v39 }
 0x337   : > { %2395 = vrcp.f32 %v1565_v60  ;;  %v1568_v37 = vld [vmem:[#allocation3 + $0x78] sm:$0xff] }
 0x338   : > { %v2386_v42 = vpop.eup %2385  ;;  %v1240_v26 = vpop.permute.xlu0 %1239 }
 0x339   : > { %1628 = vperm.xlu0 %2281, %v2386_v42   ;;  %v1250_v33 = vpop.permute.xlu1 %1249  ;;  %v1317_v32 = vmul.f32 0.0, %v1240_v26 }
 0x33a   : > { %v1567_v59 = vld [vmem:[#allocation3 + $0x70] sm:$0xff]  ;;  %v1319_v5 = vmul.f32 0.0, %v1250_v33 }
 0x33b   : > { %v1566_v12 = vld [vmem:[#allocation3 + $0x68] sm:$0xff]  ;;  %2397 = vrcp.f32 %v1567_v59 }
 0x33c   : > { %v2388_v55 = vpop.eup %2387  ;;  %2399 = vrcp.f32 %v1566_v12  ;;  %v1255_v43 = vpop.permute.xlu0 %1254 }
 0x33d   : > { %v2390_v31 = vpop.eup %2389  ;;  %1653 = vperm.xlu1 %2282, %v2388_v55   ;;  %2401 = vrcp.f32 %v1568_v37  ;;  %v1260_v45 = vpop.permute.xlu1 %1259  ;;  %v1320_v53 = vmul.f32 0.0, %v1255_v43 }
 0x33e   : > { %1658 = vperm.xlu0 %2281, %v2390_v31   ;;  %v1321_v60 = vmul.f32 0.0, %v1260_v45 }
 0x340   : > { %v2392_v20 = vpop.eup %2391  ;;  %v1265_v49 = vpop.permute.xlu0 %1264 }
 0x341   : > { %v2394_v24 = vpop.eup %2393  ;;  %1643 = vperm.xlu1 %2282, %v2392_v20   ;;  %v1270_v52 = vpop.permute.xlu1 %1269  ;;  %v1322_v42 = vmul.f32 0.0, %v1265_v49 }
 0x342   : > { %1648 = vperm.xlu0 %2281, %v2394_v24   ;;  %v1323_v2 = vmul.f32 0.0, %v1270_v52 }
 0x344   : > { %v2396_v23 = vpop.eup %2395  ;;  %v1275_v54 = vpop.permute.xlu0 %1274 }
 0x345   : > { %1663 = vperm.xlu1 %2282, %v2396_v23   ;;  %v3089_v56 = vpop.permute.xlu1 %1279  ;;  %v2175_v47 = vpop.f32.mrf.mxu1  ;;  %v1324_v7 = vmul.f32 0.0, %v1275_v54 }
 0x346   : > { %v1504_v46 = vadd.f32 %v2175_v47, %v1319_v5  ;;  %v1325_v52 = vmul.f32 0.0, %v3089_v56 }
 0x347   : > { %v1439_v63 = vpop.f32.mrf.mxu1 }
 0x348   : > { %v2398_v28 = vpop.eup %2397  ;;  %v3091_v41 = vpop.permute.xlu0 %1284  ;;  %v1502_v17 = vadd.f32 %v1439_v63, %v1317_v32 }
 0x349   : > { %v2400_v29 = vpop.eup %2399  ;;  %1673 = vperm.xlu1 %2282, %v2398_v28   ;;  %v1290_v61 = vpop.permute.xlu1 %1289 }
 0x34a   : > { %1668 = vperm.xlu0 %2281, %v2400_v29   ;;  %v2402_v38 = vpop.eup %2401  ;;  %v2176_v19 = vpop.f32.mrf.mxu1  ;;  %v1327_v28 = vmul.f32 0.0, %v1290_v61 }
 0x34b   : > { %v1505_v18 = vadd.f32 %v2176_v19, %v1320_v53  ;;  %v1326_v19 = vmul.f32 0.0, %v3091_v41 }
 0x34c   : > { %v3093_v25 = vpop.permute.xlu0 %1294  ;;  %v1442_v36 = vpop.f32.mrf.mxu1 }
 0x34d   : > { %v3097_v11 = vpop.permute.xlu1 %1299  ;;  %v1503_v50 = vadd.f32 %v1442_v36, %v1318_v10  ;;  %v1328_v26 = vmul.f32 0.0, %v3093_v25 }
 0x34e   : > { %1678 = vperm.xlu0 %2281, %v2402_v38   ;;  %v1329_v10 = vmul.f32 0.0, %v3097_v11 }
 0x350   : > { %v3101_v35 = vpop.permute.xlu0 %1304 }
 0x351   : > { %v3103_v30 = vpop.permute.xlu1 %1309  ;;  %v1330_v32 = vmul.f32 0.0, %v3101_v35 }
 0x354   : > { %v3105_v0 = vpop.permute.xlu0 %1314 }
 0x355   : > { %v2179_v48 = vpop.f32.mrf.mxu1 }
 0x356   : > { %v1508_v51 = vadd.f32 %v2179_v48, %v1323_v2 }
 0x357   : > { %v1455_v27 = vpop.f32.mrf.mxu1 }
 0x358   : > { %v1506_v37 = vadd.f32 %v1455_v27, %v1321_v60 }
 0x359   : > { %v2180_v44 = vpop.f32.mrf.mxu1 }
 0x35a   : > { %v1509_v40 = vadd.f32 %v2180_v44, %v1324_v7 }
 0x35b   : > { %v1458_v1 = vpop.f32.mrf.mxu1 }
 0x35c   : > { %v1507_v20 = vadd.f32 %v1458_v1, %v1322_v42 }
 0x35d   : > { %v2183_v3 = vpop.f32.mrf.mxu1 }
 0x35e   : > { %v1512_v33 = vadd.f32 %v2183_v3, %v1327_v28 }
 0x35f   : > { %v1471_v14 = vpop.f32.mrf.mxu1 }
 0x360   : > { %v1510_v36 = vadd.f32 %v1471_v14, %v1325_v52 }
 0x361   : > { %v2184_v57 = vpop.f32.mrf.mxu1 }
 0x362   : > { %v1513_v45 = vadd.f32 %v2184_v57, %v1328_v26 }
 0x363   : > { %v1474_v59 = vpop.f32.mrf.mxu1 }
 0x364   : > { %v1511_v48 = vadd.f32 %v1474_v59, %v1326_v19 }
 0x365   : > { %v2187_v29 = vpop.f32.mrf.mxu1 }
 0x367   : > { %v1487_v54 = vpop.f32.mrf.mxu1 }
 0x368   : > { %v1514_v41 = vadd.f32 %v1487_v54, %v1329_v10 }
 0x369   : > { %v2188_v25 = vpop.f32.mrf.mxu1 }
 0x396   : > { %v1614_v8 = vpop.permute.xlu1 %1613 }
 0x397   : > { %v1683_v21 = vmul.f32 %v1614_v8, %v1504_v46 }
 0x39a   : > { %v1604_v22 = vpop.permute.xlu1 %1603 }
 0x39b   : > { %v1681_v62 = vmul.f32 %v1604_v22, %v1502_v17  ;;  %v1332_v22 = vmul.f32 0.0, %v3105_v0 }
 0x39c   : > { %v1619_v6 = vpop.permute.xlu0 %1618 }
 0x39d   : > { %v1684_v58 = vmul.f32 %v1619_v6, %v1505_v18  ;;  %v1490_v6 = vpop.f32.mrf.mxu1  ;;  %v1517_v1 = vadd.f32 %v2188_v25, %v1332_v22 }
 0x39e   : > { %v1515_v44 = vadd.f32 %v1490_v6, %v1330_v32 }
 0x39f   : > { %v2054_v16 = vpack.c.bf16 %v1684_v58, %v1683_v21  ;;  %v1331_v58 = vmul.f32 0.0, %v3103_v30 }
 0x3a0   : > { %v1609_v9 = vpop.permute.xlu0 %1608 }
 0x3a1   : > { %2086 = vst [vmem:[%s3110_s18 + $0x8] sm:$0xff] %v2054_v16   ;;  %v1682_v13 = vmul.f32 %v1609_v9, %v1503_v50  ;;  %v1516_v9 = vadd.f32 %v2187_v29, %v1331_v58 }
 0x3a3   : > { %v2049_v15 = vpack.c.bf16 %v1682_v13, %v1681_v62 }
 0x3a4   : > { %v1634_v34 = vpop.permute.xlu1 %1633 }
 0x3a5   : > { %2050 = vst [vmem:[%s3110_s18] sm:$0xff] %v2049_v15   ;;  %v1687_v12 = vmul.f32 %v1634_v34, %v1508_v51 }
 0x3a8   : > { %v1624_v31 = vpop.permute.xlu1 %1623 }
 0x3a9   : > { %v1685_v38 = vmul.f32 %v1624_v31, %v1506_v37 }
 0x3b0   : > { %v1639_v4 = vpop.permute.xlu0 %1638 }
 0x3b1   : > { %v1688_v55 = vmul.f32 %v1639_v4, %v1509_v40 }
 0x3b3   : > { %v2064_v24 = vpack.c.bf16 %v1688_v55, %v1687_v12 }
 0x3b4   : > { %v1629_v23 = vpop.permute.xlu0 %1628 }
 0x3b5   : > { %2088 = vst [vmem:[%s3110_s18 + $0x18] sm:$0xff] %v2064_v24   ;;  %v1686_v39 = vmul.f32 %v1629_v23, %v1507_v20 }
 0x3b7   : > { %v2059_v43 = vpack.c.bf16 %v1686_v39, %v1685_v38 }
 0x3b8   : > { %v1654_v49 = vpop.permute.xlu1 %1653 }
 0x3b9   : > { %2087 = vst [vmem:[%s3110_s18 + $0x10] sm:$0xff] %v2059_v43   ;;  %v1659_v47 = vpop.permute.xlu0 %1658  ;;  %v1691_v63 = vmul.f32 %v1654_v49, %v1512_v33 }
 0x3ba   : > { %v1692_v61 = vmul.f32 %v1659_v47, %v1513_v45 }
 0x3bc   : > { %v2074_v8 = vpack.c.bf16 %v1692_v61, %v1691_v63  ;;  %v1644_v5 = vpop.permute.xlu1 %1643 }
 0x3bd   : > { %v1649_v53 = vpop.permute.xlu0 %1648  ;;  %v1689_v27 = vmul.f32 %v1644_v5, %v1510_v36 }
 0x3be   : > { %2090 = vst [vmem:[%s3110_s18 + $0x28] sm:$0xff] %v2074_v8   ;;  %v1690_v46 = vmul.f32 %v1649_v53, %v1511_v48 }
 0x3c0   : > { %v2069_v18 = vpack.c.bf16 %v1690_v46, %v1689_v27  ;;  %v1664_v56 = vpop.permute.xlu1 %1663 }
 0x3c1   : > { %v1693_v17 = vmul.f32 %v1664_v56, %v1514_v41 }
 0x3c2   : > { %2089 = vst [vmem:[%s3110_s18 + $0x20] sm:$0xff] %v2069_v18  }
 0x3c4   : > { %v1674_v16 = vpop.permute.xlu1 %1673 }
 0x3c5   : > { %v1669_v21 = vpop.permute.xlu0 %1668  ;;  %v1695_v11 = vmul.f32 %v1674_v16, %v1516_v9 }
 0x3c6   : > { %v1694_v50 = vmul.f32 %v1669_v21, %v1515_v44 }
 0x3c8   : > { %v2079_v62 = vpack.c.bf16 %v1694_v50, %v1693_v17 }
 0x3c9   : > { %v1679_v13 = vpop.permute.xlu0 %1678 }
 0x3ca   : > { %2091 = vst [vmem:[%s3110_s18 + $0x30] sm:$0xff] %v2079_v62   ;;  %v1696_v15 = vmul.f32 %v1679_v13, %v1517_v1 }
 0x3cc   : > { %v2084_v35 = vpack.c.bf16 %v1696_v15, %v1695_v11 }
 0x3ce   : > { %2092 = vst [vmem:[%s3110_s18 + $0x38] sm:$0xff] %v2084_v35  }
 0x3cf PF: > { %s13_s22 = sadd.s32 1, %s2489_s22   ;;  %s3186_s12 = smov %s2453_s13 }
 0x3d0   : > { %p10_p4 = scmp.ge.s32.totalorder %s13_s22, 6   ;;  %s3187_s13 = smov %s2619_s4 }
 0x3d1   : > { %s3188_s14 = smov %s2461_s15  ;;  %s3189_s15 = smov %s2607_s3 }
 0x3d2   : > { %s3190_s16 = smov %s2469_s17  ;;  %s3191_s17 = smov %s2604_s11 }
 0x3d3   : > { %s3192_s18 = smov %s2481_s20  ;;  %s3193_s19 = smov %s2485_s21 }
 0x3d4   : > { %s3194_s20 = smov %s3197_s23  ;;  %s3195_s21 = smov %s3201_s24 }
 0x3d5   :  { %12 = sbr.rel (!%p10_p4) target bundleno = 8 (0x8), region = 214 }

// kernel: vanilla_transformer_forward.11
= control target key start
LH: loop header
LB: loop body
LE: loop exit
PB: predicated region body
PF: predicated region fallthrough
CT: control target
= control target key end

     0   :  { %s1372_s15 = smov 0   ;;  %s1374_s16 = smov 0   ;;  %s1546_s0 = inlined_call_operand.vmem [shape: bf16[2,128,256], index: 0, kind: input, shape index: {}]   ;;  %s1547_s1 = inlined_call_operand.vmem [shape: bf16[2,2,128,128], index: 1, kind: input, shape index: {}]   ;;  %s1548_s2 = inlined_call_operand.vmem [shape: bf16[2,128,256], index: 2, kind: input, shape index: {}]   ;;  %s1549_s3 = inlined_call_operand.vmem [shape: f32[1,256], index: 3, kind: input, shape index: {}]   ;;  %s1550_s4 = inlined_call_operand.vmem [shape: bf16[2,128,256], index: 4, kind: output, shape index: {}]  }
   0x1   :  { %s1376_s17 = smov 0   ;;  %s1378_s18 = smov 0  }
   0x2   :  { %s1380_s19 = smov 0  }
   0x3 LB: > { %s26_s20 = sadd.s32 1, %s1335_s17  ;;  %s33_s21 = sadd.s32 1, %s1339_s18  ;;  %s1343_s19 = sphi %s1380_s19, %s14_s19   ;;  %s1339_s18 = sphi %s1378_s18, %s1554_s18   ;;  %s1335_s17 = sphi %s1376_s17, %s1553_s17   ;;  %s1331_s16 = sphi %s1374_s16, %s1552_s16   ;;  %s1327_s15 = sphi %s1372_s15, %s1551_s15  }
   0x4   : > { %p27_p0 = scmp.ge.s32.totalorder %s26_s20, 2  ;;  %p1142_p1 = scmp.ge.s32.totalorder %s1343_s19, 1 }
   0x5   : > { %p224_p2 = scmp.lt.s32.totalorder %s1343_s19, 5 }
   0x6   : > { %s1556_s20 = smov (%p27_p0, %s26_s20), 0  ;;  %s1558_s21 = smov (!%p27_p0, %s33_s21), %s1339_s18 }
   0x7   : > { %p225_p3 = pnand %p1142_p1, %p224_p2  ;;  %p35_p4 = scmp.ge.s32.totalorder %s1558_s21, 2 }
   0x8   : > { %p279_p5 = scmp.lt.s32.totalorder (!%p225_p3), %s1331_s16, 1  ;;  %p292_p6 = scmp.lt.s32.totalorder (!%p225_p3), %s1327_s15, 1 }
   0x9   : > { %s1560_s21 = smov (%p35_p4, %s1558_s21), 0  ;;  %228 = sbr.rel (%p225_p3) target bundleno = 339 (0x153), region = 36 }
   0xa   : > { %p1152_p7 = scmp.ne.s32.totalorder (!%p225_p3), %s1327_s15, 0 }
   0xe   : > { %s1562_s16 = smov (!%p279_p5, %s1331_s16), 1 }
   0xf   : > { %s293_s22 = scalar_select %p292_p6, %s1327_s15, 1 }
  0x10   : > { %s1196_s23 = sshll.u32 %s1562_s16, 7  ;;  %s1146_s24 = sshll.u32 %s1562_s16, 5 }
  0x11   : > { %s1409_s27 = scalar_lea.vmem %s1546_s0, %s1196_s23  ;;  %s1145_s28 = sshll.u32 %s293_s22, 4 }
  0x12   : > { %s299_s29 = sadd.s32 %s1146_s24, %s1145_s28  ;;  %s1197_s30 = sshll.u32 %s293_s22, 7 }
  0x13   : > { %s1147_s5 = sshll.u32 %s299_s29, 2  ;;  %s1414_s8 = scalar_lea.vmem %s1548_s2, %s1197_s30 }
  0x14   : > { %s1419_s11 = scalar_lea.vmem %s1547_s1, %s1147_s5  ;;  %s1424_s14 = scalar_lea.vmem %s1550_s4, %s1196_s23 }
  0x15   : > { %323 = sbr.rel (%p1152_p7) target bundleno = 43 (0x2b), region = 40 }
  0x1a   : > { %v1345_v0 = vmov 0.0  }
  0x1b   : > { %324 = vst [vmem:[#allocation2 + $0xb0] sm:$0xff] %v1345_v0  ;;  %325 = vst [vmem:[#allocation2] sm:$0xff] %v1345_v0 }
  0x1c   : > { %326 = vst [vmem:[#allocation2 + $0xd8] sm:$0xff] %v1345_v0  ;;  %327 = vst [vmem:[#allocation2 + $0x18] sm:$0xff] %v1345_v0 }
  0x1d   : > { %328 = vst [vmem:[#allocation2 + $0x50] sm:$0xff] %v1345_v0  ;;  %329 = vst [vmem:[#allocation2 + $0x68] sm:$0xff] %v1345_v0 }
  0x1e   : > { %330 = vst [vmem:[#allocation2 + $0x30] sm:$0xff] %v1345_v0  ;;  %331 = vst [vmem:[#allocation2 + $0x48] sm:$0xff] %v1345_v0 }
  0x1f   : > { %332 = vst [vmem:[#allocation2 + $0x80] sm:$0xff] %v1345_v0  ;;  %333 = vst [vmem:[#allocation2 + $0x88] sm:$0xff] %v1345_v0 }
  0x20   : > { %334 = vst [vmem:[#allocation2 + $0xe8] sm:$0xff] %v1345_v0  ;;  %335 = vst [vmem:[#allocation2 + $0xb8] sm:$0xff] %v1345_v0 }
  0x21   : > { %336 = vst [vmem:[#allocation2 + $0x60] sm:$0xff] %v1345_v0  ;;  %337 = vst [vmem:[#allocation2 + $0xf0] sm:$0xff] %v1345_v0 }
  0x22   : > { %338 = vst [vmem:[#allocation2 + $0x8] sm:$0xff] %v1345_v0  ;;  %339 = vst [vmem:[#allocation2 + $0x78] sm:$0xff] %v1345_v0 }
  0x23   : > { %340 = vst [vmem:[#allocation2 + $0x38] sm:$0xff] %v1345_v0  ;;  %341 = vst [vmem:[#allocation2 + $0x58] sm:$0xff] %v1345_v0 }
  0x24   : > { %342 = vst [vmem:[#allocation2 + $0x40] sm:$0xff] %v1345_v0  ;;  %343 = vst [vmem:[#allocation2 + $0xc8] sm:$0xff] %v1345_v0 }
  0x25   : > { %344 = vst [vmem:[#allocation2 + $0xe0] sm:$0xff] %v1345_v0  ;;  %345 = vst [vmem:[#allocation2 + $0x90] sm:$0xff] %v1345_v0 }
  0x26   : > { %346 = vst [vmem:[#allocation2 + $0x70] sm:$0xff] %v1345_v0  ;;  %347 = vst [vmem:[#allocation2 + $0xc0] sm:$0xff] %v1345_v0 }
  0x27   : > { %348 = vst [vmem:[#allocation2 + $0xa8] sm:$0xff] %v1345_v0  ;;  %349 = vst [vmem:[#allocation2 + $0xd0] sm:$0xff] %v1345_v0 }
  0x28   : > { %350 = vst [vmem:[#allocation2 + $0x10] sm:$0xff] %v1345_v0  ;;  %351 = vst [vmem:[#allocation2 + $0x28] sm:$0xff] %v1345_v0 }
  0x29   : > { %352 = vst [vmem:[#allocation2 + $0xa0] sm:$0xff] %v1345_v0  ;;  %353 = vst [vmem:[#allocation2 + $0xf8] sm:$0xff] %v1345_v0 }
  0x2a   : > { %354 = vst [vmem:[#allocation2 + $0x20] sm:$0xff] %v1345_v0  ;;  %355 = vst [vmem:[#allocation2 + $0x98] sm:$0xff] %v1345_v0 }
  0x2b PF: > { %v1273_v1 = vld [vmem:[%s1414_s8 + $0x74] ss:$8 sps:$4 sm:$0xff]   ;;  %v1275_v2 = vld [vmem:[%s1414_s8 + $0x70] ss:$8 sps:$4 sm:$0xff]   ;;  %v1346_v3 = vmov 0   ;;  %v1297_v18 = vld [vmem:[%s1419_s11] sm:$0xff]  }
  0x2c   : > { %580 = vmatprep.mubr.bf16.mxu0 %v1346_v3  ;;  %620 = vmatprep.mubr.bf16.mxu1 %v1346_v3  ;;  %v1276_v4 = vld [vmem:[%s1414_s8 + $0x64] ss:$8 sps:$4 sm:$0xff]   ;;  %v1278_v5 = vld [vmem:[%s1414_s8 + $0x60] ss:$8 sps:$4 sm:$0xff]   ;;  %v1279_v6 = vld [vmem:[%s1414_s8 + $0x54] ss:$8 sps:$4 sm:$0xff]  }
  0x2d   : > { %548 = vmatprep.subr.bf16.mxu0 %v1273_v1  ;;  %1215 = vmatprep.subr.bf16.mxu1 %v1273_v1  ;;  %v1281_v7 = vld [vmem:[%s1414_s8 + $0x50] ss:$8 sps:$4 sm:$0xff]   ;;  %v1282_v8 = vld [vmem:[%s1414_s8 + $0x44] ss:$8 sps:$4 sm:$0xff]   ;;  %v1284_v9 = vld [vmem:[%s1414_s8 + $0x40] ss:$8 sps:$4 sm:$0xff]  }
  0x2e   : > { %549 = vmatpush1.bf16.msra.mxu0 %v1275_v2  ;;  %1223 = vmatpush1.bf16.msra.mxu1 %v1275_v2  ;;  %v1285_v10 = vld [vmem:[%s1414_s8 + $0x34] ss:$8 sps:$4 sm:$0xff]   ;;  %v1287_v11 = vld [vmem:[%s1414_s8 + $0x30] ss:$8 sps:$4 sm:$0xff]   ;;  %v1288_v12 = vld [vmem:[%s1414_s8 + $0x24] ss:$8 sps:$4 sm:$0xff]  }
  0x2f   : > { %550 = vmatprep.subr.bf16.mxu0 %v1276_v4  ;;  %1216 = vmatprep.subr.bf16.mxu1 %v1276_v4  ;;  %v1290_v13 = vld [vmem:[%s1414_s8 + $0x20] ss:$8 sps:$4 sm:$0xff]   ;;  %v1291_v14 = vld [vmem:[%s1414_s8 + $0x14] ss:$8 sps:$4 sm:$0xff]   ;;  %v1293_v15 = vld [vmem:[%s1414_s8 + $0x10] ss:$8 sps:$4 sm:$0xff]  }
  0x30   : > { %v1294_v16 = vld [vmem:[%s1414_s8 + $0x4] ss:$8 sps:$4 sm:$0xff]   ;;  %v1296_v17 = vld [vmem:[%s1414_s8] ss:$8 sps:$4 sm:$0xff]   ;;  %v1301_v22 = vld [vmem:[%s1419_s11 + $0x10] sm:$0xff]   ;;  %p1177_p8 = scmp.ne.s32.totalorder %s1327_s15, 1 }
  0x31   : > { %v1298_v19 = vld [vmem:[%s1419_s11 + $0x20] sm:$0xff]   ;;  %v1299_v20 = vld [vmem:[%s1419_s11 + $0x8] sm:$0xff]   ;;  %v1302_v23 = vld [vmem:[%s1419_s11 + $0x30] sm:$0xff]  }
  0x32   : > { %551 = vmatpush1.bf16.msra.mxu0 %v1278_v5  ;;  %1224 = vmatpush1.bf16.msra.mxu1 %v1278_v5  ;;  %v1300_v21 = vld [vmem:[%s1419_s11 + $0x28] sm:$0xff]   ;;  %v1303_v24 = vld [vmem:[%s1419_s11 + $0x18] sm:$0xff]   ;;  %v356_v26 = vld [vmem:[#allocation2 + $0xb0] sm:$0xff] }
  0x33   : > { %552 = vmatprep.subr.bf16.mxu0 %v1279_v6  ;;  %1217 = vmatprep.subr.bf16.mxu1 %v1279_v6  ;;  %v1304_v25 = vld [vmem:[%s1419_s11 + $0x38] sm:$0xff]   ;;  %v357_v30 = vld [vmem:[#allocation2] sm:$0xff]  ;;  %v375_v43 = vld [vmem:[#allocation2 + $0xc8] sm:$0xff] }
  0x34   : > { %v372_v27 = vld [vmem:[#allocation2 + $0x38] sm:$0xff]  ;;  %v374_v37 = vld [vmem:[#allocation2 + $0x40] sm:$0xff]  ;;  %v360_v48 = vld [vmem:[#allocation2 + $0x50] sm:$0xff] }
  0x35   : > { %v373_v31 = vld [vmem:[#allocation2 + $0x58] sm:$0xff]  ;;  %v376_v49 = vld [vmem:[#allocation2 + $0xe0] sm:$0xff]  ;;  %v361_v54 = vld [vmem:[#allocation2 + $0x68] sm:$0xff] }
  0x36   : > { %553 = vmatpush1.bf16.msra.mxu0 %v1281_v7  ;;  %1225 = vmatpush1.bf16.msra.mxu1 %v1281_v7  ;;  %v358_v36 = vld [vmem:[#allocation2 + $0xd8] sm:$0xff]  ;;  %v377_v55 = vld [vmem:[#allocation2 + $0x90] sm:$0xff]  ;;  %v363_v2 = vld [vmem:[#allocation2 + $0x48] sm:$0xff] }
  0x37   : > { %554 = vmatprep.subr.bf16.mxu0 %v1282_v8  ;;  %1218 = vmatprep.subr.bf16.mxu1 %v1282_v8  ;;  %v359_v42 = vld [vmem:[#allocation2 + $0x18] sm:$0xff]  ;;  %v362_v60 = vld [vmem:[#allocation2 + $0x30] sm:$0xff]  ;;  %v364_v8 = vld [vmem:[#allocation2 + $0x80] sm:$0xff] }
  0x38   : > { %v378_v61 = vld [vmem:[#allocation2 + $0x70] sm:$0xff] }
  0x3a   : > { %555 = vmatpush1.bf16.msra.mxu0 %v1284_v9  ;;  %1226 = vmatpush1.bf16.msra.mxu1 %v1284_v9  ;;  %v380_v9 = vld [vmem:[#allocation2 + $0xa8] sm:$0xff] }
  0x3b   : > { %556 = vmatprep.subr.bf16.mxu0 %v1285_v10  ;;  %1219 = vmatprep.subr.bf16.mxu1 %v1285_v10 }
  0x3e   : > { %557 = vmatpush1.bf16.msra.mxu0 %v1287_v11  ;;  %1227 = vmatpush1.bf16.msra.mxu1 %v1287_v11 }
  0x3f   : > { %558 = vmatprep.subr.bf16.mxu0 %v1288_v12  ;;  %1220 = vmatprep.subr.bf16.mxu1 %v1288_v12 }
  0x42   : > { %559 = vmatpush1.bf16.msra.mxu0 %v1290_v13  ;;  %1228 = vmatpush1.bf16.msra.mxu1 %v1290_v13 }
  0x43   : > { %560 = vmatprep.subr.bf16.mxu0 %v1291_v14  ;;  %1221 = vmatprep.subr.bf16.mxu1 %v1291_v14  ;;  %v365_v14 = vld [vmem:[#allocation2 + $0x88] sm:$0xff] }
  0x46   : > { %561 = vmatpush1.bf16.msra.mxu0 %v1293_v15  ;;  %1229 = vmatpush1.bf16.msra.mxu1 %v1293_v15  ;;  %v381_v15 = vld [vmem:[#allocation2 + $0xd0] sm:$0xff] }
  0x47   : > { %562 = vmatprep.subr.bf16.mxu0 %v1294_v16  ;;  %1222 = vmatprep.subr.bf16.mxu1 %v1294_v16 }
  0x4a   : > { %563 = vmatpush1.bf16.msra.mxu0 %v1296_v17  ;;  %1230 = vmatpush1.bf16.msra.mxu1 %v1296_v17 }
  0x4d   : > { %581 = vmatmul.mubr.bf16.vlgmr.msra.gmra.mxu0 %v1297_v18  ;;  %621 = vmatmul.mubr.bf16.vlgmr.msra.gmra.mxu1 %v1298_v19 }
  0x4e   : > { %590 = vmatprep.mubr.bf16.mxu0 %v1346_v3  ;;  %630 = vmatprep.mubr.bf16.mxu1 %v1346_v3 }
  0x55   : > { %591 = vmatmul.mubr.bf16.gmra.mxu0 %v1299_v20  ;;  %631 = vmatmul.mubr.bf16.gmra.mxu1 %v1300_v21  ;;  %v366_v20 = vld [vmem:[#allocation2 + $0xe8] sm:$0xff]  ;;  %v382_v21 = vld [vmem:[#allocation2 + $0x10] sm:$0xff] }
  0x56   : > { %600 = vmatprep.mubr.bf16.mxu0 %v1346_v3  ;;  %640 = vmatprep.mubr.bf16.mxu1 %v1346_v3 }
  0x5d   : > { %601 = vmatmul.mubr.bf16.gmra.mxu0 %v1301_v22  ;;  %641 = vmatmul.mubr.bf16.gmra.mxu1 %v1302_v23 }
  0x5e   : > { %610 = vmatprep.mubr.bf16.mxu0 %v1346_v3  ;;  %650 = vmatprep.mubr.bf16.mxu1 %v1346_v3  ;;  %v379_v3 = vld [vmem:[#allocation2 + $0xc0] sm:$0xff] }
  0x65   : > { %611 = vmatmul.mubr.bf16.gmra.mxu0 %v1303_v24  ;;  %651 = vmatmul.mubr.bf16.gmra.mxu1 %v1304_v25 }
 0x10d   : > { %v582_v28 = vpop.f32.mrf.mxu0  ;;  %v622_v29 = vpop.f32.mrf.mxu1 }
 0x10e   : > { %v661_v32 = vadd.f32 %v582_v28, %v356_v26  ;;  %v677_v33 = vadd.f32 %v622_v29, %v372_v27  ;;  %v367_v26 = vld [vmem:[#allocation2 + $0xb8] sm:$0xff]  ;;  %v383_v27 = vld [vmem:[#allocation2 + $0x28] sm:$0xff] }
 0x10f   : > { %v584_v34 = vpop.f32.mrf.mxu0  ;;  %v624_v35 = vpop.f32.mrf.mxu1 }
 0x110   : > { %693 = vst [vmem:[#allocation2 + $0xb0] sm:$0xff] %v661_v32  ;;  %709 = vst [vmem:[#allocation2 + $0x38] sm:$0xff] %v677_v33  ;;  %v662_v38 = vadd.f32 %v584_v34, %v357_v30  ;;  %v678_v39 = vadd.f32 %v624_v35, %v373_v31  ;;  %v368_v32 = vld [vmem:[#allocation2 + $0x60] sm:$0xff] }
 0x111   : > { %v586_v40 = vpop.f32.mrf.mxu0  ;;  %v626_v41 = vpop.f32.mrf.mxu1  ;;  %v384_v33 = vld [vmem:[#allocation2 + $0xa0] sm:$0xff] }
 0x112   : > { %694 = vst [vmem:[#allocation2] sm:$0xff] %v662_v38  ;;  %710 = vst [vmem:[#allocation2 + $0x58] sm:$0xff] %v678_v39  ;;  %v663_v44 = vadd.f32 %v586_v40, %v358_v36  ;;  %v679_v45 = vadd.f32 %v626_v41, %v374_v37  ;;  %v369_v38 = vld [vmem:[#allocation2 + $0xf0] sm:$0xff]  ;;  %v385_v39 = vld [vmem:[#allocation2 + $0xf8] sm:$0xff] }
 0x113   : > { %v588_v46 = vpop.f32.mrf.mxu0  ;;  %v628_v47 = vpop.f32.mrf.mxu1 }
 0x114   : > { %695 = vst [vmem:[#allocation2 + $0xd8] sm:$0xff] %v663_v44  ;;  %711 = vst [vmem:[#allocation2 + $0x40] sm:$0xff] %v679_v45  ;;  %v664_v50 = vadd.f32 %v588_v46, %v359_v42  ;;  %v680_v51 = vadd.f32 %v628_v47, %v375_v43  ;;  %v370_v44 = vld [vmem:[#allocation2 + $0x8] sm:$0xff]  ;;  %v386_v45 = vld [vmem:[#allocation2 + $0x20] sm:$0xff] }
 0x115   : > { %v592_v52 = vpop.f32.mrf.mxu0  ;;  %v632_v53 = vpop.f32.mrf.mxu1 }
 0x116   : > { %696 = vst [vmem:[#allocation2 + $0x18] sm:$0xff] %v664_v50  ;;  %712 = vst [vmem:[#allocation2 + $0xc8] sm:$0xff] %v680_v51  ;;  %v665_v56 = vadd.f32 %v592_v52, %v360_v48  ;;  %v681_v57 = vadd.f32 %v632_v53, %v376_v49  ;;  %v371_v50 = vld [vmem:[#allocation2 + $0x78] sm:$0xff] }
 0x117   : > { %v594_v58 = vpop.f32.mrf.mxu0  ;;  %v634_v59 = vpop.f32.mrf.mxu1  ;;  %v387_v51 = vld [vmem:[#allocation2 + $0x98] sm:$0xff] }
 0x118   : > { %697 = vst [vmem:[#allocation2 + $0x50] sm:$0xff] %v665_v56  ;;  %713 = vst [vmem:[#allocation2 + $0xe0] sm:$0xff] %v681_v57  ;;  %v666_v62 = vadd.f32 %v594_v58, %v361_v54  ;;  %v682_v63 = vadd.f32 %v634_v59, %v377_v55 }
 0x119   : > { %v596_v0 = vpop.f32.mrf.mxu0  ;;  %v636_v1 = vpop.f32.mrf.mxu1 }
 0x11a   : > { %698 = vst [vmem:[#allocation2 + $0x68] sm:$0xff] %v666_v62  ;;  %714 = vst [vmem:[#allocation2 + $0x90] sm:$0xff] %v682_v63  ;;  %v667_v4 = vadd.f32 %v596_v0, %v362_v60  ;;  %v683_v5 = vadd.f32 %v636_v1, %v378_v61 }
 0x11b   : > { %v598_v6 = vpop.f32.mrf.mxu0  ;;  %v638_v7 = vpop.f32.mrf.mxu1 }
 0x11c   : > { %699 = vst [vmem:[#allocation2 + $0x30] sm:$0xff] %v667_v4  ;;  %715 = vst [vmem:[#allocation2 + $0x70] sm:$0xff] %v683_v5  ;;  %v668_v10 = vadd.f32 %v598_v6, %v363_v2  ;;  %v684_v11 = vadd.f32 %v638_v7, %v379_v3 }
 0x11d   : > { %v602_v12 = vpop.f32.mrf.mxu0  ;;  %v642_v13 = vpop.f32.mrf.mxu1 }
 0x11e   : > { %700 = vst [vmem:[#allocation2 + $0x48] sm:$0xff] %v668_v10  ;;  %716 = vst [vmem:[#allocation2 + $0xc0] sm:$0xff] %v684_v11  ;;  %v669_v16 = vadd.f32 %v602_v12, %v364_v8  ;;  %v685_v17 = vadd.f32 %v642_v13, %v380_v9 }
 0x11f   : > { %v604_v18 = vpop.f32.mrf.mxu0  ;;  %v644_v19 = vpop.f32.mrf.mxu1 }
 0x120   : > { %701 = vst [vmem:[#allocation2 + $0x80] sm:$0xff] %v669_v16  ;;  %717 = vst [vmem:[#allocation2 + $0xa8] sm:$0xff] %v685_v17  ;;  %v670_v22 = vadd.f32 %v604_v18, %v365_v14  ;;  %v686_v23 = vadd.f32 %v644_v19, %v381_v15 }
 0x121   : > { %v606_v24 = vpop.f32.mrf.mxu0  ;;  %v646_v25 = vpop.f32.mrf.mxu1 }
 0x122   : > { %702 = vst [vmem:[#allocation2 + $0x88] sm:$0xff] %v670_v22  ;;  %718 = vst [vmem:[#allocation2 + $0xd0] sm:$0xff] %v686_v23  ;;  %v671_v28 = vadd.f32 %v606_v24, %v366_v20  ;;  %v687_v29 = vadd.f32 %v646_v25, %v382_v21 }
 0x123   : > { %v608_v30 = vpop.f32.mrf.mxu0  ;;  %v648_v31 = vpop.f32.mrf.mxu1 }
 0x124   : > { %703 = vst [vmem:[#allocation2 + $0xe8] sm:$0xff] %v671_v28  ;;  %719 = vst [vmem:[#allocation2 + $0x10] sm:$0xff] %v687_v29  ;;  %v672_v34 = vadd.f32 %v608_v30, %v367_v26  ;;  %v688_v35 = vadd.f32 %v648_v31, %v383_v27 }
 0x125   : > { %v612_v36 = vpop.f32.mrf.mxu0  ;;  %v652_v37 = vpop.f32.mrf.mxu1 }
 0x126   : > { %704 = vst [vmem:[#allocation2 + $0xb8] sm:$0xff] %v672_v34  ;;  %720 = vst [vmem:[#allocation2 + $0x28] sm:$0xff] %v688_v35  ;;  %v673_v40 = vadd.f32 %v612_v36, %v368_v32  ;;  %v689_v41 = vadd.f32 %v652_v37, %v384_v33 }
 0x127   : > { %v614_v42 = vpop.f32.mrf.mxu0  ;;  %v654_v43 = vpop.f32.mrf.mxu1 }
 0x128   : > { %705 = vst [vmem:[#allocation2 + $0x60] sm:$0xff] %v673_v40  ;;  %721 = vst [vmem:[#allocation2 + $0xa0] sm:$0xff] %v689_v41  ;;  %v674_v46 = vadd.f32 %v614_v42, %v369_v38  ;;  %v690_v47 = vadd.f32 %v654_v43, %v385_v39 }
 0x129   : > { %v616_v48 = vpop.f32.mrf.mxu0  ;;  %v656_v49 = vpop.f32.mrf.mxu1 }
 0x12a   : > { %706 = vst [vmem:[#allocation2 + $0xf0] sm:$0xff] %v674_v46  ;;  %722 = vst [vmem:[#allocation2 + $0xf8] sm:$0xff] %v690_v47  ;;  %v675_v52 = vadd.f32 %v616_v48, %v370_v44  ;;  %v691_v53 = vadd.f32 %v656_v49, %v386_v45  ;;  %728 = sbr.rel (%p1177_p8) target bundleno = 339 (0x153), region = 44 }
 0x12b   : > { %v618_v54 = vpop.f32.mrf.mxu0  ;;  %v658_v55 = vpop.f32.mrf.mxu1 }
 0x12c   : > { %707 = vst [vmem:[#allocation2 + $0x8] sm:$0xff] %v675_v52  ;;  %723 = vst [vmem:[#allocation2 + $0x20] sm:$0xff] %v691_v53  ;;  %v676_v56 = vadd.f32 %v618_v54, %v371_v50  ;;  %v692_v57 = vadd.f32 %v658_v55, %v387_v51 }
 0x12e   : > { %708 = vst [vmem:[#allocation2 + $0x78] sm:$0xff] %v676_v56  ;;  %724 = vst [vmem:[#allocation2 + $0x98] sm:$0xff] %v692_v57 }
 0x12f   : > { %v729_v58 = vld [vmem:[%s1409_s27] sm:$0xff]  ;;  %v777_v59 = vld [vmem:[#allocation2 + $0xb0] sm:$0xff]  ;;  %v843_v61 = vlaneseq  ;;  %v730_v0 = vld [vmem:[%s1409_s27 + $0x8] sm:$0xff] }
 0x130   : > { %v778_v60 = vld [vmem:[#allocation2] sm:$0xff]  ;;  %v745_v62 = vunpack.c.l.bf16 %v729_v58  ;;  %v746_v63 = vunpack.c.h.bf16 %v729_v58  ;;  %v779_v1 = vld [vmem:[#allocation2 + $0xd8] sm:$0xff]  ;;  %v747_v3 = vunpack.c.l.bf16 %v730_v0  ;;  %v748_v4 = vunpack.c.h.bf16 %v730_v0  ;;  %v731_v6 = vld [vmem:[%s1409_s27 + $0x10] sm:$0xff] }
 0x131   : > { %v844_v2 = vshrl.u32 %v843_v61, 7  ;;  %v780_v5 = vld [vmem:[#allocation2 + $0x18] sm:$0xff]  ;;  %v781_v7 = vld [vmem:[#allocation2 + $0x50] sm:$0xff]  ;;  %v841_v10 = vld [vmem:[%s1549_s3] sm:$0x3]  ;;  %v749_v11 = vunpack.c.l.bf16 %v731_v6  ;;  %v750_v12 = vunpack.c.h.bf16 %v731_v6 }
 0x132   : > { %v809_v8 = vadd.f32 %v777_v59, %v745_v62  ;;  %v810_v9 = vadd.f32 %v778_v60, %v746_v63  ;;  %v782_v13 = vld [vmem:[#allocation2 + $0x68] sm:$0xff]  ;;  %v732_v14 = vld [vmem:[%s1409_s27 + $0x18] sm:$0xff]  ;;  %v811_v17 = vadd.f32 %v779_v1, %v747_v3  ;;  %v812_v18 = vadd.f32 %v780_v5, %v748_v4  ;;  %v783_v19 = vld [vmem:[#allocation2 + $0x30] sm:$0xff] }
 0x133   : > { %v845_v15 = vsub.s32 0, %v844_v2  ;;  %v849_v16 = vsub.s32 1, %v844_v2  ;;  %v784_v20 = vld [vmem:[#allocation2 + $0x48] sm:$0xff]  ;;  %v733_v21 = vld [vmem:[%s1409_s27 + $0x20] sm:$0xff]  ;;  %v813_v22 = vadd.f32 %v781_v7, %v749_v11  ;;  %v814_v23 = vadd.f32 %v782_v13, %v750_v12  ;;  %v788_v42 = vld [vmem:[#allocation2 + $0xb8] sm:$0xff] }
 0x134   : > { %v751_v24 = vunpack.c.l.bf16 %v732_v14  ;;  %v752_v25 = vunpack.c.h.bf16 %v732_v14  ;;  %v734_v26 = vld [vmem:[%s1409_s27 + $0x28] sm:$0xff]  ;;  %v753_v29 = vunpack.c.l.bf16 %v733_v21  ;;  %v754_v30 = vunpack.c.h.bf16 %v733_v21  ;;  %v785_v33 = vld [vmem:[#allocation2 + $0x80] sm:$0xff]  ;;  %v735_v47 = vld [vmem:[%s1409_s27 + $0x30] sm:$0xff] }
 0x135   : > { %v1469_v27 = vrot.slane %v841_v10, %v845_v15  ;;  %v1471_v28 = vrot.slane %v841_v10, %v849_v16  ;;  %v786_v34 = vld [vmem:[#allocation2 + $0x88] sm:$0xff]  ;;  %v755_v35 = vunpack.c.l.bf16 %v734_v26  ;;  %v756_v36 = vunpack.c.h.bf16 %v734_v26  ;;  %v736_v52 = vld [vmem:[%s1409_s27 + $0x38] sm:$0xff]  ;;  %v789_v57 = vld [vmem:[#allocation2 + $0x60] sm:$0xff] }
 0x136   : > { %v815_v31 = vadd.f32 %v783_v19, %v751_v24  ;;  %v816_v32 = vadd.f32 %v784_v20, %v752_v25  ;;  %v787_v41 = vld [vmem:[#allocation2 + $0xe8] sm:$0xff]  ;;  %v817_v50 = vadd.f32 %v785_v33, %v753_v29  ;;  %v818_v51 = vadd.f32 %v786_v34, %v754_v30  ;;  %v790_v58 = vld [vmem:[#allocation2 + $0xf0] sm:$0xff]  ;;  %v737_v59 = vld [vmem:[%s1409_s27 + $0x40] sm:$0xff] }
 0x137   : > { %v853_v37 = vadd.f32 %v1469_v27, %v809_v8  ;;  %v854_v38 = vadd.f32 %v1471_v28, %v810_v9  ;;  %v855_v39 = vadd.f32 %v1469_v27, %v811_v17  ;;  %v856_v40 = vadd.f32 %v1471_v28, %v812_v18  ;;  %v791_v0 = vld [vmem:[#allocation2 + $0x8] sm:$0xff]  ;;  %v792_v1 = vld [vmem:[#allocation2 + $0x78] sm:$0xff]  ;;  %v795_v17 = vld [vmem:[#allocation2 + $0x40] sm:$0xff] }
 0x138   : > { %v857_v43 = vadd.f32 %v1469_v27, %v813_v22  ;;  %v858_v44 = vadd.f32 %v1471_v28, %v814_v23  ;;  %v859_v45 = vadd.f32 %v1469_v27, %v815_v31  ;;  %v860_v46 = vadd.f32 %v1471_v28, %v816_v32  ;;  %v793_v6 = vld [vmem:[#allocation2 + $0x38] sm:$0xff]  ;;  %v738_v7 = vld [vmem:[%s1409_s27 + $0x48] sm:$0xff]  ;;  %v739_v18 = vld [vmem:[%s1409_s27 + $0x50] sm:$0xff] }
 0x139   : > { %v1199_v48 = vpack.c.bf16 %v854_v38, %v853_v37  ;;  %v1200_v49 = vpack.c.bf16 %v856_v40, %v855_v39  ;;  %v819_v55 = vadd.f32 %v787_v41, %v755_v35  ;;  %v820_v56 = vadd.f32 %v788_v42, %v756_v36  ;;  %v794_v12 = vld [vmem:[#allocation2 + $0x58] sm:$0xff]  ;;  %v796_v23 = vld [vmem:[#allocation2 + $0xc8] sm:$0xff]  ;;  %v797_v30 = vld [vmem:[#allocation2 + $0xe0] sm:$0xff] }
 0x13a   : > { %v1201_v53 = vpack.c.bf16 %v858_v44, %v857_v43  ;;  %v1202_v54 = vpack.c.bf16 %v860_v46, %v859_v45  ;;  %v861_v60 = vadd.f32 %v1469_v27, %v817_v50  ;;  %v862_v61 = vadd.f32 %v1471_v28, %v818_v51  ;;  %v740_v31 = vld [vmem:[%s1409_s27 + $0x58] sm:$0xff]  ;;  %v798_v36 = vld [vmem:[#allocation2 + $0x90] sm:$0xff]  ;;  %v741_v37 = vld [vmem:[%s1409_s27 + $0x60] sm:$0xff] }
 0x13b   : > { %981 = vst [vmem:[%s1424_s14] sm:$0xff] %v1199_v48  ;;  %982 = vst [vmem:[%s1424_s14 + $0x8] sm:$0xff] %v1200_v49  ;;  %v757_v62 = vunpack.c.l.bf16 %v735_v47  ;;  %v758_v63 = vunpack.c.h.bf16 %v735_v47  ;;  %v863_v2 = vadd.f32 %v1469_v27, %v819_v55  ;;  %v864_v3 = vadd.f32 %v1471_v28, %v820_v56  ;;  %v799_v42 = vld [vmem:[#allocation2 + $0x70] sm:$0xff]  ;;  %v800_v43 = vld [vmem:[#allocation2 + $0xc0] sm:$0xff] }
 0x13c   : > { %983 = vst [vmem:[%s1424_s14 + $0x10] sm:$0xff] %v1201_v53  ;;  %984 = vst [vmem:[%s1424_s14 + $0x18] sm:$0xff] %v1202_v54  ;;  %v759_v4 = vunpack.c.l.bf16 %v736_v52  ;;  %v760_v5 = vunpack.c.h.bf16 %v736_v52  ;;  %v1203_v8 = vpack.c.bf16 %v862_v61, %v861_v60  ;;  %v761_v11 = vunpack.c.l.bf16 %v737_v59  ;;  %v801_v48 = vld [vmem:[#allocation2 + $0xa8] sm:$0xff]  ;;  %v802_v54 = vld [vmem:[#allocation2 + $0xd0] sm:$0xff] }
 0x13d   : > { %v821_v9 = vadd.f32 %v789_v57, %v757_v62  ;;  %v822_v10 = vadd.f32 %v790_v58, %v758_v63  ;;  %v1204_v13 = vpack.c.bf16 %v864_v3, %v863_v2  ;;  %v762_v16 = vunpack.c.h.bf16 %v737_v59  ;;  %v742_v49 = vld [vmem:[%s1409_s27 + $0x68] sm:$0xff]  ;;  %v803_v59 = vld [vmem:[#allocation2 + $0x10] sm:$0xff] }
 0x13e   : > { %v823_v14 = vadd.f32 %v791_v0, %v759_v4  ;;  %v824_v15 = vadd.f32 %v792_v1, %v760_v5  ;;  %985 = vst [vmem:[%s1424_s14 + $0x20] sm:$0xff] %v1203_v8  ;;  %v825_v21 = vadd.f32 %v793_v6, %v761_v11  ;;  %v763_v22 = vunpack.c.l.bf16 %v738_v7  ;;  %v743_v60 = vld [vmem:[%s1409_s27 + $0x70] sm:$0xff]  ;;  %v804_v1 = vld [vmem:[#allocation2 + $0x28] sm:$0xff]  ;;  %v805_v6 = vld [vmem:[#allocation2 + $0xa0] sm:$0xff] }
 0x13f   : > { %v865_v19 = vadd.f32 %v1469_v27, %v821_v9  ;;  %v866_v20 = vadd.f32 %v1471_v28, %v822_v10  ;;  %986 = vst [vmem:[%s1424_s14 + $0x28] sm:$0xff] %v1204_v13  ;;  %v826_v26 = vadd.f32 %v794_v12, %v762_v16  ;;  %v764_v29 = vunpack.c.h.bf16 %v738_v7  ;;  %v744_v7 = vld [vmem:[%s1409_s27 + $0x78] sm:$0xff] }
 0x140   : > { %v867_v24 = vadd.f32 %v1469_v27, %v823_v14  ;;  %v868_v25 = vadd.f32 %v1471_v28, %v824_v15  ;;  %v869_v33 = vadd.f32 %v1469_v27, %v825_v21  ;;  %v827_v34 = vadd.f32 %v795_v17, %v763_v22  ;;  %v806_v12 = vld [vmem:[#allocation2 + $0xf8] sm:$0xff]  ;;  %v807_v17 = vld [vmem:[#allocation2 + $0x20] sm:$0xff] }
 0x141   : > { %v1205_v32 = vpack.c.bf16 %v866_v20, %v865_v19  ;;  %v765_v35 = vunpack.c.l.bf16 %v739_v18  ;;  %v870_v39 = vadd.f32 %v1471_v28, %v826_v26  ;;  %v828_v40 = vadd.f32 %v796_v23, %v764_v29 }
 0x142   : > { %v1206_v38 = vpack.c.bf16 %v868_v25, %v867_v24  ;;  %v766_v41 = vunpack.c.h.bf16 %v739_v18  ;;  %v871_v44 = vadd.f32 %v1469_v27, %v827_v34  ;;  %v767_v46 = vunpack.c.l.bf16 %v740_v31  ;;  %v808_v18 = vld [vmem:[#allocation2 + $0x98] sm:$0xff] }
 0x143   : > { %987 = vst [vmem:[%s1424_s14 + $0x30] sm:$0xff] %v1205_v32  ;;  %v829_v45 = vadd.f32 %v797_v30, %v765_v35  ;;  %v768_v47 = vunpack.c.h.bf16 %v740_v31  ;;  %v1207_v50 = vpack.c.bf16 %v870_v39, %v869_v33  ;;  %v872_v51 = vadd.f32 %v1471_v28, %v828_v40 }
 0x144   : > { %988 = vst [vmem:[%s1424_s14 + $0x38] sm:$0xff] %v1206_v38  ;;  %v830_v52 = vadd.f32 %v798_v36, %v766_v41  ;;  %v769_v53 = vunpack.c.l.bf16 %v741_v37  ;;  %v831_v56 = vadd.f32 %v799_v42, %v767_v46  ;;  %v770_v58 = vunpack.c.h.bf16 %v741_v37 }
 0x145   : > { %v873_v55 = vadd.f32 %v1469_v27, %v829_v45  ;;  %v832_v57 = vadd.f32 %v800_v43, %v768_v47  ;;  %989 = vst [vmem:[%s1424_s14 + $0x40] sm:$0xff] %v1207_v50  ;;  %v1208_v61 = vpack.c.bf16 %v872_v51, %v871_v44  ;;  %v771_v0 = vunpack.c.l.bf16 %v742_v49 }
 0x146   : > { %v874_v62 = vadd.f32 %v1471_v28, %v830_v52  ;;  %v833_v63 = vadd.f32 %v801_v48, %v769_v53  ;;  %v875_v2 = vadd.f32 %v1469_v27, %v831_v56  ;;  %v834_v4 = vadd.f32 %v802_v54, %v770_v58 }
 0x147   : > { %v876_v3 = vadd.f32 %v1471_v28, %v832_v57  ;;  %v772_v5 = vunpack.c.h.bf16 %v742_v49  ;;  %990 = vst [vmem:[%s1424_s14 + $0x48] sm:$0xff] %v1208_v61  ;;  %v835_v10 = vadd.f32 %v803_v59, %v771_v0  ;;  %v773_v11 = vunpack.c.l.bf16 %v743_v60 }
 0x148   : > { %v1209_v8 = vpack.c.bf16 %v874_v62, %v873_v55  ;;  %v877_v9 = vadd.f32 %v1469_v27, %v833_v63  ;;  %v878_v14 = vadd.f32 %v1471_v28, %v834_v4  ;;  %v774_v16 = vunpack.c.h.bf16 %v743_v60 }
 0x149   : > { %v1210_v13 = vpack.c.bf16 %v876_v3, %v875_v2  ;;  %v836_v15 = vadd.f32 %v804_v1, %v772_v5  ;;  %v879_v19 = vadd.f32 %v1469_v27, %v835_v10  ;;  %v837_v20 = vadd.f32 %v805_v6, %v773_v11 }
 0x14a   : > { %991 = vst [vmem:[%s1424_s14 + $0x50] sm:$0xff] %v1209_v8  ;;  %v775_v21 = vunpack.c.l.bf16 %v744_v7  ;;  %v776_v22 = vunpack.c.h.bf16 %v744_v7  ;;  %v1211_v23 = vpack.c.bf16 %v878_v14, %v877_v9  ;;  %v838_v25 = vadd.f32 %v806_v12, %v774_v16 }
 0x14b   : > { %992 = vst [vmem:[%s1424_s14 + $0x58] sm:$0xff] %v1210_v13  ;;  %v880_v24 = vadd.f32 %v1471_v28, %v836_v15  ;;  %v881_v26 = vadd.f32 %v1469_v27, %v837_v20 }
 0x14c   : > { %v839_v29 = vadd.f32 %v807_v17, %v775_v21  ;;  %v840_v30 = vadd.f32 %v808_v18, %v776_v22  ;;  %993 = vst [vmem:[%s1424_s14 + $0x60] sm:$0xff] %v1211_v23  ;;  %v882_v32 = vadd.f32 %v1471_v28, %v838_v25 }
 0x14d   : > { %v1212_v31 = vpack.c.bf16 %v880_v24, %v879_v19 }
 0x14e   : > { %v883_v33 = vadd.f32 %v1469_v27, %v839_v29  ;;  %v884_v34 = vadd.f32 %v1471_v28, %v840_v30  ;;  %v1213_v35 = vpack.c.bf16 %v882_v32, %v881_v26 }
 0x14f   : > { %994 = vst [vmem:[%s1424_s14 + $0x68] sm:$0xff] %v1212_v31 }
 0x150   : > { %v1214_v36 = vpack.c.bf16 %v884_v34, %v883_v33  ;;  %995 = vst [vmem:[%s1424_s14 + $0x70] sm:$0xff] %v1213_v35 }
 0x152   : > { %996 = vst [vmem:[%s1424_s14 + $0x78] sm:$0xff] %v1214_v36 }
 0x153 PF: > { %s14_s19 = sadd.s32 1, %s1343_s19   ;;  %s1551_s15 = smov %s1335_s17 }
 0x154   : > { %p11_p9 = scmp.ge.s32.totalorder %s14_s19, 6   ;;  %s1552_s16 = smov %s1339_s18 }
 0x155   : > { %s1553_s17 = smov %s1556_s20  ;;  %s1554_s18 = smov %s1560_s21 }
 0x156   :  { %13 = sbr.rel (!%p11_p9) target bundleno = 3 (0x3), region = 80 }

// kernel: vanilla_transformer_forward.17
= control target key start
LH: loop header
LB: loop body
LE: loop exit
PB: predicated region body
PF: predicated region fallthrough
CT: control target
= control target key end

     0   :  { %s1772_s18 = smov 0   ;;  %s1774_s19 = smov 0   ;;  %s2523_s0 = inlined_call_operand.vmem [shape: bf16[2,128,256], index: 0, kind: input, shape index: {}]   ;;  %s2524_s1 = inlined_call_operand.vmem [shape: f32[1,256], index: 1, kind: input, shape index: {}]   ;;  %s2525_s2 = inlined_call_operand.vmem [shape: f32[1,256], index: 2, kind: input, shape index: {}]   ;;  %s2526_s3 = inlined_call_operand.vmem [shape: bf16[256,384], index: 3, kind: input, shape index: {}]   ;;  %s2527_s4 = inlined_call_operand.vmem [shape: f32[1,384], index: 4, kind: input, shape index: {}]   ;;  %s2528_s5 = inlined_call_operand.vmem [shape: f32[2,128,384], index: 5, kind: output, shape index: {}]  }
   0x1   :  { %s1776_s20 = smov 0  }
   0x2 LB: > { %s34_s21 = sadd.s32 1, %s1736_s19  ;;  %p1478_p0 = scmp.ge.s32.totalorder %s1740_s20, 1  ;;  %s1740_s20 = sphi %s1776_s20, %s15_s20   ;;  %s1736_s19 = sphi %s1774_s19, %s2530_s19   ;;  %s1732_s18 = sphi %s1772_s18, %s2529_s18  }
   0x3   : > { %p36_p1 = scmp.ge.s32.totalorder %s34_s21, 2  ;;  %p239_p2 = scmp.lt.s32.totalorder %s1740_s20, 3 }
   0x5   : > { %s2532_s21 = smov (%p36_p1, %s34_s21), 0  ;;  %p240_p3 = pnand %p1478_p0, %p239_p2 }
   0x6   : > { %p291_p4 = scmp.lt.s32.totalorder (!%p240_p3), %s1732_s18, 1 }
   0x7   : > { %243 = sbr.rel (%p240_p3) target bundleno = 596 (0x254), region = 40 }
   0xc   : > { %s2534_s18 = smov (!%p291_p4, %s1732_s18), 1 }
   0xd   : > { %s1532_s22 = sshll.u32 %s2534_s18, 7  ;;  %s1597_s23 = smul.u32 384, %s2534_s18 }
   0xe   : > { %s1796_s25 = scalar_lea.vmem %s2523_s0, %s1532_s22 }
   0xf   : > { %v1799_v0 = vld [vmem:[%s1796_s25] sm:$0xff]  ;;  %v1802_v1 = vld [vmem:[%s1796_s25 + $0x10] sm:$0xff]  ;;  %v1805_v2 = vld [vmem:[%s1796_s25 + $0x8] sm:$0xff]  ;;  %s2414_s26 = scalar_lea.vmem %s2528_s5, %s1597_s23 }
  0x10   : > { %v347_v3 = vunpack.c.l.bf16 %v1799_v0  ;;  %v348_v4 = vunpack.c.h.bf16 %v1799_v0  ;;  %v351_v5 = vunpack.c.l.bf16 %v1802_v1  ;;  %v352_v6 = vunpack.c.h.bf16 %v1802_v1  ;;  %v1812_v7 = vld [vmem:[%s1796_s25 + $0x18] sm:$0xff]  ;;  %v1815_v8 = vld [vmem:[%s1796_s25 + $0x20] sm:$0xff]  ;;  %v1822_v13 = vld [vmem:[%s1796_s25 + $0x28] sm:$0xff] }
  0x11   : > { %v349_v9 = vunpack.c.l.bf16 %v1805_v2  ;;  %v350_v10 = vunpack.c.h.bf16 %v1805_v2  ;;  %v353_v11 = vunpack.c.l.bf16 %v1812_v7  ;;  %v354_v12 = vunpack.c.h.bf16 %v1812_v7  ;;  %v1835_v18 = vld [vmem:[%s1796_s25 + $0x30] sm:$0xff]  ;;  %v1848_v23 = vld [vmem:[%s1796_s25 + $0x38] sm:$0xff]  ;;  %v1851_v24 = vld [vmem:[%s1796_s25 + $0x40] sm:$0xff] }
  0x12   : > { %v379_v14 = vadd.f32 %v348_v4, %v347_v3  ;;  %v385_v15 = vadd.f32 %v352_v6, %v351_v5  ;;  %v355_v16 = vunpack.c.l.bf16 %v1815_v8  ;;  %v356_v17 = vunpack.c.h.bf16 %v1815_v8  ;;  %v1859_v27 = vld [vmem:[%s1796_s25 + $0x48] sm:$0xff]  ;;  %v1869_v32 = vld [vmem:[%s1796_s25 + $0x50] sm:$0xff]  ;;  %v1874_v35 = vld [vmem:[%s1796_s25 + $0x58] sm:$0xff] }
  0x13   : > { %v382_v19 = vadd.f32 %v350_v10, %v349_v9  ;;  %v388_v20 = vadd.f32 %v354_v12, %v353_v11  ;;  %v357_v21 = vunpack.c.l.bf16 %v1822_v13  ;;  %v358_v22 = vunpack.c.h.bf16 %v1822_v13  ;;  %v1887_v40 = vld [vmem:[%s1796_s25 + $0x60] sm:$0xff]  ;;  %v1895_v43 = vld [vmem:[%s1796_s25 + $0x68] sm:$0xff]  ;;  %v1917_v54 = vld [vmem:[%s1796_s25 + $0x70] sm:$0xff] }
  0x14   : > { %380 = vadd.xlane.f32.xlu0 %v379_v14  ;;  %386 = vadd.xlane.f32.xlu1 %v385_v15  ;;  %v391_v25 = vadd.f32 %v356_v17, %v355_v16  ;;  %v359_v26 = vunpack.c.l.bf16 %v1835_v18  ;;  %v360_v29 = vunpack.c.h.bf16 %v1835_v18  ;;  %v361_v30 = vunpack.c.l.bf16 %v1848_v23  ;;  %v1920_v55 = vld [vmem:[%s1796_s25 + $0x78] sm:$0xff]  ;;  %v1624_v15 = vld [vmem:[%s2526_s3 + $0xa8] ss:$12 sps:$4 sm:$0xff]  }
  0x15   : > { %v394_v28 = vadd.f32 %v358_v22, %v357_v21  ;;  %v362_v31 = vunpack.c.h.bf16 %v1848_v23  ;;  %v363_v33 = vunpack.c.l.bf16 %v1851_v24  ;;  %v364_v34 = vunpack.c.h.bf16 %v1851_v24  ;;  %v1622_v14 = vld [vmem:[%s2526_s3 + $0xac] ss:$12 sps:$4 sm:$0xff]  }
  0x16   : > { %v397_v36 = vadd.f32 %v360_v29, %v359_v26  ;;  %v365_v38 = vunpack.c.l.bf16 %v1859_v27  ;;  %v366_v39 = vunpack.c.h.bf16 %v1859_v27  ;;  %v367_v42 = vunpack.c.l.bf16 %v1869_v32  ;;  %1075 = vmatprep.subr.bf16.mxu0 %v1622_v14  ;;  %v1645_v14 = vld [vmem:[%s2526_s3] ss:$12 sps:$4 sm:$0xff]   ;;  %v1653_v27 = vld [vmem:[%s2526_s3 + $0x158] ss:$12 sps:$4 sm:$0xff]  }
  0x17   : > { %v400_v37 = vadd.f32 %v362_v31, %v361_v30  ;;  %v403_v41 = vadd.f32 %v364_v34, %v363_v33  ;;  %v368_v45 = vunpack.c.h.bf16 %v1869_v32  ;;  %v369_v46 = vunpack.c.l.bf16 %v1874_v35  ;;  %1076 = vmatpush1.bf16.msra.mxu0 %v1624_v15  ;;  %v1646_v15 = vld [vmem:[%s2526_s3 + $0x16c] ss:$12 sps:$4 sm:$0xff]  }
  0x18   : > { %383 = vadd.xlane.f32.xlu0 %v382_v19  ;;  %389 = vadd.xlane.f32.xlu1 %v388_v20  ;;  %v406_v44 = vadd.f32 %v366_v39, %v365_v38  ;;  %v370_v47 = vunpack.c.h.bf16 %v1874_v35  ;;  %v371_v48 = vunpack.c.l.bf16 %v1887_v40  ;;  %v372_v49 = vunpack.c.h.bf16 %v1887_v40  ;;  %v1625_v19 = vld [vmem:[%s2526_s3 + $0x94] ss:$12 sps:$4 sm:$0xff]   ;;  %v1627_v20 = vld [vmem:[%s2526_s3 + $0x90] ss:$12 sps:$4 sm:$0xff]  }
  0x19   : > { %v409_v50 = vadd.f32 %v368_v45, %v367_v42  ;;  %v373_v52 = vunpack.c.l.bf16 %v1895_v43  ;;  %v374_v53 = vunpack.c.h.bf16 %v1895_v43  ;;  %v375_v57 = vunpack.c.l.bf16 %v1917_v54  ;;  %1077 = vmatprep.subr.bf16.mxu0 %v1625_v19 }
  0x1a   : > { %v412_v51 = vadd.f32 %v370_v47, %v369_v46  ;;  %v415_v56 = vadd.f32 %v372_v49, %v371_v48  ;;  %v376_v59 = vunpack.c.h.bf16 %v1917_v54  ;;  %v377_v60 = vunpack.c.l.bf16 %v1920_v55 }
  0x1b   : > { %v418_v58 = vadd.f32 %v374_v53, %v373_v52  ;;  %v378_v61 = vunpack.c.h.bf16 %v1920_v55  ;;  %1078 = vmatpush1.bf16.msra.mxu0 %v1627_v20 }
  0x1c   : > { %392 = vadd.xlane.f32.xlu0 %v391_v25  ;;  %395 = vadd.xlane.f32.xlu1 %v394_v28  ;;  %v421_v62 = vadd.f32 %v376_v59, %v375_v57  ;;  %v1628_v25 = vld [vmem:[%s2526_s3 + $0x7c] ss:$12 sps:$4 sm:$0xff]  }
  0x1d   : > { %v424_v63 = vadd.f32 %v378_v61, %v377_v60  ;;  %v1648_v28 = vld [vmem:[%s2526_s3 + $0x170] ss:$12 sps:$4 sm:$0xff]   ;;  %1079 = vmatprep.subr.bf16.mxu0 %v1628_v25 }
  0x1e   : > { %1533 = vmatprep.subr.bf16.mxu1 %v1648_v28 }
  0x20   : > { %398 = vadd.xlane.f32.xlu0 %v397_v36  ;;  %401 = vadd.xlane.f32.xlu1 %v400_v37  ;;  %v1630_v36 = vld [vmem:[%s2526_s3 + $0x78] ss:$12 sps:$4 sm:$0xff]  }
  0x21   : > { %v1631_v37 = vld [vmem:[%s2526_s3 + $0x64] ss:$12 sps:$4 sm:$0xff]   ;;  %1080 = vmatpush1.bf16.msra.mxu0 %v1630_v36 }
  0x22   : > { %1081 = vmatprep.subr.bf16.mxu0 %v1631_v37 }
  0x24   : > { %404 = vadd.xlane.f32.xlu0 %v403_v41  ;;  %407 = vadd.xlane.f32.xlu1 %v406_v44  ;;  %v1633_v41 = vld [vmem:[%s2526_s3 + $0x60] ss:$12 sps:$4 sm:$0xff]  }
  0x25   : > { %v1634_v44 = vld [vmem:[%s2526_s3 + $0x4c] ss:$12 sps:$4 sm:$0xff]   ;;  %1082 = vmatpush1.bf16.msra.mxu0 %v1633_v41 }
  0x26   : > { %1083 = vmatprep.subr.bf16.mxu0 %v1634_v44 }
  0x28   : > { %410 = vadd.xlane.f32.xlu0 %v409_v50  ;;  %413 = vadd.xlane.f32.xlu1 %v412_v51  ;;  %v1636_v50 = vld [vmem:[%s2526_s3 + $0x48] ss:$12 sps:$4 sm:$0xff]  }
  0x29   : > { %v1637_v51 = vld [vmem:[%s2526_s3 + $0x34] ss:$12 sps:$4 sm:$0xff]   ;;  %1084 = vmatpush1.bf16.msra.mxu0 %v1636_v50 }
  0x2a   : > { %1085 = vmatprep.subr.bf16.mxu0 %v1637_v51 }
  0x2c   : > { %416 = vadd.xlane.f32.xlu0 %v415_v56  ;;  %419 = vadd.xlane.f32.xlu1 %v418_v58  ;;  %v1639_v56 = vld [vmem:[%s2526_s3 + $0x30] ss:$12 sps:$4 sm:$0xff]  }
  0x2d   : > { %v1640_v58 = vld [vmem:[%s2526_s3 + $0x1c] ss:$12 sps:$4 sm:$0xff]   ;;  %1086 = vmatpush1.bf16.msra.mxu0 %v1639_v56 }
  0x2e   : > { %1087 = vmatprep.subr.bf16.mxu0 %v1640_v58 }
  0x30   : > { %422 = vadd.xlane.f32.xlu0 %v421_v62  ;;  %425 = vadd.xlane.f32.xlu1 %v424_v63  ;;  %v1642_v62 = vld [vmem:[%s2526_s3 + $0x18] ss:$12 sps:$4 sm:$0xff]  }
  0x31   : > { %v1643_v63 = vld [vmem:[%s2526_s3 + $0x4] ss:$12 sps:$4 sm:$0xff]   ;;  %1088 = vmatpush1.bf16.msra.mxu0 %v1642_v62 }
  0x32   : > { %1089 = vmatprep.subr.bf16.mxu0 %v1643_v63 }
  0x35   : > { %1090 = vmatpush1.bf16.msra.mxu0 %v1645_v14 }
  0x36   : > { %1091 = vmatprep.subr.bf16.mxu0 %v1646_v15 }
  0x9d   : > { %v381_v19 = vpop.xlane.xlu0 %380  ;;  %v387_v20 = vpop.xlane.xlu1 %386 }
  0x9e   : > { %v428_v25 = vmul.f32 0.00390625, %v381_v19  ;;  %v430_v28 = vmul.f32 0.00390625, %v387_v20 }
  0xa0   : > { %v1998_v36 = vsub.f32 %v347_v3, %v428_v25  ;;  %v2002_v37 = vsub.f32 %v348_v4, %v428_v25  ;;  %v2006_v41 = vsub.f32 %v351_v5, %v430_v28  ;;  %v2010_v44 = vsub.f32 %v352_v6, %v430_v28 }
  0xa1   : > { %v384_v50 = vpop.xlane.xlu0 %383  ;;  %v390_v51 = vpop.xlane.xlu1 %389 }
  0xa2   : > { %v429_v56 = vmul.f32 0.00390625, %v384_v50  ;;  %v431_v58 = vmul.f32 0.00390625, %v390_v51  ;;  %v476_v3 = vmul.f32 %v1998_v36, %v1998_v36  ;;  %v477_v0 = vmul.f32 %v2002_v37, %v2002_v37 }
  0xa3   : > { %v480_v4 = vmul.f32 %v2006_v41, %v2006_v41  ;;  %v481_v5 = vmul.f32 %v2010_v44, %v2010_v44 }
  0xa4   : > { %v2022_v1 = vsub.f32 %v349_v9, %v429_v56  ;;  %v2026_v6 = vsub.f32 %v350_v10, %v429_v56  ;;  %v2030_v62 = vsub.f32 %v353_v11, %v431_v58  ;;  %v2034_v63 = vsub.f32 %v354_v12, %v431_v58 }
  0xa5   : > { %v393_v14 = vpop.xlane.xlu0 %392  ;;  %v508_v15 = vadd.f32 %v477_v0, %v476_v3  ;;  %v396_v19 = vpop.xlane.xlu1 %395  ;;  %v514_v10 = vadd.f32 %v481_v5, %v480_v4 }
  0xa6   : > { %v432_v20 = vmul.f32 0.00390625, %v393_v14  ;;  %v433_v25 = vmul.f32 0.00390625, %v396_v19  ;;  %v478_v9 = vmul.f32 %v2022_v1, %v2022_v1  ;;  %v479_v2 = vmul.f32 %v2026_v6, %v2026_v6 }
  0xa7   : > { %509 = vadd.xlane.f32.xlu0 %v508_v15  ;;  %v482_v11 = vmul.f32 %v2030_v62, %v2030_v62  ;;  %v483_v7 = vmul.f32 %v2034_v63, %v2034_v63 }
  0xa8   : > { %v2046_v12 = vsub.f32 %v355_v16, %v432_v20  ;;  %v2050_v28 = vsub.f32 %v356_v17, %v432_v20  ;;  %v2054_v50 = vsub.f32 %v357_v21, %v433_v25  ;;  %v2058_v51 = vsub.f32 %v358_v22, %v433_v25 }
  0xa9   : > { %v399_v56 = vpop.xlane.xlu0 %398  ;;  %v511_v58 = vadd.f32 %v479_v2, %v478_v9  ;;  %v402_v3 = vpop.xlane.xlu1 %401  ;;  %v517_v17 = vadd.f32 %v483_v7, %v482_v11 }
  0xaa   : > { %v434_v0 = vmul.f32 0.00390625, %v399_v56  ;;  %v435_v4 = vmul.f32 0.00390625, %v402_v3  ;;  %v484_v16 = vmul.f32 %v2046_v12, %v2046_v12  ;;  %v485_v8 = vmul.f32 %v2050_v28, %v2050_v28 }
  0xab   : > { %515 = vadd.xlane.f32.xlu0 %v514_v10  ;;  %512 = vadd.xlane.f32.xlu1 %v511_v58  ;;  %v486_v21 = vmul.f32 %v2054_v50, %v2054_v50  ;;  %v487_v13 = vmul.f32 %v2058_v51, %v2058_v51  ;;  %v1650_v10 = vld [vmem:[%s2526_s3 + $0xb0] ss:$12 sps:$4 sm:$0xff]  }
  0xac   : > { %v2070_v22 = vsub.f32 %v359_v26, %v434_v0  ;;  %v2074_v5 = vsub.f32 %v360_v29, %v434_v0  ;;  %v2078_v14 = vsub.f32 %v361_v30, %v435_v4  ;;  %v2082_v15 = vsub.f32 %v362_v31, %v435_v4  ;;  %v1649_v31 = vld [vmem:[%s2526_s3 + $0x168] ss:$12 sps:$4 sm:$0xff]   ;;  %1534 = vmatpush3.bf16.msra.mxu1 %v1650_v10 }
  0xad   : > { %v405_v19 = vpop.xlane.xlu0 %404  ;;  %v520_v20 = vadd.f32 %v485_v8, %v484_v16  ;;  %v408_v25 = vpop.xlane.xlu1 %407  ;;  %v523_v29 = vadd.f32 %v487_v13, %v486_v21  ;;  %1092 = vmatpush2.bf16.msra.mxu0 %v1649_v31  ;;  %1535 = vmatprep.subr.bf16.mxu1 %v1653_v27  ;;  %v1661_v27 = vld [vmem:[%s2526_s3 + $0x124] ss:$12 sps:$4 sm:$0xff]  }
  0xae   : > { %v436_v9 = vmul.f32 0.00390625, %v405_v19  ;;  %v437_v2 = vmul.f32 0.00390625, %v408_v25  ;;  %v488_v26 = vmul.f32 %v2070_v22, %v2070_v22  ;;  %v489_v18 = vmul.f32 %v2074_v5, %v2074_v5  ;;  %v1654_v25 = vld [vmem:[%s2526_s3 + $0x150] ss:$12 sps:$4 sm:$0xff]  }
  0xaf   : > { %518 = vadd.xlane.f32.xlu1 %v517_v17  ;;  %521 = vadd.xlane.f32.xlu0 %v520_v20  ;;  %v490_v30 = vmul.f32 %v2078_v14, %v2078_v14  ;;  %v491_v23 = vmul.f32 %v2082_v15, %v2082_v15 }
  0xb0   : > { %v2100_v11 = vsub.f32 %v363_v33, %v436_v9  ;;  %v2104_v7 = vsub.f32 %v364_v34, %v436_v9  ;;  %v2108_v56 = vsub.f32 %v365_v38, %v437_v2  ;;  %v2112_v58 = vsub.f32 %v366_v39, %v437_v2  ;;  %v1651_v38 = vld [vmem:[%s2526_s3 + $0x154] ss:$12 sps:$4 sm:$0xff]  }
  0xb1   : > { %v411_v3 = vpop.xlane.xlu0 %410  ;;  %v526_v0 = vadd.f32 %v489_v18, %v488_v26  ;;  %v414_v4 = vpop.xlane.xlu1 %413  ;;  %v529_v39 = vadd.f32 %v491_v23, %v490_v30  ;;  %1093 = vmatprep.subr.bf16.mxu0 %v1651_v38  ;;  %v1656_v30 = vld [vmem:[%s2526_s3 + $0x13c] ss:$12 sps:$4 sm:$0xff]   ;;  %v1658_v23 = vld [vmem:[%s2526_s3 + $0x140] ss:$12 sps:$4 sm:$0xff]  }
  0xb2   : > { %v438_v16 = vmul.f32 0.00390625, %v411_v3  ;;  %v439_v33 = vmul.f32 0.00390625, %v414_v4  ;;  %v492_v24 = vmul.f32 %v2100_v11, %v2100_v11  ;;  %v493_v34 = vmul.f32 %v2104_v7, %v2104_v7  ;;  %1094 = vmatpush2.bf16.msra.mxu0 %v1654_v25  ;;  %v1659_v4 = vld [vmem:[%s2526_s3 + $0x138] ss:$12 sps:$4 sm:$0xff]  }
  0xb3   : > { %524 = vadd.xlane.f32.xlu1 %v523_v29  ;;  %527 = vadd.xlane.f32.xlu0 %v526_v0  ;;  %v494_v8 = vmul.f32 %v2108_v56, %v2108_v56  ;;  %v495_v17 = vmul.f32 %v2112_v58, %v2112_v58 }
  0xb4   : > { %v2130_v21 = vsub.f32 %v367_v42, %v438_v16  ;;  %v2134_v13 = vsub.f32 %v368_v45, %v438_v16  ;;  %v2138_v19 = vsub.f32 %v369_v46, %v439_v33  ;;  %v2142_v20 = vsub.f32 %v370_v47, %v439_v33  ;;  %v1655_v42 = vld [vmem:[%s2526_s3 + $0x98] ss:$12 sps:$4 sm:$0xff]   ;;  %1095 = vmatprep.subr.bf16.mxu0 %v1656_v30  ;;  %v1674_v30 = vld [vmem:[%s2526_s3 + $0xf0] ss:$12 sps:$4 sm:$0xff]  }
  0xb5   : > { %v417_v32 = vpop.xlane.xlu0 %416  ;;  %v532_v45 = vadd.f32 %v493_v34, %v492_v24  ;;  %v420_v9 = vpop.xlane.xlu1 %419  ;;  %1536 = vmatpush3.bf16.msra.mxu1 %v1655_v42  ;;  %v535_v26 = vadd.f32 %v495_v17, %v494_v8 }
  0xb6   : > { %v440_v2 = vmul.f32 0.00390625, %v417_v32  ;;  %v441_v46 = vmul.f32 0.00390625, %v420_v9  ;;  %v496_v35 = vmul.f32 %v2130_v21, %v2130_v21  ;;  %v497_v47 = vmul.f32 %v2134_v13, %v2134_v13  ;;  %1537 = vmatprep.subr.bf16.mxu1 %v1658_v23  ;;  %1096 = vmatpush2.bf16.msra.mxu0 %v1659_v4  ;;  %v1664_v32 = vld [vmem:[%s2526_s3 + $0x120] ss:$12 sps:$4 sm:$0xff]   ;;  %v1675_v23 = vld [vmem:[%s2526_s3 + $0x38] ss:$12 sps:$4 sm:$0xff]  }
  0xb7   : > { %530 = vadd.xlane.f32.xlu1 %v529_v39  ;;  %533 = vadd.xlane.f32.xlu0 %v532_v45  ;;  %v498_v18 = vmul.f32 %v2138_v19, %v2138_v19  ;;  %v499_v29 = vmul.f32 %v2142_v20, %v2142_v20  ;;  %v1663_v39 = vld [vmem:[%s2526_s3 + $0x128] ss:$12 sps:$4 sm:$0xff]   ;;  %v1666_v9 = vld [vmem:[%s2526_s3 + $0x10c] ss:$12 sps:$4 sm:$0xff]  }
  0xb8   : > { %v2166_v31 = vsub.f32 %v371_v48, %v440_v2  ;;  %v2170_v10 = vsub.f32 %v372_v49, %v440_v2  ;;  %v2174_v3 = vsub.f32 %v373_v52, %v441_v46  ;;  %v2178_v0 = vsub.f32 %v374_v53, %v441_v46  ;;  %v1660_v48 = vld [vmem:[%s2526_s3 + $0x80] ss:$12 sps:$4 sm:$0xff]   ;;  %1097 = vmatprep.subr.bf16.mxu0 %v1661_v27  ;;  %v1668_v2 = vld [vmem:[%s2526_s3 + $0x110] ss:$12 sps:$4 sm:$0xff]  }
  0xb9   : > { %v423_v16 = vpop.xlane.xlu0 %422  ;;  %v538_v40 = vadd.f32 %v497_v47, %v496_v35  ;;  %v426_v49 = vpop.xlane.xlu1 %425  ;;  %1538 = vmatpush3.bf16.msra.mxu1 %v1660_v48  ;;  %v541_v24 = vadd.f32 %v499_v29, %v498_v18  ;;  %v1669_v35 = vld [vmem:[%s2526_s3 + $0x108] ss:$12 sps:$4 sm:$0xff]   ;;  %v1670_v47 = vld [vmem:[%s2526_s3 + $0x50] ss:$12 sps:$4 sm:$0xff]   ;;  %v1673_v29 = vld [vmem:[%s2526_s3 + $0xf8] ss:$12 sps:$4 sm:$0xff]  }
  0xba   : > { %v442_v33 = vmul.f32 0.00390625, %v423_v16  ;;  %v443_v52 = vmul.f32 0.00390625, %v426_v49  ;;  %v500_v43 = vmul.f32 %v2166_v31, %v2166_v31  ;;  %v501_v53 = vmul.f32 %v2170_v10, %v2170_v10  ;;  %1539 = vmatprep.subr.bf16.mxu1 %v1663_v39  ;;  %1098 = vmatpush2.bf16.msra.mxu0 %v1664_v32  ;;  %v1671_v18 = vld [vmem:[%s2526_s3 + $0xf4] ss:$12 sps:$4 sm:$0xff]   ;;  %v1676_v4 = vld [vmem:[%s2526_s3 + $0xdc] ss:$12 sps:$4 sm:$0xff]  }
  0xbb   : > { %536 = vadd.xlane.f32.xlu1 %v535_v26  ;;  %539 = vadd.xlane.f32.xlu0 %v538_v40  ;;  %v502_v34 = vmul.f32 %v2174_v3, %v2174_v3  ;;  %v503_v38 = vmul.f32 %v2178_v0, %v2178_v0  ;;  %v1678_v48 = vld [vmem:[%s2526_s3 + $0xe0] ss:$12 sps:$4 sm:$0xff]   ;;  %v1679_v16 = vld [vmem:[%s2526_s3 + $0xd8] ss:$12 sps:$4 sm:$0xff]  }
  0xbc   : > { %v2202_v8 = vsub.f32 %v375_v57, %v442_v33  ;;  %v2206_v17 = vsub.f32 %v376_v59, %v442_v33  ;;  %v2210_v25 = vsub.f32 %v377_v60, %v443_v52  ;;  %v2214_v42 = vsub.f32 %v378_v61, %v443_v52  ;;  %v1665_v57 = vld [vmem:[%s2526_s3 + $0x68] ss:$12 sps:$4 sm:$0xff]   ;;  %1099 = vmatprep.subr.bf16.mxu0 %v1666_v9  ;;  %v1680_v40 = vld [vmem:[%s2526_s3 + $0x20] ss:$12 sps:$4 sm:$0xff]   ;;  %v1681_v49 = vld [vmem:[%s2526_s3 + $0xc4] ss:$12 sps:$4 sm:$0xff]  }
  0xbd   : > { %v544_v45 = vadd.f32 %v501_v53, %v500_v43  ;;  %v547_v55 = vadd.f32 %v503_v38, %v502_v34  ;;  %1540 = vmatpush3.bf16.msra.mxu1 %v1665_v57  ;;  %v1683_v33 = vld [vmem:[%s2526_s3 + $0xc8] ss:$12 sps:$4 sm:$0xff]   ;;  %v1684_v52 = vld [vmem:[%s2526_s3 + $0xc0] ss:$12 sps:$4 sm:$0xff]   ;;  %v637_v57 = vlaneseq }
  0xbe   : > { %v504_v54 = vmul.f32 %v2202_v8, %v2202_v8  ;;  %v505_v59 = vmul.f32 %v2206_v17, %v2206_v17  ;;  %v506_v60 = vmul.f32 %v2210_v25, %v2210_v25  ;;  %v507_v61 = vmul.f32 %v2214_v42, %v2214_v42  ;;  %1541 = vmatprep.subr.bf16.mxu1 %v1668_v2  ;;  %v1685_v43 = vld [vmem:[%s2526_s3 + $0x8] ss:$12 sps:$4 sm:$0xff]  }
  0xbf   : > { %542 = vadd.xlane.f32.xlu1 %v541_v24  ;;  %545 = vadd.xlane.f32.xlu0 %v544_v45  ;;  %v2278_v9 = vshrl.u32 %v637_v57, 7 }
  0xc0   : > { %v550_v46 = vadd.f32 %v505_v59, %v504_v54  ;;  %1100 = vmatpush2.bf16.msra.mxu0 %v1669_v35  ;;  %v553_v26 = vadd.f32 %v507_v61, %v506_v60 }
  0xc1   : > { %1542 = vmatpush3.bf16.msra.mxu1 %v1670_v47  ;;  %1101 = vmatprep.subr.bf16.mxu0 %v1671_v18 }
  0xc2   : > { %1543 = vmatprep.subr.bf16.mxu1 %v1673_v29  ;;  %v2281_v29 = vsub.s32 0, %v2278_v9 }
  0xc3   : > { %548 = vadd.xlane.f32.xlu1 %v547_v55  ;;  %551 = vadd.xlane.f32.xlu0 %v550_v46 }
  0xc4   : > { %1102 = vmatpush2.bf16.msra.mxu0 %v1674_v30  ;;  %v2284_v30 = vsub.s32 1, %v2278_v9 }
  0xc5   : > { %1544 = vmatpush3.bf16.msra.mxu1 %v1675_v23  ;;  %1103 = vmatprep.subr.bf16.mxu0 %v1676_v4  ;;  %v345_v4 = vld [vmem:[%s2524_s1] sm:$0x3] }
  0xc6   : > { %1545 = vmatprep.subr.bf16.mxu1 %v1678_v48 }
  0xc7   : > { %554 = vadd.xlane.f32.xlu1 %v553_v26 }
  0xc8   : > { %1104 = vmatpush2.bf16.msra.mxu0 %v1679_v16 }
  0xc9   : > { %1546 = vmatpush3.bf16.msra.mxu1 %v1680_v40  ;;  %1105 = vmatprep.subr.bf16.mxu0 %v1681_v49 }
  0xca   : > { %1547 = vmatprep.subr.bf16.mxu1 %v1683_v33 }
  0xcc   : > { %1106 = vmatpush2.bf16.msra.mxu0 %v1684_v52  ;;  %v2290_v52 = vrot.slane %v345_v4, %v2281_v29 }
  0xcd   : > { %1548 = vmatpush3.bf16.msra.mxu1 %v1685_v43  ;;  %v2293_v43 = vrot.slane %v345_v4, %v2284_v30 }
 0x130   : > { %v510_v53 = vpop.xlane.xlu0 %509 }
 0x131   : > { %v556_v24 = vmul.f32 0.00390625, %v510_v53 }
 0x133   : > { %v572_v34 = vadd.f32 1e-05, %v556_v24  ;;  %v346_v24 = vld [vmem:[%s2525_s2] sm:$0x3] }
 0x134   : > { %v513_v38 = vpop.xlane.xlu1 %512  ;;  %v516_v27 = vpop.xlane.xlu0 %515 }
 0x135   : > { %1686 = vrsqrt.f32 %v572_v34  ;;  %v557_v39 = vmul.f32 0.00390625, %v513_v38  ;;  %v558_v32 = vmul.f32 0.00390625, %v516_v27 }
 0x137   : > { %v573_v45 = vadd.f32 1e-05, %v557_v39  ;;  %v574_v54 = vadd.f32 1e-05, %v558_v32 }
 0x138   : > { %v519_v59 = vpop.xlane.xlu1 %518  ;;  %v522_v55 = vpop.xlane.xlu0 %521 }
 0x139   : > { %1688 = vrsqrt.f32 %v573_v45  ;;  %v559_v60 = vmul.f32 0.00390625, %v519_v59  ;;  %v560_v61 = vmul.f32 0.00390625, %v522_v55  ;;  %v2305_v59 = vrot.slane %v346_v24, %v2284_v30 }
 0x13a   : > { %1690 = vrsqrt.f32 %v574_v54  ;;  %v2302_v54 = vrot.slane %v346_v24, %v2281_v29 }
 0x13b   : > { %v575_v2 = vadd.f32 1e-05, %v559_v60  ;;  %v576_v46 = vadd.f32 1e-05, %v560_v61 }
 0x13c   : > { %v525_v35 = vpop.xlane.xlu1 %524  ;;  %v528_v47 = vpop.xlane.xlu0 %527 }
 0x13d   : > { %1692 = vrsqrt.f32 %v575_v2  ;;  %v561_v26 = vmul.f32 0.00390625, %v525_v35  ;;  %v562_v18 = vmul.f32 0.00390625, %v528_v47 }
 0x13e   : > { %1694 = vrsqrt.f32 %v576_v46 }
 0x13f   : > { %v577_v23 = vadd.f32 1e-05, %v561_v26  ;;  %v578_v48 = vadd.f32 1e-05, %v562_v18 }
 0x140   : > { %v531_v16 = vpop.xlane.xlu1 %530  ;;  %v534_v33 = vpop.xlane.xlu0 %533 }
 0x141   : > { %1696 = vrsqrt.f32 %v577_v23  ;;  %v563_v40 = vmul.f32 0.00390625, %v531_v16  ;;  %v564_v39 = vmul.f32 0.00390625, %v534_v33 }
 0x142   : > { %v1687_v49 = vpop.eup %1686  ;;  %1698 = vrsqrt.f32 %v578_v48 }
 0x143   : > { %v579_v53 = vadd.f32 1e-05, %v563_v40  ;;  %v605_v34 = vmul.f32 %v1687_v49, %v2002_v37  ;;  %v604_v38 = vmul.f32 %v1687_v49, %v1998_v36  ;;  %v580_v35 = vadd.f32 1e-05, %v564_v39 }
 0x144   : > { %v537_v27 = vpop.xlane.xlu1 %536  ;;  %v540_v18 = vpop.xlane.xlu0 %539 }
 0x145   : > { %1700 = vrsqrt.f32 %v579_v53  ;;  %v565_v32 = vmul.f32 0.00390625, %v537_v27  ;;  %v648_v45 = vmul.f32 %v2293_v43, %v605_v34  ;;  %v647_v55 = vmul.f32 %v2290_v52, %v604_v38 }
 0x146   : > { %v1689_v57 = vpop.eup %1688  ;;  %v566_v24 = vmul.f32 0.00390625, %v540_v18 }
 0x147   : > { %v1691_v60 = vpop.eup %1690  ;;  %v581_v37 = vadd.f32 1e-05, %v565_v32  ;;  %v607_v36 = vmul.f32 %v1689_v57, %v2026_v6  ;;  %v606_v2 = vmul.f32 %v1689_v57, %v2022_v1  ;;  %v691_v23 = vadd.f32 %v2305_v59, %v648_v45 }
 0x148   : > { %v543_v61 = vpop.xlane.xlu1 %542  ;;  %v609_v46 = vmul.f32 %v1691_v60, %v2010_v44  ;;  %v690_v48 = vadd.f32 %v2302_v54, %v647_v55  ;;  %v608_v33 = vmul.f32 %v1691_v60, %v2006_v41 }
 0x149   : > { %v650_v47 = vmul.f32 %v2293_v43, %v607_v36  ;;  %v649_v4 = vmul.f32 %v2290_v52, %v606_v2  ;;  %1702 = vrsqrt.f32 %v581_v37  ;;  %v567_v16 = vmul.f32 0.00390625, %v543_v61 }
 0x14a   : > { %v1693_v26 = vpop.eup %1692  ;;  %v652_v49 = vmul.f32 %v2293_v43, %v609_v46  ;;  %1704 = vrsqrt.f32 %v580_v35  ;;  %v651_v60 = vmul.f32 %v2290_v52, %v608_v33  ;;  %v582_v36 = vadd.f32 1e-05, %v566_v24  ;;  %v546_v35 = vpop.xlane.xlu0 %545 }
 0x14b   : > { %v693_v6 = vadd.f32 %v2305_v59, %v650_v47  ;;  %v611_v40 = vmul.f32 %v1693_v26, %v2034_v63  ;;  %v1695_v1 = vpop.eup %1694  ;;  %v692_v44 = vadd.f32 %v2302_v54, %v649_v4  ;;  %v610_v53 = vmul.f32 %v1693_v26, %v2030_v62 }
 0x14c   : > { %v583_v57 = vadd.f32 1e-05, %v567_v16  ;;  %v613_v63 = vmul.f32 %v1695_v1, %v2050_v28  ;;  %v549_v55 = vpop.xlane.xlu1 %548  ;;  %v695_v41 = vadd.f32 %v2305_v59, %v652_v49  ;;  %v612_v4 = vmul.f32 %v1695_v1, %v2046_v12 }
 0x14d   : > { %v723_v34 = vpack.c.bf16 %v693_v6, %v691_v23  ;;  %v722_v27 = vpack.c.bf16 %v692_v44, %v690_v48  ;;  %v654_v39 = vmul.f32 %v2293_v43, %v611_v40  ;;  %v653_v32 = vmul.f32 %v2290_v52, %v610_v53 }
 0x14e   : > { %v1697_v38 = vpop.eup %1696  ;;  %v656_v61 = vmul.f32 %v2293_v43, %v613_v63  ;;  %1706 = vrsqrt.f32 %v583_v57  ;;  %v569_v26 = vmul.f32 0.00390625, %v549_v55  ;;  %v694_v23 = vadd.f32 %v2302_v54, %v651_v60 }
 0x14f   : > { %1107 = vmatprep.mubr.bf16.mxu0 %v723_v34  ;;  %1220 = vmatprep.mubr.bf16.mxu1 %v723_v34  ;;  %v615_v45 = vmul.f32 %v1697_v38, %v2058_v51  ;;  %v697_v62 = vadd.f32 %v2305_v59, %v654_v39  ;;  %v1699_v37 = vpop.eup %1698  ;;  %v696_v51 = vadd.f32 %v2302_v54, %v653_v32  ;;  %1708 = vrsqrt.f32 %v582_v36 }
 0x150   : > { %1108 = vmatmul.mubr.bf16.vlgmr.msra.gmra.mxu0 %v722_v27  ;;  %1221 = vmatmul.mubr.bf16.vlgmr.msra.gmra.mxu1 %v722_v27  ;;  %v614_v47 = vmul.f32 %v1697_v38, %v2054_v50  ;;  %v568_v16 = vmul.f32 0.00390625, %v546_v35  ;;  %v699_v6 = vadd.f32 %v2305_v59, %v656_v61  ;;  %v617_v40 = vmul.f32 %v1699_v37, %v2074_v5  ;;  %v555_v34 = vpop.xlane.xlu1 %554  ;;  %v552_v5 = vpop.xlane.xlu0 %551 }
 0x151   : > { %v658_v2 = vmul.f32 %v2293_v43, %v615_v45  ;;  %v725_v28 = vpack.c.bf16 %v697_v62, %v695_v41  ;;  %v724_v44 = vpack.c.bf16 %v696_v51, %v694_v23  ;;  %v585_v49 = vadd.f32 1e-05, %v569_v26 }
 0x152   : > { %v1701_v46 = vpop.eup %1700  ;;  %v657_v50 = vmul.f32 %v2290_v52, %v614_v47  ;;  %v655_v12 = vmul.f32 %v2290_v52, %v612_v4  ;;  %v660_v1 = vmul.f32 %v2293_v43, %v617_v40  ;;  %v571_v32 = vmul.f32 0.00390625, %v555_v34 }
 0x153   : > { %v701_v18 = vadd.f32 %v2305_v59, %v658_v2  ;;  %1117 = vmatprep.mubr.bf16.mxu0 %v725_v28  ;;  %1228 = vmatprep.mubr.bf16.mxu1 %v725_v28  ;;  %v619_v48 = vmul.f32 %v1701_v46, %v2082_v15  ;;  %v584_v15 = vadd.f32 1e-05, %v568_v16  ;;  %v618_v39 = vmul.f32 %v1701_v46, %v2078_v14 }
 0x154   : > { %v700_v27 = vadd.f32 %v2302_v54, %v657_v50  ;;  %1710 = vrsqrt.f32 %v585_v49  ;;  %v698_v45 = vadd.f32 %v2302_v54, %v655_v12  ;;  %v616_v55 = vmul.f32 %v1699_v37, %v2070_v22 }
 0x155   : > { %v727_v33 = vpack.c.bf16 %v701_v18, %v699_v6  ;;  %v662_v53 = vmul.f32 %v2293_v43, %v619_v48  ;;  %1712 = vrsqrt.f32 %v584_v15  ;;  %v570_v41 = vmul.f32 0.00390625, %v552_v5 }
 0x156   : > { %v1703_v24 = vpop.eup %1702  ;;  %v703_v62 = vadd.f32 %v2305_v59, %v660_v1  ;;  %v726_v36 = vpack.c.bf16 %v700_v27, %v698_v45  ;;  %v661_v61 = vmul.f32 %v2290_v52, %v618_v39  ;;  %v587_v14 = vadd.f32 1e-05, %v571_v32 }
 0x157   : > { %v1705_v38 = vpop.eup %1704  ;;  %v705_v57 = vadd.f32 %v2305_v59, %v662_v53  ;;  %v623_v63 = vmul.f32 %v1703_v24, %v2112_v58  ;;  %v659_v58 = vmul.f32 %v2290_v52, %v616_v55  ;;  %v586_v28 = vadd.f32 1e-05, %v570_v41 }
 0x158   : > { %1118 = vmatmul.mubr.bf16.gmra.mxu0 %v724_v44  ;;  %1229 = vmatmul.mubr.bf16.gmra.mxu1 %v724_v44  ;;  %v621_v60 = vmul.f32 %v1705_v38, %v2104_v7  ;;  %v704_v7 = vadd.f32 %v2302_v54, %v661_v61  ;;  %v622_v51 = vmul.f32 %v1703_v24, %v2108_v56  ;;  %1714 = vrsqrt.f32 %v587_v14 }
 0x159   : > { %1127 = vmatprep.mubr.bf16.mxu0 %v727_v33  ;;  %1236 = vmatprep.mubr.bf16.mxu1 %v727_v33  ;;  %v729_v2 = vpack.c.bf16 %v705_v57, %v703_v62  ;;  %v666_v46 = vmul.f32 %v2293_v43, %v623_v63  ;;  %v702_v18 = vadd.f32 %v2302_v54, %v659_v58  ;;  %1716 = vrsqrt.f32 %v586_v28 }
 0x15a   : > { %v664_v22 = vmul.f32 %v2293_v43, %v621_v60  ;;  %v620_v23 = vmul.f32 %v1705_v38, %v2100_v11  ;;  %v665_v6 = vmul.f32 %v2290_v52, %v622_v51 }
 0x15b   : > { %v1707_v35 = vpop.eup %1706  ;;  %v709_v47 = vadd.f32 %v2305_v59, %v666_v46  ;;  %v728_v16 = vpack.c.bf16 %v704_v7, %v702_v18 }
 0x15c   : > { %v1709_v37 = vpop.eup %1708  ;;  %v627_v26 = vmul.f32 %v1707_v35, %v2142_v20  ;;  %v707_v4 = vadd.f32 %v2305_v59, %v664_v22  ;;  %v663_v20 = vmul.f32 %v2290_v52, %v620_v23  ;;  %v708_v49 = vadd.f32 %v2302_v54, %v665_v6 }
 0x15d   : > { %v625_v48 = vmul.f32 %v1709_v37, %v2134_v13  ;;  %v626_v13 = vmul.f32 %v1707_v35, %v2138_v19  ;;  %v624_v34 = vmul.f32 %v1709_v37, %v2130_v21 }
 0x15e   : > { %v731_v40 = vpack.c.bf16 %v709_v47, %v707_v4  ;;  %v670_v56 = vmul.f32 %v2293_v43, %v627_v26  ;;  %v706_v24 = vadd.f32 %v2302_v54, %v663_v20  ;;  %v814_v47 = vsub.s32 2, %v2278_v9 }
 0x15f   : > { %v668_v11 = vmul.f32 %v2293_v43, %v625_v48  ;;  %v669_v38 = vmul.f32 %v2290_v52, %v626_v13  ;;  %v667_v19 = vmul.f32 %v2290_v52, %v624_v34 }
 0x160   : > { %1128 = vmatmul.mubr.bf16.gmra.mxu0 %v726_v36  ;;  %1237 = vmatmul.mubr.bf16.gmra.mxu1 %v726_v36  ;;  %v713_v33 = vadd.f32 %v2305_v59, %v670_v56  ;;  %v730_v1 = vpack.c.bf16 %v708_v49, %v706_v24 }
 0x161   : > { %1137 = vmatprep.mubr.bf16.mxu0 %v729_v2  ;;  %1244 = vmatprep.mubr.bf16.mxu1 %v729_v2  ;;  %v1711_v44 = vpop.eup %1710  ;;  %v711_v12 = vadd.f32 %v2305_v59, %v668_v11  ;;  %v712_v32 = vadd.f32 %v2302_v54, %v669_v38  ;;  %v710_v45 = vadd.f32 %v2302_v54, %v667_v19 }
 0x162   : > { %v1713_v50 = vpop.eup %1712  ;;  %v631_v53 = vmul.f32 %v1711_v44, %v2178_v0 }
 0x163   : > { %v629_v15 = vmul.f32 %v1713_v50, %v2170_v10  ;;  %v733_v5 = vpack.c.bf16 %v713_v33, %v711_v12  ;;  %v630_v10 = vmul.f32 %v1711_v44, %v2174_v3  ;;  %v628_v55 = vmul.f32 %v1713_v50, %v2166_v31 }
 0x164   : > { %v674_v27 = vmul.f32 %v2293_v43, %v631_v53  ;;  %v732_v60 = vpack.c.bf16 %v712_v32, %v710_v45 }
 0x165   : > { %v1715_v39 = vpop.eup %1714  ;;  %v672_v0 = vmul.f32 %v2293_v43, %v629_v15  ;;  %v673_v36 = vmul.f32 %v2290_v52, %v630_v10  ;;  %v671_v3 = vmul.f32 %v2290_v52, %v628_v55 }
 0x166   : > { %v1717_v21 = vpop.eup %1716  ;;  %v717_v57 = vadd.f32 %v2305_v59, %v674_v27  ;;  %v635_v63 = vmul.f32 %v1715_v39, %v2214_v42  ;;  %v634_v2 = vmul.f32 %v1715_v39, %v2210_v25 }
 0x167   : > { %v715_v41 = vadd.f32 %v2305_v59, %v672_v0  ;;  %v633_v62 = vmul.f32 %v1717_v21, %v2206_v17  ;;  %v716_v31 = vadd.f32 %v2302_v54, %v673_v36  ;;  %v714_v46 = vadd.f32 %v2302_v54, %v671_v3 }
 0x168   : > { %1138 = vmatmul.mubr.bf16.gmra.mxu0 %v728_v16  ;;  %1245 = vmatmul.mubr.bf16.gmra.mxu1 %v728_v16  ;;  %v678_v14 = vmul.f32 %v2293_v43, %v635_v63  ;;  %v632_v35 = vmul.f32 %v1717_v21, %v2202_v8  ;;  %v677_v22 = vmul.f32 %v2290_v52, %v634_v2  ;;  %v802_v8 = vld [vmem:[%s2527_s4] sm:$0x7] }
 0x169   : > { %1147 = vmatprep.mubr.bf16.mxu0 %v731_v40  ;;  %1252 = vmatprep.mubr.bf16.mxu1 %v731_v40  ;;  %v735_v61 = vpack.c.bf16 %v717_v57, %v715_v41  ;;  %v676_v42 = vmul.f32 %v2293_v43, %v633_v62  ;;  %v734_v28 = vpack.c.bf16 %v716_v31, %v714_v46 }
 0x16a   : > { %v721_v17 = vadd.f32 %v2305_v59, %v678_v14  ;;  %v675_v43 = vmul.f32 %v2290_v52, %v632_v35  ;;  %v720_v25 = vadd.f32 %v2302_v54, %v677_v22  ;;  %v2409_v52 = vrot.slane %v802_v8, %v2284_v30 }
 0x16b   : > { %v719_v58 = vadd.f32 %v2305_v59, %v676_v42  ;;  %v2405_v59 = vrot.slane %v802_v8, %v2281_v29  ;;  %v2417_v29 = vrot.slane %v802_v8, %v814_v47 }
 0x16c   : > { %v718_v7 = vadd.f32 %v2302_v54, %v675_v43 }
 0x16d   : > { %v737_v37 = vpack.c.bf16 %v721_v17, %v719_v58 }
 0x16e   : > { %v736_v51 = vpack.c.bf16 %v720_v25, %v718_v7 }
 0x170   : > { %1148 = vmatmul.mubr.bf16.gmra.mxu0 %v730_v1  ;;  %1253 = vmatmul.mubr.bf16.gmra.mxu1 %v730_v1 }
 0x171   : > { %1157 = vmatprep.mubr.bf16.mxu0 %v733_v5  ;;  %1260 = vmatprep.mubr.bf16.mxu1 %v733_v5 }
 0x178   : > { %1158 = vmatmul.mubr.bf16.gmra.mxu0 %v732_v60  ;;  %1261 = vmatmul.mubr.bf16.gmra.mxu1 %v732_v60 }
 0x179   : > { %1167 = vmatprep.mubr.bf16.mxu0 %v735_v61  ;;  %1268 = vmatprep.mubr.bf16.mxu1 %v735_v61 }
 0x180   : > { %1168 = vmatmul.mubr.bf16.gmra.mxu0 %v734_v28  ;;  %1269 = vmatmul.mubr.bf16.gmra.mxu1 %v734_v28 }
 0x181   : > { %1177 = vmatprep.mubr.bf16.mxu0 %v737_v37  ;;  %1276 = vmatprep.mubr.bf16.mxu1 %v737_v37 }
 0x188   : > { %1178 = vmatmul.mubr.bf16.gmra.mxu0 %v736_v51  ;;  %1277 = vmatmul.mubr.bf16.gmra.mxu1 %v736_v51 }
 0x210   : > { %v1109_v54 = vpop.f32.mrf.mxu0  ;;  %v1549_v26 = vpop.f32.mrf.mxu1 }
 0x211   : > { %v1110_v18 = vadd.f32 %v1109_v54, %v2405_v59 }
 0x212   : > { %v1111_v23 = vpop.f32.mrf.mxu0  ;;  %v1550_v9 = vpop.f32.mrf.mxu1 }
 0x213   : > { %1285 = vst [vmem:[%s2414_s26] sm:$0xff] %v1110_v18  ;;  %v1112_v30 = vadd.f32 %v1111_v23, %v2409_v52  ;;  %v1551_v4 = vadd.f32 %v1550_v9, %v1549_v26 }
 0x214   : > { %v1113_v48 = vpop.f32.mrf.mxu0  ;;  %v1552_v16 = vpop.f32.mrf.mxu1 }
 0x215   : > { %1286 = vst [vmem:[%s2414_s26 + $0x8] sm:$0xff] %v1112_v30  ;;  %v1223_v6 = vadd.f32 %v1551_v4, %v2417_v29  ;;  %v1114_v40 = vadd.f32 %v1113_v48, %v2405_v59 }
 0x216   : > { %v1115_v56 = vpop.f32.mrf.mxu0  ;;  %v1553_v44 = vpop.f32.mrf.mxu1 }
 0x217   : > { %1287 = vst [vmem:[%s2414_s26 + $0x10] sm:$0xff] %v1223_v6  ;;  %1288 = vst [vmem:[%s2414_s26 + $0x18] sm:$0xff] %v1114_v40  ;;  %v1116_v20 = vadd.f32 %v1115_v56, %v2409_v52  ;;  %v1554_v11 = vadd.f32 %v1553_v44, %v1552_v16 }
 0x218   : > { %v1119_v50 = vpop.f32.mrf.mxu0  ;;  %v1555_v49 = vpop.f32.mrf.mxu1 }
 0x219   : > { %1289 = vst [vmem:[%s2414_s26 + $0x20] sm:$0xff] %v1116_v20  ;;  %v1226_v13 = vadd.f32 %v1554_v11, %v2417_v29  ;;  %v1120_v33 = vadd.f32 %v1119_v50, %v2405_v59 }
 0x21a   : > { %v1121_v53 = vpop.f32.mrf.mxu0  ;;  %v1556_v24 = vpop.f32.mrf.mxu1 }
 0x21b   : > { %1290 = vst [vmem:[%s2414_s26 + $0x28] sm:$0xff] %v1226_v13  ;;  %1291 = vst [vmem:[%s2414_s26 + $0x30] sm:$0xff] %v1120_v33  ;;  %v1122_v34 = vadd.f32 %v1121_v53, %v2409_v52  ;;  %v1557_v12 = vadd.f32 %v1556_v24, %v1555_v49 }
 0x21c   : > { %v1123_v15 = vpop.f32.mrf.mxu0  ;;  %v1558_v1 = vpop.f32.mrf.mxu1 }
 0x21d   : > { %1292 = vst [vmem:[%s2414_s26 + $0x38] sm:$0xff] %v1122_v34  ;;  %v1231_v38 = vadd.f32 %v1557_v12, %v2417_v29  ;;  %v1124_v5 = vadd.f32 %v1123_v15, %v2405_v59 }
 0x21e   : > { %v1125_v27 = vpop.f32.mrf.mxu0  ;;  %v1559_v39 = vpop.f32.mrf.mxu1 }
 0x21f   : > { %1293 = vst [vmem:[%s2414_s26 + $0x40] sm:$0xff] %v1231_v38  ;;  %1294 = vst [vmem:[%s2414_s26 + $0x48] sm:$0xff] %v1124_v5  ;;  %v1126_v19 = vadd.f32 %v1125_v27, %v2409_v52  ;;  %v1560_v0 = vadd.f32 %v1559_v39, %v1558_v1 }
 0x220   : > { %v1129_v21 = vpop.f32.mrf.mxu0  ;;  %v1561_v32 = vpop.f32.mrf.mxu1 }
 0x221   : > { %1295 = vst [vmem:[%s2414_s26 + $0x50] sm:$0xff] %v1126_v19  ;;  %v1234_v10 = vadd.f32 %v1560_v0, %v2417_v29  ;;  %v1130_v57 = vadd.f32 %v1129_v21, %v2405_v59 }
 0x222   : > { %v1131_v63 = vpop.f32.mrf.mxu0  ;;  %v1562_v45 = vpop.f32.mrf.mxu1 }
 0x223   : > { %1296 = vst [vmem:[%s2414_s26 + $0x58] sm:$0xff] %v1234_v10  ;;  %1297 = vst [vmem:[%s2414_s26 + $0x60] sm:$0xff] %v1130_v57  ;;  %v1132_v55 = vadd.f32 %v1131_v63, %v2409_v52  ;;  %v1563_v41 = vadd.f32 %v1562_v45, %v1561_v32 }
 0x224   : > { %v1133_v62 = vpop.f32.mrf.mxu0  ;;  %v1564_v60 = vpop.f32.mrf.mxu1 }
 0x225   : > { %1298 = vst [vmem:[%s2414_s26 + $0x68] sm:$0xff] %v1132_v55  ;;  %v1239_v36 = vadd.f32 %v1563_v41, %v2417_v29  ;;  %v1134_v61 = vadd.f32 %v1133_v62, %v2405_v59 }
 0x226   : > { %v1135_v14 = vpop.f32.mrf.mxu0  ;;  %v1565_v3 = vpop.f32.mrf.mxu1 }
 0x227   : > { %1299 = vst [vmem:[%s2414_s26 + $0x70] sm:$0xff] %v1239_v36  ;;  %1300 = vst [vmem:[%s2414_s26 + $0x78] sm:$0xff] %v1134_v61  ;;  %v1136_v42 = vadd.f32 %v1135_v14, %v2409_v52  ;;  %v1566_v31 = vadd.f32 %v1565_v3, %v1564_v60 }
 0x228   : > { %v1139_v2 = vpop.f32.mrf.mxu0  ;;  %v1567_v17 = vpop.f32.mrf.mxu1 }
 0x229   : > { %1301 = vst [vmem:[%s2414_s26 + $0x80] sm:$0xff] %v1136_v42  ;;  %v1242_v46 = vadd.f32 %v1566_v31, %v2417_v29  ;;  %v1140_v35 = vadd.f32 %v1139_v2, %v2405_v59 }
 0x22a   : > { %v1141_v58 = vpop.f32.mrf.mxu0  ;;  %v1568_v28 = vpop.f32.mrf.mxu1 }
 0x22b   : > { %1302 = vst [vmem:[%s2414_s26 + $0x88] sm:$0xff] %v1242_v46  ;;  %1303 = vst [vmem:[%s2414_s26 + $0x90] sm:$0xff] %v1140_v35  ;;  %v1142_v22 = vadd.f32 %v1141_v58, %v2409_v52  ;;  %v1569_v37 = vadd.f32 %v1568_v28, %v1567_v17 }
 0x22c   : > { %v1143_v43 = vpop.f32.mrf.mxu0  ;;  %v1570_v25 = vpop.f32.mrf.mxu1 }
 0x22d   : > { %1304 = vst [vmem:[%s2414_s26 + $0x98] sm:$0xff] %v1142_v22  ;;  %v1247_v7 = vadd.f32 %v1569_v37, %v2417_v29  ;;  %v1144_v51 = vadd.f32 %v1143_v43, %v2405_v59 }
 0x22e   : > { %v1145_v8 = vpop.f32.mrf.mxu0  ;;  %v1571_v47 = vpop.f32.mrf.mxu1 }
 0x22f   : > { %1305 = vst [vmem:[%s2414_s26 + $0xa0] sm:$0xff] %v1247_v7  ;;  %1306 = vst [vmem:[%s2414_s26 + $0xa8] sm:$0xff] %v1144_v51  ;;  %v1146_v54 = vadd.f32 %v1145_v8, %v2409_v52  ;;  %v1572_v26 = vadd.f32 %v1571_v47, %v1570_v25 }
 0x230   : > { %v1149_v18 = vpop.f32.mrf.mxu0  ;;  %v1573_v23 = vpop.f32.mrf.mxu1 }
 0x231   : > { %1307 = vst [vmem:[%s2414_s26 + $0xb0] sm:$0xff] %v1146_v54  ;;  %v1250_v9 = vadd.f32 %v1572_v26, %v2417_v29  ;;  %v1150_v30 = vadd.f32 %v1149_v18, %v2405_v59 }
 0x232   : > { %v1151_v4 = vpop.f32.mrf.mxu0  ;;  %v1574_v48 = vpop.f32.mrf.mxu1 }
 0x233   : > { %1308 = vst [vmem:[%s2414_s26 + $0xb8] sm:$0xff] %v1250_v9  ;;  %1309 = vst [vmem:[%s2414_s26 + $0xc0] sm:$0xff] %v1150_v30  ;;  %v1152_v16 = vadd.f32 %v1151_v4, %v2409_v52  ;;  %v1575_v6 = vadd.f32 %v1574_v48, %v1573_v23 }
 0x234   : > { %v1153_v40 = vpop.f32.mrf.mxu0  ;;  %v1576_v56 = vpop.f32.mrf.mxu1 }
 0x235   : > { %1310 = vst [vmem:[%s2414_s26 + $0xc8] sm:$0xff] %v1152_v16  ;;  %v1255_v44 = vadd.f32 %v1575_v6, %v2417_v29  ;;  %v1154_v20 = vadd.f32 %v1153_v40, %v2405_v59 }
 0x236   : > { %v1155_v11 = vpop.f32.mrf.mxu0  ;;  %v1577_v50 = vpop.f32.mrf.mxu1 }
 0x237   : > { %1311 = vst [vmem:[%s2414_s26 + $0xd0] sm:$0xff] %v1255_v44  ;;  %1312 = vst [vmem:[%s2414_s26 + $0xd8] sm:$0xff] %v1154_v20  ;;  %v1156_v49 = vadd.f32 %v1155_v11, %v2409_v52  ;;  %v1578_v13 = vadd.f32 %v1577_v50, %v1576_v56 }
 0x238   : > { %v1159_v33 = vpop.f32.mrf.mxu0  ;;  %v1579_v53 = vpop.f32.mrf.mxu1 }
 0x239   : > { %1313 = vst [vmem:[%s2414_s26 + $0xe0] sm:$0xff] %v1156_v49  ;;  %v1258_v24 = vadd.f32 %v1578_v13, %v2417_v29  ;;  %v1160_v34 = vadd.f32 %v1159_v33, %v2405_v59 }
 0x23a   : > { %v1161_v12 = vpop.f32.mrf.mxu0  ;;  %v1580_v15 = vpop.f32.mrf.mxu1 }
 0x23b   : > { %1314 = vst [vmem:[%s2414_s26 + $0xe8] sm:$0xff] %v1258_v24  ;;  %1315 = vst [vmem:[%s2414_s26 + $0xf0] sm:$0xff] %v1160_v34  ;;  %v1162_v1 = vadd.f32 %v1161_v12, %v2409_v52  ;;  %v1581_v38 = vadd.f32 %v1580_v15, %v1579_v53 }
 0x23c   : > { %v1163_v5 = vpop.f32.mrf.mxu0  ;;  %v1582_v27 = vpop.f32.mrf.mxu1 }
 0x23d   : > { %1316 = vst [vmem:[%s2414_s26 + $0xf8] sm:$0xff] %v1162_v1  ;;  %v1263_v39 = vadd.f32 %v1581_v38, %v2417_v29  ;;  %v1164_v19 = vadd.f32 %v1163_v5, %v2405_v59 }
 0x23e   : > { %v1165_v0 = vpop.f32.mrf.mxu0  ;;  %v1583_v21 = vpop.f32.mrf.mxu1 }
 0x23f   : > { %1317 = vst [vmem:[%s2414_s26 + $0x100] sm:$0xff] %v1263_v39  ;;  %1318 = vst [vmem:[%s2414_s26 + $0x108] sm:$0xff] %v1164_v19  ;;  %v1166_v32 = vadd.f32 %v1165_v0, %v2409_v52  ;;  %v1584_v10 = vadd.f32 %v1583_v21, %v1582_v27 }
 0x240   : > { %v1169_v57 = vpop.f32.mrf.mxu0  ;;  %v1585_v63 = vpop.f32.mrf.mxu1 }
 0x241   : > { %1319 = vst [vmem:[%s2414_s26 + $0x110] sm:$0xff] %v1166_v32  ;;  %v1266_v45 = vadd.f32 %v1584_v10, %v2417_v29  ;;  %v1170_v55 = vadd.f32 %v1169_v57, %v2405_v59 }
 0x242   : > { %v1171_v41 = vpop.f32.mrf.mxu0  ;;  %v1586_v62 = vpop.f32.mrf.mxu1 }
 0x243   : > { %1320 = vst [vmem:[%s2414_s26 + $0x118] sm:$0xff] %v1266_v45  ;;  %1321 = vst [vmem:[%s2414_s26 + $0x120] sm:$0xff] %v1170_v55  ;;  %v1172_v60 = vadd.f32 %v1171_v41, %v2409_v52  ;;  %v1587_v36 = vadd.f32 %v1586_v62, %v1585_v63 }
 0x244   : > { %v1173_v61 = vpop.f32.mrf.mxu0  ;;  %v1588_v14 = vpop.f32.mrf.mxu1 }
 0x245   : > { %1322 = vst [vmem:[%s2414_s26 + $0x128] sm:$0xff] %v1172_v60  ;;  %v1271_v3 = vadd.f32 %v1587_v36, %v2417_v29  ;;  %v1174_v42 = vadd.f32 %v1173_v61, %v2405_v59 }
 0x246   : > { %v1175_v31 = vpop.f32.mrf.mxu0  ;;  %v1589_v2 = vpop.f32.mrf.mxu1 }
 0x247   : > { %1323 = vst [vmem:[%s2414_s26 + $0x130] sm:$0xff] %v1271_v3  ;;  %1324 = vst [vmem:[%s2414_s26 + $0x138] sm:$0xff] %v1174_v42  ;;  %v1176_v17 = vadd.f32 %v1175_v31, %v2409_v52  ;;  %v1590_v46 = vadd.f32 %v1589_v2, %v1588_v14 }
 0x248   : > { %v1179_v35 = vpop.f32.mrf.mxu0  ;;  %v1591_v58 = vpop.f32.mrf.mxu1 }
 0x249   : > { %1325 = vst [vmem:[%s2414_s26 + $0x140] sm:$0xff] %v1176_v17  ;;  %v1274_v28 = vadd.f32 %v1590_v46, %v2417_v29  ;;  %v1180_v22 = vadd.f32 %v1179_v35, %v2405_v59 }
 0x24a   : > { %v1181_v37 = vpop.f32.mrf.mxu0  ;;  %v1592_v43 = vpop.f32.mrf.mxu1 }
 0x24b   : > { %1326 = vst [vmem:[%s2414_s26 + $0x148] sm:$0xff] %v1274_v28  ;;  %1327 = vst [vmem:[%s2414_s26 + $0x150] sm:$0xff] %v1180_v22  ;;  %v1182_v25 = vadd.f32 %v1181_v37, %v2409_v52  ;;  %v1593_v7 = vadd.f32 %v1592_v43, %v1591_v58 }
 0x24c   : > { %v1183_v51 = vpop.f32.mrf.mxu0  ;;  %v1594_v8 = vpop.f32.mrf.mxu1 }
 0x24d   : > { %1328 = vst [vmem:[%s2414_s26 + $0x158] sm:$0xff] %v1182_v25  ;;  %v1279_v47 = vadd.f32 %v1593_v7, %v2417_v29  ;;  %v1184_v54 = vadd.f32 %v1183_v51, %v2405_v59 }
 0x24e   : > { %v1185_v26 = vpop.f32.mrf.mxu0  ;;  %v1595_v18 = vpop.f32.mrf.mxu1 }
 0x24f   : > { %1329 = vst [vmem:[%s2414_s26 + $0x160] sm:$0xff] %v1279_v47  ;;  %1330 = vst [vmem:[%s2414_s26 + $0x168] sm:$0xff] %v1184_v54  ;;  %v1186_v23 = vadd.f32 %v1185_v26, %v2409_v52  ;;  %v1596_v9 = vadd.f32 %v1595_v18, %v1594_v8 }
 0x251   : > { %1331 = vst [vmem:[%s2414_s26 + $0x170] sm:$0xff] %v1186_v23  ;;  %v1282_v30 = vadd.f32 %v1596_v9, %v2417_v29 }
 0x253   : > { %1332 = vst [vmem:[%s2414_s26 + $0x178] sm:$0xff] %v1282_v30 }
 0x254 PF: > { %s15_s20 = sadd.s32 1, %s1740_s20   ;;  %s2529_s18 = smov %s1736_s19 }
 0x255   : > { %p12_p5 = scmp.ge.s32.totalorder %s15_s20, 4   ;;  %s2530_s19 = smov %s2532_s21 }
 0x257   :  { %14 = sbr.rel (!%p12_p5) target bundleno = 2 (0x2), region = 76 }

// kernel: vanilla_transformer_forward.12
= control target key start
LH: loop header
LB: loop body
LE: loop exit
PB: predicated region body
PF: predicated region fallthrough
CT: control target
= control target key end

     0   :  { %s5953_s0 = inlined_call_operand.vmem [shape: bf16[2,128,256], index: 0, kind: input, shape index: {}]   ;;  %s5954_s1 = inlined_call_operand.vmem [shape: f32[1,256], index: 1, kind: input, shape index: {}]   ;;  %s5955_s2 = inlined_call_operand.vmem [shape: f32[1,256], index: 2, kind: input, shape index: {}]   ;;  %s5956_s3 = inlined_call_operand.vmem [shape: bf16[256,1024], index: 3, kind: input, shape index: {}]   ;;  %s5957_s4 = inlined_call_operand.vmem [shape: f32[1,1024], index: 4, kind: input, shape index: {}]   ;;  %s5958_s5 = inlined_call_operand.vmem [shape: bf16[1024,256], index: 5, kind: input, shape index: {}]   ;;  %s5959_s6 = inlined_call_operand.vmem [shape: f32[1,256], index: 6, kind: input, shape index: {}]   ;;  %s5960_s7 = inlined_call_operand.vmem [shape: bf16[2,128,256], index: 7, kind: output, shape index: {}]  }
   0x1   :  { %6019 = sst [smem:[#allocation57_spill]] %s5956_s3 }
   0x2   :  { %s4294_s24 = smov 0   ;;  %s4296_s25 = smov 0  }
   0x3   :  { %s4298_s26 = smov 0   ;;  %s4300_s27 = smov 0  }
   0x4   :  { %s4302_s28 = smov 0   ;;  %s4304_s29 = smov 0  }
   0x5   :  { %s4306_s30 = smov 0  }
   0x6 LB: > { %s29_s8 = sadd.s32 1, %s4243_s28  ;;  %s36_s9 = sadd.s32 1, %s4247_s29  ;;  %s4251_s30 = sphi %s4306_s30, %s17_s30   ;;  %s4247_s29 = sphi %s4304_s29, %s6161_s29   ;;  %s4243_s28 = sphi %s4302_s28, %s6160_s28   ;;  %s4239_s27 = sphi %s4300_s27, %s6159_s27   ;;  %s4235_s26 = sphi %s4298_s26, %s6158_s26   ;;  %s4231_s25 = sphi %s4296_s25, %s6157_s25   ;;  %s4227_s24 = sphi %s4294_s24, %s6156_s24  }
   0x7   : > { %p30_p0 = scmp.ge.s32.totalorder %s29_s8, 2  ;;  %s113_s10 = sadd.s32 1, %s4231_s25 }
   0x8   : > { %p120_p1 = scmp.ne.s32.totalorder %s4231_s25, %s4227_s24  ;;  %p121_p2 = scmp.eq.s32.totalorder %s4251_s30, 0 }
   0x9   : > { %s6163_s8 = smov (%p30_p0, %s29_s8), 0  ;;  %s6165_s9 = smov (!%p30_p0, %s36_s9), %s4247_s29 }
   0xa   : > { %s110_s11 = ssub.s32 %s4243_s28, %s6163_s8  ;;  %p122_p3 = por %p121_p2, %p120_p1 }
   0xb   : > { %p38_p4 = scmp.ge.s32.totalorder %s6165_s9, 2  ;;  %p111_p5 = scmp.eq.s32.totalorder %s110_s11, 0 }
   0xc   : > { %p3543_p6 = scmp.ge.s32.totalorder %s4251_s30, 4 }
   0xd   : > { %s6167_s9 = smov (%p38_p4, %s6165_s9), 0 }
   0xe   : > { %6020 = sst [smem:[#allocation5_spill]] %s6167_s9  ;;  %270 = sbr.rel (%p3543_p6) target bundleno = 61 (0x3d), region = 32 }
   0xf   : > { %s4343_s12 = scalar_select %p111_p5, %s4231_s25, %s113_s10  }
  0x13   : > { %273 = sbr.rel (!%p122_p3) target bundleno = 61 (0x3d), region = 36  ;;  %s275_s13 = sand.u32 (%p122_p3), 1, %s4231_s25  }
  0x14   : > { %s3737_s14 = sshll.u32 (%p122_p3), %s4243_s28, 4  ;;  %s3544_s15 = sshll.u32 (%p122_p3), %s275_s13, 9 }
  0x15   : > { %s6021_s3 = sld [smem:[#allocation57_spill]] (%p122_p3)  ;;  %s4356_s19 = scalar_lea.vmem (%p122_p3), [#allocation4], %s3544_s15 }
  0x1b   : > { %s4351_s18 = scalar_lea.vmem %s6021_s3, %s3737_s14 }
  0x1c   : > { %v293_v0 = vld [vmem:[%s4351_s18] sm:$0xff]  ;;  %v295_v1 = vld [vmem:[%s4351_s18 + $0x8] sm:$0xff] }
  0x1d   : > { %v297_v2 = vld [vmem:[%s4351_s18 + $0x20] sm:$0xff]  ;;  %294 = vst [vmem:[%s4356_s19] sm:$0xff] %v293_v0  ;;  %296 = vst [vmem:[%s4356_s19 + $0x8] sm:$0xff] %v295_v1  ;;  %v299_v3 = vld [vmem:[%s4351_s18 + $0x28] sm:$0xff] }
  0x1e   : > { %298 = vst [vmem:[%s4356_s19 + $0x10] sm:$0xff] %v297_v2  ;;  %v301_v4 = vld [vmem:[%s4351_s18 + $0x40] sm:$0xff]  ;;  %v303_v5 = vld [vmem:[%s4351_s18 + $0x48] sm:$0xff]  ;;  %300 = vst [vmem:[%s4356_s19 + $0x18] sm:$0xff] %v299_v3 }
  0x1f   : > { %302 = vst [vmem:[%s4356_s19 + $0x20] sm:$0xff] %v301_v4  ;;  %304 = vst [vmem:[%s4356_s19 + $0x28] sm:$0xff] %v303_v5  ;;  %v305_v6 = vld [vmem:[%s4351_s18 + $0x60] sm:$0xff]  ;;  %v307_v7 = vld [vmem:[%s4351_s18 + $0x68] sm:$0xff] }
  0x20   : > { %v309_v8 = vld [vmem:[%s4351_s18 + $0x80] sm:$0xff]  ;;  %306 = vst [vmem:[%s4356_s19 + $0x30] sm:$0xff] %v305_v6  ;;  %308 = vst [vmem:[%s4356_s19 + $0x38] sm:$0xff] %v307_v7  ;;  %v311_v9 = vld [vmem:[%s4351_s18 + $0x88] sm:$0xff] }
  0x21   : > { %310 = vst [vmem:[%s4356_s19 + $0x40] sm:$0xff] %v309_v8  ;;  %v313_v10 = vld [vmem:[%s4351_s18 + $0xa0] sm:$0xff]  ;;  %v315_v11 = vld [vmem:[%s4351_s18 + $0xa8] sm:$0xff]  ;;  %312 = vst [vmem:[%s4356_s19 + $0x48] sm:$0xff] %v311_v9 }
  0x22   : > { %314 = vst [vmem:[%s4356_s19 + $0x50] sm:$0xff] %v313_v10  ;;  %316 = vst [vmem:[%s4356_s19 + $0x58] sm:$0xff] %v315_v11  ;;  %v317_v12 = vld [vmem:[%s4351_s18 + $0xc0] sm:$0xff]  ;;  %v319_v13 = vld [vmem:[%s4351_s18 + $0xc8] sm:$0xff] }
  0x23   : > { %v321_v14 = vld [vmem:[%s4351_s18 + $0xe0] sm:$0xff]  ;;  %318 = vst [vmem:[%s4356_s19 + $0x60] sm:$0xff] %v317_v12  ;;  %320 = vst [vmem:[%s4356_s19 + $0x68] sm:$0xff] %v319_v13  ;;  %v323_v15 = vld [vmem:[%s4351_s18 + $0xe8] sm:$0xff] }
  0x24   : > { %322 = vst [vmem:[%s4356_s19 + $0x70] sm:$0xff] %v321_v14  ;;  %v325_v16 = vld [vmem:[%s4351_s18 + $0x100] sm:$0xff]  ;;  %v327_v17 = vld [vmem:[%s4351_s18 + $0x108] sm:$0xff]  ;;  %324 = vst [vmem:[%s4356_s19 + $0x78] sm:$0xff] %v323_v15 }
  0x25   : > { %326 = vst [vmem:[%s4356_s19 + $0x80] sm:$0xff] %v325_v16  ;;  %328 = vst [vmem:[%s4356_s19 + $0x88] sm:$0xff] %v327_v17  ;;  %v329_v18 = vld [vmem:[%s4351_s18 + $0x120] sm:$0xff]  ;;  %v331_v19 = vld [vmem:[%s4351_s18 + $0x128] sm:$0xff] }
  0x26   : > { %v333_v20 = vld [vmem:[%s4351_s18 + $0x140] sm:$0xff]  ;;  %330 = vst [vmem:[%s4356_s19 + $0x90] sm:$0xff] %v329_v18  ;;  %332 = vst [vmem:[%s4356_s19 + $0x98] sm:$0xff] %v331_v19  ;;  %v335_v21 = vld [vmem:[%s4351_s18 + $0x148] sm:$0xff] }
  0x27   : > { %334 = vst [vmem:[%s4356_s19 + $0xa0] sm:$0xff] %v333_v20  ;;  %v337_v22 = vld [vmem:[%s4351_s18 + $0x160] sm:$0xff]  ;;  %v339_v23 = vld [vmem:[%s4351_s18 + $0x168] sm:$0xff]  ;;  %336 = vst [vmem:[%s4356_s19 + $0xa8] sm:$0xff] %v335_v21 }
  0x28   : > { %338 = vst [vmem:[%s4356_s19 + $0xb0] sm:$0xff] %v337_v22  ;;  %340 = vst [vmem:[%s4356_s19 + $0xb8] sm:$0xff] %v339_v23  ;;  %v341_v24 = vld [vmem:[%s4351_s18 + $0x180] sm:$0xff]  ;;  %v343_v25 = vld [vmem:[%s4351_s18 + $0x188] sm:$0xff] }
  0x29   : > { %v345_v26 = vld [vmem:[%s4351_s18 + $0x1a0] sm:$0xff]  ;;  %342 = vst [vmem:[%s4356_s19 + $0xc0] sm:$0xff] %v341_v24  ;;  %344 = vst [vmem:[%s4356_s19 + $0xc8] sm:$0xff] %v343_v25  ;;  %v347_v27 = vld [vmem:[%s4351_s18 + $0x1a8] sm:$0xff] }
  0x2a   : > { %346 = vst [vmem:[%s4356_s19 + $0xd0] sm:$0xff] %v345_v26  ;;  %v349_v28 = vld [vmem:[%s4351_s18 + $0x1c0] sm:$0xff]  ;;  %v351_v29 = vld [vmem:[%s4351_s18 + $0x1c8] sm:$0xff]  ;;  %348 = vst [vmem:[%s4356_s19 + $0xd8] sm:$0xff] %v347_v27 }
  0x2b   : > { %350 = vst [vmem:[%s4356_s19 + $0xe0] sm:$0xff] %v349_v28  ;;  %352 = vst [vmem:[%s4356_s19 + $0xe8] sm:$0xff] %v351_v29  ;;  %v353_v30 = vld [vmem:[%s4351_s18 + $0x1e0] sm:$0xff]  ;;  %v355_v31 = vld [vmem:[%s4351_s18 + $0x1e8] sm:$0xff] }
  0x2c   : > { %v357_v32 = vld [vmem:[%s4351_s18 + $0x200] sm:$0xff]  ;;  %354 = vst [vmem:[%s4356_s19 + $0xf0] sm:$0xff] %v353_v30  ;;  %356 = vst [vmem:[%s4356_s19 + $0xf8] sm:$0xff] %v355_v31  ;;  %v359_v33 = vld [vmem:[%s4351_s18 + $0x208] sm:$0xff] }
  0x2d   : > { %358 = vst [vmem:[%s4356_s19 + $0x100] sm:$0xff] %v357_v32  ;;  %v361_v34 = vld [vmem:[%s4351_s18 + $0x220] sm:$0xff]  ;;  %v363_v35 = vld [vmem:[%s4351_s18 + $0x228] sm:$0xff]  ;;  %360 = vst [vmem:[%s4356_s19 + $0x108] sm:$0xff] %v359_v33 }
  0x2e   : > { %362 = vst [vmem:[%s4356_s19 + $0x110] sm:$0xff] %v361_v34  ;;  %364 = vst [vmem:[%s4356_s19 + $0x118] sm:$0xff] %v363_v35  ;;  %v365_v36 = vld [vmem:[%s4351_s18 + $0x240] sm:$0xff]  ;;  %v367_v37 = vld [vmem:[%s4351_s18 + $0x248] sm:$0xff] }
  0x2f   : > { %v369_v38 = vld [vmem:[%s4351_s18 + $0x260] sm:$0xff]  ;;  %366 = vst [vmem:[%s4356_s19 + $0x120] sm:$0xff] %v365_v36  ;;  %368 = vst [vmem:[%s4356_s19 + $0x128] sm:$0xff] %v367_v37  ;;  %v371_v39 = vld [vmem:[%s4351_s18 + $0x268] sm:$0xff] }
  0x30   : > { %370 = vst [vmem:[%s4356_s19 + $0x130] sm:$0xff] %v369_v38  ;;  %v373_v40 = vld [vmem:[%s4351_s18 + $0x280] sm:$0xff]  ;;  %v375_v41 = vld [vmem:[%s4351_s18 + $0x288] sm:$0xff]  ;;  %372 = vst [vmem:[%s4356_s19 + $0x138] sm:$0xff] %v371_v39 }
  0x31   : > { %374 = vst [vmem:[%s4356_s19 + $0x140] sm:$0xff] %v373_v40  ;;  %376 = vst [vmem:[%s4356_s19 + $0x148] sm:$0xff] %v375_v41  ;;  %v377_v42 = vld [vmem:[%s4351_s18 + $0x2a0] sm:$0xff]  ;;  %v379_v43 = vld [vmem:[%s4351_s18 + $0x2a8] sm:$0xff] }
  0x32   : > { %v381_v44 = vld [vmem:[%s4351_s18 + $0x2c0] sm:$0xff]  ;;  %378 = vst [vmem:[%s4356_s19 + $0x150] sm:$0xff] %v377_v42  ;;  %380 = vst [vmem:[%s4356_s19 + $0x158] sm:$0xff] %v379_v43  ;;  %v383_v45 = vld [vmem:[%s4351_s18 + $0x2c8] sm:$0xff] }
  0x33   : > { %382 = vst [vmem:[%s4356_s19 + $0x160] sm:$0xff] %v381_v44  ;;  %v385_v46 = vld [vmem:[%s4351_s18 + $0x2e0] sm:$0xff]  ;;  %v387_v47 = vld [vmem:[%s4351_s18 + $0x2e8] sm:$0xff]  ;;  %384 = vst [vmem:[%s4356_s19 + $0x168] sm:$0xff] %v383_v45 }
  0x34   : > { %386 = vst [vmem:[%s4356_s19 + $0x170] sm:$0xff] %v385_v46  ;;  %388 = vst [vmem:[%s4356_s19 + $0x178] sm:$0xff] %v387_v47  ;;  %v389_v48 = vld [vmem:[%s4351_s18 + $0x300] sm:$0xff]  ;;  %v391_v49 = vld [vmem:[%s4351_s18 + $0x308] sm:$0xff] }
  0x35   : > { %v393_v50 = vld [vmem:[%s4351_s18 + $0x320] sm:$0xff]  ;;  %390 = vst [vmem:[%s4356_s19 + $0x180] sm:$0xff] %v389_v48  ;;  %392 = vst [vmem:[%s4356_s19 + $0x188] sm:$0xff] %v391_v49  ;;  %v395_v51 = vld [vmem:[%s4351_s18 + $0x328] sm:$0xff] }
  0x36   : > { %394 = vst [vmem:[%s4356_s19 + $0x190] sm:$0xff] %v393_v50  ;;  %v397_v52 = vld [vmem:[%s4351_s18 + $0x340] sm:$0xff]  ;;  %v399_v53 = vld [vmem:[%s4351_s18 + $0x348] sm:$0xff]  ;;  %396 = vst [vmem:[%s4356_s19 + $0x198] sm:$0xff] %v395_v51 }
  0x37   : > { %398 = vst [vmem:[%s4356_s19 + $0x1a0] sm:$0xff] %v397_v52  ;;  %400 = vst [vmem:[%s4356_s19 + $0x1a8] sm:$0xff] %v399_v53  ;;  %v401_v54 = vld [vmem:[%s4351_s18 + $0x360] sm:$0xff]  ;;  %v403_v55 = vld [vmem:[%s4351_s18 + $0x368] sm:$0xff] }
  0x38   : > { %v405_v56 = vld [vmem:[%s4351_s18 + $0x380] sm:$0xff]  ;;  %402 = vst [vmem:[%s4356_s19 + $0x1b0] sm:$0xff] %v401_v54  ;;  %404 = vst [vmem:[%s4356_s19 + $0x1b8] sm:$0xff] %v403_v55  ;;  %v407_v57 = vld [vmem:[%s4351_s18 + $0x388] sm:$0xff] }
  0x39   : > { %406 = vst [vmem:[%s4356_s19 + $0x1c0] sm:$0xff] %v405_v56  ;;  %v409_v58 = vld [vmem:[%s4351_s18 + $0x3a0] sm:$0xff]  ;;  %v411_v59 = vld [vmem:[%s4351_s18 + $0x3a8] sm:$0xff]  ;;  %408 = vst [vmem:[%s4356_s19 + $0x1c8] sm:$0xff] %v407_v57 }
  0x3a   : > { %410 = vst [vmem:[%s4356_s19 + $0x1d0] sm:$0xff] %v409_v58  ;;  %412 = vst [vmem:[%s4356_s19 + $0x1d8] sm:$0xff] %v411_v59  ;;  %v413_v60 = vld [vmem:[%s4351_s18 + $0x3c0] sm:$0xff]  ;;  %v415_v61 = vld [vmem:[%s4351_s18 + $0x3c8] sm:$0xff] }
  0x3b   : > { %v417_v62 = vld [vmem:[%s4351_s18 + $0x3e0] sm:$0xff]  ;;  %414 = vst [vmem:[%s4356_s19 + $0x1e0] sm:$0xff] %v413_v60  ;;  %416 = vst [vmem:[%s4356_s19 + $0x1e8] sm:$0xff] %v415_v61  ;;  %v419_v63 = vld [vmem:[%s4351_s18 + $0x3e8] sm:$0xff] }
  0x3c   : > { %418 = vst [vmem:[%s4356_s19 + $0x1f0] sm:$0xff] %v417_v62  ;;  %420 = vst [vmem:[%s4356_s19 + $0x1f8] sm:$0xff] %v419_v63 }
  0x3d PF: > { %p3547_p7 = scmp.ge.s32.totalorder %s4251_s30, 1  ;;  %p443_p8 = scmp.lt.s32.totalorder %s4251_s30, 5 }
  0x3f   : > { %p444_p9 = pnand %p3547_p7, %p443_p8 }
  0x41   : > { %447 = sbr.rel (%p444_p9) target bundleno = 1119 (0x45f), region = 67 }
  0x46   : > { %s450_s20 = sand.u32 1, %s4227_s24   ;;  %p507_p10 = scmp.lt.s32.totalorder %s4239_s27, 1 }
  0x47   : > { %s3548_s21 = sshll.u32 %s450_s20, 9  ;;  %s3551_s22 = sshll.u32 %s4235_s26, 2 }
  0x48   : > { %p519_p11 = scmp.lt.s32.totalorder %s3551_s22, 7  ;;  %s6169_s27 = smov (!%p507_p10, %s4239_s27), 1 }
  0x49   : > { %s3738_s23 = sshll.u32 %s6169_s27, 7  ;;  %s3552_s10 = sshll.u32 %s4235_s26, 6 }
  0x4a   : > { %s6171_s22 = smov (!%p519_p11, %s3551_s22), 7  ;;  %s4495_s14 = scalar_lea.vmem %s5953_s0, %s3738_s23 }
  0x4b   : > { %s521_s17 = scalar_lea.vmem %s5957_s4, %s6171_s22  ;;  %p524_p12 = scmp.lt.s32.totalorder %s3552_s10, 127 }
  0x4c   : > { %s4504_s19 = scalar_lea.vmem %s5960_s7, %s3738_s23  ;;  %s4511_s11 = scalar_lea.vmem [#allocation4], %s3548_s21 }
  0x4d   : > { %s6173_s10 = smov (!%p524_p12, %s3552_s10), 127  ;;  %p3557_p13 = scmp.ne.s32.totalorder %s4235_s26, 0 }
  0x4e   : > { %s3739_s20 = sshll.u32 %s6173_s10, 3 }
  0x4f   : > { %s4509_s9 = scalar_lea.vmem %s5958_s5, %s3739_s20  ;;  %544 = sbr.rel (%p3557_p13) target bundleno = 441 (0x1b9), region = 75 }
  0x54   : > { %v4515_v0 = vld [vmem:[%s4495_s14] sm:$0xff]  ;;  %v4518_v1 = vld [vmem:[%s4495_s14 + $0x10] sm:$0xff]  ;;  %v4521_v2 = vld [vmem:[%s4495_s14 + $0x8] sm:$0xff] }
  0x55   : > { %v563_v3 = vunpack.c.l.bf16 %v4515_v0  ;;  %v564_v4 = vunpack.c.h.bf16 %v4515_v0  ;;  %v567_v5 = vunpack.c.l.bf16 %v4518_v1  ;;  %v568_v6 = vunpack.c.h.bf16 %v4518_v1  ;;  %v4528_v7 = vld [vmem:[%s4495_s14 + $0x18] sm:$0xff]  ;;  %v4531_v8 = vld [vmem:[%s4495_s14 + $0x20] sm:$0xff]  ;;  %v4538_v13 = vld [vmem:[%s4495_s14 + $0x28] sm:$0xff] }
  0x56   : > { %v565_v9 = vunpack.c.l.bf16 %v4521_v2  ;;  %v566_v10 = vunpack.c.h.bf16 %v4521_v2  ;;  %v569_v11 = vunpack.c.l.bf16 %v4528_v7  ;;  %v570_v12 = vunpack.c.h.bf16 %v4528_v7  ;;  %v4561_v22 = vld [vmem:[%s4495_s14 + $0x30] sm:$0xff]  ;;  %v4564_v23 = vld [vmem:[%s4495_s14 + $0x38] sm:$0xff]  ;;  %v4579_v30 = vld [vmem:[%s4495_s14 + $0x40] sm:$0xff] }
  0x57   : > { %v595_v14 = vadd.f32 %v564_v4, %v563_v3  ;;  %v601_v15 = vadd.f32 %v568_v6, %v567_v5  ;;  %v571_v16 = vunpack.c.l.bf16 %v4531_v8  ;;  %v572_v17 = vunpack.c.h.bf16 %v4531_v8  ;;  %v4582_v31 = vld [vmem:[%s4495_s14 + $0x48] sm:$0xff]  ;;  %v4597_v38 = vld [vmem:[%s4495_s14 + $0x50] sm:$0xff]  ;;  %v4600_v39 = vld [vmem:[%s4495_s14 + $0x58] sm:$0xff] }
  0x58   : > { %v598_v18 = vadd.f32 %v566_v10, %v565_v9  ;;  %v604_v19 = vadd.f32 %v570_v12, %v569_v11  ;;  %v573_v20 = vunpack.c.l.bf16 %v4538_v13  ;;  %v574_v21 = vunpack.c.h.bf16 %v4538_v13  ;;  %v4615_v46 = vld [vmem:[%s4495_s14 + $0x60] sm:$0xff]  ;;  %v4618_v47 = vld [vmem:[%s4495_s14 + $0x68] sm:$0xff]  ;;  %v4633_v54 = vld [vmem:[%s4495_s14 + $0x70] sm:$0xff] }
  0x59   : > { %596 = vadd.xlane.f32.xlu0 %v595_v14  ;;  %602 = vadd.xlane.f32.xlu1 %v601_v15  ;;  %v607_v24 = vadd.f32 %v572_v17, %v571_v16  ;;  %v575_v25 = vunpack.c.l.bf16 %v4561_v22  ;;  %v576_v27 = vunpack.c.h.bf16 %v4561_v22  ;;  %v577_v28 = vunpack.c.l.bf16 %v4564_v23  ;;  %v4636_v55 = vld [vmem:[%s4495_s14 + $0x78] sm:$0xff] }
  0x5a   : > { %v610_v26 = vadd.f32 %v574_v21, %v573_v20  ;;  %v578_v29 = vunpack.c.h.bf16 %v4564_v23  ;;  %v579_v32 = vunpack.c.l.bf16 %v4579_v30  ;;  %v580_v33 = vunpack.c.h.bf16 %v4579_v30 }
  0x5b   : > { %v613_v34 = vadd.f32 %v576_v27, %v575_v25  ;;  %v581_v36 = vunpack.c.l.bf16 %v4582_v31  ;;  %v582_v37 = vunpack.c.h.bf16 %v4582_v31  ;;  %v583_v41 = vunpack.c.l.bf16 %v4597_v38 }
  0x5c   : > { %v616_v35 = vadd.f32 %v578_v29, %v577_v28  ;;  %v619_v40 = vadd.f32 %v580_v33, %v579_v32  ;;  %v584_v43 = vunpack.c.h.bf16 %v4597_v38  ;;  %v585_v44 = vunpack.c.l.bf16 %v4600_v39 }
  0x5d   : > { %599 = vadd.xlane.f32.xlu0 %v598_v18  ;;  %605 = vadd.xlane.f32.xlu1 %v604_v19  ;;  %v622_v42 = vadd.f32 %v582_v37, %v581_v36  ;;  %v586_v45 = vunpack.c.h.bf16 %v4600_v39  ;;  %v587_v48 = vunpack.c.l.bf16 %v4615_v46  ;;  %v588_v49 = vunpack.c.h.bf16 %v4615_v46 }
  0x5e   : > { %v625_v50 = vadd.f32 %v584_v43, %v583_v41  ;;  %v589_v52 = vunpack.c.l.bf16 %v4618_v47  ;;  %v590_v53 = vunpack.c.h.bf16 %v4618_v47  ;;  %v591_v57 = vunpack.c.l.bf16 %v4633_v54 }
  0x5f   : > { %v628_v51 = vadd.f32 %v586_v45, %v585_v44  ;;  %v631_v56 = vadd.f32 %v588_v49, %v587_v48  ;;  %v592_v59 = vunpack.c.h.bf16 %v4633_v54  ;;  %v593_v60 = vunpack.c.l.bf16 %v4636_v55 }
  0x60   : > { %v634_v58 = vadd.f32 %v590_v53, %v589_v52  ;;  %v594_v61 = vunpack.c.h.bf16 %v4636_v55 }
  0x61   : > { %608 = vadd.xlane.f32.xlu0 %v607_v24  ;;  %611 = vadd.xlane.f32.xlu1 %v610_v26  ;;  %v637_v62 = vadd.f32 %v592_v59, %v591_v57 }
  0x62   : > { %v640_v63 = vadd.f32 %v594_v61, %v593_v60 }
  0x65   : > { %614 = vadd.xlane.f32.xlu0 %v613_v34  ;;  %617 = vadd.xlane.f32.xlu1 %v616_v35 }
  0x69   : > { %620 = vadd.xlane.f32.xlu0 %v619_v40  ;;  %623 = vadd.xlane.f32.xlu1 %v622_v42 }
  0x6d   : > { %626 = vadd.xlane.f32.xlu0 %v625_v50  ;;  %629 = vadd.xlane.f32.xlu1 %v628_v51 }
  0x71   : > { %632 = vadd.xlane.f32.xlu0 %v631_v56  ;;  %635 = vadd.xlane.f32.xlu1 %v634_v58 }
  0x75   : > { %638 = vadd.xlane.f32.xlu0 %v637_v62  ;;  %641 = vadd.xlane.f32.xlu1 %v640_v63 }
  0xe2   : > { %v597_v14 = vpop.xlane.xlu0 %596  ;;  %v603_v15 = vpop.xlane.xlu1 %602 }
  0xe3   : > { %v644_v18 = vmul.f32 0.00390625, %v597_v14  ;;  %v646_v19 = vmul.f32 0.00390625, %v603_v15 }
  0xe5   : > { %v4660_v24 = vsub.f32 %v563_v3, %v644_v18  ;;  %v4664_v26 = vsub.f32 %v564_v4, %v644_v18  ;;  %v4668_v34 = vsub.f32 %v567_v5, %v646_v19  ;;  %v4672_v35 = vsub.f32 %v568_v6, %v646_v19 }
  0xe6   : > { %v600_v40 = vpop.xlane.xlu0 %599  ;;  %v606_v42 = vpop.xlane.xlu1 %605 }
  0xe7   : > { %v645_v50 = vmul.f32 0.00390625, %v600_v40  ;;  %v647_v51 = vmul.f32 0.00390625, %v606_v42  ;;  %v692_v3 = vmul.f32 %v4660_v24, %v4660_v24  ;;  %v693_v0 = vmul.f32 %v4664_v26, %v4664_v26 }
  0xe8   : > { %v696_v4 = vmul.f32 %v4668_v34, %v4668_v34  ;;  %v697_v5 = vmul.f32 %v4672_v35, %v4672_v35 }
  0xe9   : > { %v4684_v1 = vsub.f32 %v565_v9, %v645_v50  ;;  %v4688_v6 = vsub.f32 %v566_v10, %v645_v50  ;;  %v4692_v56 = vsub.f32 %v569_v11, %v647_v51  ;;  %v4696_v58 = vsub.f32 %v570_v12, %v647_v51 }
  0xea   : > { %v609_v62 = vpop.xlane.xlu0 %608  ;;  %v724_v63 = vadd.f32 %v693_v0, %v692_v3  ;;  %v612_v14 = vpop.xlane.xlu1 %611  ;;  %v730_v10 = vadd.f32 %v697_v5, %v696_v4 }
  0xeb   : > { %v648_v15 = vmul.f32 0.00390625, %v609_v62  ;;  %v649_v18 = vmul.f32 0.00390625, %v612_v14  ;;  %v694_v9 = vmul.f32 %v4684_v1, %v4684_v1  ;;  %v695_v2 = vmul.f32 %v4688_v6, %v4688_v6 }
  0xec   : > { %725 = vadd.xlane.f32.xlu0 %v724_v63  ;;  %v698_v11 = vmul.f32 %v4692_v56, %v4692_v56  ;;  %v699_v7 = vmul.f32 %v4696_v58, %v4696_v58 }
  0xed   : > { %v4708_v12 = vsub.f32 %v571_v16, %v648_v15  ;;  %v4712_v19 = vsub.f32 %v572_v17, %v648_v15  ;;  %v4716_v40 = vsub.f32 %v573_v20, %v649_v18  ;;  %v4720_v42 = vsub.f32 %v574_v21, %v649_v18 }
  0xee   : > { %v615_v50 = vpop.xlane.xlu0 %614  ;;  %v727_v51 = vadd.f32 %v695_v2, %v694_v9  ;;  %v618_v3 = vpop.xlane.xlu1 %617  ;;  %v733_v17 = vadd.f32 %v699_v7, %v698_v11 }
  0xef   : > { %v650_v0 = vmul.f32 0.00390625, %v615_v50  ;;  %v651_v4 = vmul.f32 0.00390625, %v618_v3  ;;  %v700_v16 = vmul.f32 %v4708_v12, %v4708_v12  ;;  %v701_v8 = vmul.f32 %v4712_v19, %v4712_v19 }
  0xf0   : > { %731 = vadd.xlane.f32.xlu0 %v730_v10  ;;  %728 = vadd.xlane.f32.xlu1 %v727_v51  ;;  %v702_v20 = vmul.f32 %v4716_v40, %v4716_v40  ;;  %v703_v13 = vmul.f32 %v4720_v42, %v4720_v42 }
  0xf1   : > { %v4732_v21 = vsub.f32 %v575_v25, %v650_v0  ;;  %v4736_v5 = vsub.f32 %v576_v27, %v650_v0  ;;  %v4740_v62 = vsub.f32 %v577_v28, %v651_v4  ;;  %v4744_v63 = vsub.f32 %v578_v29, %v651_v4 }
  0xf2   : > { %v621_v14 = vpop.xlane.xlu0 %620  ;;  %v736_v15 = vadd.f32 %v701_v8, %v700_v16  ;;  %v624_v18 = vpop.xlane.xlu1 %623  ;;  %v739_v27 = vadd.f32 %v703_v13, %v702_v20 }
  0xf3   : > { %v652_v9 = vmul.f32 0.00390625, %v621_v14  ;;  %v653_v2 = vmul.f32 0.00390625, %v624_v18  ;;  %v704_v25 = vmul.f32 %v4732_v21, %v4732_v21  ;;  %v705_v22 = vmul.f32 %v4736_v5, %v4736_v5 }
  0xf4   : > { %734 = vadd.xlane.f32.xlu1 %v733_v17  ;;  %737 = vadd.xlane.f32.xlu0 %v736_v15  ;;  %v706_v28 = vmul.f32 %v4740_v62, %v4740_v62  ;;  %v707_v23 = vmul.f32 %v4744_v63, %v4744_v63 }
  0xf5   : > { %v4756_v29 = vsub.f32 %v579_v32, %v652_v9  ;;  %v4760_v10 = vsub.f32 %v580_v33, %v652_v9  ;;  %v4764_v11 = vsub.f32 %v581_v36, %v653_v2  ;;  %v4768_v7 = vsub.f32 %v582_v37, %v653_v2 }
  0xf6   : > { %v627_v50 = vpop.xlane.xlu0 %626  ;;  %v742_v51 = vadd.f32 %v705_v22, %v704_v25  ;;  %v630_v3 = vpop.xlane.xlu1 %629  ;;  %v745_v33 = vadd.f32 %v707_v23, %v706_v28 }
  0xf7   : > { %v654_v0 = vmul.f32 0.00390625, %v627_v50  ;;  %v655_v4 = vmul.f32 0.00390625, %v630_v3  ;;  %v708_v32 = vmul.f32 %v4756_v29, %v4756_v29  ;;  %v709_v30 = vmul.f32 %v4760_v10, %v4760_v10 }
  0xf8   : > { %740 = vadd.xlane.f32.xlu1 %v739_v27  ;;  %743 = vadd.xlane.f32.xlu0 %v742_v51  ;;  %v710_v36 = vmul.f32 %v4764_v11, %v4764_v11  ;;  %v711_v31 = vmul.f32 %v4768_v7, %v4768_v7 }
  0xf9   : > { %v4780_v37 = vsub.f32 %v583_v41, %v654_v0  ;;  %v4784_v16 = vsub.f32 %v584_v43, %v654_v0  ;;  %v4788_v8 = vsub.f32 %v585_v44, %v655_v4  ;;  %v4792_v17 = vsub.f32 %v586_v45, %v655_v4 }
  0xfa   : > { %v633_v20 = vpop.xlane.xlu0 %632  ;;  %v748_v13 = vadd.f32 %v709_v30, %v708_v32  ;;  %v636_v14 = vpop.xlane.xlu1 %635  ;;  %v751_v43 = vadd.f32 %v711_v31, %v710_v36 }
  0xfb   : > { %v656_v15 = vmul.f32 0.00390625, %v633_v20  ;;  %v657_v18 = vmul.f32 0.00390625, %v636_v14  ;;  %v712_v41 = vmul.f32 %v4780_v37, %v4780_v37  ;;  %v713_v38 = vmul.f32 %v4784_v16, %v4784_v16 }
  0xfc   : > { %746 = vadd.xlane.f32.xlu1 %v745_v33  ;;  %749 = vadd.xlane.f32.xlu0 %v748_v13  ;;  %v714_v44 = vmul.f32 %v4788_v8, %v4788_v8  ;;  %v715_v39 = vmul.f32 %v4792_v17, %v4792_v17  ;;  %v853_v20 = vlaneseq }
  0xfd   : > { %v4804_v45 = vsub.f32 %v587_v48, %v656_v15  ;;  %v4808_v9 = vsub.f32 %v588_v49, %v656_v15  ;;  %v4812_v2 = vsub.f32 %v589_v52, %v657_v18  ;;  %v4816_v25 = vsub.f32 %v590_v53, %v657_v18 }
  0xfe   : > { %v639_v22 = vpop.xlane.xlu0 %638  ;;  %v754_v27 = vadd.f32 %v713_v38, %v712_v41  ;;  %v642_v28 = vpop.xlane.xlu1 %641  ;;  %v757_v49 = vadd.f32 %v715_v39, %v714_v44 }
  0xff   : > { %v658_v23 = vmul.f32 0.00390625, %v639_v22  ;;  %v659_v50 = vmul.f32 0.00390625, %v642_v28  ;;  %v716_v48 = vmul.f32 %v4804_v45, %v4804_v45  ;;  %v717_v46 = vmul.f32 %v4808_v9, %v4808_v9 }
 0x100   : > { %752 = vadd.xlane.f32.xlu1 %v751_v43  ;;  %755 = vadd.xlane.f32.xlu0 %v754_v27  ;;  %v718_v52 = vmul.f32 %v4812_v2, %v4812_v2  ;;  %v719_v47 = vmul.f32 %v4816_v25, %v4816_v25  ;;  %v854_v43 = vshrl.u32 %v853_v20, 7 }
 0x101   : > { %v4828_v53 = vsub.f32 %v591_v57, %v658_v23  ;;  %v4832_v51 = vsub.f32 %v592_v59, %v658_v23  ;;  %v4836_v3 = vsub.f32 %v593_v60, %v659_v50  ;;  %v4840_v0 = vsub.f32 %v594_v61, %v659_v50 }
 0x102   : > { %v760_v4 = vadd.f32 %v717_v46, %v716_v48  ;;  %v763_v54 = vadd.f32 %v719_v47, %v718_v52  ;;  %v4253_v61 = vmov 0.0   ;;  %v855_v50 = vsub.s32 0, %v854_v43 }
 0x103   : > { %v720_v32 = vmul.f32 %v4828_v53, %v4828_v53  ;;  %v721_v57 = vmul.f32 %v4832_v51, %v4832_v51  ;;  %v722_v59 = vmul.f32 %v4836_v3, %v4836_v3  ;;  %v723_v60 = vmul.f32 %v4840_v0, %v4840_v0  ;;  %1050 = vst [vmem:[#allocation3 + $0xa8] sm:$0xff] %v4253_v61 }
 0x104   : > { %758 = vadd.xlane.f32.xlu1 %v757_v49  ;;  %761 = vadd.xlane.f32.xlu0 %v760_v4  ;;  %1051 = vst [vmem:[#allocation3 + $0x68] sm:$0xff] %v4253_v61  ;;  %1052 = vst [vmem:[#allocation3 + $0x10] sm:$0xff] %v4253_v61  ;;  %v561_v49 = vld [vmem:[%s5954_s1] sm:$0x3]  ;;  %v859_v52 = vsub.s32 1, %v854_v43 }
 0x105   : > { %v766_v30 = vadd.f32 %v721_v57, %v720_v32  ;;  %v769_v55 = vadd.f32 %v723_v60, %v722_v59  ;;  %1053 = vst [vmem:[#allocation3 + $0xc0] sm:$0xff] %v4253_v61  ;;  %1054 = vst [vmem:[#allocation3 + $0xc8] sm:$0xff] %v4253_v61  ;;  %v562_v32 = vld [vmem:[%s5955_s2] sm:$0x3]  ;;  %v4856_v59 = vrot.slane %v561_v49, %v855_v50 }
 0x106   : > { %1055 = vst [vmem:[#allocation3 + $0xb0] sm:$0xff] %v4253_v61  ;;  %1056 = vst [vmem:[#allocation3 + $0x70] sm:$0xff] %v4253_v61  ;;  %v4862_v20 = vrot.slane %v562_v32, %v859_v52 }
 0x107   : > { %1057 = vst [vmem:[#allocation3 + $0x38] sm:$0xff] %v4253_v61  ;;  %1058 = vst [vmem:[#allocation3 + $0x48] sm:$0xff] %v4253_v61 }
 0x108   : > { %764 = vadd.xlane.f32.xlu1 %v763_v54  ;;  %767 = vadd.xlane.f32.xlu0 %v766_v30  ;;  %1059 = vst [vmem:[#allocation3 + $0xf8] sm:$0xff] %v4253_v61  ;;  %1060 = vst [vmem:[#allocation3 + $0x78] sm:$0xff] %v4253_v61 }
 0x109   : > { %1061 = vst [vmem:[#allocation3 + $0x88] sm:$0xff] %v4253_v61  ;;  %1062 = vst [vmem:[#allocation3 + $0xf0] sm:$0xff] %v4253_v61 }
 0x10a   : > { %1063 = vst [vmem:[#allocation3 + $0x18] sm:$0xff] %v4253_v61  ;;  %1064 = vst [vmem:[#allocation3 + $0x30] sm:$0xff] %v4253_v61 }
 0x10b   : > { %1065 = vst [vmem:[#allocation3 + $0x50] sm:$0xff] %v4253_v61  ;;  %1066 = vst [vmem:[#allocation3 + $0xb8] sm:$0xff] %v4253_v61 }
 0x10c   : > { %770 = vadd.xlane.f32.xlu1 %v769_v55  ;;  %1067 = vst [vmem:[#allocation3 + $0xd0] sm:$0xff] %v4253_v61  ;;  %1068 = vst [vmem:[#allocation3 + $0xd8] sm:$0xff] %v4253_v61  ;;  %v4858_v55 = vrot.slane %v561_v49, %v859_v52 }
 0x10d   : > { %1069 = vst [vmem:[#allocation3 + $0x58] sm:$0xff] %v4253_v61  ;;  %1070 = vst [vmem:[#allocation3 + $0x80] sm:$0xff] %v4253_v61 }
 0x10e   : > { %1071 = vst [vmem:[#allocation3 + $0x40] sm:$0xff] %v4253_v61  ;;  %1072 = vst [vmem:[#allocation3 + $0x28] sm:$0xff] %v4253_v61 }
 0x10f   : > { %1073 = vst [vmem:[#allocation3] sm:$0xff] %v4253_v61  ;;  %1074 = vst [vmem:[#allocation3 + $0x90] sm:$0xff] %v4253_v61 }
 0x110   : > { %1075 = vst [vmem:[#allocation3 + $0xe8] sm:$0xff] %v4253_v61  ;;  %1076 = vst [vmem:[#allocation3 + $0xa0] sm:$0xff] %v4253_v61 }
 0x111   : > { %1077 = vst [vmem:[#allocation3 + $0x20] sm:$0xff] %v4253_v61  ;;  %1078 = vst [vmem:[#allocation3 + $0x8] sm:$0xff] %v4253_v61 }
 0x112   : > { %1079 = vst [vmem:[#allocation3 + $0xe0] sm:$0xff] %v4253_v61  ;;  %1080 = vst [vmem:[#allocation3 + $0x60] sm:$0xff] %v4253_v61 }
 0x113   : > { %1081 = vst [vmem:[#allocation3 + $0x98] sm:$0xff] %v4253_v61 }
 0x175   : > { %v726_v33 = vpop.xlane.xlu0 %725 }
 0x176   : > { %v772_v36 = vmul.f32 0.00390625, %v726_v33 }
 0x178   : > { %v788_v31 = vadd.f32 1e-05, %v772_v36 }
 0x179   : > { %v729_v13 = vpop.xlane.xlu1 %728  ;;  %v732_v14 = vpop.xlane.xlu0 %731 }
 0x17a   : > { %3830 = vrsqrt.f32 %v788_v31  ;;  %v773_v15 = vmul.f32 0.00390625, %v729_v13  ;;  %v774_v18 = vmul.f32 0.00390625, %v732_v14  ;;  %v4860_v31 = vrot.slane %v562_v32, %v855_v50 }
 0x17c   : > { %v789_v41 = vadd.f32 1e-05, %v773_v15  ;;  %v790_v38 = vadd.f32 1e-05, %v774_v18 }
 0x17d   : > { %v735_v44 = vpop.xlane.xlu1 %734  ;;  %v738_v39 = vpop.xlane.xlu0 %737 }
 0x17e   : > { %3832 = vrsqrt.f32 %v789_v41  ;;  %v775_v22 = vmul.f32 0.00390625, %v735_v44  ;;  %v776_v27 = vmul.f32 0.00390625, %v738_v39 }
 0x17f   : > { %3834 = vrsqrt.f32 %v790_v38 }
 0x180   : > { %v791_v28 = vadd.f32 1e-05, %v775_v22  ;;  %v792_v23 = vadd.f32 1e-05, %v776_v27 }
 0x181   : > { %v741_v48 = vpop.xlane.xlu1 %740  ;;  %v744_v46 = vpop.xlane.xlu0 %743 }
 0x182   : > { %3836 = vrsqrt.f32 %v791_v28  ;;  %v777_v47 = vmul.f32 0.00390625, %v741_v48  ;;  %v778_v4 = vmul.f32 0.00390625, %v744_v46 }
 0x183   : > { %3838 = vrsqrt.f32 %v792_v23 }
 0x184   : > { %v793_v57 = vadd.f32 1e-05, %v777_v47  ;;  %v794_v54 = vadd.f32 1e-05, %v778_v4 }
 0x185   : > { %v747_v60 = vpop.xlane.xlu1 %746  ;;  %v750_v30 = vpop.xlane.xlu0 %749 }
 0x186   : > { %3840 = vrsqrt.f32 %v793_v57  ;;  %v779_v61 = vmul.f32 0.00390625, %v747_v60  ;;  %v780_v33 = vmul.f32 0.00390625, %v750_v30 }
 0x187   : > { %v3831_v36 = vpop.eup %3830  ;;  %3842 = vrsqrt.f32 %v794_v54 }
 0x188   : > { %v820_v13 = vmul.f32 %v3831_v36, %v4660_v24  ;;  %v821_v14 = vmul.f32 %v3831_v36, %v4664_v26  ;;  %v795_v15 = vadd.f32 1e-05, %v779_v61  ;;  %v796_v18 = vadd.f32 1e-05, %v780_v33 }
 0x189   : > { %v753_v41 = vpop.xlane.xlu1 %752  ;;  %v756_v38 = vpop.xlane.xlu0 %755 }
 0x18a   : > { %v863_v43 = vmul.f32 %v4856_v59, %v820_v13  ;;  %v864_v44 = vmul.f32 %v4858_v55, %v821_v14  ;;  %3844 = vrsqrt.f32 %v795_v15  ;;  %v781_v39 = vmul.f32 0.00390625, %v753_v41 }
 0x18b   : > { %v3833_v22 = vpop.eup %3832  ;;  %3846 = vrsqrt.f32 %v796_v18  ;;  %v782_v27 = vmul.f32 0.00390625, %v756_v38 }
 0x18c   : > { %v3835_v28 = vpop.eup %3834  ;;  %v906_v23 = vadd.f32 %v4860_v31, %v863_v43  ;;  %v907_v24 = vadd.f32 %v4862_v20, %v864_v44  ;;  %v822_v26 = vmul.f32 %v3833_v22, %v4684_v1  ;;  %v823_v50 = vmul.f32 %v3833_v22, %v4688_v6 }
 0x18d   : > { %v824_v48 = vmul.f32 %v3835_v28, %v4668_v34  ;;  %v825_v46 = vmul.f32 %v3835_v28, %v4672_v35  ;;  %v797_v49 = vadd.f32 1e-05, %v781_v39  ;;  %v798_v52 = vadd.f32 1e-05, %v782_v27  ;;  %v759_v47 = vpop.xlane.xlu1 %758  ;;  %v762_v4 = vpop.xlane.xlu0 %761 }
 0x18e   : > { %v3741_v32 = vpack.c.bf16 %v907_v24, %v906_v23  ;;  %v865_v57 = vmul.f32 %v4856_v59, %v822_v26  ;;  %v866_v54 = vmul.f32 %v4858_v55, %v823_v50  ;;  %v783_v60 = vmul.f32 0.00390625, %v759_v47 }
 0x18f   : > { %v3837_v30 = vpop.eup %3836  ;;  %v867_v61 = vmul.f32 %v4856_v59, %v824_v48  ;;  %v868_v1 = vmul.f32 %v4858_v55, %v825_v46  ;;  %3848 = vrsqrt.f32 %v797_v49  ;;  %v784_v6 = vmul.f32 0.00390625, %v762_v4 }
 0x190   : > { %v3839_v34 = vpop.eup %3838  ;;  %1034 = vst [vmem:[#allocation2 + $0x30] sm:$0xff] %v3741_v32  ;;  %v908_v35 = vadd.f32 %v4860_v31, %v865_v57  ;;  %v909_v33 = vadd.f32 %v4862_v20, %v866_v54  ;;  %v826_v36 = vmul.f32 %v3837_v30, %v4692_v56  ;;  %v827_v13 = vmul.f32 %v3837_v30, %v4696_v58 }
 0x191   : > { %v910_v14 = vadd.f32 %v4860_v31, %v867_v61  ;;  %v911_v15 = vadd.f32 %v4862_v20, %v868_v1  ;;  %v828_v18 = vmul.f32 %v3839_v34, %v4708_v12  ;;  %v829_v41 = vmul.f32 %v3839_v34, %v4712_v19  ;;  %v765_v28 = vpop.xlane.xlu1 %764 }
 0x192   : > { %v3742_v38 = vpack.c.bf16 %v909_v33, %v908_v35  ;;  %v869_v43 = vmul.f32 %v4856_v59, %v826_v36  ;;  %v870_v44 = vmul.f32 %v4858_v55, %v827_v13  ;;  %3850 = vrsqrt.f32 %v798_v52 }
 0x193   : > { %v3841_v39 = vpop.eup %3840  ;;  %v3743_v22 = vpack.c.bf16 %v911_v15, %v910_v14  ;;  %v871_v56 = vmul.f32 %v4856_v59, %v828_v18  ;;  %v872_v58 = vmul.f32 %v4858_v55, %v829_v41  ;;  %v799_v27 = vadd.f32 1e-05, %v783_v60 }
 0x194   : > { %v3843_v23 = vpop.eup %3842  ;;  %1035 = vst [vmem:[#allocation2] sm:$0xff] %v3742_v38  ;;  %v912_v12 = vadd.f32 %v4860_v31, %v869_v43  ;;  %v913_v19 = vadd.f32 %v4862_v20, %v870_v44  ;;  %v830_v24 = vmul.f32 %v3841_v39, %v4716_v40  ;;  %v831_v26 = vmul.f32 %v3841_v39, %v4720_v42 }
 0x195   : > { %1036 = vst [vmem:[#allocation2 + $0x58] sm:$0xff] %v3743_v22  ;;  %v914_v50 = vadd.f32 %v4860_v31, %v871_v56  ;;  %v915_v48 = vadd.f32 %v4862_v20, %v872_v58  ;;  %v832_v46 = vmul.f32 %v3843_v23, %v4732_v21  ;;  %v833_v49 = vmul.f32 %v3843_v23, %v4736_v5  ;;  %v771_v36 = vpop.xlane.xlu1 %770 }
 0x196   : > { %v3744_v52 = vpack.c.bf16 %v913_v19, %v912_v12  ;;  %v873_v47 = vmul.f32 %v4856_v59, %v830_v24  ;;  %v874_v4 = vmul.f32 %v4858_v55, %v831_v26  ;;  %3852 = vrsqrt.f32 %v799_v27 }
 0x197   : > { %v3845_v32 = vpop.eup %3844  ;;  %v3745_v57 = vpack.c.bf16 %v915_v48, %v914_v50  ;;  %v875_v40 = vmul.f32 %v4856_v59, %v832_v46  ;;  %v876_v42 = vmul.f32 %v4858_v55, %v833_v49  ;;  %v800_v54 = vadd.f32 1e-05, %v784_v6  ;;  %v768_v6 = vpop.xlane.xlu0 %767 }
 0x198   : > { %v3847_v60 = vpop.eup %3846  ;;  %1037 = vst [vmem:[#allocation2 + $0x18] sm:$0xff] %v3744_v52  ;;  %v916_v30 = vadd.f32 %v4860_v31, %v873_v47  ;;  %v917_v21 = vadd.f32 %v4862_v20, %v874_v4  ;;  %v834_v5 = vmul.f32 %v3845_v32, %v4740_v62  ;;  %v835_v61 = vmul.f32 %v3845_v32, %v4744_v63 }
 0x199   : > { %1038 = vst [vmem:[#allocation2 + $0x50] sm:$0xff] %v3745_v57  ;;  %v918_v1 = vadd.f32 %v4860_v31, %v875_v40  ;;  %v919_v34 = vadd.f32 %v4862_v20, %v876_v42  ;;  %v836_v35 = vmul.f32 %v3847_v60, %v4756_v29  ;;  %v837_v33 = vmul.f32 %v3847_v60, %v4760_v10 }
 0x19a   : > { %v3746_v13 = vpack.c.bf16 %v917_v21, %v916_v30  ;;  %v877_v14 = vmul.f32 %v4856_v59, %v834_v5  ;;  %v878_v15 = vmul.f32 %v4858_v55, %v835_v61  ;;  %3854 = vrsqrt.f32 %v800_v54 }
 0x19b   : > { %v3747_v62 = vpack.c.bf16 %v919_v34, %v918_v1  ;;  %v879_v63 = vmul.f32 %v4856_v59, %v836_v35  ;;  %v880_v18 = vmul.f32 %v4858_v55, %v837_v33  ;;  %v785_v41 = vmul.f32 0.00390625, %v765_v28 }
 0x19c   : > { %v3849_v38 = vpop.eup %3848  ;;  %1039 = vst [vmem:[#allocation2 + $0x68] sm:$0xff] %v3746_v13  ;;  %v920_v29 = vadd.f32 %v4860_v31, %v877_v14  ;;  %v921_v10 = vadd.f32 %v4862_v20, %v878_v15  ;;  %v786_v43 = vmul.f32 0.00390625, %v768_v6  ;;  %v787_v44 = vmul.f32 0.00390625, %v771_v36 }
 0x19d   : > { %1040 = vst [vmem:[#allocation2 + $0x8] sm:$0xff] %v3747_v62  ;;  %v922_v39 = vadd.f32 %v4860_v31, %v879_v63  ;;  %v923_v22 = vadd.f32 %v4862_v20, %v880_v18  ;;  %v838_v56 = vmul.f32 %v3849_v38, %v4764_v11  ;;  %v839_v58 = vmul.f32 %v3849_v38, %v4768_v7 }
 0x19e   : > { %v3748_v27 = vpack.c.bf16 %v921_v10, %v920_v29  ;;  %v801_v23 = vadd.f32 1e-05, %v785_v41  ;;  %v802_v28 = vadd.f32 1e-05, %v786_v43  ;;  %v803_v12 = vadd.f32 1e-05, %v787_v44 }
 0x19f   : > { %v3851_v19 = vpop.eup %3850  ;;  %v3749_v24 = vpack.c.bf16 %v923_v22, %v922_v39  ;;  %v881_v26 = vmul.f32 %v4856_v59, %v838_v56  ;;  %v882_v50 = vmul.f32 %v4858_v55, %v839_v58 }
 0x1a0   : > { %1041 = vst [vmem:[#allocation2 + $0x48] sm:$0xff] %v3748_v27  ;;  %v840_v48 = vmul.f32 %v3851_v19, %v4780_v37  ;;  %v841_v46 = vmul.f32 %v3851_v19, %v4784_v16  ;;  %3856 = vrsqrt.f32 %v801_v23 }
 0x1a1   : > { %1042 = vst [vmem:[#allocation2 + $0x40] sm:$0xff] %v3749_v24  ;;  %v924_v11 = vadd.f32 %v4860_v31, %v881_v26  ;;  %v925_v7 = vadd.f32 %v4862_v20, %v882_v50  ;;  %3858 = vrsqrt.f32 %v802_v28 }
 0x1a2   : > { %v883_v49 = vmul.f32 %v4856_v59, %v840_v48  ;;  %v884_v52 = vmul.f32 %v4858_v55, %v841_v46  ;;  %3860 = vrsqrt.f32 %v803_v12 }
 0x1a3   : > { %v3853_v47 = vpop.eup %3852  ;;  %v3750_v4 = vpack.c.bf16 %v925_v7, %v924_v11 }
 0x1a4   : > { %v926_v32 = vadd.f32 %v4860_v31, %v883_v49  ;;  %v927_v37 = vadd.f32 %v4862_v20, %v884_v52  ;;  %v842_v16 = vmul.f32 %v3853_v47, %v4788_v8  ;;  %v843_v57 = vmul.f32 %v3853_v47, %v4792_v17 }
 0x1a5   : > { %1043 = vst [vmem:[#allocation2 + $0x20] sm:$0xff] %v3750_v4 }
 0x1a6   : > { %v3751_v40 = vpack.c.bf16 %v927_v37, %v926_v32  ;;  %v885_v42 = vmul.f32 %v4856_v59, %v842_v16  ;;  %v886_v54 = vmul.f32 %v4858_v55, %v843_v57 }
 0x1a7   : > { %v3855_v60 = vpop.eup %3854 }
 0x1a8   : > { %1044 = vst [vmem:[#allocation2 + $0x10] sm:$0xff] %v3751_v40  ;;  %v928_v30 = vadd.f32 %v4860_v31, %v885_v42  ;;  %v929_v21 = vadd.f32 %v4862_v20, %v886_v54  ;;  %v844_v5 = vmul.f32 %v3855_v60, %v4804_v45  ;;  %v845_v61 = vmul.f32 %v3855_v60, %v4808_v9 }
 0x1aa   : > { %v3752_v1 = vpack.c.bf16 %v929_v21, %v928_v30  ;;  %v887_v8 = vmul.f32 %v4856_v59, %v844_v5  ;;  %v888_v17 = vmul.f32 %v4858_v55, %v845_v61 }
 0x1ac   : > { %1045 = vst [vmem:[#allocation2 + $0x38] sm:$0xff] %v3752_v1  ;;  %v930_v34 = vadd.f32 %v4860_v31, %v887_v8  ;;  %v931_v35 = vadd.f32 %v4862_v20, %v888_v17 }
 0x1ad   : > { %v3857_v33 = vpop.eup %3856 }
 0x1ae   : > { %v3859_v6 = vpop.eup %3858  ;;  %v3753_v36 = vpack.c.bf16 %v931_v35, %v930_v34  ;;  %v846_v13 = vmul.f32 %v3857_v33, %v4812_v2  ;;  %v847_v14 = vmul.f32 %v3857_v33, %v4816_v25 }
 0x1af   : > { %v3861_v45 = vpop.eup %3860  ;;  %v848_v9 = vmul.f32 %v3859_v6, %v4828_v53  ;;  %v849_v15 = vmul.f32 %v3859_v6, %v4832_v51 }
 0x1b0   : > { %1046 = vst [vmem:[#allocation2 + $0x60] sm:$0xff] %v3753_v36  ;;  %v889_v62 = vmul.f32 %v4856_v59, %v846_v13  ;;  %v890_v63 = vmul.f32 %v4858_v55, %v847_v14  ;;  %v850_v18 = vmul.f32 %v3861_v45, %v4836_v3  ;;  %v851_v41 = vmul.f32 %v3861_v45, %v4840_v0 }
 0x1b1   : > { %v891_v38 = vmul.f32 %v4856_v59, %v848_v9  ;;  %v892_v2 = vmul.f32 %v4858_v55, %v849_v15 }
 0x1b2   : > { %v932_v25 = vadd.f32 %v4860_v31, %v889_v62  ;;  %v933_v29 = vadd.f32 %v4862_v20, %v890_v63  ;;  %v893_v53 = vmul.f32 %v4856_v59, %v850_v18  ;;  %v894_v51 = vmul.f32 %v4858_v55, %v851_v41 }
 0x1b3   : > { %v934_v10 = vadd.f32 %v4860_v31, %v891_v38  ;;  %v935_v43 = vadd.f32 %v4862_v20, %v892_v2 }
 0x1b4   : > { %v3754_v44 = vpack.c.bf16 %v933_v29, %v932_v25  ;;  %v936_v3 = vadd.f32 %v4860_v31, %v893_v53  ;;  %v937_v0 = vadd.f32 %v4862_v20, %v894_v51 }
 0x1b5   : > { %v3755_v39 = vpack.c.bf16 %v935_v43, %v934_v10 }
 0x1b6   : > { %1047 = vst [vmem:[#allocation2 + $0x70] sm:$0xff] %v3754_v44  ;;  %v3756_v22 = vpack.c.bf16 %v937_v0, %v936_v3 }
 0x1b7   : > { %1048 = vst [vmem:[#allocation2 + $0x78] sm:$0xff] %v3755_v39 }
 0x1b8   : > { %1049 = vst [vmem:[#allocation2 + $0x28] sm:$0xff] %v3756_v22 }
 0x1b9 PF: > { %v3862_v59 = vld [vmem:[%s4511_s11 + $0xe4] ss:$16 sps:$4 sm:$0xff]   ;;  %v3864_v55 = vld [vmem:[%s4511_s11 + $0xec] ss:$16 sps:$4 sm:$0xff]   ;;  %v3866_v31 = vld [vmem:[%s4511_s11 + $0xe0] ss:$16 sps:$4 sm:$0xff]  }
 0x1ba   : > { %1584 = vmatprep.subr.bf16.mxu0 %v3862_v59  ;;  %v3867_v20 = vld [vmem:[%s4511_s11 + $0xe8] ss:$16 sps:$4 sm:$0xff]   ;;  %1697 = vmatprep.subr.bf16.mxu1 %v3864_v55  ;;  %v3868_v56 = vld [vmem:[%s4511_s11 + $0xc4] ss:$16 sps:$4 sm:$0xff]   ;;  %v3870_v58 = vld [vmem:[%s4511_s11 + $0xcc] ss:$16 sps:$4 sm:$0xff]  }
 0x1bb   : > { %1585 = vmatpush1.bf16.msra.mxu0 %v3866_v31  ;;  %1698 = vmatpush1.bf16.msra.mxu1 %v3867_v20  ;;  %v3872_v27 = vld [vmem:[%s4511_s11 + $0xc0] ss:$16 sps:$4 sm:$0xff]   ;;  %v3873_v23 = vld [vmem:[%s4511_s11 + $0xc8] ss:$16 sps:$4 sm:$0xff]   ;;  %v3874_v28 = vld [vmem:[%s4511_s11 + $0xa4] ss:$16 sps:$4 sm:$0xff]  }
 0x1bc   : > { %1586 = vmatprep.subr.bf16.mxu0 %v3868_v56  ;;  %1699 = vmatprep.subr.bf16.mxu1 %v3870_v58  ;;  %v3876_v12 = vld [vmem:[%s4511_s11 + $0xac] ss:$16 sps:$4 sm:$0xff]   ;;  %v3878_v19 = vld [vmem:[%s4511_s11 + $0xa0] ss:$16 sps:$4 sm:$0xff]   ;;  %v3879_v24 = vld [vmem:[%s4511_s11 + $0xa8] ss:$16 sps:$4 sm:$0xff]  }
 0x1bd   : > { %v3880_v26 = vld [vmem:[%s4511_s11 + $0x84] ss:$16 sps:$4 sm:$0xff]   ;;  %v3882_v50 = vld [vmem:[%s4511_s11 + $0x8c] ss:$16 sps:$4 sm:$0xff]   ;;  %v3884_v48 = vld [vmem:[%s4511_s11 + $0x80] ss:$16 sps:$4 sm:$0xff]  }
 0x1be   : > { %v3885_v46 = vld [vmem:[%s4511_s11 + $0x88] ss:$16 sps:$4 sm:$0xff]   ;;  %v3886_v11 = vld [vmem:[%s4511_s11 + $0x64] ss:$16 sps:$4 sm:$0xff]   ;;  %v3888_v7 = vld [vmem:[%s4511_s11 + $0x6c] ss:$16 sps:$4 sm:$0xff]  }
 0x1bf   : > { %1587 = vmatpush1.bf16.msra.mxu0 %v3872_v27  ;;  %1700 = vmatpush1.bf16.msra.mxu1 %v3873_v23  ;;  %v3890_v49 = vld [vmem:[%s4511_s11 + $0x60] ss:$16 sps:$4 sm:$0xff]   ;;  %v3891_v52 = vld [vmem:[%s4511_s11 + $0x68] ss:$16 sps:$4 sm:$0xff]   ;;  %v3892_v47 = vld [vmem:[%s4511_s11 + $0x44] ss:$16 sps:$4 sm:$0xff]  }
 0x1c0   : > { %1588 = vmatprep.subr.bf16.mxu0 %v3874_v28  ;;  %1701 = vmatprep.subr.bf16.mxu1 %v3876_v12  ;;  %v3894_v4 = vld [vmem:[%s4511_s11 + $0x4c] ss:$16 sps:$4 sm:$0xff]   ;;  %v3896_v32 = vld [vmem:[%s4511_s11 + $0x40] ss:$16 sps:$4 sm:$0xff]   ;;  %v3897_v37 = vld [vmem:[%s4511_s11 + $0x48] ss:$16 sps:$4 sm:$0xff]  }
 0x1c1   : > { %v3898_v16 = vld [vmem:[%s4511_s11 + $0x24] ss:$16 sps:$4 sm:$0xff]   ;;  %v3900_v57 = vld [vmem:[%s4511_s11 + $0x2c] ss:$16 sps:$4 sm:$0xff]   ;;  %v3902_v40 = vld [vmem:[%s4511_s11 + $0x20] ss:$16 sps:$4 sm:$0xff]  }
 0x1c2   : > { %v3903_v42 = vld [vmem:[%s4511_s11 + $0x28] ss:$16 sps:$4 sm:$0xff]   ;;  %v3904_v54 = vld [vmem:[%s4511_s11 + $0x4] ss:$16 sps:$4 sm:$0xff]   ;;  %v3906_v60 = vld [vmem:[%s4511_s11 + $0xc] ss:$16 sps:$4 sm:$0xff]  }
 0x1c3   : > { %1589 = vmatpush1.bf16.msra.mxu0 %v3878_v19  ;;  %1702 = vmatpush1.bf16.msra.mxu1 %v3879_v24  ;;  %v3908_v30 = vld [vmem:[%s4511_s11] ss:$16 sps:$4 sm:$0xff]   ;;  %v3909_v21 = vld [vmem:[%s4511_s11 + $0x8] ss:$16 sps:$4 sm:$0xff]   ;;  %v3910_v5 = vld [vmem:[%s4511_s11 + $0x1e4] ss:$16 sps:$4 sm:$0xff]  }
 0x1c4   : > { %1590 = vmatprep.subr.bf16.mxu0 %v3880_v26  ;;  %1703 = vmatprep.subr.bf16.mxu1 %v3882_v50  ;;  %v3912_v61 = vld [vmem:[%s4511_s11 + $0x1ec] ss:$16 sps:$4 sm:$0xff]   ;;  %v3914_v1 = vld [vmem:[%s4511_s11 + $0x1e0] ss:$16 sps:$4 sm:$0xff]   ;;  %v3915_v8 = vld [vmem:[%s4511_s11 + $0x1e8] ss:$16 sps:$4 sm:$0xff]  }
 0x1c5   : > { %v3916_v17 = vld [vmem:[%s4511_s11 + $0x1c4] ss:$16 sps:$4 sm:$0xff]   ;;  %v3918_v34 = vld [vmem:[%s4511_s11 + $0x1cc] ss:$16 sps:$4 sm:$0xff]   ;;  %v3920_v35 = vld [vmem:[%s4511_s11 + $0x1c0] ss:$16 sps:$4 sm:$0xff]  }
 0x1c6   : > { %v3921_v33 = vld [vmem:[%s4511_s11 + $0x1c8] ss:$16 sps:$4 sm:$0xff]   ;;  %v3922_v6 = vld [vmem:[%s4511_s11 + $0x1a4] ss:$16 sps:$4 sm:$0xff]   ;;  %v3924_v36 = vld [vmem:[%s4511_s11 + $0x1ac] ss:$16 sps:$4 sm:$0xff]  }
 0x1c7   : > { %1591 = vmatpush1.bf16.msra.mxu0 %v3884_v48  ;;  %1704 = vmatpush1.bf16.msra.mxu1 %v3885_v46  ;;  %v3926_v13 = vld [vmem:[%s4511_s11 + $0x1a0] ss:$16 sps:$4 sm:$0xff]   ;;  %v3927_v14 = vld [vmem:[%s4511_s11 + $0x1a8] ss:$16 sps:$4 sm:$0xff]   ;;  %v3928_v45 = vld [vmem:[%s4511_s11 + $0x184] ss:$16 sps:$4 sm:$0xff]  }
 0x1c8   : > { %1592 = vmatprep.subr.bf16.mxu0 %v3886_v11  ;;  %1705 = vmatprep.subr.bf16.mxu1 %v3888_v7  ;;  %v3930_v9 = vld [vmem:[%s4511_s11 + $0x18c] ss:$16 sps:$4 sm:$0xff]   ;;  %v3960_v15 = vld [vmem:[#allocation2 + $0x34] ss:$-48 sps:$4 sm:$0xff]   ;;  %v3932_v62 = vld [vmem:[%s4511_s11 + $0x180] ss:$16 sps:$4 sm:$0xff]  }
 0x1c9   : > { %v3933_v63 = vld [vmem:[%s4511_s11 + $0x188] ss:$16 sps:$4 sm:$0xff]   ;;  %v3934_v18 = vld [vmem:[%s4511_s11 + $0x164] ss:$16 sps:$4 sm:$0xff]   ;;  %v3936_v41 = vld [vmem:[%s4511_s11 + $0x16c] ss:$16 sps:$4 sm:$0xff]   ;;  %1616 = vmatprep.mubr.bf16.mxu0 %v3960_v15  ;;  %1729 = vmatprep.mubr.bf16.mxu1 %v3960_v15 }
 0x1ca   : > { %v3938_v38 = vld [vmem:[%s4511_s11 + $0x160] ss:$16 sps:$4 sm:$0xff]   ;;  %v3939_v2 = vld [vmem:[%s4511_s11 + $0x168] ss:$16 sps:$4 sm:$0xff]   ;;  %v3940_v25 = vld [vmem:[%s4511_s11 + $0x144] ss:$16 sps:$4 sm:$0xff]  }
 0x1cb   : > { %1593 = vmatpush1.bf16.msra.mxu0 %v3890_v49  ;;  %1706 = vmatpush1.bf16.msra.mxu1 %v3891_v52  ;;  %v3942_v29 = vld [vmem:[%s4511_s11 + $0x14c] ss:$16 sps:$4 sm:$0xff]   ;;  %v3944_v53 = vld [vmem:[%s4511_s11 + $0x140] ss:$16 sps:$4 sm:$0xff]   ;;  %v3945_v51 = vld [vmem:[%s4511_s11 + $0x148] ss:$16 sps:$4 sm:$0xff]  }
 0x1cc   : > { %1594 = vmatprep.subr.bf16.mxu0 %v3892_v47  ;;  %1707 = vmatprep.subr.bf16.mxu1 %v3894_v4  ;;  %v3946_v10 = vld [vmem:[%s4511_s11 + $0x124] ss:$16 sps:$4 sm:$0xff]   ;;  %v3948_v43 = vld [vmem:[%s4511_s11 + $0x12c] ss:$16 sps:$4 sm:$0xff]   ;;  %v3950_v44 = vld [vmem:[%s4511_s11 + $0x120] ss:$16 sps:$4 sm:$0xff]  }
 0x1cd   : > { %v3951_v3 = vld [vmem:[%s4511_s11 + $0x128] ss:$16 sps:$4 sm:$0xff]   ;;  %v3952_v0 = vld [vmem:[%s4511_s11 + $0x104] ss:$16 sps:$4 sm:$0xff]   ;;  %v3954_v39 = vld [vmem:[%s4511_s11 + $0x10c] ss:$16 sps:$4 sm:$0xff]  }
 0x1ce   : > { %v3956_v22 = vld [vmem:[%s4511_s11 + $0x100] ss:$16 sps:$4 sm:$0xff]   ;;  %v3957_v59 = vld [vmem:[%s4511_s11 + $0x108] ss:$16 sps:$4 sm:$0xff]   ;;  %v3975_v20 = vld [vmem:[%s4509_s9 + $0x74] ss:$8 sps:$4 sm:$0xff]  }
 0x1cf   : > { %1595 = vmatpush1.bf16.msra.mxu0 %v3896_v32  ;;  %1708 = vmatpush1.bf16.msra.mxu1 %v3897_v37  ;;  %v1084_v55 = vld [vmem:[#allocation2 + $0x58] sm:$0xff]  ;;  %v3958_v58 = vld [vmem:[#allocation2 + $0x30] ss:$-48 sps:$4 sm:$0xff]   ;;  %v3981_v12 = vld [vmem:[%s4509_s9 + $0x64] ss:$8 sps:$4 sm:$0xff]   ;;  %p3718_p0 = scmp.ne.s32.totalorder %s4235_s26, 1 }
 0x1d0   : > { %1596 = vmatprep.subr.bf16.mxu0 %v3898_v16  ;;  %1709 = vmatprep.subr.bf16.mxu1 %v3900_v57  ;;  %v1085_v31 = vld [vmem:[#allocation2 + $0x18] sm:$0xff]  ;;  %v3984_v19 = vld [vmem:[%s4509_s9 + $0x164] ss:$8 sps:$4 sm:$0xff]   ;;  %v3979_v24 = vld [vmem:[%s4509_s9 + $0x60] ss:$8 sps:$4 sm:$0xff]  }
 0x1d1   : > { %v3978_v56 = vld [vmem:[%s4509_s9 + $0x174] ss:$8 sps:$4 sm:$0xff]   ;;  %v3577_v27 = vcombine.high %v1084_v55, %v1085_v31  ;;  %v3973_v23 = vld [vmem:[%s4509_s9 + $0x70] ss:$8 sps:$4 sm:$0xff]   ;;  %v3982_v26 = vld [vmem:[%s4509_s9 + $0x160] ss:$8 sps:$4 sm:$0xff]   ;;  %v3576_v11 = vcombine.low %v1084_v55, %v1085_v31 }
 0x1d2   : > { %v3976_v28 = vld [vmem:[%s4509_s9 + $0x170] ss:$8 sps:$4 sm:$0xff]   ;;  %v3987_v50 = vld [vmem:[%s4509_s9 + $0x54] ss:$8 sps:$4 sm:$0xff]   ;;  %v3993_v52 = vld [vmem:[%s4509_s9 + $0x44] ss:$8 sps:$4 sm:$0xff]  }
 0x1d3   : > { %1597 = vmatpush1.bf16.msra.mxu0 %v3902_v40  ;;  %1710 = vmatpush1.bf16.msra.mxu1 %v3903_v42  ;;  %v3961_v48 = vld [vmem:[#allocation2 + $0x54] ss:$24 sps:$4 sm:$0xff]   ;;  %v3985_v7 = vld [vmem:[%s4509_s9 + $0x50] ss:$8 sps:$4 sm:$0xff]   ;;  %v3991_v37 = vld [vmem:[%s4509_s9 + $0x40] ss:$8 sps:$4 sm:$0xff]  }
 0x1d4   : > { %1598 = vmatprep.subr.bf16.mxu0 %v3904_v54  ;;  %1711 = vmatprep.subr.bf16.mxu1 %v3906_v60  ;;  %v3990_v46 = vld [vmem:[%s4509_s9 + $0x154] ss:$8 sps:$4 sm:$0xff]   ;;  %v3988_v49 = vld [vmem:[%s4509_s9 + $0x150] ss:$8 sps:$4 sm:$0xff]   ;;  %v3996_v47 = vld [vmem:[%s4509_s9 + $0x144] ss:$8 sps:$4 sm:$0xff]  }
 0x1d5   : > { %v1088_v4 = vld [vmem:[#allocation2 + $0x8] sm:$0xff]  ;;  %v3999_v57 = vld [vmem:[%s4509_s9 + $0x34] ss:$8 sps:$4 sm:$0xff]   ;;  %v3997_v54 = vld [vmem:[%s4509_s9 + $0x30] ss:$8 sps:$4 sm:$0xff]  }
 0x1d6   : > { %v1089_v32 = vld [vmem:[#allocation2 + $0x48] sm:$0xff]  ;;  %v4002_v40 = vld [vmem:[%s4509_s9 + $0x134] ss:$8 sps:$4 sm:$0xff]   ;;  %v4000_v60 = vld [vmem:[%s4509_s9 + $0x130] ss:$8 sps:$4 sm:$0xff]  }
 0x1d7   : > { %1599 = vmatpush1.bf16.msra.mxu0 %v3908_v30  ;;  %1712 = vmatpush1.bf16.msra.mxu1 %v3909_v21  ;;  %v3994_v16 = vld [vmem:[%s4509_s9 + $0x140] ss:$8 sps:$4 sm:$0xff]   ;;  %v3581_v30 = vcombine.high %v1088_v4, %v1089_v32  ;;  %v4005_v21 = vld [vmem:[%s4509_s9 + $0x24] ss:$8 sps:$4 sm:$0xff]   ;;  %v4036_v55 = vld [vmem:[%s4509_s9 + $0x1d0] ss:$8 sps:$4 sm:$0xff]  }
 0x1d8   : > { %1600 = vmatprep.subr.bf16.mxu0 %v3910_v5  ;;  %1713 = vmatprep.subr.bf16.mxu1 %v3912_v61  ;;  %v3963_v42 = vld [vmem:[#allocation2 + $0x50] ss:$24 sps:$4 sm:$0xff]   ;;  %v4008_v5 = vld [vmem:[%s4509_s9 + $0x124] ss:$8 sps:$4 sm:$0xff]  }
 0x1d9   : > { %v1090_v61 = vld [vmem:[#allocation2 + $0x40] sm:$0xff] }
 0x1da   : > { %v3967_v15 = vld [vmem:[#allocation2 + $0x64] ss:$16 sps:$4 sm:$0xff]  }
 0x1db   : > { %1601 = vmatpush2.bf16.msra.mxu0 %v3914_v1  ;;  %1714 = vmatpush2.bf16.msra.mxu1 %v3915_v8  ;;  %v1091_v1 = vld [vmem:[#allocation2 + $0x20] sm:$0xff] }
 0x1dc   : > { %1602 = vmatprep.subr.bf16.mxu0 %v3916_v17  ;;  %1715 = vmatprep.subr.bf16.mxu1 %v3918_v34  ;;  %v4003_v8 = vld [vmem:[%s4509_s9 + $0x20] ss:$8 sps:$4 sm:$0xff]   ;;  %v4011_v34 = vld [vmem:[%s4509_s9 + $0x14] ss:$8 sps:$4 sm:$0xff]   ;;  %v4041_v31 = vld [vmem:[%s4509_s9 + $0xc4] ss:$8 sps:$4 sm:$0xff]  }
 0x1dd   : > { %v4006_v17 = vld [vmem:[%s4509_s9 + $0x120] ss:$8 sps:$4 sm:$0xff]  }
 0x1df   : > { %1603 = vmatpush2.bf16.msra.mxu0 %v3920_v35  ;;  %1716 = vmatpush2.bf16.msra.mxu1 %v3921_v33  ;;  %v4014_v35 = vld [vmem:[%s4509_s9 + $0x114] ss:$8 sps:$4 sm:$0xff]   ;;  %v3580_v33 = vcombine.low %v1088_v4, %v1089_v32  ;;  %v4066_v4 = vld [vmem:[%s4509_s9 + $0x180] ss:$8 sps:$4 sm:$0xff]   ;;  %v1164_v32 = vlaneseq }
 0x1e0   : > { %1604 = vmatprep.subr.bf16.mxu0 %v3922_v6  ;;  %1717 = vmatprep.subr.bf16.mxu1 %v3924_v36  ;;  %v3583_v6 = vcombine.high %v1090_v61, %v1091_v1  ;;  %v4009_v36 = vld [vmem:[%s4509_s9 + $0x10] ss:$8 sps:$4 sm:$0xff]  }
 0x1e3   : > { %1605 = vmatpush2.bf16.msra.mxu0 %v3926_v13  ;;  %1718 = vmatpush2.bf16.msra.mxu1 %v3927_v14  ;;  %v4012_v13 = vld [vmem:[%s4509_s9 + $0x110] ss:$8 sps:$4 sm:$0xff]   ;;  %v3582_v14 = vcombine.low %v1090_v61, %v1091_v1 }
 0x1e4   : > { %1606 = vmatprep.subr.bf16.mxu0 %v3928_v45  ;;  %1719 = vmatprep.subr.bf16.mxu1 %v3930_v9  ;;  %v3964_v45 = vld [vmem:[#allocation2 + $0x14] ss:$40 sps:$4 sm:$0xff]   ;;  %v3966_v9 = vld [vmem:[#allocation2 + $0x10] ss:$40 sps:$4 sm:$0xff]  }
 0x1e7   : > { %1607 = vmatpush2.bf16.msra.mxu0 %v3932_v62  ;;  %1720 = vmatpush2.bf16.msra.mxu1 %v3933_v63  ;;  %v3969_v62 = vld [vmem:[#allocation2 + $0x60] ss:$16 sps:$4 sm:$0xff]   ;;  %v3970_v63 = vld [vmem:[#allocation2 + $0x7c] ss:$-80 sps:$4 sm:$0xff]  }
 0x1e8   : > { %1608 = vmatprep.subr.bf16.mxu0 %v3934_v18  ;;  %1721 = vmatprep.subr.bf16.mxu1 %v3936_v41  ;;  %v3972_v18 = vld [vmem:[#allocation2 + $0x78] ss:$-80 sps:$4 sm:$0xff]   ;;  %v4017_v41 = vld [vmem:[%s4509_s9 + $0x4] ss:$8 sps:$4 sm:$0xff]  }
 0x1eb   : > { %1609 = vmatpush2.bf16.msra.mxu0 %v3938_v38  ;;  %1722 = vmatpush2.bf16.msra.mxu1 %v3939_v2  ;;  %v4020_v38 = vld [vmem:[%s4509_s9 + $0x104] ss:$8 sps:$4 sm:$0xff]   ;;  %v4015_v2 = vld [vmem:[%s4509_s9] ss:$8 sps:$4 sm:$0xff]  }
 0x1ec   : > { %1610 = vmatprep.subr.bf16.mxu0 %v3940_v25  ;;  %1723 = vmatprep.subr.bf16.mxu1 %v3942_v29  ;;  %v4018_v25 = vld [vmem:[%s4509_s9 + $0x100] ss:$8 sps:$4 sm:$0xff]   ;;  %v4023_v29 = vld [vmem:[%s4509_s9 + $0xf4] ss:$8 sps:$4 sm:$0xff]  }
 0x1ef   : > { %1611 = vmatpush2.bf16.msra.mxu0 %v3944_v53  ;;  %1724 = vmatpush2.bf16.msra.mxu1 %v3945_v51  ;;  %v4026_v53 = vld [vmem:[%s4509_s9 + $0x1f4] ss:$8 sps:$4 sm:$0xff]   ;;  %v4021_v51 = vld [vmem:[%s4509_s9 + $0xf0] ss:$8 sps:$4 sm:$0xff]  }
 0x1f0   : > { %1612 = vmatprep.subr.bf16.mxu0 %v3946_v10  ;;  %1725 = vmatprep.subr.bf16.mxu1 %v3948_v43  ;;  %v4024_v10 = vld [vmem:[%s4509_s9 + $0x1f0] ss:$8 sps:$4 sm:$0xff]   ;;  %v4029_v43 = vld [vmem:[%s4509_s9 + $0xe4] ss:$8 sps:$4 sm:$0xff]  }
 0x1f3   : > { %1613 = vmatpush2.bf16.msra.mxu0 %v3950_v44  ;;  %1726 = vmatpush2.bf16.msra.mxu1 %v3951_v3  ;;  %v4032_v44 = vld [vmem:[%s4509_s9 + $0x1e4] ss:$8 sps:$4 sm:$0xff]   ;;  %v4027_v3 = vld [vmem:[%s4509_s9 + $0xe0] ss:$8 sps:$4 sm:$0xff]  }
 0x1f4   : > { %1614 = vmatprep.subr.bf16.mxu0 %v3952_v0  ;;  %1727 = vmatprep.subr.bf16.mxu1 %v3954_v39  ;;  %v4030_v0 = vld [vmem:[%s4509_s9 + $0x1e0] ss:$8 sps:$4 sm:$0xff]   ;;  %v4035_v39 = vld [vmem:[%s4509_s9 + $0xd4] ss:$8 sps:$4 sm:$0xff]  }
 0x1f7   : > { %1615 = vmatpush2.bf16.msra.mxu0 %v3956_v22  ;;  %1728 = vmatpush2.bf16.msra.mxu1 %v3957_v59  ;;  %v4038_v22 = vld [vmem:[%s4509_s9 + $0x1d4] ss:$8 sps:$4 sm:$0xff]   ;;  %v4033_v59 = vld [vmem:[%s4509_s9 + $0xd0] ss:$8 sps:$4 sm:$0xff]  }
 0x1f8   : > { %2834 = vmatprep.subr.bf16.mxu0 %v3975_v20  ;;  %2947 = vmatprep.subr.bf16.mxu1 %v3978_v56  ;;  %v4044_v20 = vld [vmem:[%s4509_s9 + $0x1c4] ss:$8 sps:$4 sm:$0xff]   ;;  %v4039_v56 = vld [vmem:[%s4509_s9 + $0xc0] ss:$8 sps:$4 sm:$0xff]  }
 0x1fa   : > { %1617 = vmatmul.mubr.bf16.vlgmr.msra.gmra.mxu0 %v3958_v58  ;;  %1730 = vmatmul.mubr.bf16.vlgmr.msra.gmra.mxu1 %v3958_v58  ;;  %v4042_v58 = vld [vmem:[%s4509_s9 + $0x1c0] ss:$8 sps:$4 sm:$0xff]  }
 0x1fb   : > { %1626 = vmatprep.mubr.bf16.mxu0 %v3577_v27  ;;  %1739 = vmatprep.mubr.bf16.mxu1 %v3577_v27  ;;  %v4047_v27 = vld [vmem:[%s4509_s9 + $0xb4] ss:$8 sps:$4 sm:$0xff]  }
 0x1fc   : > { %2835 = vmatpush1.bf16.msra.mxu0 %v3973_v23  ;;  %2948 = vmatpush1.bf16.msra.mxu1 %v3976_v28  ;;  %v4050_v23 = vld [vmem:[%s4509_s9 + $0x1b4] ss:$8 sps:$4 sm:$0xff]   ;;  %v4045_v28 = vld [vmem:[%s4509_s9 + $0xb0] ss:$8 sps:$4 sm:$0xff]  }
 0x1fd   : > { %2836 = vmatprep.subr.bf16.mxu0 %v3981_v12  ;;  %2949 = vmatprep.subr.bf16.mxu1 %v3984_v19  ;;  %v4048_v12 = vld [vmem:[%s4509_s9 + $0x1b0] ss:$8 sps:$4 sm:$0xff]   ;;  %v4053_v19 = vld [vmem:[%s4509_s9 + $0xa4] ss:$8 sps:$4 sm:$0xff]  }
 0x200   : > { %2837 = vmatpush1.bf16.msra.mxu0 %v3979_v24  ;;  %2950 = vmatpush1.bf16.msra.mxu1 %v3982_v26  ;;  %v4056_v24 = vld [vmem:[%s4509_s9 + $0x1a4] ss:$8 sps:$4 sm:$0xff]   ;;  %v4051_v26 = vld [vmem:[%s4509_s9 + $0xa0] ss:$8 sps:$4 sm:$0xff]  }
 0x201   : > { %2838 = vmatprep.subr.bf16.mxu0 %v3987_v50  ;;  %2951 = vmatprep.subr.bf16.mxu1 %v3990_v46  ;;  %v4054_v50 = vld [vmem:[%s4509_s9 + $0x1a0] ss:$8 sps:$4 sm:$0xff]   ;;  %v4062_v46 = vld [vmem:[%s4509_s9 + $0x194] ss:$8 sps:$4 sm:$0xff]  }
 0x202   : > { %1627 = vmatmul.mubr.bf16.gmra.mxu0 %v3576_v11  ;;  %1740 = vmatmul.mubr.bf16.gmra.mxu1 %v3576_v11  ;;  %v4057_v11 = vld [vmem:[%s4509_s9 + $0x90] ss:$8 sps:$4 sm:$0xff]  }
 0x203   : > { %1636 = vmatprep.mubr.bf16.mxu0 %v3961_v48  ;;  %1749 = vmatprep.mubr.bf16.mxu1 %v3961_v48  ;;  %v4059_v48 = vld [vmem:[%s4509_s9 + $0x94] ss:$8 sps:$4 sm:$0xff]  }
 0x204   : > { %2839 = vmatpush1.bf16.msra.mxu0 %v3985_v7  ;;  %2952 = vmatpush1.bf16.msra.mxu1 %v3988_v49  ;;  %v4060_v7 = vld [vmem:[%s4509_s9 + $0x190] ss:$8 sps:$4 sm:$0xff]   ;;  %v4065_v49 = vld [vmem:[%s4509_s9 + $0x84] ss:$8 sps:$4 sm:$0xff]  }
 0x205   : > { %2840 = vmatprep.subr.bf16.mxu0 %v3993_v52  ;;  %2953 = vmatprep.subr.bf16.mxu1 %v3996_v47  ;;  %v4068_v52 = vld [vmem:[%s4509_s9 + $0x184] ss:$8 sps:$4 sm:$0xff]   ;;  %v4063_v47 = vld [vmem:[%s4509_s9 + $0x80] ss:$8 sps:$4 sm:$0xff]  }
 0x208   : > { %2841 = vmatpush1.bf16.msra.mxu0 %v3991_v37  ;;  %2954 = vmatpush1.bf16.msra.mxu1 %v3994_v16  ;;  %v5088_v37 = vshrl.u32 %v1164_v32, 7 }
 0x209   : > { %2842 = vmatprep.subr.bf16.mxu0 %v3999_v57  ;;  %2955 = vmatprep.subr.bf16.mxu1 %v4002_v40  ;;  %v1162_v40 = vld [vmem:[%s521_s17] sm:$0xf] }
 0x20a   : > { %1637 = vmatmul.mubr.bf16.gmra.mxu0 %v3963_v42  ;;  %1750 = vmatmul.mubr.bf16.gmra.mxu1 %v3963_v42  ;;  %6022 = vst [vmem:[#allocation6_spill] sm:$0xff] %v5088_v37  ;;  %v5962_v16 = vsub.s32 0, %v5088_v37  ;;  %v1174_v57 = vsub.s32 2, %v5088_v37  ;;  %v5961_v42 = vsub.s32 1, %v5088_v37 }
 0x20b   : > { %1646 = vmatprep.mubr.bf16.mxu0 %v3581_v30  ;;  %1759 = vmatprep.mubr.bf16.mxu1 %v3581_v30 }
 0x20c   : > { %2843 = vmatpush1.bf16.msra.mxu0 %v3997_v54  ;;  %2956 = vmatpush1.bf16.msra.mxu1 %v4000_v60  ;;  %v1178_v54 = vsub.s32 3, %v5088_v37  ;;  %v5101_v60 = vrot.slane %v1162_v40, %v5962_v16  ;;  %v5103_v30 = vrot.slane %v1162_v40, %v1174_v57  ;;  %v5107_v61 = vrot.slane %v1162_v40, %v5961_v42 }
 0x20d   : > { %2844 = vmatprep.subr.bf16.mxu0 %v4005_v21  ;;  %2957 = vmatprep.subr.bf16.mxu1 %v4008_v5 }
 0x20e   : > { %v5109_v1 = vrot.slane %v1162_v40, %v1178_v54 }
 0x210   : > { %2845 = vmatpush1.bf16.msra.mxu0 %v4003_v8  ;;  %2958 = vmatpush1.bf16.msra.mxu1 %v4006_v17 }
 0x211   : > { %2846 = vmatprep.subr.bf16.mxu0 %v4011_v34  ;;  %2959 = vmatprep.subr.bf16.mxu1 %v4014_v35 }
 0x212   : > { %1647 = vmatmul.mubr.bf16.gmra.mxu0 %v3580_v33  ;;  %1760 = vmatmul.mubr.bf16.gmra.mxu1 %v3580_v33 }
 0x213   : > { %1656 = vmatprep.mubr.bf16.mxu0 %v3583_v6  ;;  %1769 = vmatprep.mubr.bf16.mxu1 %v3583_v6 }
 0x214   : > { %2847 = vmatpush1.bf16.msra.mxu0 %v4009_v36  ;;  %2960 = vmatpush1.bf16.msra.mxu1 %v4012_v13 }
 0x215   : > { %2848 = vmatprep.subr.bf16.mxu0 %v4017_v41  ;;  %2961 = vmatprep.subr.bf16.mxu1 %v4020_v38 }
 0x218   : > { %2849 = vmatpush1.bf16.msra.mxu0 %v4015_v2  ;;  %2962 = vmatpush1.bf16.msra.mxu1 %v4018_v25 }
 0x219   : > { %2850 = vmatprep.subr.bf16.mxu0 %v4023_v29  ;;  %2963 = vmatprep.subr.bf16.mxu1 %v4026_v53 }
 0x21a   : > { %1657 = vmatmul.mubr.bf16.gmra.mxu0 %v3582_v14  ;;  %1770 = vmatmul.mubr.bf16.gmra.mxu1 %v3582_v14 }
 0x21b   : > { %1666 = vmatprep.mubr.bf16.mxu0 %v3964_v45  ;;  %1779 = vmatprep.mubr.bf16.mxu1 %v3964_v45 }
 0x21c   : > { %2851 = vmatpush2.bf16.msra.mxu0 %v4021_v51  ;;  %2964 = vmatpush2.bf16.msra.mxu1 %v4024_v10 }
 0x21d   : > { %2852 = vmatprep.subr.bf16.mxu0 %v4029_v43  ;;  %2965 = vmatprep.subr.bf16.mxu1 %v4032_v44 }
 0x220   : > { %2853 = vmatpush2.bf16.msra.mxu0 %v4027_v3  ;;  %2966 = vmatpush2.bf16.msra.mxu1 %v4030_v0 }
 0x221   : > { %2854 = vmatprep.subr.bf16.mxu0 %v4035_v39  ;;  %2967 = vmatprep.subr.bf16.mxu1 %v4038_v22 }
 0x222   : > { %1667 = vmatmul.mubr.bf16.gmra.mxu0 %v3966_v9  ;;  %1780 = vmatmul.mubr.bf16.gmra.mxu1 %v3966_v9 }
 0x223   : > { %1676 = vmatprep.mubr.bf16.mxu0 %v3967_v15  ;;  %1789 = vmatprep.mubr.bf16.mxu1 %v3967_v15 }
 0x224   : > { %2855 = vmatpush2.bf16.msra.mxu0 %v4033_v59  ;;  %2968 = vmatpush2.bf16.msra.mxu1 %v4036_v55 }
 0x225   : > { %2856 = vmatprep.subr.bf16.mxu0 %v4041_v31  ;;  %2969 = vmatprep.subr.bf16.mxu1 %v4044_v20 }
 0x228   : > { %2857 = vmatpush2.bf16.msra.mxu0 %v4039_v56  ;;  %2970 = vmatpush2.bf16.msra.mxu1 %v4042_v58 }
 0x229   : > { %2858 = vmatprep.subr.bf16.mxu0 %v4047_v27  ;;  %2971 = vmatprep.subr.bf16.mxu1 %v4050_v23 }
 0x22a   : > { %1677 = vmatmul.mubr.bf16.gmra.mxu0 %v3969_v62  ;;  %1790 = vmatmul.mubr.bf16.gmra.mxu1 %v3969_v62 }
 0x22b   : > { %1686 = vmatprep.mubr.bf16.mxu0 %v3970_v63  ;;  %1799 = vmatprep.mubr.bf16.mxu1 %v3970_v63 }
 0x22c   : > { %2859 = vmatpush2.bf16.msra.mxu0 %v4045_v28  ;;  %2972 = vmatpush2.bf16.msra.mxu1 %v4048_v12 }
 0x22d   : > { %2860 = vmatprep.subr.bf16.mxu0 %v4053_v19  ;;  %2973 = vmatprep.subr.bf16.mxu1 %v4056_v24 }
 0x230   : > { %2861 = vmatpush2.bf16.msra.mxu0 %v4051_v26  ;;  %2974 = vmatpush2.bf16.msra.mxu1 %v4054_v50 }
 0x231   : > { %2862 = vmatprep.subr.bf16.mxu0 %v4059_v48  ;;  %2975 = vmatprep.subr.bf16.mxu1 %v4062_v46 }
 0x232   : > { %1687 = vmatmul.mubr.bf16.gmra.mxu0 %v3972_v18  ;;  %1800 = vmatmul.mubr.bf16.gmra.mxu1 %v3972_v18 }
 0x234   : > { %2863 = vmatpush2.bf16.msra.mxu0 %v4057_v11  ;;  %2976 = vmatpush2.bf16.msra.mxu1 %v4060_v7 }
 0x235   : > { %2864 = vmatprep.subr.bf16.mxu0 %v4065_v49  ;;  %2977 = vmatprep.subr.bf16.mxu1 %v4068_v52 }
 0x238   : > { %2865 = vmatpush2.bf16.msra.mxu0 %v4063_v47  ;;  %2978 = vmatpush2.bf16.msra.mxu1 %v4066_v4 }
 0x2ba   : > { %v1618_v21 = vpop.f32.mrf.mxu0  ;;  %v1731_v5 = vpop.f32.mrf.mxu1 }
 0x2bb   : > { %v1619_v8 = vadd.f32 %v1618_v21, %v5101_v60  ;;  %v1732_v17 = vadd.f32 %v1731_v5, %v5103_v30 }
 0x2bc   : > { %v1620_v34 = vpop.f32.mrf.mxu0  ;;  %v1733_v35 = vpop.f32.mrf.mxu1 }
 0x2bd   : > { %v1874_v33 = vmul.f32 0.044715, %v1619_v8  ;;  %v1876_v6 = vmul.f32 0.044715, %v1732_v17  ;;  %v5114_v36 = vadd.f32 %v1620_v34, %v5107_v61  ;;  %v5117_v13 = vadd.f32 %v1733_v35, %v5109_v1 }
 0x2be   : > { %v1622_v14 = vpop.f32.mrf.mxu0  ;;  %v1735_v45 = vpop.f32.mrf.mxu1  ;;  %v5129_v31 = vmul.f32 0.5, %v1619_v8  ;;  %v5131_v58 = vmul.f32 0.5, %v1732_v17 }
 0x2bf   : > { %v1938_v9 = vmul.f32 %v1874_v33, %v1619_v8  ;;  %v1940_v15 = vmul.f32 %v1876_v6, %v1732_v17  ;;  %v1623_v62 = vadd.f32 %v1622_v14, %v5101_v60  ;;  %v1736_v63 = vadd.f32 %v1735_v45, %v5103_v30 }
 0x2c0   : > { %v1624_v18 = vpop.f32.mrf.mxu0  ;;  %v1737_v41 = vpop.f32.mrf.mxu1  ;;  %v1875_v29 = vmul.f32 0.044715, %v5114_v36  ;;  %v1877_v44 = vmul.f32 0.044715, %v5117_v13  ;;  %v5140_v48 = vmul.f32 0.5, %v5114_v36  ;;  %v5150_v47 = vmul.f32 0.5, %v5117_v13 }
 0x2c1   : > { %v2002_v38 = vmul.f32 %v1938_v9, %v1619_v8  ;;  %v2004_v2 = vmul.f32 %v1940_v15, %v1732_v17  ;;  %v1878_v25 = vmul.f32 0.044715, %v1623_v62  ;;  %v1880_v53 = vmul.f32 0.044715, %v1736_v63 }
 0x2c2   : > { %v1628_v51 = vpop.f32.mrf.mxu0  ;;  %v1741_v10 = vpop.f32.mrf.mxu1  ;;  %v5124_v0 = vadd.f32 %v1624_v18, %v5107_v61  ;;  %v5127_v22 = vadd.f32 %v1737_v41, %v5109_v1  ;;  %v1939_v27 = vmul.f32 %v1875_v29, %v5114_v36  ;;  %v1941_v26 = vmul.f32 %v1877_v44, %v5117_v13  ;;  %6024 = vst [vmem:[#allocation8_spill] sm:$0xff] %v5140_v48 }
 0x2c3   : > { %v2066_v43 = vadd.f32 %v2002_v38, %v1619_v8  ;;  %v1942_v3 = vmul.f32 %v1878_v25, %v1623_v62  ;;  %v1944_v39 = vmul.f32 %v1880_v53, %v1736_v63  ;;  %v2068_v20 = vadd.f32 %v2004_v2, %v1732_v17  ;;  %6026 = vst [vmem:[#allocation10_spill] sm:$0xff] %v5150_v47 }
 0x2c4   : > { %v1630_v59 = vpop.f32.mrf.mxu0  ;;  %v1743_v55 = vpop.f32.mrf.mxu1  ;;  %v1879_v28 = vmul.f32 0.044715, %v5124_v0  ;;  %v5137_v50 = vadd.f32 %v1628_v51, %v5101_v60  ;;  %v1881_v46 = vmul.f32 0.044715, %v5127_v22  ;;  %v5144_v11 = vadd.f32 %v1741_v10, %v5103_v30 }
 0x2c5   : > { %v2006_v56 = vmul.f32 %v1942_v3, %v1623_v62  ;;  %v2008_v23 = vmul.f32 %v1944_v39, %v1736_v63  ;;  %v2130_v24 = vmul.f32 0.7978846, %v2066_v43  ;;  %v5147_v7 = vadd.f32 %v1630_v59, %v5107_v61 }
 0x2c6   : > { %v1632_v12 = vpop.f32.mrf.mxu0  ;;  %v1745_v19 = vpop.f32.mrf.mxu1  ;;  %6023 = vst [vmem:[#allocation7_spill] sm:$0xff] %v5137_v50  ;;  %6025 = vst [vmem:[#allocation9_spill] sm:$0xff] %v5144_v11  ;;  %v2132_v4 = vmul.f32 0.7978846, %v2068_v20  ;;  %v5152_v32 = vmul.f32 0.5, %v1623_v62  ;;  %v5154_v40 = vmul.f32 0.5, %v1736_v63  ;;  %v5157_v54 = vmul.f32 %v1939_v27, %v5114_v36 }
 0x2c7   : > { %v2070_v57 = vadd.f32 %v2006_v56, %v1623_v62  ;;  %v2072_v21 = vadd.f32 %v2008_v23, %v1736_v63  ;;  %v1943_v5 = vmul.f32 %v1879_v28, %v5124_v0  ;;  %v5161_v8 = vadd.f32 %v1743_v55, %v5109_v1 }
 0x2c8   : > { %v1634_v49 = vpop.f32.mrf.mxu0  ;;  %v1747_v52 = vpop.f32.mrf.mxu1  ;;  %4069 = vtanh.f32 %v2130_v24  ;;  %v5164_v35 = vmul.f32 %v1941_v26, %v5117_v13  ;;  %v1882_v33 = vmul.f32 0.044715, %v5137_v50  ;;  %v5168_v6 = vadd.f32 %v1632_v12, %v5101_v60 }
 0x2c9   : > { %6027 = vst [vmem:[#allocation11_spill] sm:$0xff] %v5161_v8  ;;  %v1945_v14 = vmul.f32 %v1881_v46, %v5127_v22  ;;  %v1884_v45 = vmul.f32 0.044715, %v5144_v11  ;;  %v1883_v9 = vmul.f32 0.044715, %v5147_v7  ;;  %v5174_v15 = vadd.f32 %v1745_v19, %v5103_v30 }
 0x2ca   : > { %v1638_v17 = vpop.f32.mrf.mxu0  ;;  %v1751_v34 = vpop.f32.mrf.mxu1  ;;  %6028 = vst [vmem:[#allocation12_spill] sm:$0xff] %v5168_v6  ;;  %4071 = vtanh.f32 %v2132_v4  ;;  %v2134_v18 = vmul.f32 0.7978846, %v2070_v57  ;;  %v1885_v41 = vmul.f32 0.044715, %v5161_v8  ;;  %v5178_v38 = vadd.f32 %v1634_v49, %v5107_v61 }
 0x2cb   : > { %6029 = vst [vmem:[#allocation13_spill] sm:$0xff] %v5174_v15  ;;  %v2136_v2 = vmul.f32 0.7978846, %v2072_v21  ;;  %v5181_v25 = vmul.f32 %v1943_v5, %v5124_v0  ;;  %v5184_v29 = vadd.f32 %v1747_v52, %v5109_v1  ;;  %v5187_v53 = vadd.f32 %v1638_v17, %v5101_v60 }
 0x2cc   : > { %v1640_v62 = vpop.f32.mrf.mxu0  ;;  %v1753_v63 = vpop.f32.mrf.mxu1  ;;  %v1946_v43 = vmul.f32 %v1882_v33, %v5137_v50  ;;  %v1886_v44 = vmul.f32 0.044715, %v5168_v6  ;;  %v5192_v3 = vadd.f32 %v1751_v34, %v5103_v30  ;;  %v5198_v59 = vmul.f32 %v1945_v14, %v5127_v22 }
 0x2cd   : > { %6030 = vst [vmem:[#allocation14_spill] sm:$0xff] %v5184_v29  ;;  %6031 = vst [vmem:[#allocation15_spill] sm:$0xff] %v5187_v53  ;;  %v5195_v39 = vadd.f32 %v1640_v62, %v5107_v61  ;;  %v1948_v55 = vmul.f32 %v1884_v45, %v5144_v11  ;;  %v1947_v20 = vmul.f32 %v1883_v9, %v5147_v7  ;;  %v1888_v56 = vmul.f32 0.044715, %v5174_v15 }
 0x2ce   : > { %v1642_v51 = vpop.f32.mrf.mxu0  ;;  %v1755_v10 = vpop.f32.mrf.mxu1  ;;  %6032 = vst [vmem:[#allocation16_spill] sm:$0xff] %v5192_v3  ;;  %4073 = vtanh.f32 %v2134_v18  ;;  %v1949_v28 = vmul.f32 %v1885_v41, %v5161_v8  ;;  %v1887_v12 = vmul.f32 0.044715, %v5178_v38  ;;  %v1889_v19 = vmul.f32 0.044715, %v5184_v29 }
 0x2cf   : > { %6033 = vst [vmem:[#allocation17_spill] sm:$0xff] %v5195_v39  ;;  %4075 = vtanh.f32 %v2136_v2  ;;  %v1890_v24 = vmul.f32 0.044715, %v5187_v53  ;;  %v1892_v26 = vmul.f32 0.044715, %v5192_v3  ;;  %v5210_v4 = vmul.f32 %v1946_v43, %v5137_v50 }
 0x2d0   : > { %v1644_v27 = vpop.f32.mrf.mxu0  ;;  %v1757_v23 = vpop.f32.mrf.mxu1  ;;  %v1891_v46 = vmul.f32 0.044715, %v5195_v39  ;;  %v1950_v57 = vmul.f32 %v1886_v44, %v5168_v6  ;;  %v5214_v21 = vadd.f32 %v1753_v63, %v5109_v1  ;;  %v5217_v5 = vadd.f32 %v1642_v51, %v5101_v60 }
 0x2d1   : > { %6034 = vst [vmem:[#allocation18_spill] sm:$0xff] %v5210_v4  ;;  %v5220_v17 = vmul.f32 %v1948_v55, %v5144_v11  ;;  %v5223_v34 = vmul.f32 %v1947_v20, %v5147_v7  ;;  %v1952_v33 = vmul.f32 %v1888_v56, %v5174_v15  ;;  %v5227_v14 = vadd.f32 %v1755_v10, %v5103_v30 }
 0x2d2   : > { %v1648_v49 = vpop.f32.mrf.mxu0  ;;  %v1761_v52 = vpop.f32.mrf.mxu1  ;;  %6035 = vst [vmem:[#allocation19_spill] sm:$0xff] %v5214_v21  ;;  %v5230_v62 = vmul.f32 %v1949_v28, %v5161_v8  ;;  %v1951_v63 = vmul.f32 %v1887_v12, %v5178_v38  ;;  %v1953_v18 = vmul.f32 %v1889_v19, %v5184_v29  ;;  %v5235_v41 = vadd.f32 %v1644_v27, %v5107_v61 }
 0x2d3   : > { %6036 = vst [vmem:[#allocation20_spill] sm:$0xff] %v5220_v17  ;;  %v1954_v2 = vmul.f32 %v1890_v24, %v5187_v53  ;;  %v1956_v51 = vmul.f32 %v1892_v26, %v5192_v3  ;;  %v1955_v43 = vmul.f32 %v1891_v46, %v5195_v39  ;;  %v5241_v10 = vadd.f32 %v1757_v23, %v5109_v1 }
 0x2d4   : > { %v1650_v45 = vpop.f32.mrf.mxu0  ;;  %v1763_v9 = vpop.f32.mrf.mxu1  ;;  %6037 = vst [vmem:[#allocation21_spill] sm:$0xff] %v5230_v62  ;;  %v5244_v20 = vmul.f32 %v1950_v57, %v5168_v6  ;;  %v1893_v56 = vmul.f32 0.044715, %v5214_v21  ;;  %v1894_v28 = vmul.f32 0.044715, %v5217_v5  ;;  %v5249_v27 = vadd.f32 %v1648_v49, %v5101_v60 }
 0x2d5   : > { %v5251_v12 = vpop.eup %4069  ;;  %v5254_v19 = vmul.f32 %v1952_v33, %v5174_v15  ;;  %v1896_v23 = vmul.f32 0.044715, %v5227_v14  ;;  %v1895_v24 = vmul.f32 0.044715, %v5235_v41  ;;  %v5259_v26 = vadd.f32 %v1761_v52, %v5103_v30 }
 0x2d6   : > { %v1652_v44 = vpop.f32.mrf.mxu0  ;;  %v1765_v55 = vpop.f32.mrf.mxu1  ;;  %6038 = vst [vmem:[#allocation22_spill] sm:$0xff] %v5244_v20  ;;  %v5262_v42 = vmul.f32 %v1951_v63, %v5178_v38  ;;  %v5265_v49 = vmul.f32 %v1953_v18, %v5184_v29  ;;  %v1897_v16 = vmul.f32 0.044715, %v5241_v10  ;;  %v5269_v33 = vadd.f32 %v1650_v45, %v5107_v61 }
 0x2d7   : > { %6039 = vst [vmem:[#allocation23_spill] sm:$0xff] %v5254_v19  ;;  %v5271_v37 = vpop.eup %4071  ;;  %v5274_v19 = vmul.f32 %v1954_v2, %v5187_v53  ;;  %v5277_v52 = vmul.f32 %v1956_v51, %v5192_v3  ;;  %v5280_v15 = vmul.f32 %v1955_v43, %v5195_v39  ;;  %v5283_v63 = vadd.f32 %v1763_v9, %v5109_v1 }
 0x2d8   : > { %v1654_v46 = vpop.f32.mrf.mxu0  ;;  %v1767_v57 = vpop.f32.mrf.mxu1  ;;  %6040 = vst [vmem:[#allocation24_spill] sm:$0xff] %v5262_v42  ;;  %6041 = vst [vmem:[#allocation25_spill] sm:$0xff] %v5265_v49  ;;  %v1957_v11 = vmul.f32 %v1893_v56, %v5214_v21  ;;  %v1958_v45 = vmul.f32 %v1894_v28, %v5217_v5  ;;  %v1898_v20 = vmul.f32 0.044715, %v5249_v27  ;;  %v5289_v2 = vadd.f32 %v1652_v44, %v5101_v60 }
 0x2d9   : > { %6042 = vst [vmem:[#allocation26_spill] sm:$0xff] %v5274_v19  ;;  %6043 = vst [vmem:[#allocation27_spill] sm:$0xff] %v5277_v52  ;;  %v1960_v51 = vmul.f32 %v1896_v23, %v5227_v14  ;;  %v1959_v52 = vmul.f32 %v1895_v24, %v5235_v41  ;;  %v1900_v43 = vmul.f32 0.044715, %v5259_v26  ;;  %v5295_v9 = vadd.f32 %v1765_v55, %v5103_v30 }
 0x2da   : > { %6044 = vst [vmem:[#allocation28_spill] sm:$0xff] %v5280_v15  ;;  %v1658_v18 = vpop.f32.mrf.mxu0  ;;  %v1771_v17 = vpop.f32.mrf.mxu1  ;;  %v1961_v56 = vmul.f32 %v1897_v16, %v5241_v10  ;;  %v1899_v28 = vmul.f32 0.044715, %v5269_v33  ;;  %v1901_v53 = vmul.f32 0.044715, %v5283_v63  ;;  %v5301_v44 = vadd.f32 %v1654_v46, %v5107_v61 }
 0x2db   : > { %6045 = vst [vmem:[#allocation29_spill] sm:$0xff] %v5295_v9  ;;  %v5303_v15 = vpop.eup %4073  ;;  %v1902_v23 = vmul.f32 0.044715, %v5289_v2  ;;  %v1904_v24 = vmul.f32 0.044715, %v5295_v9  ;;  %v5308_v55 = vadd.f32 %v1767_v57, %v5109_v1  ;;  %v5311_v39 = vadd.f32 %v1658_v18, %v5101_v60 }
 0x2dc   : > { %v1660_v3 = vpop.f32.mrf.mxu0  ;;  %v1773_v19 = vpop.f32.mrf.mxu1  ;;  %v1962_v4 = vmul.f32 %v1898_v20, %v5249_v27  ;;  %v1903_v46 = vmul.f32 0.044715, %v5301_v44  ;;  %v5318_v50 = vadd.f32 %v1771_v17, %v5103_v30  ;;  %v5324_v48 = vmul.f32 %v1957_v11, %v5214_v21 }
 0x2dd   : > { %6046 = vst [vmem:[#allocation30_spill] sm:$0xff] %v5311_v39  ;;  %v5313_v6 = vpop.eup %4075  ;;  %v5321_v47 = vadd.f32 %v1660_v3, %v5107_v61  ;;  %v1964_v57 = vmul.f32 %v1900_v43, %v5259_v26  ;;  %v1905_v18 = vmul.f32 0.044715, %v5308_v55  ;;  %v1906_v49 = vmul.f32 0.044715, %v5311_v39 }
 0x2de   : > { %v1662_v16 = vpop.f32.mrf.mxu0  ;;  %6047 = vst [vmem:[#allocation31_spill] sm:$0xff] %v5318_v50  ;;  %6049 = vst [vmem:[#allocation33_spill] sm:$0xff] %v5324_v48  ;;  %v1775_v29 = vpop.f32.mrf.mxu1  ;;  %v1963_v20 = vmul.f32 %v1899_v28, %v5269_v33  ;;  %v1965_v62 = vmul.f32 %v1901_v53, %v5283_v63  ;;  %v1908_v17 = vmul.f32 0.044715, %v5318_v50  ;;  %v5334_v3 = vmul.f32 %v1958_v45, %v5217_v5 }
 0x2df   : > { %6048 = vst [vmem:[#allocation32_spill] sm:$0xff] %v5321_v47  ;;  %v1907_v8 = vmul.f32 0.044715, %v5321_v47  ;;  %v5337_v11 = vmul.f32 %v1960_v51, %v5227_v14  ;;  %v1966_v43 = vmul.f32 %v1902_v23, %v5289_v2  ;;  %v1968_v48 = vmul.f32 %v1904_v24, %v5295_v9 }
 0x2e0   : > { %6050 = vst [vmem:[#allocation34_spill] sm:$0xff] %v5334_v3  ;;  %v1664_v21 = vpop.f32.mrf.mxu0  ;;  %v5342_v42 = vmul.f32 %v1959_v52, %v5235_v41  ;;  %v5345_v53 = vmul.f32 %v1961_v56, %v5241_v10  ;;  %v5348_v28 = vmul.f32 %v1962_v4, %v5249_v27  ;;  %v1967_v45 = vmul.f32 %v1903_v46, %v5301_v44  ;;  %v1777_v52 = vpop.f32.mrf.mxu1 }
 0x2e1   : > { %6051 = vst [vmem:[#allocation35_spill] sm:$0xff] %v5337_v11  ;;  %v5352_v3 = vmul.f32 %v1964_v57, %v5259_v26  ;;  %v1969_v51 = vmul.f32 %v1905_v18, %v5308_v55  ;;  %v1970_v23 = vmul.f32 %v1906_v49, %v5311_v39  ;;  %v5357_v24 = vadd.f32 %v1773_v19, %v5109_v1 }
 0x2e2   : > { %v5360_v11 = vmul.f32 %v1963_v20, %v5269_v33  ;;  %v5363_v56 = vmul.f32 %v1965_v62, %v5283_v63  ;;  %v1972_v4 = vmul.f32 %v1908_v17, %v5318_v50  ;;  %v1971_v46 = vmul.f32 %v1907_v8, %v5321_v47  ;;  %v1668_v20 = vpop.f32.mrf.mxu0 }
 0x2e3   : > { %6052 = vst [vmem:[#allocation36_spill] sm:$0xff] %v5352_v3  ;;  %6053 = vst [vmem:[#allocation37_spill] sm:$0xff] %v5357_v24  ;;  %v5368_v57 = vmul.f32 %v1966_v43, %v5289_v2  ;;  %v5371_v18 = vmul.f32 %v1968_v48, %v5295_v9  ;;  %v5374_v19 = vadd.f32 %v1662_v16, %v5101_v60 }
 0x2e4   : > { %v5377_v49 = vadd.f32 %v1775_v29, %v5103_v30  ;;  %v5380_v62 = vmul.f32 %v1967_v45, %v5301_v44  ;;  %v5383_v17 = vadd.f32 %v1664_v21, %v5107_v61  ;;  %v2067_v8 = vadd.f32 %v5157_v54, %v5114_v36 }
 0x2e5   : > { %6054 = vst [vmem:[#allocation38_spill] sm:$0xff] %v5371_v18  ;;  %6055 = vst [vmem:[#allocation39_spill] sm:$0xff] %v5374_v19  ;;  %v2071_v48 = vadd.f32 %v5181_v25, %v5124_v0  ;;  %v5390_v43 = vmul.f32 %v1969_v51, %v5308_v55  ;;  %v5393_v16 = vmul.f32 %v1970_v23, %v5311_v39  ;;  %v1909_v29 = vmul.f32 0.044715, %v5357_v24  ;;  %v1781_v18 = vpop.f32.mrf.mxu1 }
 0x2e6   : > { %6056 = vst [vmem:[#allocation40_spill] sm:$0xff] %v5377_v49  ;;  %v5397_v45 = vadd.f32 %v1777_v52, %v5109_v1  ;;  %v5400_v21 = vmul.f32 %v1972_v4, %v5318_v50  ;;  %v5403_v36 = vmul.f32 %v1971_v46, %v5321_v47  ;;  %v2131_v54 = vmul.f32 0.7978846, %v2067_v8 }
 0x2e7   : > { %6057 = vst [vmem:[#allocation41_spill] sm:$0xff] %v5393_v16  ;;  %v2135_v25 = vmul.f32 0.7978846, %v2071_v48  ;;  %v1910_v51 = vmul.f32 0.044715, %v5374_v19  ;;  %v2069_v23 = vadd.f32 %v5164_v35, %v5117_v13  ;;  %v2073_v52 = vadd.f32 %v5198_v59, %v5127_v22  ;;  %v1670_v16 = vpop.f32.mrf.mxu0  ;;  %v1783_v50 = vpop.f32.mrf.mxu1 }
 0x2e8   : > { %6058 = vst [vmem:[#allocation42_spill] sm:$0xff] %v5397_v45  ;;  %6059 = vst [vmem:[#allocation43_spill] sm:$0xff] %v5400_v21  ;;  %v1912_v9 = vmul.f32 0.044715, %v5377_v49  ;;  %v1911_v39 = vmul.f32 0.044715, %v5383_v17  ;;  %4077 = vtanh.f32 %v2131_v54  ;;  %v5413_v4 = vadd.f32 %v1668_v20, %v5101_v60 }
 0x2e9   : > { %6060 = vst [vmem:[#allocation44_spill] sm:$0xff] %v5403_v36  ;;  %v5416_v46 = vadd.f32 %v1781_v18, %v5103_v30  ;;  %v1913_v8 = vmul.f32 0.044715, %v5397_v45  ;;  %4079 = vtanh.f32 %v2135_v25  ;;  %v2133_v48 = vmul.f32 0.7978846, %v2069_v23  ;;  %v1672_v25 = vpop.f32.mrf.mxu0 }
 0x2ea   : > { %6061 = vst [vmem:[#allocation45_spill] sm:$0xff] %v5413_v4  ;;  %v2137_v21 = vmul.f32 0.7978846, %v2073_v52  ;;  %v1973_v13 = vmul.f32 %v1909_v29, %v5357_v24  ;;  %v5421_v35 = vmul.f32 0.5, %v5124_v0  ;;  %v1914_v59 = vmul.f32 0.044715, %v5413_v4 }
 0x2eb   : > { %6062 = vst [vmem:[#allocation46_spill] sm:$0xff] %v5416_v46  ;;  %v1916_v54 = vmul.f32 0.044715, %v5416_v46  ;;  %v1974_v20 = vmul.f32 %v1910_v51, %v5374_v19  ;;  %4081 = vtanh.f32 %v2133_v48  ;;  %v2262_v18 = vadd.f32 1.0, %v5303_v15  ;;  %v1785_v15 = vpop.f32.mrf.mxu1 }
 0x2ec   : > { %v5428_v36 = vadd.f32 %v1670_v16, %v5107_v61  ;;  %v1976_v23 = vmul.f32 %v1912_v9, %v5377_v49  ;;  %v1975_v29 = vmul.f32 %v1911_v39, %v5383_v17  ;;  %4083 = vtanh.f32 %v2137_v21 }
 0x2ed   : > { %v2264_v0 = vadd.f32 1.0, %v5313_v6  ;;  %v1977_v52 = vmul.f32 %v1913_v8, %v5397_v45  ;;  %v2258_v47 = vadd.f32 1.0, %v5251_v12  ;;  %v2260_v51 = vadd.f32 1.0, %v5271_v37 }
 0x2ee   : > { %6063 = vst [vmem:[#allocation47_spill] sm:$0xff] %v5428_v36  ;;  %v1915_v48 = vmul.f32 0.044715, %v5428_v36  ;;  %v1978_v16 = vmul.f32 %v1914_v59, %v5413_v4  ;;  %v1980_v3 = vmul.f32 %v1916_v54, %v5416_v46  ;;  %v5440_v9 = vadd.f32 %v1783_v50, %v5109_v1 }
 0x2ef   : > { %v5443_v39 = vadd.f32 %v1672_v25, %v5101_v60  ;;  %v5446_v6 = vmul.f32 %v1973_v13, %v5357_v24  ;;  %v5449_v12 = vmul.f32 %v1974_v20, %v5374_v19  ;;  %v1817_v37 = vmul.f32 0.5, %v5127_v22  ;;  %v1674_v13 = vpop.f32.mrf.mxu0  ;;  %v1787_v25 = vpop.f32.mrf.mxu1  ;;  %v6080_v19 = vld [vmem:[#allocation8_spill] sm:$0xff] }
 0x2f0   : > { %v5453_v21 = vmul.f32 %v2262_v18, %v5152_v32  ;;  %v5456_v8 = vmul.f32 %v1976_v23, %v5377_v49  ;;  %v5459_v50 = vmul.f32 %v2264_v0, %v5154_v40  ;;  %v1979_v59 = vmul.f32 %v1915_v48, %v5428_v36  ;;  %v6077_v49 = vld [vmem:[#allocation14_spill] sm:$0xff] }
 0x2f1   : > { %6064 = vst [vmem:[#allocation48_spill] sm:$0xff] %v5443_v39  ;;  %6065 = vst [vmem:[#allocation49_spill] sm:$0xff] %v5446_v6  ;;  %v5463_v54 = vadd.f32 %v1785_v15, %v5103_v30  ;;  %v5466_v20 = vmul.f32 %v1975_v29, %v5383_v17  ;;  %v5469_v22 = vmul.f32 %v1977_v52, %v5397_v45  ;;  %v1917_v0 = vmul.f32 0.044715, %v5440_v9 }
 0x2f2   : > { %6066 = vst [vmem:[#allocation50_spill] sm:$0xff] %v5449_v12  ;;  %6067 = vst [vmem:[#allocation51_spill] sm:$0xff] %v5456_v8  ;;  %v2322_v32 = vmul.f32 %v2258_v47, %v5129_v31  ;;  %v5473_v18 = vmul.f32 %v2260_v51, %v5131_v58  ;;  %v5476_v40 = vmul.f32 %v1978_v16, %v5413_v4  ;;  %v1918_v29 = vmul.f32 0.044715, %v5443_v39  ;;  %v6073_v58 = vld [vmem:[#allocation24_spill] sm:$0xff]  ;;  %v6075_v4 = vld [vmem:[#allocation11_spill] sm:$0xff] }
 0x2f3   : > { %6068 = vst [vmem:[#allocation52_spill] sm:$0xff] %v5463_v54  ;;  %6069 = vst [vmem:[#allocation53_spill] sm:$0xff] %v5466_v20  ;;  %v5479_v23 = vmul.f32 %v1980_v3, %v5416_v46  ;;  %v5485_v52 = vadd.f32 %v1674_v13, %v5107_v61  ;;  %v2075_v31 = vadd.f32 %v5223_v34, %v5147_v7  ;;  %v1920_v15 = vmul.f32 0.044715, %v5463_v54 }
 0x2f4   : > { %6070 = vst [vmem:[#allocation54_spill] sm:$0xff] %v5469_v22  ;;  %6071 = vst [vmem:[#allocation55_spill] sm:$0xff] %v5476_v40  ;;  %v2418_v48 = vpack.c.bf16 %v5453_v21, %v2322_v32  ;;  %v2079_v47 = vadd.f32 %v6073_v58, %v5178_v38  ;;  %v5494_v3 = vmul.f32 %v1979_v59, %v5428_v36  ;;  %v5501_v13 = vmul.f32 0.5, %v5147_v7  ;;  %v1791_v36 = vpop.f32.mrf.mxu1 }
 0x2f5   : > { %6072 = vst [vmem:[#allocation56_spill] sm:$0xff] %v5479_v23  ;;  %v5498_v16 = vadd.f32 %v1787_v25, %v5109_v1  ;;  %v4078_v21 = vpop.eup %4077  ;;  %v5504_v34 = vmul.f32 0.5, %v5178_v38  ;;  %v2139_v32 = vmul.f32 0.7978846, %v2075_v31  ;;  %v1678_v23 = vpop.f32.mrf.mxu0  ;;  %v1981_v59 = vmul.f32 %v1917_v0, %v5440_v9  ;;  %v6078_v38 = vld [vmem:[#allocation25_spill] sm:$0xff] }
 0x2f6   : > { %6074 = vst [vmem:[#allocation24_spill] sm:$0xff] %v5494_v3  ;;  %v2143_v58 = vmul.f32 0.7978846, %v2079_v47  ;;  %v4080_v46 = vpop.eup %4079  ;;  %v2259_v51 = vadd.f32 1.0, %v4078_v21  ;;  %v1982_v40 = vmul.f32 %v1918_v29, %v5443_v39  ;;  %v6076_v3 = vld [vmem:[#allocation21_spill] sm:$0xff]  ;;  %v2081_v12 = vadd.f32 %v6078_v38, %v6077_v49 }
 0x2f7   : > { %v2077_v25 = vadd.f32 %v6076_v3, %v6075_v4  ;;  %v2263_v8 = vadd.f32 1.0, %v4080_v46  ;;  %v1919_v7 = vmul.f32 0.044715, %v5485_v52  ;;  %4085 = vtanh.f32 %v2139_v32  ;;  %v1680_v6 = vpop.f32.mrf.mxu0 }
 0x2f8   : > { %v4082_v31 = vpop.eup %4081  ;;  %v1921_v47 = vmul.f32 0.044715, %v5498_v16  ;;  %4087 = vtanh.f32 %v2143_v58  ;;  %v5515_v0 = vadd.f32 %v1678_v23, %v5101_v60  ;;  %v2323_v22 = vmul.f32 %v2259_v51, %v6080_v19  ;;  %v1793_v58 = vpop.f32.mrf.mxu1  ;;  %v6083_v19 = vld [vmem:[#allocation10_spill] sm:$0xff]  ;;  %v6084_v51 = vld [vmem:[#allocation7_spill] sm:$0xff] }
 0x2f9   : > { %v2141_v21 = vmul.f32 0.7978846, %v2077_v25  ;;  %v4084_v29 = vpop.eup %4083  ;;  %v2327_v3 = vmul.f32 %v2263_v8, %v5421_v35  ;;  %v2261_v46 = vadd.f32 1.0, %v4082_v31  ;;  %v2145_v45 = vmul.f32 0.7978846, %v2081_v12 }
 0x2fa   : > { %6079 = vst [vmem:[#allocation11_spill] sm:$0xff] %v5515_v0  ;;  %v2265_v32 = vadd.f32 1.0, %v4084_v29  ;;  %v1984_v24 = vmul.f32 %v1920_v15, %v5463_v54  ;;  %v5521_v38 = vadd.f32 %v1791_v36, %v5103_v30  ;;  %v5524_v23 = vmul.f32 %v1981_v59, %v5440_v9  ;;  %v6085_v15 = vld [vmem:[#allocation18_spill] sm:$0xff] }
 0x2fb   : > { %4089 = vtanh.f32 %v2141_v21  ;;  %v2419_v25 = vpack.c.bf16 %v2327_v3, %v2323_v22  ;;  %v5527_v20 = vmul.f32 0.5, %v6075_v4  ;;  %v2325_v35 = vmul.f32 %v2261_v46, %v6083_v19  ;;  %v6087_v21 = vld [vmem:[#allocation12_spill] sm:$0xff]  ;;  %v6088_v4 = vld [vmem:[#allocation22_spill] sm:$0xff] }
 0x2fc   : > { %6081 = vst [vmem:[#allocation21_spill] sm:$0xff] %v5521_v38  ;;  %6082 = vst [vmem:[#allocation14_spill] sm:$0xff] %v5524_v23  ;;  %4091 = vtanh.f32 %v2145_v45  ;;  %v2329_v12 = vmul.f32 %v2265_v32, %v1817_v37  ;;  %v1922_v8 = vmul.f32 0.044715, %v5515_v0  ;;  %v2074_v31 = vadd.f32 %v6085_v15, %v6084_v51  ;;  %v1682_v45 = vpop.f32.mrf.mxu0  ;;  %v6089_v32 = vld [vmem:[#allocation9_spill] sm:$0xff]  ;;  %v6090_v19 = vld [vmem:[#allocation20_spill] sm:$0xff] }
 0x2fd   : > { %2866 = vmatprep.mubr.bf16.mxu0 %v2419_v25  ;;  %v5534_v36 = vmul.f32 %v1982_v40, %v5443_v39  ;;  %v1983_v22 = vmul.f32 %v1919_v7, %v5485_v52  ;;  %v1985_v59 = vmul.f32 %v1921_v47, %v5498_v16  ;;  %v2078_v29 = vadd.f32 %v6088_v4, %v6087_v21  ;;  %v1795_v25 = vpop.f32.mrf.mxu1  ;;  %v6091_v40 = vld [vmem:[#allocation13_spill] sm:$0xff] }
 0x2fe   : > { %v2421_v3 = vpack.c.bf16 %v2329_v12, %v2325_v35  ;;  %2867 = vmatmul.mubr.bf16.vlgmr.msra.gmra.mxu0 %v2418_v48  ;;  %v1924_v37 = vmul.f32 0.044715, %v5521_v38  ;;  %v2138_v46 = vmul.f32 0.7978846, %v2074_v31  ;;  %v2076_v15 = vadd.f32 %v6090_v19, %v6089_v32 }
 0x2ff   : > { %6086 = vst [vmem:[#allocation25_spill] sm:$0xff] %v5534_v36  ;;  %v2142_v23 = vmul.f32 0.7978846, %v2078_v29  ;;  %v6092_v36 = vld [vmem:[#allocation23_spill] sm:$0xff]  ;;  %v5546_v7 = vadd.f32 %v1680_v6, %v5107_v61  ;;  %v5549_v47 = vadd.f32 %v1793_v58, %v5109_v1  ;;  %v1986_v48 = vmul.f32 %v1922_v8, %v5515_v0 }
 0x300   : > { %v2080_v39 = vadd.f32 %v6092_v36, %v6091_v40  ;;  %2979 = vmatprep.mubr.bf16.mxu1 %v2421_v3  ;;  %4093 = vtanh.f32 %v2138_v46  ;;  %v2140_v35 = vmul.f32 0.7978846, %v2076_v15  ;;  %v5553_v12 = vadd.f32 %v1682_v45, %v5101_v60  ;;  %v1684_v45 = vpop.f32.mrf.mxu0 }
 0x301   : > { %6093 = vst [vmem:[#allocation8_spill] sm:$0xff] %v5549_v47  ;;  %v6095_v31 = vpack.c.bf16 %v5459_v50, %v5473_v18  ;;  %v5559_v36 = vmul.f32 %v1984_v24, %v5463_v54  ;;  %4095 = vtanh.f32 %v2142_v23  ;;  %v5562_v58 = vadd.f32 %v1795_v25, %v5103_v30 }
 0x302   : > { %6094 = vst [vmem:[#allocation10_spill] sm:$0xff] %v5553_v12  ;;  %v2144_v6 = vmul.f32 0.7978846, %v2080_v39  ;;  %v1825_v4 = vmul.f32 0.5, %v6077_v49  ;;  %v1988_v8 = vmul.f32 %v1924_v37, %v5521_v38  ;;  %4097 = vtanh.f32 %v2140_v35 }
 0x303   : > { %2980 = vmatmul.mubr.bf16.vlgmr.msra.gmra.mxu1 %v6095_v31  ;;  %6096 = vst [vmem:[#allocation7_spill] sm:$0xff] %v5559_v36  ;;  %v1923_v29 = vmul.f32 0.044715, %v5546_v7  ;;  %v5568_v3 = vmul.f32 %v1983_v22, %v5485_v52  ;;  %v1925_v24 = vmul.f32 0.044715, %v5549_v47  ;;  %v5573_v18 = vmul.f32 %v1985_v59, %v5498_v16  ;;  %v1797_v22 = vpop.f32.mrf.mxu1 }
 0x304   : > { %4099 = vtanh.f32 %v2144_v6  ;;  %v1926_v50 = vmul.f32 0.044715, %v5553_v12  ;;  %v4086_v39 = vpop.eup %4085  ;;  %v5576_v49 = vmul.f32 %v1986_v48, %v5515_v0  ;;  %v5579_v23 = vmul.f32 0.5, %v6084_v51 }
 0x305   : > { %6097 = vst [vmem:[#allocation18_spill] sm:$0xff] %v5573_v18  ;;  %v5582_v37 = vmul.f32 0.5, %v6087_v21  ;;  %v4088_v46 = vpop.eup %4087  ;;  %v2267_v19 = vadd.f32 1.0, %v4086_v39  ;;  %v5585_v15 = vmul.f32 0.5, %v6089_v32  ;;  %v1928_v25 = vmul.f32 0.044715, %v5562_v58 }
 0x306   : > { %6098 = vst [vmem:[#allocation12_spill] sm:$0xff] %v5576_v49  ;;  %v5589_v59 = vadd.f32 %v1684_v45, %v5107_v61  ;;  %v2271_v35 = vadd.f32 1.0, %v4088_v46  ;;  %v5592_v48 = vmul.f32 %v1988_v8, %v5521_v38  ;;  %v5595_v51 = vmul.f32 0.5, %v6091_v40  ;;  %v6100_v49 = vld [vmem:[#allocation17_spill] sm:$0xff]  ;;  %v6101_v45 = vld [vmem:[#allocation28_spill] sm:$0xff] }
 0x307   : > { %v1987_v21 = vmul.f32 %v1923_v29, %v5546_v7  ;;  %v1989_v6 = vmul.f32 %v1925_v24, %v5549_v47  ;;  %v1990_v32 = vmul.f32 %v1926_v50, %v5553_v12  ;;  %v5601_v39 = vadd.f32 %v1797_v22, %v5109_v1  ;;  %v1688_v22 = vpop.f32.mrf.mxu0 }
 0x308   : > { %6099 = vst [vmem:[#allocation22_spill] sm:$0xff] %v5592_v48  ;;  %v4090_v31 = vpop.eup %4089  ;;  %v2083_v0 = vadd.f32 %v6101_v45, %v6100_v49  ;;  %v2331_v8 = vmul.f32 %v2267_v19, %v5501_v13  ;;  %v2335_v48 = vmul.f32 %v2271_v35, %v5504_v34  ;;  %v2087_v29 = vadd.f32 %v5342_v42, %v5235_v41  ;;  %v6102_v34 = vld [vmem:[#allocation19_spill] sm:$0xff]  ;;  %v6103_v35 = vld [vmem:[#allocation33_spill] sm:$0xff] }
 0x309   : > { %v4092_v46 = vpop.eup %4091  ;;  %v2269_v40 = vadd.f32 1.0, %v4090_v31  ;;  %v1992_v24 = vmul.f32 %v1928_v25, %v5562_v58  ;;  %v1927_v50 = vmul.f32 0.044715, %v5589_v59  ;;  %v5613_v45 = vmul.f32 0.5, %v6100_v49  ;;  %v1801_v25 = vpop.f32.mrf.mxu1 }
 0x30a   : > { %v2273_v38 = vadd.f32 1.0, %v4092_v46  ;;  %v2147_v36 = vmul.f32 0.7978846, %v2083_v0  ;;  %v2423_v54 = vpack.c.bf16 %v2335_v48, %v2331_v8  ;;  %v2151_v13 = vmul.f32 0.7978846, %v2087_v29  ;;  %v1690_v8 = vpop.f32.mrf.mxu0  ;;  %v6106_v29 = vld [vmem:[#allocation15_spill] sm:$0xff] }
 0x30b   : > { %v2333_v18 = vmul.f32 %v2269_v40, %v5527_v20  ;;  %v2085_v31 = vadd.f32 %v6103_v35, %v6102_v34  ;;  %v2089_v42 = vadd.f32 %v5345_v53, %v5241_v10  ;;  %v5620_v0 = vmul.f32 %v1987_v21, %v5546_v7 }
 0x30c   : > { %v2337_v19 = vmul.f32 %v2273_v38, %v1825_v4  ;;  %4101 = vtanh.f32 %v2147_v36  ;;  %2876 = vmatprep.mubr.bf16.mxu0 %v2423_v54  ;;  %v1929_v48 = vmul.f32 0.044715, %v5601_v39  ;;  %v5624_v20 = vadd.f32 %v1688_v22, %v5101_v60 }
 0x30d   : > { %4103 = vtanh.f32 %v2151_v13  ;;  %v4094_v49 = vpop.eup %4093  ;;  %v5627_v36 = vmul.f32 %v1989_v6, %v5549_v47  ;;  %v2149_v4 = vmul.f32 0.7978846, %v2085_v31  ;;  %v2153_v46 = vmul.f32 0.7978846, %v2089_v42  ;;  %v6107_v13 = vld [vmem:[#allocation26_spill] sm:$0xff] }
 0x30e   : > { %v2425_v38 = vpack.c.bf16 %v2337_v19, %v2333_v18  ;;  %v4096_v53 = vpop.eup %4095  ;;  %v2266_v40 = vadd.f32 1.0, %v4094_v49  ;;  %v5630_v54 = vmul.f32 %v1990_v32, %v5553_v12  ;;  %v5633_v21 = vadd.f32 %v1801_v25, %v5103_v30  ;;  %v6108_v19 = vld [vmem:[#allocation34_spill] sm:$0xff] }
 0x30f   : > { %6104 = vst [vmem:[#allocation9_spill] sm:$0xff] %v5627_v36  ;;  %v2082_v22 = vadd.f32 %v6107_v13, %v6106_v29  ;;  %v4098_v35 = vpop.eup %4097  ;;  %v2270_v18 = vadd.f32 1.0, %v4096_v53  ;;  %v1991_v6 = vmul.f32 %v1927_v50, %v5589_v59  ;;  %4105 = vtanh.f32 %v2149_v4  ;;  %v1692_v36 = vpop.f32.mrf.mxu0 }
 0x310   : > { %6105 = vst [vmem:[#allocation20_spill] sm:$0xff] %v5630_v54  ;;  %2989 = vmatprep.mubr.bf16.mxu1 %v2425_v38  ;;  %v2086_v31 = vadd.f32 %v6108_v19, %v5217_v5  ;;  %v2268_v49 = vadd.f32 1.0, %v4098_v35  ;;  %v1993_v32 = vmul.f32 %v1929_v48, %v5601_v39  ;;  %4107 = vtanh.f32 %v2153_v46  ;;  %v1803_v54 = vpop.f32.mrf.mxu1 }
 0x311   : > { %v4100_v42 = vpop.eup %4099  ;;  %v1930_v25 = vmul.f32 0.044715, %v5624_v20  ;;  %v2330_v12 = vmul.f32 %v2266_v40, %v5579_v23  ;;  %v2334_v13 = vmul.f32 %v2270_v18, %v5582_v37  ;;  %v2146_v53 = vmul.f32 0.7978846, %v2082_v22  ;;  %v6109_v23 = vld [vmem:[#allocation16_spill] sm:$0xff]  ;;  %v6110_v37 = vld [vmem:[#allocation27_spill] sm:$0xff] }
 0x312   : > { %v2272_v38 = vadd.f32 1.0, %v4100_v42  ;;  %v5645_v50 = vmul.f32 %v1992_v24, %v5562_v58  ;;  %v1831_v4 = vmul.f32 0.5, %v5235_v41  ;;  %v1932_v35 = vmul.f32 0.044715, %v5633_v21  ;;  %v6111_v22 = vld [vmem:[#allocation35_spill] sm:$0xff]  ;;  %v1805_v41 = vpop.f32.mrf.mxu1 }
 0x313   : > { %v2150_v19 = vmul.f32 0.7978846, %v2086_v31  ;;  %v2422_v48 = vpack.c.bf16 %v2334_v13, %v2330_v12  ;;  %v2332_v46 = vmul.f32 %v2268_v49, %v5585_v15  ;;  %4109 = vtanh.f32 %v2146_v53  ;;  %v1694_v31 = vpop.f32.mrf.mxu0 }
 0x314   : > { %v2336_v47 = vmul.f32 %v2272_v38, %v5595_v51  ;;  %v2084_v40 = vadd.f32 %v6110_v37, %v6109_v23  ;;  %v2088_v18 = vadd.f32 %v6111_v22, %v5227_v14  ;;  %v5656_v24 = vadd.f32 %v1690_v8, %v5107_v61 }
 0x315   : > { %4111 = vtanh.f32 %v2150_v19  ;;  %2877 = vmatmul.mubr.bf16.gmra.mxu0 %v2422_v48  ;;  %v5659_v12 = vmul.f32 %v1991_v6, %v5589_v59  ;;  %v5662_v15 = vmul.f32 %v1993_v32, %v5601_v39  ;;  %v1994_v51 = vmul.f32 %v1930_v25, %v5624_v20 }
 0x316   : > { %v2424_v42 = vpack.c.bf16 %v2336_v47, %v2332_v46  ;;  %v2148_v49 = vmul.f32 0.7978846, %v2084_v40  ;;  %v2152_v13 = vmul.f32 0.7978846, %v2088_v18  ;;  %v5666_v38 = vadd.f32 %v1803_v54, %v5109_v1  ;;  %v1807_v46 = vpop.f32.mrf.mxu1 }
 0x317   : > { %v5669_v8 = vadd.f32 %v1692_v36, %v5101_v60  ;;  %v1829_v47 = vmul.f32 0.5, %v6102_v34  ;;  %v1996_v6 = vmul.f32 %v1932_v35, %v5633_v21  ;;  %v1931_v53 = vmul.f32 0.044715, %v5656_v24 }
 0x318   : > { %2990 = vmatmul.mubr.bf16.gmra.mxu1 %v2424_v42  ;;  %v5675_v32 = vadd.f32 %v1805_v41, %v5103_v30  ;;  %v1833_v19 = vmul.f32 0.5, %v5241_v10  ;;  %v1826_v48 = vmul.f32 0.5, %v6106_v29  ;;  %4113 = vtanh.f32 %v2148_v49 }
 0x319   : > { %v4102_v25 = vpop.eup %4101  ;;  %v5680_v54 = vadd.f32 %v1694_v31, %v5107_v61  ;;  %v1830_v34 = vmul.f32 0.5, %v5217_v5  ;;  %v5684_v35 = vmul.f32 0.5, %v6109_v23  ;;  %4115 = vtanh.f32 %v2152_v13 }
 0x31a   : > { %v4104_v60 = vpop.eup %4103  ;;  %v2275_v36 = vadd.f32 1.0, %v4102_v25  ;;  %v5687_v37 = vmul.f32 %v1994_v51, %v5624_v20  ;;  %v1933_v10 = vmul.f32 0.044715, %v5666_v38  ;;  %v1934_v29 = vmul.f32 0.044715, %v5669_v8 }
 0x31b   : > { %v2279_v30 = vadd.f32 1.0, %v4104_v60  ;;  %v5692_v61 = vmul.f32 %v1996_v6, %v5633_v21  ;;  %v5695_v40 = vmul.f32 0.5, %v5227_v14  ;;  %v1995_v5 = vmul.f32 %v1931_v53, %v5656_v24 }
 0x31c   : > { %v1936_v23 = vmul.f32 0.044715, %v5675_v32  ;;  %v4106_v22 = vpop.eup %4105  ;;  %v2339_v18 = vmul.f32 %v2275_v36, %v5613_v45  ;;  %v1935_v42 = vmul.f32 0.044715, %v5680_v54  ;;  %v5702_v51 = vadd.f32 %v1807_v46, %v5109_v1 }
 0x31d   : > { %v2343_v41 = vmul.f32 %v2279_v30, %v1831_v4  ;;  %v4108_v31 = vpop.eup %4107  ;;  %v2277_v49 = vadd.f32 1.0, %v4106_v22  ;;  %v5705_v13 = vmul.f32 0.5, %v5269_v33  ;;  %v2091_v14 = vadd.f32 %v5360_v11, %v5269_v33 }
 0x31e   : > { %v2095_v6 = vadd.f32 %v5380_v62, %v5301_v44  ;;  %v2281_v25 = vadd.f32 1.0, %v4108_v31  ;;  %v1997_v45 = vmul.f32 %v1933_v10, %v5666_v38  ;;  %v1998_v4 = vmul.f32 %v1934_v29, %v5669_v8 }
 0x31f   : > { %v2427_v53 = vpack.c.bf16 %v2343_v41, %v2339_v18  ;;  %v5714_v1 = vmul.f32 %v1995_v5, %v5656_v24  ;;  %v2000_v60 = vmul.f32 %v1936_v23, %v5675_v32  ;;  %v2155_v36 = vmul.f32 0.7978846, %v2091_v14 }
 0x320   : > { %v2159_v46 = vmul.f32 0.7978846, %v2095_v6  ;;  %v4110_v30 = vpop.eup %4109  ;;  %v2341_v22 = vmul.f32 %v2277_v49, %v1829_v47  ;;  %v2345_v33 = vmul.f32 %v2281_v25, %v1833_v19  ;;  %v2093_v11 = vadd.f32 %v5363_v56, %v5283_v63 }
 0x321   : > { %2886 = vmatprep.mubr.bf16.mxu0 %v2427_v53  ;;  %v2097_v62 = vadd.f32 %v5390_v43, %v5308_v55  ;;  %v2274_v18 = vadd.f32 1.0, %v4110_v30  ;;  %v5722_v29 = vmul.f32 %v1935_v42, %v5680_v54  ;;  %4117 = vtanh.f32 %v2155_v36  ;;  %v6112_v53 = vld [vmem:[#allocation36_spill] sm:$0xff]  ;;  %v6114_v36 = vld [vmem:[#allocation38_spill] sm:$0xff] }
 0x322   : > { %v4112_v10 = vpop.eup %4111  ;;  %v2090_v5 = vadd.f32 %v5348_v28, %v5249_v27  ;;  %v2429_v23 = vpack.c.bf16 %v2345_v33, %v2341_v22  ;;  %4119 = vtanh.f32 %v2159_v46  ;;  %v2157_v47 = vmul.f32 0.7978846, %v2093_v11 }
 0x323   : > { %v2278_v41 = vadd.f32 1.0, %v4112_v10  ;;  %v5727_v19 = vmul.f32 %v1997_v45, %v5666_v38  ;;  %v2161_v56 = vmul.f32 0.7978846, %v2097_v62  ;;  %v2094_v43 = vadd.f32 %v5368_v57, %v5289_v2  ;;  %v6113_v45 = vld [vmem:[#allocation29_spill] sm:$0xff]  ;;  %v6116_v10 = vld [vmem:[#allocation32_spill] sm:$0xff] }
 0x324   : > { %v2154_v31 = vmul.f32 0.7978846, %v2090_v5  ;;  %2999 = vmatprep.mubr.bf16.mxu1 %v2429_v23  ;;  %v2338_v49 = vmul.f32 %v2274_v18, %v1826_v48  ;;  %v5732_v14 = vmul.f32 %v1998_v4, %v5669_v8  ;;  %4121 = vtanh.f32 %v2157_v47  ;;  %v6117_v18 = vld [vmem:[#allocation44_spill] sm:$0xff]  ;;  %v6118_v23 = vld [vmem:[#allocation53_spill] sm:$0xff] }
 0x325   : > { %v2342_v42 = vmul.f32 %v2278_v41, %v1830_v34  ;;  %v4114_v28 = vpop.eup %4113  ;;  %4123 = vtanh.f32 %v2161_v56  ;;  %v2158_v6 = vmul.f32 0.7978846, %v2094_v43  ;;  %v2092_v25 = vadd.f32 %v6112_v53, %v5259_v26 }
 0x326   : > { %v2096_v46 = vadd.f32 %v6114_v36, %v6113_v45  ;;  %v4116_v30 = vpop.eup %4115  ;;  %v2276_v57 = vadd.f32 1.0, %v4114_v28  ;;  %v5739_v33 = vmul.f32 0.044715, %v5702_v51  ;;  %4125 = vtanh.f32 %v2154_v31  ;;  %v6122_v36 = vld [vmem:[#allocation54_spill] sm:$0xff] }
 0x327   : > { %v2426_v22 = vpack.c.bf16 %v2342_v42, %v2338_v49  ;;  %v2280_v48 = vadd.f32 1.0, %v4116_v30  ;;  %4127 = vtanh.f32 %v2158_v6  ;;  %v2156_v34 = vmul.f32 0.7978846, %v2092_v25  ;;  %v6120_v42 = vld [vmem:[#allocation49_spill] sm:$0xff]  ;;  %v6121_v25 = vld [vmem:[#allocation42_spill] sm:$0xff] }
 0x328   : > { %v2160_v4 = vmul.f32 0.7978846, %v2096_v46  ;;  %v5742_v11 = vmul.f32 %v2000_v60, %v5675_v32  ;;  %v1839_v62 = vmul.f32 0.5, %v5301_v44  ;;  %v2099_v5 = vadd.f32 %v6117_v18, %v6116_v10  ;;  %v6119_v60 = vld [vmem:[#allocation37_spill] sm:$0xff] }
 0x329   : > { %2887 = vmatmul.mubr.bf16.gmra.mxu0 %v2426_v22  ;;  %v2103_v41 = vadd.f32 %v6118_v23, %v5383_v17  ;;  %v2340_v47 = vmul.f32 %v2276_v57, %v5684_v35  ;;  %v2344_v56 = vmul.f32 %v2280_v48, %v5695_v40  ;;  %v1837_v43 = vmul.f32 0.5, %v5283_v63  ;;  %v6123_v40 = vld [vmem:[#allocation30_spill] sm:$0xff]  ;;  %v6124_v30 = vld [vmem:[#allocation41_spill] sm:$0xff]  ;;  %v6125_v22 = vld [vmem:[#allocation39_spill] sm:$0xff] }
 0x32a   : > { %6115 = vst [vmem:[#allocation13_spill] sm:$0xff] %v5742_v11  ;;  %4129 = vtanh.f32 %v2156_v34  ;;  %v2163_v31 = vmul.f32 0.7978846, %v2099_v5  ;;  %v2101_v28 = vadd.f32 %v6120_v42, %v6119_v60  ;;  %v1841_v6 = vmul.f32 0.5, %v5308_v55  ;;  %v6126_v57 = vld [vmem:[#allocation50_spill] sm:$0xff]  ;;  %v6127_v23 = vld [vmem:[#allocation31_spill] sm:$0xff] }
 0x32b   : > { %4131 = vtanh.f32 %v2160_v4  ;;  %v2167_v49 = vmul.f32 0.7978846, %v2103_v41  ;;  %v2428_v44 = vpack.c.bf16 %v2344_v56, %v2340_v47  ;;  %v1834_v53 = vmul.f32 0.5, %v5249_v27  ;;  %v6128_v41 = vld [vmem:[#allocation43_spill] sm:$0xff] }
 0x32c   : > { %v2105_v46 = vadd.f32 %v6122_v36, %v6121_v25  ;;  %4133 = vtanh.f32 %v2163_v31  ;;  %v2165_v35 = vmul.f32 0.7978846, %v2101_v28  ;;  %v2098_v63 = vadd.f32 %v6124_v30, %v6123_v40  ;;  %v6129_v28 = vld [vmem:[#allocation40_spill] sm:$0xff] }
 0x32d   : > { %v2102_v48 = vadd.f32 %v6126_v57, %v6125_v22  ;;  %3000 = vmatmul.mubr.bf16.gmra.mxu1 %v2428_v44  ;;  %v1838_v34 = vmul.f32 0.5, %v5289_v2  ;;  %v5764_v4 = vmul.f32 0.5, %v5259_v26  ;;  %4135 = vtanh.f32 %v2167_v49  ;;  %v6130_v44 = vld [vmem:[#allocation51_spill] sm:$0xff]  ;;  %v6132_v57 = vld [vmem:[#allocation24_spill] sm:$0xff] }
 0x32e   : > { %v2169_v55 = vmul.f32 0.7978846, %v2105_v46  ;;  %v4118_v27 = vpop.eup %4117  ;;  %4137 = vtanh.f32 %v2165_v35  ;;  %v2162_v18 = vmul.f32 0.7978846, %v2098_v63  ;;  %v2100_v47 = vadd.f32 %v6128_v41, %v6127_v23  ;;  %v6131_v63 = vld [vmem:[#allocation47_spill] sm:$0xff] }
 0x32f   : > { %v2166_v5 = vmul.f32 0.7978846, %v2102_v48  ;;  %v4120_v56 = vpop.eup %4119  ;;  %v2283_v31 = vadd.f32 1.0, %v4118_v27  ;;  %v1840_v42 = vmul.f32 0.5, %v6113_v45  ;;  %v2104_v2 = vadd.f32 %v6130_v44, %v6129_v28 }
 0x330   : > { %4139 = vtanh.f32 %v2169_v55  ;;  %v2287_v36 = vadd.f32 1.0, %v4120_v56  ;;  %v1843_v26 = vmul.f32 0.5, %v6116_v10  ;;  %v2164_v49 = vmul.f32 0.7978846, %v2100_v47 }
 0x331   : > { %4141 = vtanh.f32 %v2162_v18  ;;  %v4122_v46 = vpop.eup %4121  ;;  %v2347_v35 = vmul.f32 %v2283_v31, %v5705_v13  ;;  %v2168_v30 = vmul.f32 0.7978846, %v2104_v2  ;;  %v2107_v48 = vadd.f32 %v6132_v57, %v6131_v63 }
 0x332   : > { %4143 = vtanh.f32 %v2166_v5  ;;  %v4124_v27 = vpop.eup %4123  ;;  %v2351_v41 = vmul.f32 %v2287_v36, %v1839_v62  ;;  %v2285_v45 = vadd.f32 1.0, %v4122_v46  ;;  %v2111_v55 = vadd.f32 %v5568_v3, %v5485_v52  ;;  %v6134_v46 = vld [vmem:[#allocation18_spill] sm:$0xff] }
 0x333   : > { %4145 = vtanh.f32 %v2164_v49  ;;  %v4126_v56 = vpop.eup %4125  ;;  %v2289_v44 = vadd.f32 1.0, %v4124_v27  ;;  %v1847_v10 = vmul.f32 0.5, %v5383_v17  ;;  %v2171_v18 = vmul.f32 0.7978846, %v2107_v48  ;;  %v6133_v49 = vld [vmem:[#allocation14_spill] sm:$0xff] }
 0x334   : > { %4147 = vtanh.f32 %v2168_v30  ;;  %v4128_v47 = vpop.eup %4127  ;;  %v2431_v13 = vpack.c.bf16 %v2351_v41, %v2347_v35  ;;  %v2282_v5 = vadd.f32 1.0, %v4126_v56  ;;  %v1845_v31 = vmul.f32 0.5, %v6119_v60 }
 0x335   : > { %v2175_v2 = vmul.f32 0.7978846, %v2111_v55  ;;  %v2349_v57 = vmul.f32 %v2285_v45, %v1837_v43  ;;  %v2353_v11 = vmul.f32 %v2289_v44, %v1841_v6  ;;  %v2286_v62 = vadd.f32 1.0, %v4128_v47  ;;  %v6136_v47 = vld [vmem:[#allocation55_spill] sm:$0xff] }
 0x336   : > { %4149 = vtanh.f32 %v2171_v18  ;;  %2896 = vmatprep.mubr.bf16.mxu0 %v2431_v13  ;;  %v1849_v3 = vmul.f32 0.5, %v6121_v25  ;;  %v2109_v17 = vadd.f32 %v6133_v49, %v5440_v9  ;;  %v2113_v30 = vadd.f32 %v6134_v46, %v5498_v16  ;;  %v6135_v18 = vld [vmem:[#allocation45_spill] sm:$0xff] }
 0x337   : > { %v4130_v36 = vpop.eup %4129  ;;  %4151 = vtanh.f32 %v2175_v2  ;;  %v2433_v48 = vpack.c.bf16 %v2353_v11, %v2349_v57  ;;  %v2346_v27 = vmul.f32 %v2282_v5, %v1834_v53  ;;  %v2350_v60 = vmul.f32 %v2286_v62, %v1838_v34  ;;  %v6137_v2 = vld [vmem:[#allocation48_spill] sm:$0xff]  ;;  %v6138_v49 = vld [vmem:[#allocation25_spill] sm:$0xff] }
 0x338   : > { %v4132_v35 = vpop.eup %4131  ;;  %v2284_v41 = vadd.f32 1.0, %v4130_v36  ;;  %v1842_v6 = vmul.f32 0.5, %v6123_v40  ;;  %v2173_v45 = vmul.f32 0.7978846, %v2109_v17  ;;  %v2177_v55 = vmul.f32 0.7978846, %v2113_v30 }
 0x339   : > { %v2288_v43 = vadd.f32 1.0, %v4132_v35  ;;  %v4134_v56 = vpop.eup %4133  ;;  %3009 = vmatprep.mubr.bf16.mxu1 %v2433_v48  ;;  %v2430_v25 = vpack.c.bf16 %v2350_v60, %v2346_v27  ;;  %v1846_v44 = vmul.f32 0.5, %v6125_v22  ;;  %v2106_v13 = vadd.f32 %v6136_v47, %v6135_v18 }
 0x33a   : > { %v2110_v46 = vadd.f32 %v6138_v49, %v6137_v2  ;;  %v4136_v11 = vpop.eup %4135  ;;  %v2348_v53 = vmul.f32 %v2284_v41, %v5764_v4  ;;  %v2291_v5 = vadd.f32 1.0, %v4134_v56  ;;  %4153 = vtanh.f32 %v2173_v45  ;;  %v6139_v4 = vld [vmem:[#allocation46_spill] sm:$0xff] }
 0x33b   : > { %v2352_v34 = vmul.f32 %v2288_v43, %v1840_v42  ;;  %v4138_v40 = vpop.eup %4137  ;;  %2897 = vmatmul.mubr.bf16.gmra.mxu0 %v2430_v25  ;;  %v2295_v57 = vadd.f32 1.0, %v4136_v11  ;;  %4155 = vtanh.f32 %v2177_v55  ;;  %v2170_v62 = vmul.f32 0.7978846, %v2106_v13  ;;  %v6140_v42 = vld [vmem:[#allocation56_spill] sm:$0xff]  ;;  %v6142_v25 = vld [vmem:[#allocation7_spill] sm:$0xff] }
 0x33c   : > { %v2174_v36 = vmul.f32 0.7978846, %v2110_v46  ;;  %v2355_v30 = vmul.f32 %v2291_v5, %v1843_v26  ;;  %v2293_v35 = vadd.f32 1.0, %v4138_v40  ;;  %v1844_v48 = vmul.f32 0.5, %v6127_v23  ;;  %v6141_v55 = vld [vmem:[#allocation52_spill] sm:$0xff] }
 0x33d   : > { %v4140_v17 = vpop.eup %4139  ;;  %v2432_v22 = vpack.c.bf16 %v2352_v34, %v2348_v53  ;;  %v2359_v60 = vmul.f32 %v2295_v57, %v1847_v10  ;;  %4157 = vtanh.f32 %v2170_v62  ;;  %v2108_v41 = vadd.f32 %v6140_v42, %v6139_v4 }
 0x33e   : > { %v4142_v27 = vpop.eup %4141  ;;  %v2297_v47 = vadd.f32 1.0, %v4140_v17  ;;  %v2357_v45 = vmul.f32 %v2293_v35, %v1845_v31  ;;  %4159 = vtanh.f32 %v2174_v36  ;;  %v2112_v13 = vadd.f32 %v6142_v25, %v6141_v55 }
 0x33f   : > { %v4144_v43 = vpop.eup %4143  ;;  %3010 = vmatmul.mubr.bf16.gmra.mxu1 %v2432_v22  ;;  %v2290_v56 = vadd.f32 1.0, %v4142_v27  ;;  %v2435_v26 = vpack.c.bf16 %v2359_v60, %v2355_v30  ;;  %v2172_v23 = vmul.f32 0.7978846, %v2108_v41  ;;  %v1848_v34 = vmul.f32 0.5, %v6129_v28  ;;  %v6143_v41 = vld [vmem:[#allocation8_spill] sm:$0xff] }
 0x340   : > { %v4146_v49 = vpop.eup %4145  ;;  %v2361_v46 = vmul.f32 %v2297_v47, %v1849_v3  ;;  %v2294_v11 = vadd.f32 1.0, %v4144_v43  ;;  %v2176_v40 = vmul.f32 0.7978846, %v2112_v13  ;;  %v2063_v17 = vmul.f32 %v5722_v29, %v5680_v54  ;;  %v6144_v43 = vld [vmem:[#allocation9_spill] sm:$0xff] }
 0x341   : > { %v4148_v53 = vpop.eup %4147  ;;  %v2354_v10 = vmul.f32 %v2290_v56, %v1842_v6  ;;  %v2292_v5 = vadd.f32 1.0, %v4146_v49  ;;  %2906 = vmatprep.mubr.bf16.mxu0 %v2435_v26  ;;  %4161 = vtanh.f32 %v2172_v23  ;;  %v2115_v3 = vadd.f32 %v5620_v0, %v5546_v7  ;;  %v6145_v49 = vld [vmem:[#allocation11_spill] sm:$0xff] }
 0x342   : > { %v2437_v57 = vpack.c.bf16 %v2361_v46, %v2357_v45  ;;  %v2358_v62 = vmul.f32 %v2294_v11, %v1846_v44  ;;  %v2296_v31 = vadd.f32 1.0, %v4148_v53  ;;  %4163 = vtanh.f32 %v2176_v40 }
 0x343   : > { %v4150_v36 = vpop.eup %4149  ;;  %v2356_v22 = vmul.f32 %v2292_v5, %v1844_v48  ;;  %v2119_v27 = vadd.f32 %v5659_v12, %v5589_v59  ;;  %v1851_v44 = vmul.f32 0.5, %v6131_v63  ;;  %v1855_v60 = vmul.f32 0.5, %v5485_v52 }
 0x344   : > { %v4152_v30 = vpop.eup %4151  ;;  %3019 = vmatprep.mubr.bf16.mxu1 %v2437_v57  ;;  %v2434_v6 = vpack.c.bf16 %v2358_v62, %v2354_v10  ;;  %v2360_v28 = vmul.f32 %v2296_v31, %v1848_v34  ;;  %v2299_v35 = vadd.f32 1.0, %v4150_v36  ;;  %v2179_v42 = vmul.f32 0.7978846, %v2115_v3  ;;  %v6147_v10 = vld [vmem:[#allocation10_spill] sm:$0xff]  ;;  %v6148_v34 = vld [vmem:[#allocation20_spill] sm:$0xff] }
 0x345   : > { %v2303_v47 = vadd.f32 1.0, %v4152_v30  ;;  %v2001_v29 = vmul.f32 %v5739_v33, %v5702_v51  ;;  %v2183_v0 = vmul.f32 0.7978846, %v2119_v27  ;;  %v2117_v45 = vadd.f32 %v6144_v43, %v6143_v41  ;;  %v6146_v33 = vld [vmem:[#allocation12_spill] sm:$0xff] }
 0x346   : > { %2907 = vmatmul.mubr.bf16.gmra.mxu0 %v2434_v6  ;;  %v2436_v48 = vpack.c.bf16 %v2360_v28, %v2356_v22  ;;  %v2363_v56 = vmul.f32 %v2299_v35, %v1851_v44  ;;  %4165 = vtanh.f32 %v2179_v42  ;;  %v2121_v12 = vadd.f32 %v5662_v15, %v5601_v39  ;;  %v6149_v6 = vld [vmem:[#allocation21_spill] sm:$0xff]  ;;  %v6150_v28 = vld [vmem:[#allocation22_spill] sm:$0xff] }
 0x347   : > { %v2367_v25 = vmul.f32 %v2303_v47, %v1855_v60  ;;  %v4154_v63 = vpop.eup %4153  ;;  %v1853_v52 = vmul.f32 0.5, %v5440_v9  ;;  %4167 = vtanh.f32 %v2183_v0  ;;  %v2181_v13 = vmul.f32 0.7978846, %v2117_v45 }
 0x348   : > { %3020 = vmatmul.mubr.bf16.gmra.mxu1 %v2436_v48  ;;  %v2114_v26 = vadd.f32 %v6146_v33, %v6145_v49  ;;  %v4156_v46 = vpop.eup %4155  ;;  %v2301_v23 = vadd.f32 1.0, %v4154_v63  ;;  %v2185_v53 = vmul.f32 0.7978846, %v2121_v12  ;;  %v2118_v5 = vadd.f32 %v6148_v34, %v6147_v10 }
 0x349   : > { %v2439_v11 = vpack.c.bf16 %v2367_v25, %v2363_v56  ;;  %v1857_v40 = vmul.f32 0.5, %v5498_v16  ;;  %v2305_v57 = vadd.f32 1.0, %v4156_v46  ;;  %4169 = vtanh.f32 %v2181_v13 }
 0x34a   : > { %v2178_v15 = vmul.f32 0.7978846, %v2114_v26  ;;  %v4158_v62 = vpop.eup %4157  ;;  %v2365_v9 = vmul.f32 %v2301_v23, %v1853_v52  ;;  %v1850_v31 = vmul.f32 0.5, %v6135_v18  ;;  %4171 = vtanh.f32 %v2185_v53 }
 0x34b   : > { %2916 = vmatprep.mubr.bf16.mxu0 %v2439_v11  ;;  %v2182_v36 = vmul.f32 0.7978846, %v2118_v5  ;;  %v4160_v22 = vpop.eup %4159  ;;  %v2369_v3 = vmul.f32 %v2305_v57, %v1857_v40  ;;  %v2298_v30 = vadd.f32 1.0, %v4158_v62  ;;  %v2116_v35 = vadd.f32 %v6150_v28, %v6149_v6 }
 0x34c   : > { %4173 = vtanh.f32 %v2178_v15  ;;  %v1854_v27 = vmul.f32 0.5, %v6137_v2  ;;  %v2302_v16 = vadd.f32 1.0, %v4160_v22  ;;  %v2120_v44 = vadd.f32 %v5645_v50, %v5562_v58 }
 0x34d   : > { %4175 = vtanh.f32 %v2182_v36  ;;  %v2065_v60 = vmul.f32 %v2001_v29, %v5702_v51  ;;  %v2441_v47 = vpack.c.bf16 %v2369_v3, %v2365_v9  ;;  %v2362_v18 = vmul.f32 %v2298_v30, %v1850_v31 }
 0x34e   : > { %v2180_v42 = vmul.f32 0.7978846, %v2116_v35  ;;  %v4162_v48 = vpop.eup %4161  ;;  %v2366_v0 = vmul.f32 %v2302_v16, %v1854_v27  ;;  %v2184_v43 = vmul.f32 0.7978846, %v2120_v44  ;;  %v2123_v45 = vadd.f32 %v5714_v1, %v5656_v24 }
 0x34f   : > { %v2127_v56 = vadd.f32 %v2063_v17, %v5680_v54  ;;  %v4164_v25 = vpop.eup %4163  ;;  %3029 = vmatprep.mubr.bf16.mxu1 %v2441_v47  ;;  %v1852_v2 = vmul.f32 0.5, %v6139_v4  ;;  %v1856_v12 = vmul.f32 0.5, %v6141_v55  ;;  %v2300_v50 = vadd.f32 1.0, %v4162_v48 }
 0x350   : > { %4177 = vtanh.f32 %v2180_v42  ;;  %v2438_v29 = vpack.c.bf16 %v2366_v0, %v2362_v18  ;;  %v2304_v63 = vadd.f32 1.0, %v4164_v25  ;;  %v2187_v52 = vmul.f32 0.7978846, %v2123_v45 }
 0x351   : > { %4179 = vtanh.f32 %v2184_v43  ;;  %v1859_v13 = vmul.f32 0.5, %v5546_v7  ;;  %v2191_v33 = vmul.f32 0.7978846, %v2127_v56  ;;  %v2125_v1 = vadd.f32 %v5727_v19, %v5666_v38 }
 0x352   : > { %v2129_v17 = vadd.f32 %v2065_v60, %v5702_v51  ;;  %2917 = vmatmul.mubr.bf16.gmra.mxu0 %v2438_v29  ;;  %v2364_v26 = vmul.f32 %v2300_v50, %v1852_v2  ;;  %v2368_v46 = vmul.f32 %v2304_v63, %v1856_v12  ;;  %v1863_v4 = vmul.f32 0.5, %v5589_v59 }
 0x353   : > { %4181 = vtanh.f32 %v2187_v52  ;;  %v4166_v55 = vpop.eup %4165  ;;  %v2189_v11 = vmul.f32 0.7978846, %v2125_v1  ;;  %v2122_v53 = vadd.f32 %v5687_v37, %v5624_v20  ;;  %v1861_v19 = vmul.f32 0.5, %v6143_v41  ;;  %v6151_v41 = vld [vmem:[#allocation13_spill] sm:$0xff] }
 0x354   : > { %4183 = vtanh.f32 %v2191_v33  ;;  %v2193_v23 = vmul.f32 0.7978846, %v2129_v17  ;;  %v4168_v7 = vpop.eup %4167  ;;  %v2440_v34 = vpack.c.bf16 %v2368_v46, %v2364_v26  ;;  %v2307_v5 = vadd.f32 1.0, %v4166_v55 }
 0x355   : > { %v2126_v40 = vadd.f32 %v5732_v14, %v5669_v8  ;;  %v2311_v57 = vadd.f32 1.0, %v4168_v7  ;;  %v1865_v15 = vmul.f32 0.5, %v5601_v39  ;;  %4185 = vtanh.f32 %v2189_v11 }
 0x356   : > { %v2186_v59 = vmul.f32 0.7978846, %v2122_v53  ;;  %v4170_v62 = vpop.eup %4169  ;;  %3030 = vmatmul.mubr.bf16.gmra.mxu1 %v2440_v34  ;;  %v2371_v9 = vmul.f32 %v2307_v5, %v1859_v13  ;;  %4187 = vtanh.f32 %v2193_v23  ;;  %v2124_v37 = vadd.f32 %v5692_v61, %v5633_v21 }
 0x357   : > { %v2190_v31 = vmul.f32 0.7978846, %v2126_v40  ;;  %v4172_v36 = vpop.eup %4171  ;;  %v2375_v22 = vmul.f32 %v2311_v57, %v1863_v4  ;;  %v2309_v3 = vadd.f32 1.0, %v4170_v62  ;;  %v2128_v14 = vadd.f32 %v6151_v41, %v5675_v32 }
 0x358   : > { %4189 = vtanh.f32 %v2186_v59  ;;  %v2313_v28 = vadd.f32 1.0, %v4172_v36  ;;  %v1858_v39 = vmul.f32 0.5, %v6145_v49  ;;  %v2188_v35 = vmul.f32 0.7978846, %v2124_v37 }
 0x359   : > { %v4174_v30 = vpop.eup %4173  ;;  %4191 = vtanh.f32 %v2190_v31  ;;  %v2443_v16 = vpack.c.bf16 %v2375_v22, %v2371_v9  ;;  %v1862_v44 = vmul.f32 0.5, %v6147_v10  ;;  %v2192_v47 = vmul.f32 0.7978846, %v2128_v14 }
 0x35a   : > { %v4176_v27 = vpop.eup %4175  ;;  %v2306_v60 = vadd.f32 1.0, %v4174_v30  ;;  %v2373_v61 = vmul.f32 %v2309_v3, %v1861_v19  ;;  %v2377_v18 = vmul.f32 %v2313_v28, %v1865_v15  ;;  %4193 = vtanh.f32 %v2188_v35  ;;  %v2386_v28 = vld [vmem:[#allocation3 + $0xa8] sm:$0xff] }
 0x35b   : > { %v2310_v42 = vadd.f32 1.0, %v4176_v27  ;;  %2926 = vmatprep.mubr.bf16.mxu0 %v2443_v16  ;;  %4195 = vtanh.f32 %v2192_v47  ;;  %v1860_v2 = vmul.f32 0.5, %v6149_v6  ;;  %v1864_v10 = vmul.f32 0.5, %v5562_v58  ;;  %v2387_v16 = vld [vmem:[#allocation3 + $0x68] sm:$0xff]  ;;  %v2388_v47 = vld [vmem:[#allocation3 + $0x10] sm:$0xff] }
 0x35c   : > { %v2445_v0 = vpack.c.bf16 %v2377_v18, %v2373_v61  ;;  %v2370_v43 = vmul.f32 %v2306_v60, %v1858_v39  ;;  %v1867_v33 = vmul.f32 0.5, %v5656_v24  ;;  %v1871_v1 = vmul.f32 0.5, %v5680_v54 }
 0x35d   : > { %v4178_v48 = vpop.eup %4177  ;;  %v2374_v45 = vmul.f32 %v2310_v42, %v1862_v44  ;;  %v1869_v58 = vmul.f32 0.5, %v5666_v38  ;;  %v1873_v53 = vmul.f32 0.5, %v5702_v51  ;;  %v1866_v24 = vmul.f32 0.5, %v5624_v20 }
 0x35e   : > { %v4180_v56 = vpop.eup %4179  ;;  %v2308_v49 = vadd.f32 1.0, %v4178_v48  ;;  %3039 = vmatprep.mubr.bf16.mxu1 %v2445_v0  ;;  %v1870_v57 = vmul.f32 0.5, %v5669_v8  ;;  %v1868_v51 = vmul.f32 0.5, %v5633_v21  ;;  %v1872_v36 = vmul.f32 0.5, %v5675_v32  ;;  %v2389_v48 = vld [vmem:[#allocation3 + $0xc0] sm:$0xff] }
 0x35f   : > { %v2442_v25 = vpack.c.bf16 %v2374_v45, %v2370_v43  ;;  %v2312_v12 = vadd.f32 1.0, %v4180_v56 }
 0x360   : > { %v4182_v50 = vpop.eup %4181  ;;  %v2372_v63 = vmul.f32 %v2308_v49, %v1860_v2 }
 0x361   : > { %v4184_v29 = vpop.eup %4183  ;;  %2927 = vmatmul.mubr.bf16.gmra.mxu0 %v2442_v25  ;;  %v2376_v52 = vmul.f32 %v2312_v12, %v1864_v10  ;;  %v2315_v13 = vadd.f32 1.0, %v4182_v50  ;;  %v2390_v25 = vld [vmem:[#allocation3 + $0xc8] sm:$0xff]  ;;  %v2391_v50 = vld [vmem:[#allocation3 + $0xb0] sm:$0xff] }
 0x362   : > { %v2319_v17 = vadd.f32 1.0, %v4184_v29  ;;  %v4186_v26 = vpop.eup %4185 }
 0x363   : > { %v2444_v46 = vpack.c.bf16 %v2376_v52, %v2372_v63  ;;  %v4188_v4 = vpop.eup %4187  ;;  %v2379_v55 = vmul.f32 %v2315_v13, %v1867_v33  ;;  %v2317_v6 = vadd.f32 1.0, %v4186_v26  ;;  %v2392_v33 = vld [vmem:[#allocation3 + $0x70] sm:$0xff] }
 0x364   : > { %v2383_v11 = vmul.f32 %v2319_v17, %v1871_v1  ;;  %v2321_v7 = vadd.f32 1.0, %v4188_v4  ;;  %v2393_v4 = vld [vmem:[#allocation3 + $0x38] sm:$0xff] }
 0x365   : > { %v4190_v23 = vpop.eup %4189  ;;  %3040 = vmatmul.mubr.bf16.gmra.mxu1 %v2444_v46  ;;  %v2381_v54 = vmul.f32 %v2317_v6, %v1869_v58 }
 0x366   : > { %v4192_v34 = vpop.eup %4191  ;;  %v2447_v5 = vpack.c.bf16 %v2383_v11, %v2379_v55  ;;  %v2314_v19 = vadd.f32 1.0, %v4190_v23  ;;  %v2385_v40 = vmul.f32 %v2321_v7, %v1873_v53  ;;  %v2394_v7 = vld [vmem:[#allocation3 + $0x48] sm:$0xff] }
 0x367   : > { %v2318_v15 = vadd.f32 1.0, %v4192_v34  ;;  %v4194_v59 = vpop.eup %4193 }
 0x368   : > { %2936 = vmatprep.mubr.bf16.mxu0 %v2447_v5  ;;  %v4196_v62 = vpop.eup %4195  ;;  %v2449_v9 = vpack.c.bf16 %v2385_v40, %v2381_v54  ;;  %v2378_v31 = vmul.f32 %v2314_v19, %v1866_v24  ;;  %v2316_v38 = vadd.f32 1.0, %v4194_v59  ;;  %v2395_v19 = vld [vmem:[#allocation3 + $0xf8] sm:$0xff] }
 0x369   : > { %v2382_v37 = vmul.f32 %v2318_v15, %v1870_v57  ;;  %v2320_v22 = vadd.f32 1.0, %v4196_v62  ;;  %v2396_v15 = vld [vmem:[#allocation3 + $0x78] sm:$0xff] }
 0x36a   : > { %3049 = vmatprep.mubr.bf16.mxu1 %v2449_v9  ;;  %v2380_v3 = vmul.f32 %v2316_v38, %v1868_v51 }
 0x36b   : > { %v2446_v20 = vpack.c.bf16 %v2382_v37, %v2378_v31  ;;  %v2384_v41 = vmul.f32 %v2320_v22, %v1872_v36  ;;  %v2397_v37 = vld [vmem:[#allocation3 + $0x88] sm:$0xff] }
 0x36d   : > { %2937 = vmatmul.mubr.bf16.gmra.mxu0 %v2446_v20  ;;  %v2448_v14 = vpack.c.bf16 %v2384_v41, %v2380_v3  ;;  %v2398_v41 = vld [vmem:[#allocation3 + $0xf0] sm:$0xff] }
 0x36f   : > { %3050 = vmatmul.mubr.bf16.gmra.mxu1 %v2448_v14 }
 0x3be   : > { %v2868_v8 = vpop.f32.mrf.mxu0 }
 0x3c0   : > { %v2870_v30 = vpop.f32.mrf.mxu0 }
 0x3c2   : > { %v2872_v27 = vpop.f32.mrf.mxu0 }
 0x3c3   : > { %v2981_v39 = vpop.f32.mrf.mxu1 }
 0x3c4   : > { %v2982_v35 = vadd.f32 %v2981_v39, %v2868_v8  ;;  %v2874_v61 = vpop.f32.mrf.mxu0 }
 0x3c5   : > { %v2983_v44 = vpop.f32.mrf.mxu1 }
 0x3c6   : > { %v3060_v60 = vadd.f32 %v2982_v35, %v2386_v28  ;;  %v2984_v21 = vadd.f32 %v2983_v44, %v2870_v30  ;;  %v2399_v28 = vld [vmem:[#allocation3 + $0x18] sm:$0xff]  ;;  %v2400_v44 = vld [vmem:[#allocation3 + $0x30] sm:$0xff] }
 0x3c7   : > { %v2985_v32 = vpop.f32.mrf.mxu1 }
 0x3c8   : > { %3092 = vst [vmem:[#allocation3 + $0xa8] sm:$0xff] %v3060_v60  ;;  %v3061_v18 = vadd.f32 %v2984_v21, %v2387_v16  ;;  %v2986_v42 = vadd.f32 %v2985_v32, %v2872_v27  ;;  %v2401_v32 = vld [vmem:[#allocation3 + $0x50] sm:$0xff] }
 0x3c9   : > { %v2987_v0 = vpop.f32.mrf.mxu1 }
 0x3ca   : > { %3093 = vst [vmem:[#allocation3 + $0x68] sm:$0xff] %v3061_v18  ;;  %v3062_v43 = vadd.f32 %v2986_v42, %v2388_v47  ;;  %v2988_v45 = vadd.f32 %v2987_v0, %v2874_v61 }
 0x3cc   : > { %3094 = vst [vmem:[#allocation3 + $0x10] sm:$0xff] %v3062_v43  ;;  %v3063_v56 = vadd.f32 %v2988_v45, %v2389_v48  ;;  %v2402_v43 = vld [vmem:[#allocation3 + $0xb8] sm:$0xff] }
 0x3ce   : > { %3095 = vst [vmem:[#allocation3 + $0xc0] sm:$0xff] %v3063_v56 }
 0x3d5   : > { %v2878_v49 = vpop.f32.mrf.mxu0 }
 0x3d7   : > { %v2880_v10 = vpop.f32.mrf.mxu0 }
 0x3d8   : > { %v2991_v2 = vpop.f32.mrf.mxu1 }
 0x3d9   : > { %v2992_v12 = vadd.f32 %v2991_v2, %v2878_v49  ;;  %v2882_v63 = vpop.f32.mrf.mxu0 }
 0x3da   : > { %v2993_v29 = vpop.f32.mrf.mxu1 }
 0x3db   : > { %v3064_v52 = vadd.f32 %v2992_v12, %v2390_v25  ;;  %v2994_v13 = vadd.f32 %v2993_v29, %v2880_v10  ;;  %v2884_v17 = vpop.f32.mrf.mxu0  ;;  %v2403_v25 = vld [vmem:[#allocation3 + $0xd0] sm:$0xff]  ;;  %v2404_v29 = vld [vmem:[#allocation3 + $0xd8] sm:$0xff] }
 0x3dc   : > { %v2995_v1 = vpop.f32.mrf.mxu1 }
 0x3dd   : > { %3096 = vst [vmem:[#allocation3 + $0xc8] sm:$0xff] %v3064_v52  ;;  %v3065_v26 = vadd.f32 %v2994_v13, %v2391_v50  ;;  %v2996_v46 = vadd.f32 %v2995_v1, %v2882_v63  ;;  %v2405_v1 = vld [vmem:[#allocation3 + $0x58] sm:$0xff] }
 0x3de   : > { %v2997_v55 = vpop.f32.mrf.mxu1 }
 0x3df   : > { %3097 = vst [vmem:[#allocation3 + $0xb0] sm:$0xff] %v3065_v26  ;;  %v3066_v11 = vadd.f32 %v2996_v46, %v2392_v33  ;;  %v2998_v6 = vadd.f32 %v2997_v55, %v2884_v17 }
 0x3e1   : > { %3098 = vst [vmem:[#allocation3 + $0x70] sm:$0xff] %v3066_v11  ;;  %v3067_v23 = vadd.f32 %v2998_v6, %v2393_v4  ;;  %v2406_v6 = vld [vmem:[#allocation3 + $0x80] sm:$0xff] }
 0x3e3   : > { %3099 = vst [vmem:[#allocation3 + $0x38] sm:$0xff] %v3067_v23 }
 0x3e9   : > { %v2888_v58 = vpop.f32.mrf.mxu0 }
 0x3eb   : > { %v2890_v53 = vpop.f32.mrf.mxu0 }
 0x3ed   : > { %v3001_v34 = vpop.f32.mrf.mxu1  ;;  %v2892_v5 = vpop.f32.mrf.mxu0 }
 0x3ee   : > { %v3002_v24 = vadd.f32 %v3001_v34, %v2888_v58 }
 0x3ef   : > { %v3003_v54 = vpop.f32.mrf.mxu1  ;;  %v2894_v62 = vpop.f32.mrf.mxu0 }
 0x3f0   : > { %v3068_v40 = vadd.f32 %v3002_v24, %v2394_v7  ;;  %v3004_v57 = vadd.f32 %v3003_v54, %v2890_v53  ;;  %v2407_v7 = vld [vmem:[#allocation3 + $0x40] sm:$0xff] }
 0x3f1   : > { %v3005_v59 = vpop.f32.mrf.mxu1 }
 0x3f2   : > { %3100 = vst [vmem:[#allocation3 + $0x48] sm:$0xff] %v3068_v40  ;;  %v3069_v9 = vadd.f32 %v3004_v57, %v2395_v19  ;;  %v3006_v31 = vadd.f32 %v3005_v59, %v2892_v5  ;;  %v2408_v19 = vld [vmem:[#allocation3 + $0x28] sm:$0xff]  ;;  %v2409_v59 = vld [vmem:[#allocation3] sm:$0xff] }
 0x3f3   : > { %v3007_v38 = vpop.f32.mrf.mxu1 }
 0x3f4   : > { %3101 = vst [vmem:[#allocation3 + $0xf8] sm:$0xff] %v3069_v9  ;;  %v3070_v51 = vadd.f32 %v3006_v31, %v2396_v15  ;;  %v3008_v36 = vadd.f32 %v3007_v38, %v2894_v62 }
 0x3f6   : > { %3102 = vst [vmem:[#allocation3 + $0x78] sm:$0xff] %v3070_v51  ;;  %v3071_v22 = vadd.f32 %v3008_v36, %v2397_v37  ;;  %v2410_v36 = vld [vmem:[#allocation3 + $0x90] sm:$0xff] }
 0x3f8   : > { %3103 = vst [vmem:[#allocation3 + $0x88] sm:$0xff] %v3071_v22 }
 0x3fb   : > { %v2898_v20 = vpop.f32.mrf.mxu0 }
 0x3fd   : > { %v2900_v3 = vpop.f32.mrf.mxu0 }
 0x3ff   : > { %v3011_v14 = vpop.f32.mrf.mxu1  ;;  %v2902_v30 = vpop.f32.mrf.mxu0 }
 0x400   : > { %v3012_v8 = vadd.f32 %v3011_v14, %v2898_v20 }
 0x401   : > { %v3013_v39 = vpop.f32.mrf.mxu1  ;;  %v2904_v16 = vpop.f32.mrf.mxu0 }
 0x402   : > { %v3072_v35 = vadd.f32 %v3012_v8, %v2398_v41  ;;  %v3014_v27 = vadd.f32 %v3013_v39, %v2900_v3  ;;  %v2411_v41 = vld [vmem:[#allocation3 + $0xe8] sm:$0xff] }
 0x403   : > { %v3015_v60 = vpop.f32.mrf.mxu1 }
 0x404   : > { %3104 = vst [vmem:[#allocation3 + $0xf0] sm:$0xff] %v3072_v35  ;;  %v3073_v21 = vadd.f32 %v3014_v27, %v2399_v28  ;;  %v3016_v47 = vadd.f32 %v3015_v60, %v2902_v30  ;;  %v2412_v28 = vld [vmem:[#allocation3 + $0xa0] sm:$0xff] }
 0x405   : > { %v3017_v61 = vpop.f32.mrf.mxu1 }
 0x406   : > { %3105 = vst [vmem:[#allocation3 + $0x18] sm:$0xff] %v3073_v21  ;;  %v3074_v18 = vadd.f32 %v3016_v47, %v2400_v44  ;;  %v3018_v42 = vadd.f32 %v3017_v61, %v2904_v16  ;;  %v2908_v48 = vpop.f32.mrf.mxu0  ;;  %v2413_v44 = vld [vmem:[#allocation3 + $0x20] sm:$0xff] }
 0x408   : > { %3106 = vst [vmem:[#allocation3 + $0x30] sm:$0xff] %v3074_v18  ;;  %v3075_v0 = vadd.f32 %v3018_v42, %v2401_v32  ;;  %v3021_v45 = vpop.f32.mrf.mxu1  ;;  %v2910_v56 = vpop.f32.mrf.mxu0  ;;  %v2414_v42 = vld [vmem:[#allocation3 + $0x8] sm:$0xff] }
 0x409   : > { %v3022_v49 = vadd.f32 %v3021_v45, %v2908_v48  ;;  %v2415_v45 = vld [vmem:[#allocation3 + $0xe0] sm:$0xff] }
 0x40a   : > { %3107 = vst [vmem:[#allocation3 + $0x50] sm:$0xff] %v3075_v0  ;;  %v3023_v2 = vpop.f32.mrf.mxu1  ;;  %v2912_v10 = vpop.f32.mrf.mxu0 }
 0x40b   : > { %v3076_v12 = vadd.f32 %v3022_v49, %v2402_v43  ;;  %v3024_v50 = vadd.f32 %v3023_v2, %v2910_v56  ;;  %v2416_v2 = vld [vmem:[#allocation3 + $0x60] sm:$0xff] }
 0x40c   : > { %v3025_v63 = vpop.f32.mrf.mxu1  ;;  %v2914_v52 = vpop.f32.mrf.mxu0 }
 0x40d   : > { %3108 = vst [vmem:[#allocation3 + $0xb8] sm:$0xff] %v3076_v12  ;;  %v3077_v13 = vadd.f32 %v3024_v50, %v2403_v25  ;;  %v3026_v33 = vadd.f32 %v3025_v63, %v2912_v10  ;;  %v2417_v63 = vld [vmem:[#allocation3 + $0x98] sm:$0xff] }
 0x40e   : > { %v3027_v17 = vpop.f32.mrf.mxu1 }
 0x40f   : > { %3109 = vst [vmem:[#allocation3 + $0xd0] sm:$0xff] %v3077_v13  ;;  %v3078_v26 = vadd.f32 %v3026_v33, %v2404_v29  ;;  %v3028_v46 = vadd.f32 %v3027_v17, %v2914_v52 }
 0x411   : > { %3110 = vst [vmem:[#allocation3 + $0xd8] sm:$0xff] %v3078_v26  ;;  %v3079_v4 = vadd.f32 %v3028_v46, %v2405_v1 }
 0x412   : > { %v2918_v55 = vpop.f32.mrf.mxu0 }
 0x413   : > { %3111 = vst [vmem:[#allocation3 + $0x58] sm:$0xff] %v3079_v4 }
 0x414   : > { %v2920_v11 = vpop.f32.mrf.mxu0 }
 0x416   : > { %v3031_v23 = vpop.f32.mrf.mxu1  ;;  %v2922_v58 = vpop.f32.mrf.mxu0 }
 0x417   : > { %v3032_v53 = vadd.f32 %v3031_v23, %v2918_v55 }
 0x418   : > { %v3033_v34 = vpop.f32.mrf.mxu1  ;;  %v2924_v40 = vpop.f32.mrf.mxu0 }
 0x419   : > { %v3080_v5 = vadd.f32 %v3032_v53, %v2406_v6  ;;  %v3034_v24 = vadd.f32 %v3033_v34, %v2920_v11 }
 0x41a   : > { %v3035_v54 = vpop.f32.mrf.mxu1 }
 0x41b   : > { %3112 = vst [vmem:[#allocation3 + $0x80] sm:$0xff] %v3080_v5  ;;  %v3081_v57 = vadd.f32 %v3034_v24, %v2407_v7  ;;  %v3036_v15 = vadd.f32 %v3035_v54, %v2922_v58 }
 0x41c   : > { %v3037_v62 = vpop.f32.mrf.mxu1 }
 0x41d   : > { %3113 = vst [vmem:[#allocation3 + $0x40] sm:$0xff] %v3081_v57  ;;  %v3082_v9 = vadd.f32 %v3036_v15, %v2408_v19  ;;  %v3038_v31 = vadd.f32 %v3037_v62, %v2924_v40 }
 0x41f   : > { %3114 = vst [vmem:[#allocation3 + $0x28] sm:$0xff] %v3082_v9  ;;  %v3083_v37 = vadd.f32 %v3038_v31, %v2409_v59 }
 0x421   : > { %v2928_v38 = vpop.f32.mrf.mxu0  ;;  %3115 = vst [vmem:[#allocation3] sm:$0xff] %v3083_v37 }
 0x423   : > { %v2930_v51 = vpop.f32.mrf.mxu0 }
 0x425   : > { %v3041_v22 = vpop.f32.mrf.mxu1  ;;  %v2932_v20 = vpop.f32.mrf.mxu0 }
 0x426   : > { %v3042_v3 = vadd.f32 %v3041_v22, %v2928_v38 }
 0x427   : > { %v3043_v14 = vpop.f32.mrf.mxu1  ;;  %v2934_v35 = vpop.f32.mrf.mxu0 }
 0x428   : > { %v3084_v8 = vadd.f32 %v3042_v3, %v2410_v36  ;;  %v3044_v30 = vadd.f32 %v3043_v14, %v2930_v51 }
 0x429   : > { %v3045_v39 = vpop.f32.mrf.mxu1 }
 0x42a   : > { %3116 = vst [vmem:[#allocation3 + $0x90] sm:$0xff] %v3084_v8  ;;  %v3085_v27 = vadd.f32 %v3044_v30, %v2411_v41  ;;  %v3046_v16 = vadd.f32 %v3045_v39, %v2932_v20 }
 0x42b   : > { %v3047_v60 = vpop.f32.mrf.mxu1 }
 0x42c   : > { %3117 = vst [vmem:[#allocation3 + $0xe8] sm:$0xff] %v3085_v27  ;;  %v3086_v21 = vadd.f32 %v3046_v16, %v2412_v28  ;;  %v3048_v47 = vadd.f32 %v3047_v60, %v2934_v35 }
 0x42d   : > { %v2938_v32 = vpop.f32.mrf.mxu0 }
 0x42e   : > { %3118 = vst [vmem:[#allocation3 + $0xa0] sm:$0xff] %v3086_v21  ;;  %v3087_v61 = vadd.f32 %v3048_v47, %v2413_v44 }
 0x42f   : > { %v2940_v18 = vpop.f32.mrf.mxu0  ;;  %v3051_v48 = vpop.f32.mrf.mxu1 }
 0x430   : > { %3119 = vst [vmem:[#allocation3 + $0x20] sm:$0xff] %v3087_v61  ;;  %v3052_v0 = vadd.f32 %v3051_v48, %v2938_v32 }
 0x431   : > { %v2942_v43 = vpop.f32.mrf.mxu0  ;;  %v3053_v56 = vpop.f32.mrf.mxu1 }
 0x432   : > { %v3088_v49 = vadd.f32 %v3052_v0, %v2414_v42  ;;  %v3054_v25 = vadd.f32 %v3053_v56, %v2940_v18 }
 0x433   : > { %v3055_v10 = vpop.f32.mrf.mxu1  ;;  %v2944_v12 = vpop.f32.mrf.mxu0 }
 0x434   : > { %3120 = vst [vmem:[#allocation3 + $0x8] sm:$0xff] %v3088_v49  ;;  %v3089_v50 = vadd.f32 %v3054_v25, %v2415_v45  ;;  %v3056_v29 = vadd.f32 %v3055_v10, %v2942_v43 }
 0x435   : > { %v3057_v52 = vpop.f32.mrf.mxu1 }
 0x436   : > { %3121 = vst [vmem:[#allocation3 + $0xe0] sm:$0xff] %v3089_v50  ;;  %v3090_v13 = vadd.f32 %v3056_v29, %v2416_v2  ;;  %v3058_v33 = vadd.f32 %v3057_v52, %v2944_v12  ;;  %3127 = sbr.rel (%p3718_p0) target bundleno = 1119 (0x45f), region = 79 }
 0x438   : > { %3122 = vst [vmem:[#allocation3 + $0x60] sm:$0xff] %v3090_v13  ;;  %v3091_v1 = vadd.f32 %v3058_v33, %v2417_v63 }
 0x43a   : > { %3123 = vst [vmem:[#allocation3 + $0x98] sm:$0xff] %v3091_v1 }
 0x43b   : > { %v3128_v17 = vld [vmem:[%s4495_s14] sm:$0xff]  ;;  %v3176_v26 = vld [vmem:[#allocation3 + $0xa8] sm:$0xff]  ;;  %v3178_v23 = vld [vmem:[#allocation3 + $0x10] sm:$0xff] }
 0x43c   : > { %v3177_v46 = vld [vmem:[#allocation3 + $0x68] sm:$0xff]  ;;  %v3144_v4 = vunpack.c.l.bf16 %v3128_v17  ;;  %v3145_v55 = vunpack.c.h.bf16 %v3128_v17  ;;  %v3240_v11 = vld [vmem:[%s5959_s6] sm:$0x3]  ;;  %v3130_v40 = vld [vmem:[%s4495_s14 + $0x10] sm:$0xff] }
 0x43d   : > { %v3129_v6 = vld [vmem:[%s4495_s14 + $0x8] sm:$0xff]  ;;  %v6152_v58 = vld [vmem:[#allocation6_spill] sm:$0xff]  ;;  %v3148_v62 = vunpack.c.l.bf16 %v3130_v40  ;;  %v3149_v9 = vunpack.c.h.bf16 %v3130_v40  ;;  %v3181_v31 = vld [vmem:[#allocation3 + $0xb0] sm:$0xff] }
 0x43e   : > { %v6153_v53 = vsub.s32 0, %v6152_v58  ;;  %v6154_v34 = vsub.s32 1, %v6152_v58  ;;  %v3146_v24 = vunpack.c.l.bf16 %v3129_v6  ;;  %v3147_v19 = vunpack.c.h.bf16 %v3129_v6  ;;  %v3179_v54 = vld [vmem:[#allocation3 + $0xc0] sm:$0xff]  ;;  %v3180_v57 = vld [vmem:[#allocation3 + $0xc8] sm:$0xff]  ;;  %v3131_v37 = vld [vmem:[%s4495_s14 + $0x18] sm:$0xff] }
 0x43f   : > { %v3208_v15 = vadd.f32 %v3176_v26, %v3144_v4  ;;  %v3209_v59 = vadd.f32 %v3177_v46, %v3145_v55  ;;  %v3182_v38 = vld [vmem:[#allocation3 + $0x70] sm:$0xff]  ;;  %v3150_v22 = vunpack.c.l.bf16 %v3131_v37  ;;  %v3151_v20 = vunpack.c.h.bf16 %v3131_v37  ;;  %v3183_v3 = vld [vmem:[#allocation3 + $0x38] sm:$0xff]  ;;  %v3132_v41 = vld [vmem:[%s4495_s14 + $0x20] sm:$0xff] }
 0x440   : > { %v5864_v7 = vrot.slane %v3240_v11, %v6153_v53  ;;  %v5868_v5 = vrot.slane %v3240_v11, %v6154_v34  ;;  %v3210_v51 = vadd.f32 %v3178_v23, %v3146_v24  ;;  %v3211_v36 = vadd.f32 %v3179_v54, %v3147_v19  ;;  %v3184_v44 = vld [vmem:[#allocation3 + $0x48] sm:$0xff]  ;;  %v3185_v18 = vld [vmem:[#allocation3 + $0xf8] sm:$0xff]  ;;  %v3134_v42 = vld [vmem:[%s4495_s14 + $0x30] sm:$0xff] }
 0x441   : > { %v3212_v30 = vadd.f32 %v3180_v57, %v3148_v62  ;;  %v3213_v28 = vadd.f32 %v3181_v31, %v3149_v9  ;;  %v3214_v27 = vadd.f32 %v3182_v38, %v3150_v22  ;;  %v3215_v16 = vadd.f32 %v3183_v3, %v3151_v20  ;;  %v3133_v60 = vld [vmem:[%s4495_s14 + $0x28] sm:$0xff]  ;;  %v3186_v56 = vld [vmem:[#allocation3 + $0x78] sm:$0xff]  ;;  %v3188_v29 = vld [vmem:[#allocation3 + $0xf0] sm:$0xff] }
 0x442   : > { %v3252_v14 = vadd.f32 %v5864_v7, %v3208_v15  ;;  %v3253_v8 = vadd.f32 %v5868_v5, %v3209_v59  ;;  %v3254_v39 = vadd.f32 %v5864_v7, %v3210_v51  ;;  %v3255_v35 = vadd.f32 %v5868_v5, %v3211_v36  ;;  %v3187_v49 = vld [vmem:[#allocation3 + $0x88] sm:$0xff]  ;;  %v3135_v25 = vld [vmem:[%s4495_s14 + $0x38] sm:$0xff]  ;;  %v3190_v17 = vld [vmem:[#allocation3 + $0x30] sm:$0xff] }
 0x443   : > { %v3256_v47 = vadd.f32 %v5864_v7, %v3212_v30  ;;  %v3257_v32 = vadd.f32 %v5868_v5, %v3213_v28  ;;  %v3152_v61 = vunpack.c.l.bf16 %v3132_v41  ;;  %v3258_v0 = vadd.f32 %v5864_v7, %v3214_v27  ;;  %v3189_v63 = vld [vmem:[#allocation3 + $0x18] sm:$0xff]  ;;  %v3136_v26 = vld [vmem:[%s4495_s14 + $0x40] sm:$0xff]  ;;  %v3191_v6 = vld [vmem:[#allocation3 + $0x50] sm:$0xff] }
 0x444   : > { %v3757_v21 = vpack.c.bf16 %v3253_v8, %v3252_v14  ;;  %v3758_v48 = vpack.c.bf16 %v3255_v35, %v3254_v39  ;;  %v3259_v43 = vadd.f32 %v5868_v5, %v3215_v16  ;;  %v3153_v45 = vunpack.c.h.bf16 %v3132_v41  ;;  %v3192_v24 = vld [vmem:[#allocation3 + $0xb8] sm:$0xff]  ;;  %v3137_v15 = vld [vmem:[%s4495_s14 + $0x48] sm:$0xff]  ;;  %v3193_v37 = vld [vmem:[#allocation3 + $0xd0] sm:$0xff] }
 0x445   : > { %v3759_v2 = vpack.c.bf16 %v3257_v32, %v3256_v47  ;;  %v3216_v10 = vadd.f32 %v3184_v44, %v3152_v61  ;;  %v3154_v12 = vunpack.c.l.bf16 %v3133_v60  ;;  %v3155_v50 = vunpack.c.h.bf16 %v3133_v60  ;;  %v3138_v38 = vld [vmem:[%s4495_s14 + $0x50] sm:$0xff]  ;;  %v3194_v3 = vld [vmem:[#allocation3 + $0xd8] sm:$0xff]  ;;  %v3196_v35 = vld [vmem:[#allocation3 + $0x80] sm:$0xff] }
 0x446   : > { %3380 = vst [vmem:[%s4504_s19] sm:$0xff] %v3757_v21  ;;  %3381 = vst [vmem:[%s4504_s19 + $0x8] sm:$0xff] %v3758_v48  ;;  %v3760_v52 = vpack.c.bf16 %v3259_v43, %v3258_v0  ;;  %v3217_v13 = vadd.f32 %v3185_v18, %v3153_v45  ;;  %v3156_v33 = vunpack.c.l.bf16 %v3134_v42  ;;  %v3157_v1 = vunpack.c.h.bf16 %v3134_v42  ;;  %v3195_v41 = vld [vmem:[#allocation3 + $0x58] sm:$0xff]  ;;  %v3197_v27 = vld [vmem:[#allocation3 + $0x40] sm:$0xff] }
 0x447   : > { %3382 = vst [vmem:[%s4504_s19 + $0x10] sm:$0xff] %v3759_v2  ;;  %v3260_v46 = vadd.f32 %v5864_v7, %v3216_v10  ;;  %v3218_v4 = vadd.f32 %v3186_v56, %v3154_v12  ;;  %v3219_v55 = vadd.f32 %v3187_v49, %v3155_v50  ;;  %v3158_v11 = vunpack.c.l.bf16 %v3135_v25  ;;  %v3139_v14 = vld [vmem:[%s4495_s14 + $0x58] sm:$0xff]  ;;  %v3198_v47 = vld [vmem:[#allocation3 + $0x28] sm:$0xff]  ;;  %v3140_v32 = vld [vmem:[%s4495_s14 + $0x60] sm:$0xff] }
 0x448   : > { %3383 = vst [vmem:[%s4504_s19 + $0x18] sm:$0xff] %v3760_v52  ;;  %v3261_v23 = vadd.f32 %v5868_v5, %v3217_v13  ;;  %v3220_v58 = vadd.f32 %v3188_v29, %v3156_v33  ;;  %v3221_v53 = vadd.f32 %v3189_v63, %v3157_v1  ;;  %v3159_v34 = vunpack.c.h.bf16 %v3135_v25  ;;  %v3199_v0 = vld [vmem:[#allocation3] sm:$0xff]  ;;  %v3200_v25 = vld [vmem:[#allocation3 + $0x90] sm:$0xff]  ;;  %v3141_v29 = vld [vmem:[%s4495_s14 + $0x68] sm:$0xff] }
 0x449   : > { %v3262_v19 = vadd.f32 %v5864_v7, %v3218_v4  ;;  %v3263_v54 = vadd.f32 %v5868_v5, %v3219_v55  ;;  %v3222_v40 = vadd.f32 %v3190_v17, %v3158_v11  ;;  %v3160_v57 = vunpack.c.l.bf16 %v3136_v26  ;;  %v3201_v1 = vld [vmem:[#allocation3 + $0xe8] sm:$0xff]  ;;  %v3142_v17 = vld [vmem:[%s4495_s14 + $0x70] sm:$0xff]  ;;  %v3202_v11 = vld [vmem:[#allocation3 + $0xa0] sm:$0xff] }
 0x44a   : > { %v3761_v59 = vpack.c.bf16 %v3261_v23, %v3260_v46  ;;  %v3264_v62 = vadd.f32 %v5864_v7, %v3220_v58  ;;  %v3265_v9 = vadd.f32 %v5868_v5, %v3221_v53  ;;  %v3223_v31 = vadd.f32 %v3191_v6, %v3159_v34  ;;  %v3203_v6 = vld [vmem:[#allocation3 + $0x20] sm:$0xff]  ;;  %v3143_v23 = vld [vmem:[%s4495_s14 + $0x78] sm:$0xff] }
 0x44b   : > { %v3762_v51 = vpack.c.bf16 %v3263_v54, %v3262_v19  ;;  %v3266_v36 = vadd.f32 %v5864_v7, %v3222_v40  ;;  %v3161_v22 = vunpack.c.h.bf16 %v3136_v26  ;;  %v3224_v20 = vadd.f32 %v3192_v24, %v3160_v57  ;;  %v3204_v19 = vld [vmem:[#allocation3 + $0x8] sm:$0xff]  ;;  %v3205_v54 = vld [vmem:[#allocation3 + $0xe0] sm:$0xff] }
 0x44c   : > { %3384 = vst [vmem:[%s4504_s19 + $0x20] sm:$0xff] %v3761_v59  ;;  %v3763_v8 = vpack.c.bf16 %v3265_v9, %v3264_v62  ;;  %v3267_v30 = vadd.f32 %v5868_v5, %v3223_v31  ;;  %v3162_v28 = vunpack.c.l.bf16 %v3137_v15  ;;  %v3163_v39 = vunpack.c.h.bf16 %v3137_v15  ;;  %v3206_v62 = vld [vmem:[#allocation3 + $0x60] sm:$0xff] }
 0x44d   : > { %3385 = vst [vmem:[%s4504_s19 + $0x28] sm:$0xff] %v3762_v51  ;;  %v3225_v16 = vadd.f32 %v3193_v37, %v3161_v22  ;;  %v3268_v44 = vadd.f32 %v5864_v7, %v3224_v20  ;;  %v3164_v60 = vunpack.c.l.bf16 %v3138_v38  ;;  %v3165_v21 = vunpack.c.h.bf16 %v3138_v38  ;;  %v3207_v51 = vld [vmem:[#allocation3 + $0x98] sm:$0xff] }
 0x44e   : > { %3386 = vst [vmem:[%s4504_s19 + $0x30] sm:$0xff] %v3763_v8  ;;  %v3764_v61 = vpack.c.bf16 %v3267_v30, %v3266_v36  ;;  %v3226_v18 = vadd.f32 %v3194_v3, %v3162_v28  ;;  %v3227_v42 = vadd.f32 %v3195_v41, %v3163_v39  ;;  %v3166_v48 = vunpack.c.l.bf16 %v3139_v14 }
 0x44f   : > { %v3269_v43 = vadd.f32 %v5868_v5, %v3225_v16  ;;  %v3228_v45 = vadd.f32 %v3196_v35, %v3164_v60  ;;  %v3229_v56 = vadd.f32 %v3197_v27, %v3165_v21  ;;  %v3167_v49 = vunpack.c.h.bf16 %v3139_v14 }
 0x450   : > { %3387 = vst [vmem:[%s4504_s19 + $0x38] sm:$0xff] %v3764_v61  ;;  %v3270_v2 = vadd.f32 %v5864_v7, %v3226_v18  ;;  %v3271_v10 = vadd.f32 %v5868_v5, %v3227_v42  ;;  %v3230_v12 = vadd.f32 %v3198_v47, %v3166_v48  ;;  %v3168_v50 = vunpack.c.l.bf16 %v3140_v32 }
 0x451   : > { %v3765_v63 = vpack.c.bf16 %v3269_v43, %v3268_v44  ;;  %v3272_v52 = vadd.f32 %v5864_v7, %v3228_v45  ;;  %v3273_v13 = vadd.f32 %v5868_v5, %v3229_v56  ;;  %v3231_v33 = vadd.f32 %v3199_v0, %v3167_v49 }
 0x452   : > { %v3766_v26 = vpack.c.bf16 %v3271_v10, %v3270_v2  ;;  %v3274_v46 = vadd.f32 %v5864_v7, %v3230_v12  ;;  %v3169_v4 = vunpack.c.h.bf16 %v3140_v32  ;;  %v3232_v55 = vadd.f32 %v3200_v25, %v3168_v50 }
 0x453   : > { %3388 = vst [vmem:[%s4504_s19 + $0x40] sm:$0xff] %v3765_v63  ;;  %v3767_v58 = vpack.c.bf16 %v3273_v13, %v3272_v52  ;;  %v3275_v53 = vadd.f32 %v5868_v5, %v3231_v33  ;;  %v3170_v34 = vunpack.c.l.bf16 %v3141_v29  ;;  %v3171_v24 = vunpack.c.h.bf16 %v3141_v29 }
 0x454   : > { %3389 = vst [vmem:[%s4504_s19 + $0x48] sm:$0xff] %v3766_v26  ;;  %v3233_v40 = vadd.f32 %v3201_v1, %v3169_v4  ;;  %v3276_v57 = vadd.f32 %v5864_v7, %v3232_v55  ;;  %v3172_v15 = vunpack.c.l.bf16 %v3142_v17  ;;  %v3173_v59 = vunpack.c.h.bf16 %v3142_v17 }
 0x455   : > { %3390 = vst [vmem:[%s4504_s19 + $0x50] sm:$0xff] %v3767_v58  ;;  %v3768_v9 = vpack.c.bf16 %v3275_v53, %v3274_v46  ;;  %v3234_v31 = vadd.f32 %v3202_v11, %v3170_v34  ;;  %v3235_v37 = vadd.f32 %v3203_v6, %v3171_v24  ;;  %v3174_v38 = vunpack.c.l.bf16 %v3143_v23 }
 0x456   : > { %v3277_v36 = vadd.f32 %v5868_v5, %v3233_v40  ;;  %v3236_v22 = vadd.f32 %v3204_v19, %v3172_v15  ;;  %v3237_v20 = vadd.f32 %v3205_v54, %v3173_v59  ;;  %v3175_v3 = vunpack.c.h.bf16 %v3143_v23 }
 0x457   : > { %3391 = vst [vmem:[%s4504_s19 + $0x58] sm:$0xff] %v3768_v9  ;;  %v3278_v41 = vadd.f32 %v5864_v7, %v3234_v31  ;;  %v3279_v14 = vadd.f32 %v5868_v5, %v3235_v37  ;;  %v3238_v8 = vadd.f32 %v3206_v62, %v3174_v38 }
 0x458   : > { %v3769_v30 = vpack.c.bf16 %v3277_v36, %v3276_v57  ;;  %v3280_v28 = vadd.f32 %v5864_v7, %v3236_v22  ;;  %v3281_v39 = vadd.f32 %v5868_v5, %v3237_v20  ;;  %v3239_v35 = vadd.f32 %v3207_v51, %v3175_v3 }
 0x459   : > { %v3770_v27 = vpack.c.bf16 %v3279_v14, %v3278_v41  ;;  %v3282_v16 = vadd.f32 %v5864_v7, %v3238_v8 }
 0x45a   : > { %3392 = vst [vmem:[%s4504_s19 + $0x60] sm:$0xff] %v3769_v30  ;;  %v3771_v44 = vpack.c.bf16 %v3281_v39, %v3280_v28  ;;  %v3283_v60 = vadd.f32 %v5868_v5, %v3239_v35 }
 0x45b   : > { %3393 = vst [vmem:[%s4504_s19 + $0x68] sm:$0xff] %v3770_v27 }
 0x45c   : > { %3394 = vst [vmem:[%s4504_s19 + $0x70] sm:$0xff] %v3771_v44  ;;  %v3772_v21 = vpack.c.bf16 %v3283_v60, %v3282_v16 }
 0x45e   : > { %3395 = vst [vmem:[%s4504_s19 + $0x78] sm:$0xff] %v3772_v21 }
 0x45f PF: > { %s17_s30 = sadd.s32 1, %s4251_s30   ;;  %s6155_s14 = sld [smem:[#allocation5_spill]] }
 0x460   : > { %p14_p1 = scmp.ge.s32.totalorder %s17_s30, 6   ;;  %s6156_s24 = smov %s4231_s25 }
 0x461   : > { %s6157_s25 = smov %s4343_s12  ;;  %s6158_s26 = smov %s4243_s28 }
 0x462   : > { %s6159_s27 = smov %s4247_s29  ;;  %s6160_s28 = smov %s6163_s8 }
 0x463   :  { %16 = sbr.rel (!%p14_p1) target bundleno = 6 (0x6), region = 123 }
 0x465   : > { %s6161_s29 = smov %s6155_s14 }

</bundles_post_ra>
